<compile_context>
chip_gen: v5e
topology: v5e:2x2
jax: 0.10.0
libtpu: 0.0.40
codegen_flags: <defaults>
</compile_context>

<pallas_src>
import functools
import math

import jax
import jax.numpy as jnp
import numpy as np
from jax.experimental import pallas as pl
from jax.experimental.pallas import tpu as pltpu


def _mha_kernel(*refs, nb_head, d_k, n_tile, t_len, d_model, shared_qkv,
                compute_dtype):
    if shared_qkv:
        (x_ref, bias_ref, wqkv_ref, bqkv_ref, wo_ref, bo_ref, o_ref) = refs
    else:
        (xq_ref, xk_ref, xv_ref, bias_ref, wqkv_ref, bqkv_ref, wo_ref, bo_ref,
         o_ref) = refs

    rows = n_tile * t_len
    D = d_model

    wqkv = wqkv_ref[...]          # (D, 3D), compute dtype, VMEM-resident
    bqkv = bqkv_ref[...]          # (1, 3D), f32

    # --- fused input projection(s): f32 accumulation on the MXU -------------------
    if shared_qkv:
        x = x_ref[0]                                            # (rows, D)
        qkv = jnp.dot(x, wqkv, preferred_element_type=jnp.float32) + bqkv
        q, k, v = qkv[:, :D], qkv[:, D:2 * D], qkv[:, 2 * D:]
    else:
        q = jnp.dot(xq_ref[0], wqkv[:, :D],
                    preferred_element_type=jnp.float32) + bqkv[:, :D]
        k = jnp.dot(xk_ref[0], wqkv[:, D:2 * D],
                    preferred_element_type=jnp.float32) + bqkv[:, D:2 * D]
        v = jnp.dot(xv_ref[0], wqkv[:, 2 * D:],
                    preferred_element_type=jnp.float32) + bqkv[:, 2 * D:]

    # --- restack heads onto a leading batch axis (sublane-safe reshapes only) ------
    def to_heads(m):  # (rows, D) -> (nb_head * n_tile, T, d_k), head-major batch
        parts = [m[:, h * d_k:(h + 1) * d_k].reshape(n_tile, t_len, d_k)
                 for h in range(nb_head)]
        return jnp.concatenate(parts, axis=0).astype(compute_dtype)

    qh, kh, vh = to_heads(q), to_heads(k), to_heads(v)

    # --- one batched MXU stream for scores over all (head, node) pairs -------------
    s = jnp.einsum('btd,bsd->bts', qh, kh,
                   preferred_element_type=jnp.float32)          # (H*n_tile, T, T)
    s = s + bias_ref[0][None, :, :]        # additive -1e9 mask bias, single broadcast

    # --- single softmax pass over the merged tensor --------------------------------
    s = s - jnp.max(s, axis=-1, keepdims=True)
    e = jnp.exp(s)
    denom = jnp.sum(e, axis=-1, keepdims=True)
    r = pl.reciprocal(denom, approx=True)          # EUP slot
    r = r * (2.0 - denom * r)                      # one Newton step -> ~f32 accuracy
    p = (e * r).astype(compute_dtype)
    # dropout(p=0.0) in the reference module -> identity

    # --- one batched MXU stream for the context ------------------------------------
    ctx = jnp.einsum('bts,bsd->btd', p, vh,
                     preferred_element_type=jnp.float32)        # (H*n_tile, T, d_k)

    # --- concat heads back along lanes and do a single full-width output matmul ----
    ctx_all = jnp.concatenate(
        [ctx[h * n_tile:(h + 1) * n_tile].reshape(rows, d_k)
         for h in range(nb_head)], axis=-1).astype(compute_dtype)   # (rows, D)
    y = jnp.dot(ctx_all, wo_ref[...],
                preferred_element_type=jnp.float32) + bo_ref[...]
    o_ref[0] = y


def _pick_n_tile(n, t, batch, target_rows=512, max_rows=2048):
    """Pick a divisor of N balancing MXU fill, VMEM footprint and core parallelism."""
    divisors = [d for d in range(1, n + 1) if n % d == 0]
    cand = [d for d in divisors if d * t >= target_rows]
    d = cand[0] if cand else divisors[-1]
    # Cap the tile so the double-buffered, lane-padded working set stays well inside
    # VMEM (matters most on v7x: 64 MiB physical).
    while d * t > max_rows:
        smaller = [x for x in divisors if x < d]
        if not smaller:
            break
        d = smaller[-1]
    # Keep >= 2 "parallel" grid steps so both v7x TensorCores get work.
    while batch * (n // d) < 2:
        smaller = [x for x in divisors if x < d]
        if not smaller:
            break
        d = smaller[-1]
    return d


def _vmem_limit_bytes(rows, t_len, d_model, n_in_streams, in_el_bytes):
    """Explicit VMEM budget: double-buffered I/O blocks + resident weights + temps."""
    lane = lambda x: -(-x // 128) * 128
    sub = lambda x: -(-x // 8) * 8
    io_block = sub(rows) * lane(d_model)
    in_b = n_in_streams * io_block * in_el_bytes
    out_b = io_block * 4
    mask_b = sub(t_len) * lane(t_len) * 4
    w_b = (sub(d_model) * (lane(3 * d_model) + lane(d_model)) * in_el_bytes
           + (lane(3 * d_model) + lane(d_model)) * 4)
    est = 2 * (in_b + out_b + mask_b + w_b) + 12 * io_block * 4 + (4 << 20)
    return int(min(max(est, 32 << 20), 64 << 20))


def multi_head_attention(query, key, value, mask, params, *, nb_head,
                         n_tile=None, compute_dtype=jnp.bfloat16):
    """query/key/value: (B, N, T, D); mask: (B, T, T) or None; returns (B, N, T, D) f32."""
    B, N, T, D = query.shape
    assert D % nb_head == 0
    d_k = D // nb_head
    wq, bq, wk, bk, wv, bv, wo, bo = params

    shared = (key is None and value is None) or (key is query and value is query)
    if key is None:
        key = query
    if value is None:
        value = query

    if n_tile is None:
        n_tile = _pick_n_tile(N, T, B)
    assert N % n_tile == 0
    rows = n_tile * T

    # One-time wrapper-side parameter prep (kernel never transposes or rescales):
    #  - fused (D, 3D) QKV weight with 1/sqrt(d_k) folded into the Q columns,
    #  - mask converted once to an additive bias,
    #  - matmul operands cast to compute_dtype (bf16 by default), biases kept f32.
    scale = 1.0 / math.sqrt(d_k)
    f32 = jnp.float32
    wqkv_t = jnp.concatenate([wq.T * scale, wk.T, wv.T], axis=1).astype(compute_dtype)
    bqkv = jnp.concatenate([bq * scale, bk, bv]).reshape(1, 3 * D).astype(f32)
    wo_t = wo.T.astype(compute_dtype)
    bo2 = bo.reshape(1, D).astype(f32)
    if mask is None:
        mask_bias = jnp.zeros((B, T, T), f32)
    else:
        mask_bias = jnp.where(mask == 0, jnp.float32(-1e9), jnp.float32(0.0))

    def flat(x):  # (B, N, T, D) -> (B, N*T, D) so kernel blocks are (rows, D) slabs
        return x.reshape(B, N * T, D).astype(compute_dtype)

    x_spec = pl.BlockSpec((1, rows, D), lambda b, n: (b, n, 0))
    mask_spec = pl.BlockSpec((1, T, T), lambda b, n: (b, 0, 0))
    # Weights/biases use constant index maps -> stay VMEM-resident across the grid.
    wqkv_spec = pl.BlockSpec((D, 3 * D), lambda b, n: (0, 0))
    bqkv_spec = pl.BlockSpec((1, 3 * D), lambda b, n: (0, 0))
    wo_spec = pl.BlockSpec((D, D), lambda b, n: (0, 0))
    bo_spec = pl.BlockSpec((1, D), lambda b, n: (0, 0))

    if shared:
        inputs = (flat(query),)
        in_specs = [x_spec]
    else:
        inputs = (flat(query), flat(key), flat(value))
        in_specs = [x_spec, x_spec, x_spec]
    inputs = inputs + (mask_bias, wqkv_t, bqkv, wo_t, bo2)
    in_specs = in_specs + [mask_spec, wqkv_spec, bqkv_spec, wo_spec, bo_spec]

    kernel = functools.partial(
        _mha_kernel, nb_head=nb_head, d_k=d_k, n_tile=n_tile, t_len=T,
        d_model=D, shared_qkv=shared, compute_dtype=compute_dtype)

    el = jnp.dtype(compute_dtype).itemsize
    vmem_limit = _vmem_limit_bytes(rows, T, D, 1 if shared else 3, el)

    out = pl.pallas_call(
        kernel,
        out_shape=jax.ShapeDtypeStruct((B, N * T, D), jnp.float32),
        grid=(B, N // n_tile),
        in_specs=in_specs,
        out_specs=pl.BlockSpec((1, rows, D), lambda b, n: (b, n, 0)),
        compiler_params=pltpu.CompilerParams(
            dimension_semantics=("parallel", "parallel"),
            vmem_limit_bytes=vmem_limit),
    )(*inputs)
    return out.reshape(B, N, T, D)


def _reference_mha(query, key, value, mask, params, *, nb_head):
    """Pure-JAX mirror of the PyTorch forward for verification."""
    B, N, T, D = query.shape
    d_k = D // nb_head
    wq, bq, wk, bk, wv, bv, wo, bo = params

    def lin(x, w, b):
        return jnp.einsum('bnti,oi->bnto', x, w) + b

    def split_heads(x):  # (B,N,T,D) -> (B,N,h,T,d_k)
        return x.reshape(B, N, T, nb_head, d_k).transpose(0, 1, 3, 2, 4)

    q = split_heads(lin(query, wq, bq))
    k = split_heads(lin(key, wk, bk))
    v = split_heads(lin(value, wv, bv))

    scores = jnp.einsum('bnhtd,bnhsd->bnhts', q, k) / math.sqrt(d_k)
    if mask is not None:
        m = mask[:, None, None, :, :]  # (B,1,1,T,T)
        scores = jnp.where(m == 0, -1e9, scores)
    p = jax.nn.softmax(scores, axis=-1)
    x = jnp.einsum('bnhts,bnhsd->bnhtd', p, v)
    x = x.transpose(0, 1, 3, 2, 4).reshape(B, N, T, D)
    return lin(x, wo, bo)


if __name__ == "__main__":
    B, N, T, D = 2, 32, 8, 32
    nb_head = 4

    key0 = jax.random.PRNGKey(0)
    ks = jax.random.split(key0, 14)

    x = jax.random.normal(ks[0], (B, N, T, D), jnp.float32)
    q_in = jax.random.normal(ks[1], (B, N, T, D), jnp.float32)
    k_in = jax.random.normal(ks[2], (B, N, T, D), jnp.float32)
    v_in = jax.random.normal(ks[11], (B, N, T, D), jnp.float32)
    # causal-style mask (B, T, T); zeros are masked out (additive -1e9 bias)
    mask = jnp.broadcast_to(jnp.tril(jnp.ones((T, T), jnp.float32)), (B, T, T))

    pscale = 1.0 / math.sqrt(D)
    params = (
        jax.random.normal(ks[3], (D, D), jnp.float32) * pscale,   # Wq
        jax.random.normal(ks[4], (D,), jnp.float32) * pscale,     # bq
        jax.random.normal(ks[5], (D, D), jnp.float32) * pscale,   # Wk
        jax.random.normal(ks[6], (D,), jnp.float32) * pscale,     # bk
        jax.random.normal(ks[7], (D, D), jnp.float32) * pscale,   # Wv
        jax.random.normal(ks[8], (D,), jnp.float32) * pscale,     # bv
        jax.random.normal(ks[9], (D, D), jnp.float32) * pscale,   # Wo
        jax.random.normal(ks[10], (D,), jnp.float32) * pscale,    # bo
    )

    ref_self = _reference_mha(x, x, x, mask, params, nb_head=nb_head)
    ref_cross = _reference_mha(q_in, k_in, v_in, mask, params, nb_head=nb_head)

    # 1) self-attention (q = k = v): deduped single input stream, fused QKV, f32
    #    compute. Newton-refined reciprocal => tight tolerance (catches layout bugs).
    out_self_f32 = multi_head_attention(x, x, x, mask, params, nb_head=nb_head,
                                        compute_dtype=jnp.float32)
    out_self_f32 = jax.block_until_ready(out_self_f32)
    np.testing.assert_allclose(np.asarray(out_self_f32), np.asarray(ref_self),
                               atol=2e-4, rtol=2e-4)

    # 2) distinct q/k/v (cross-attention path), f32 compute.
    out_cross_f32 = multi_head_attention(q_in, k_in, v_in, mask, params,
                                         nb_head=nb_head, compute_dtype=jnp.float32)
    out_cross_f32 = jax.block_until_ready(out_cross_f32)
    np.testing.assert_allclose(np.asarray(out_cross_f32), np.asarray(ref_cross),
                               atol=2e-4, rtol=2e-4)

    # 3) bf16 matmul inputs (f32 accumulation) -- the default high-throughput path.
    #    Tolerance reflects bf16 input rounding only; layout bugs would be O(1).
    out_self_bf16 = multi_head_attention(x, x, x, mask, params, nb_head=nb_head,
                                         compute_dtype=jnp.bfloat16)
    out_self_bf16 = jax.block_until_ready(out_self_bf16)
    np.testing.assert_allclose(np.asarray(out_self_bf16), np.asarray(ref_self),
                               atol=1e-1, rtol=1e-1)

    print("KERNEL_OK")
</pallas_src>

<mosaic_0001>
module attributes {stable_mosaic.version = 11 : i64} {
  func.func @_mha_kernel(%arg0: i32, %arg1: i32, %arg2: memref<1x256x32xf32, #tpu.memory_space<vmem>>, %arg3: memref<1x8x8xf32, #tpu.memory_space<vmem>>, %arg4: memref<32x96xf32, #tpu.memory_space<vmem>>, %arg5: memref<1x96xf32, #tpu.memory_space<vmem>>, %arg6: memref<32x32xf32, #tpu.memory_space<vmem>>, %arg7: memref<1x32xf32, #tpu.memory_space<vmem>>, %arg8: memref<1x256x32xf32, #tpu.memory_space<vmem>>) attributes {dimension_semantics = [#tpu.dimension_semantics<parallel>, #tpu.dimension_semantics<parallel>], iteration_bounds = array<i64: 2, 1>, scalar_prefetch = 0 : i64, scratch_operands = 0 : i64, tpu.core_type = #tpu.core_type<tc>, window_params = [{transform_indices = @transform_0, window_bounds = array<i64: 1, 256, 32>}, {transform_indices = @transform_1, window_bounds = array<i64: 1, 8, 8>}, {pipeline_mode = #tpu.pipeline_mode<synchronous>, transform_indices = @transform_2, window_bounds = array<i64: 32, 96>}, {pipeline_mode = #tpu.pipeline_mode<synchronous>, transform_indices = @transform_3, window_bounds = array<i64: 1, 96>}, {pipeline_mode = #tpu.pipeline_mode<synchronous>, transform_indices = @transform_4, window_bounds = array<i64: 32, 32>}, {pipeline_mode = #tpu.pipeline_mode<synchronous>, transform_indices = @transform_5, window_bounds = array<i64: 1, 32>}, {transform_indices = @transform_6, window_bounds = array<i64: 1, 256, 32>}]} {
    %c0 = arith.constant 0 : index
    %c0_0 = arith.constant 0 : index
    %0 = vector.load %arg4[%c0, %c0_0] : memref<32x96xf32, #tpu.memory_space<vmem>>, vector<32x96xf32>
    %c0_1 = arith.constant 0 : index
    %c0_2 = arith.constant 0 : index
    %1 = vector.load %arg5[%c0_1, %c0_2] : memref<1x96xf32, #tpu.memory_space<vmem>>, vector<1x96xf32>
    %c0_3 = arith.constant 0 : index
    %c0_4 = arith.constant 0 : index
    %c0_5 = arith.constant 0 : index
    %2 = vector.load %arg2[%c0_3, %c0_4, %c0_5] : memref<1x256x32xf32, #tpu.memory_space<vmem>>, vector<1x256x32xf32>
    %3 = vector.shape_cast %2 : vector<1x256x32xf32> to vector<256x32xf32>
    %cst = arith.constant dense<0.000000e+00> : vector<256x96xf32>
    %4 = tpu.matmul %3, %0, %cst {dimension_numbers = #tpu.dot_dimension_numbers<[1], [0], [0], [1], [0, 0, 1, 1], [], []>} : vector<256x32xf32>, vector<32x96xf32>, vector<256x96xf32> -> vector<256x96xf32>
    %5 = vector.broadcast %1 : vector<1x96xf32> to vector<256x96xf32>
    %6 = arith.addf %4, %5 : vector<256x96xf32>
    %7 = vector.extract_strided_slice %6 {offsets = [0, 0], sizes = [256, 32], strides = [1, 1]} : vector<256x96xf32> to vector<256x32xf32>
    %8 = vector.extract_strided_slice %6 {offsets = [0, 32], sizes = [256, 32], strides = [1, 1]} : vector<256x96xf32> to vector<256x32xf32>
    %9 = vector.extract_strided_slice %6 {offsets = [0, 64], sizes = [256, 32], strides = [1, 1]} : vector<256x96xf32> to vector<256x32xf32>
    %10 = vector.extract_strided_slice %7 {offsets = [0, 0], sizes = [256, 8], strides = [1, 1]} : vector<256x32xf32> to vector<256x8xf32>
    %11 = vector.shape_cast %10 : vector<256x8xf32> to vector<32x8x8xf32>
    %12 = vector.extract_strided_slice %7 {offsets = [0, 8], sizes = [256, 8], strides = [1, 1]} : vector<256x32xf32> to vector<256x8xf32>
    %13 = vector.shape_cast %12 : vector<256x8xf32> to vector<32x8x8xf32>
    %14 = vector.extract_strided_slice %7 {offsets = [0, 16], sizes = [256, 8], strides = [1, 1]} : vector<256x32xf32> to vector<256x8xf32>
    %15 = vector.shape_cast %14 : vector<256x8xf32> to vector<32x8x8xf32>
    %16 = vector.extract_strided_slice %7 {offsets = [0, 24], sizes = [256, 8], strides = [1, 1]} : vector<256x32xf32> to vector<256x8xf32>
    %17 = vector.shape_cast %16 : vector<256x8xf32> to vector<32x8x8xf32>
    %18 = tpu.concatenate %11, %13, %15, %17 in 0 : vector<32x8x8xf32>, vector<32x8x8xf32>, vector<32x8x8xf32>, vector<32x8x8xf32> -> vector<128x8x8xf32>
    %19 = vector.extract_strided_slice %8 {offsets = [0, 0], sizes = [256, 8], strides = [1, 1]} : vector<256x32xf32> to vector<256x8xf32>
    %20 = vector.shape_cast %19 : vector<256x8xf32> to vector<32x8x8xf32>
    %21 = vector.extract_strided_slice %8 {offsets = [0, 8], sizes = [256, 8], strides = [1, 1]} : vector<256x32xf32> to vector<256x8xf32>
    %22 = vector.shape_cast %21 : vector<256x8xf32> to vector<32x8x8xf32>
    %23 = vector.extract_strided_slice %8 {offsets = [0, 16], sizes = [256, 8], strides = [1, 1]} : vector<256x32xf32> to vector<256x8xf32>
    %24 = vector.shape_cast %23 : vector<256x8xf32> to vector<32x8x8xf32>
    %25 = vector.extract_strided_slice %8 {offsets = [0, 24], sizes = [256, 8], strides = [1, 1]} : vector<256x32xf32> to vector<256x8xf32>
    %26 = vector.shape_cast %25 : vector<256x8xf32> to vector<32x8x8xf32>
    %27 = tpu.concatenate %20, %22, %24, %26 in 0 : vector<32x8x8xf32>, vector<32x8x8xf32>, vector<32x8x8xf32>, vector<32x8x8xf32> -> vector<128x8x8xf32>
    %28 = vector.extract_strided_slice %9 {offsets = [0, 0], sizes = [256, 8], strides = [1, 1]} : vector<256x32xf32> to vector<256x8xf32>
    %29 = vector.shape_cast %28 : vector<256x8xf32> to vector<32x8x8xf32>
    %30 = vector.extract_strided_slice %9 {offsets = [0, 8], sizes = [256, 8], strides = [1, 1]} : vector<256x32xf32> to vector<256x8xf32>
    %31 = vector.shape_cast %30 : vector<256x8xf32> to vector<32x8x8xf32>
    %32 = vector.extract_strided_slice %9 {offsets = [0, 16], sizes = [256, 8], strides = [1, 1]} : vector<256x32xf32> to vector<256x8xf32>
    %33 = vector.shape_cast %32 : vector<256x8xf32> to vector<32x8x8xf32>
    %34 = vector.extract_strided_slice %9 {offsets = [0, 24], sizes = [256, 8], strides = [1, 1]} : vector<256x32xf32> to vector<256x8xf32>
    %35 = vector.shape_cast %34 : vector<256x8xf32> to vector<32x8x8xf32>
    %36 = tpu.concatenate %29, %31, %33, %35 in 0 : vector<32x8x8xf32>, vector<32x8x8xf32>, vector<32x8x8xf32>, vector<32x8x8xf32> -> vector<128x8x8xf32>
    "tpu.trace_start"() <{level = 10 : i32, message = "btd,bsd->bts"}> : () -> ()
    %cst_6 = arith.constant dense<0.000000e+00> : vector<128x8x8xf32>
    %37 = tpu.matmul %18, %27, %cst_6 {dimension_numbers = #tpu.dot_dimension_numbers<[2], [2], [1], [1], [0, 0, 0, 1, 1, 1], [0], [0]>} : vector<128x8x8xf32>, vector<128x8x8xf32>, vector<128x8x8xf32> -> vector<128x8x8xf32>
    "tpu.trace_stop"() : () -> ()
    %c0_7 = arith.constant 0 : index
    %c0_8 = arith.constant 0 : index
    %c0_9 = arith.constant 0 : index
    %38 = vector.load %arg3[%c0_7, %c0_8, %c0_9] : memref<1x8x8xf32, #tpu.memory_space<vmem>>, vector<1x8x8xf32>
    %39 = vector.shape_cast %38 : vector<1x8x8xf32> to vector<8x8xf32>
    %40 = vector.shape_cast %39 : vector<8x8xf32> to vector<1x8x8xf32>
    %41 = vector.broadcast %40 : vector<1x8x8xf32> to vector<128x8x8xf32>
    %42 = arith.addf %37, %41 : vector<128x8x8xf32>
    %cst_10 = arith.constant dense<0xFF800000> : vector<128x8xf32>
    %43 = vector.multi_reduction <maximumf>, %42, %cst_10 [2] : vector<128x8x8xf32> to vector<128x8xf32>
    %44 = vector.shape_cast %43 : vector<128x8xf32> to vector<128x8x1xf32>
    %45 = vector.broadcast %44 : vector<128x8x1xf32> to vector<128x8x8xf32>
    %46 = arith.subf %42, %45 : vector<128x8x8xf32>
    %47 = math.exp %46 : vector<128x8x8xf32>
    %cst_11 = arith.constant dense<0.000000e+00> : vector<128x8xf32>
    %48 = vector.multi_reduction <add>, %47, %cst_11 [2] : vector<128x8x8xf32> to vector<128x8xf32>
    %49 = vector.shape_cast %48 : vector<128x8xf32> to vector<128x8x1xf32>
    %50 = tpu.reciprocal %49 {approx = true} : vector<128x8x1xf32> -> vector<128x8x1xf32>
    %51 = arith.mulf %49, %50 : vector<128x8x1xf32>
    %cst_12 = arith.constant 2.000000e+00 : f32
    %52 = vector.broadcast %cst_12 : f32 to vector<128x8x1xf32>
    %53 = arith.subf %52, %51 : vector<128x8x1xf32>
    %54 = arith.mulf %50, %53 : vector<128x8x1xf32>
    %55 = vector.broadcast %54 : vector<128x8x1xf32> to vector<128x8x8xf32>
    %56 = arith.mulf %47, %55 : vector<128x8x8xf32>
    "tpu.trace_start"() <{level = 10 : i32, message = "bts,bsd->btd"}> : () -> ()
    %cst_13 = arith.constant dense<0.000000e+00> : vector<128x8x8xf32>
    %57 = tpu.matmul %56, %36, %cst_13 {dimension_numbers = #tpu.dot_dimension_numbers<[2], [1], [1], [2], [0, 0, 0, 1, 1, 2], [0], [0]>} : vector<128x8x8xf32>, vector<128x8x8xf32>, vector<128x8x8xf32> -> vector<128x8x8xf32>
    "tpu.trace_stop"() : () -> ()
    %58 = vector.extract_strided_slice %57 {offsets = [0, 0, 0], sizes = [32, 8, 8], strides = [1, 1, 1]} : vector<128x8x8xf32> to vector<32x8x8xf32>
    %59 = vector.shape_cast %58 : vector<32x8x8xf32> to vector<256x8xf32>
    %60 = vector.extract_strided_slice %57 {offsets = [32, 0, 0], sizes = [32, 8, 8], strides = [1, 1, 1]} : vector<128x8x8xf32> to vector<32x8x8xf32>
    %61 = vector.shape_cast %60 : vector<32x8x8xf32> to vector<256x8xf32>
    %62 = vector.extract_strided_slice %57 {offsets = [64, 0, 0], sizes = [32, 8, 8], strides = [1, 1, 1]} : vector<128x8x8xf32> to vector<32x8x8xf32>
    %63 = vector.shape_cast %62 : vector<32x8x8xf32> to vector<256x8xf32>
    %64 = vector.extract_strided_slice %57 {offsets = [96, 0, 0], sizes = [32, 8, 8], strides = [1, 1, 1]} : vector<128x8x8xf32> to vector<32x8x8xf32>
    %65 = vector.shape_cast %64 : vector<32x8x8xf32> to vector<256x8xf32>
    %66 = tpu.concatenate %59, %61, %63, %65 in 1 : vector<256x8xf32>, vector<256x8xf32>, vector<256x8xf32>, vector<256x8xf32> -> vector<256x32xf32>
    %c0_14 = arith.constant 0 : index
    %c0_15 = arith.constant 0 : index
    %67 = vector.load %arg6[%c0_14, %c0_15] : memref<32x32xf32, #tpu.memory_space<vmem>>, vector<32x32xf32>
    %cst_16 = arith.constant dense<0.000000e+00> : vector<256x32xf32>
    %68 = tpu.matmul %66, %67, %cst_16 {dimension_numbers = #tpu.dot_dimension_numbers<[1], [0], [0], [1], [0, 0, 1, 1], [], []>} : vector<256x32xf32>, vector<32x32xf32>, vector<256x32xf32> -> vector<256x32xf32>
    %c0_17 = arith.constant 0 : index
    %c0_18 = arith.constant 0 : index
    %69 = vector.load %arg7[%c0_17, %c0_18] : memref<1x32xf32, #tpu.memory_space<vmem>>, vector<1x32xf32>
    %70 = vector.broadcast %69 : vector<1x32xf32> to vector<256x32xf32>
    %71 = arith.addf %68, %70 : vector<256x32xf32>
    %c0_19 = arith.constant 0 : index
    %c0_20 = arith.constant 0 : index
    %c0_21 = arith.constant 0 : index
    %72 = vector.load %arg8[%c0_19, %c0_20, %c0_21] : memref<1x256x32xf32, #tpu.memory_space<vmem>>, vector<1x256x32xf32>
    %73 = vector.shape_cast %72 : vector<1x256x32xf32> to vector<256x32xf32>
    %74 = vector.shape_cast %71 : vector<256x32xf32> to vector<1x256x32xf32>
    tpu.vector_store %arg8[%c0_19, %c0_20, %c0_21], %74 {strides = array<i32>} : memref<1x256x32xf32, #tpu.memory_space<vmem>>, vector<1x256x32xf32>,
    return
  }
  func.func @transform_0(%arg0: i32, %arg1: i32) -> (i32, i32, i32) {
    %c0_i32 = arith.constant 0 : i32
    %c0_i32_0 = arith.constant 0 : i32
    return %arg0, %arg1, %c0_i32 : i32, i32, i32
  }
  func.func @transform_1(%arg0: i32, %arg1: i32) -> (i32, i32, i32) {
    %c0_i32 = arith.constant 0 : i32
    %c0_i32_0 = arith.constant 0 : i32
    %c0_i32_1 = arith.constant 0 : i32
    return %arg0, %c0_i32, %c0_i32_0 : i32, i32, i32
  }
  func.func @transform_2(%arg0: i32, %arg1: i32) -> (i32, i32) {
    %c0_i32 = arith.constant 0 : i32
    %c0_i32_0 = arith.constant 0 : i32
    %c0_i32_1 = arith.constant 0 : i32
    return %c0_i32, %c0_i32_0 : i32, i32
  }
  func.func @transform_3(%arg0: i32, %arg1: i32) -> (i32, i32) {
    %c0_i32 = arith.constant 0 : i32
    %c0_i32_0 = arith.constant 0 : i32
    %c0_i32_1 = arith.constant 0 : i32
    return %c0_i32, %c0_i32_0 : i32, i32
  }
  func.func @transform_4(%arg0: i32, %arg1: i32) -> (i32, i32) {
    %c0_i32 = arith.constant 0 : i32
    %c0_i32_0 = arith.constant 0 : i32
    %c0_i32_1 = arith.constant 0 : i32
    return %c0_i32, %c0_i32_0 : i32, i32
  }
  func.func @transform_5(%arg0: i32, %arg1: i32) -> (i32, i32) {
    %c0_i32 = arith.constant 0 : i32
    %c0_i32_0 = arith.constant 0 : i32
    %c0_i32_1 = arith.constant 0 : i32
    return %c0_i32, %c0_i32_0 : i32, i32
  }
  func.func @transform_6(%arg0: i32, %arg1: i32) -> (i32, i32, i32) {
    %c0_i32 = arith.constant 0 : i32
    %c0_i32_0 = arith.constant 0 : i32
    return %arg0, %arg1, %c0_i32 : i32, i32, i32
  }
}

</mosaic_0001>

<bundles_post_ra>
// kernel: tpu_custom_call.1
= control target key start
LH: loop header
LB: loop body
LE: loop exit
PB: predicated region body
PF: predicated region fallthrough
CT: control target
= control target key end

     0   :  { %s11470_s21 = smov 0   ;;  %s11472_s22 = smov 0   ;;  %s16681_s0 = inlined_call_operand.vmem [shape: f32[2,256,32], index: 0, kind: input, shape index: {}]   ;;  %s16682_s1 = inlined_call_operand.vmem [shape: f32[2,8,8], index: 1, kind: input, shape index: {}]   ;;  %s16683_s2 = inlined_call_operand.vmem [shape: f32[32,96], index: 2, kind: input, shape index: {}]   ;;  %s16684_s3 = inlined_call_operand.vmem [shape: f32[1,96], index: 3, kind: input, shape index: {}]   ;;  %s16685_s4 = inlined_call_operand.vmem [shape: f32[32,32], index: 4, kind: input, shape index: {}]   ;;  %s16686_s5 = inlined_call_operand.vmem [shape: f32[1,32], index: 5, kind: input, shape index: {}]   ;;  %s16687_s6 = inlined_call_operand.vmem [shape: f32[2,256,32], index: 6, kind: output, shape index: {}]  }
   0x1   :  { %s11474_s23 = smov 0  }
   0x2 LB: > { %s28_s24 = sadd.s32 1, %s11421_s22  ;;  %p10066_p0 = scmp.ge.s32.totalorder %s11425_s23, 1  ;;  %s11425_s23 = sphi %s11474_s23, %s16_s23   ;;  %s11421_s22 = sphi %s11472_s22, %s18366_s22   ;;  %s11417_s21 = sphi %s11470_s21, %s18365_s21  }
   0x3   : > { %p30_p1 = scmp.ge.s32.totalorder %s28_s24, 2  ;;  %p242_p2 = scmp.lt.s32.totalorder %s11425_s23, 3 }
   0x5   : > { %s18368_s24 = smov (%p30_p1, %s28_s24), 0  ;;  %p243_p3 = pnand %p10066_p0, %p242_p2 }
   0x7   : > { %246 = sbr.rel (%p243_p3) target bundleno = 2399 (0x95f), region = 44 }
   0xc   : > { %v311_v0 = vld [vmem:[%s16683_s2 + $0x18] sm:$0xff]  ;;  %v310_v1 = vld [vmem:[%s16683_s2 + $0x10] sm:$0xff]  ;;  %p285_p4 = scmp.lt.s32.totalorder %s11417_s21, 1  ;;  %v309_v2 = vld [vmem:[%s16683_s2 + $0x8] sm:$0xff]  ;;  %vm348_vm0 = vcmask 261120   ;;  %s11427_s15 = smov 104  }
   0xd   : > { %457 = vmatpush.msra.mxu0 %v311_v0  ;;  %v308_v3 = vld [vmem:[%s16683_s2] sm:$0xff]  ;;  %s11428_s16 = smov 112   ;;  %s11429_s17 = smov 120   ;;  %vm785_vm1 = vcmask 64512   ;;  %vm9681_vm2 = vcmask 195584   ;;  %vm9648_vm3 = vcmask 130048  }
   0xe   : > { %s18370_s21 = smov (!%p285_p4, %s11417_s21), 1  ;;  %v11545_v20 = vld [vmem:[%s16684_s3] ss:$0 sm:$0xff]  ;;  %s11430_s18 = smov 96  }
   0xf   : > { %458 = vmatpush.msra.mxu0 %v310_v1  ;;  %s10522_s9 = sshll.u32 %s18370_s21, 8  ;;  %s10069_s19 = sshll.u32 %s18370_s21, 3 }
  0x10   : > { %s11508_s12 = scalar_lea.vmem %s16681_s0, %s10522_s9  ;;  %s12669_s26 = scalar_lea.vmem %s16682_s1, %s10069_s19 }
  0x11   : > { %459 = vmatpush.msra.mxu0 %v309_v2  ;;  %v313_v4 = vld [vmem:[%s11508_s12] sm:$0xff]  ;;  %v314_v5 = vld [vmem:[%s11508_s12 + $0x8] sm:$0xff]  ;;  %v315_v6 = vld [vmem:[%s11508_s12 + $0x10] sm:$0xff]  ;;  %s11431_s27 = smov 64   ;;  %s11432_s28 = smov 8  }
  0x12   : > { %v316_v7 = vld [vmem:[%s11508_s12 + $0x18] sm:$0xff]  ;;  %v317_v8 = vld [vmem:[%s11508_s12 + $0x20] sm:$0xff]  ;;  %v318_v9 = vld [vmem:[%s11508_s12 + $0x28] sm:$0xff]  ;;  %s11433_s29 = smov 16   ;;  %s11434_s30 = smov 24  }
  0x13   : > { %460 = vmatpush.msra.mxu0 %v308_v3  ;;  %v319_v10 = vld [vmem:[%s11508_s12 + $0x30] sm:$0xff]  ;;  %v320_v11 = vld [vmem:[%s11508_s12 + $0x38] sm:$0xff]  ;;  %v321_v12 = vld [vmem:[%s11508_s12 + $0x40] sm:$0xff]  ;;  %s16508_s20 = scalar_lea.vmem %s16687_s6, %s10522_s9 }
  0x14   : > { %10072 = vmatmul.msk.f32.vlgmr.msra.gmra.mxu0 %vm348_vm0, %v313_v4  ;;  %v322_v13 = vld [vmem:[%s11508_s12 + $0x48] sm:$0xff]  ;;  %v323_v14 = vld [vmem:[%s11508_s12 + $0x50] sm:$0xff]  ;;  %v324_v15 = vld [vmem:[%s11508_s12 + $0x58] sm:$0xff] }
  0x15   : > { %v325_v16 = vld [vmem:[%s11508_s12 + $0x60] sm:$0xff]  ;;  %v326_v17 = vld [vmem:[%s11508_s12 + $0x68] sm:$0xff]  ;;  %v327_v18 = vld [vmem:[%s11508_s12 + $0x70] sm:$0xff] }
  0x16   : > { %v328_v19 = vld [vmem:[%s11508_s12 + $0x78] sm:$0xff]  ;;  %v329_v22 = vld [vmem:[%s11508_s12 + $0x80] sm:$0xff]  ;;  %v330_v25 = vld [vmem:[%s11508_s12 + $0x88] sm:$0xff] }
  0x17   : > { %v331_v28 = vld [vmem:[%s11508_s12 + $0x90] sm:$0xff]  ;;  %v332_v31 = vld [vmem:[%s11508_s12 + $0x98] sm:$0xff]  ;;  %v333_v34 = vld [vmem:[%s11508_s12 + $0xa0] sm:$0xff] }
  0x18   : > { %v334_v36 = vld [vmem:[%s11508_s12 + $0xa8] sm:$0xff]  ;;  %v335_v39 = vld [vmem:[%s11508_s12 + $0xb0] sm:$0xff]  ;;  %v336_v40 = vld [vmem:[%s11508_s12 + $0xb8] sm:$0xff] }
  0x19   : > { %v337_v43 = vld [vmem:[%s11508_s12 + $0xc0] sm:$0xff]  ;;  %v338_v45 = vld [vmem:[%s11508_s12 + $0xc8] sm:$0xff]  ;;  %v339_v49 = vld [vmem:[%s11508_s12 + $0xd0] sm:$0xff] }
  0x1a   : > { %v340_v50 = vld [vmem:[%s11508_s12 + $0xd8] sm:$0xff]  ;;  %v341_v53 = vld [vmem:[%s11508_s12 + $0xe0] sm:$0xff]  ;;  %v342_v58 = vld [vmem:[%s11508_s12 + $0xe8] sm:$0xff] }
  0x1b   : > { %v343_v60 = vld [vmem:[%s11508_s12 + $0xf0] sm:$0xff]  ;;  %v344_v2 = vld [vmem:[%s11508_s12 + $0xf8] sm:$0xff] }
  0x1c   : > { %10073 = vmatmul.msk.f32.gmra.mxu0 %vm348_vm0, %v314_v5 }
  0x24   : > { %10074 = vmatmul.msk.f32.gmra.mxu0 %vm348_vm0, %v315_v6 }
  0x2c   : > { %10075 = vmatmul.msk.f32.gmra.mxu0 %vm348_vm0, %v316_v7 }
  0x34   : > { %10076 = vmatmul.msk.f32.gmra.mxu0 %vm348_vm0, %v317_v8 }
  0x3c   : > { %10077 = vmatmul.msk.f32.gmra.mxu0 %vm348_vm0, %v318_v9 }
  0x44   : > { %10078 = vmatmul.msk.f32.gmra.mxu0 %vm348_vm0, %v319_v10 }
  0x4c   : > { %10079 = vmatmul.msk.f32.gmra.mxu0 %vm348_vm0, %v320_v11 }
  0x54   : > { %10080 = vmatmul.msk.f32.gmra.mxu0 %vm348_vm0, %v321_v12 }
  0x5c   : > { %10081 = vmatmul.msk.f32.gmra.mxu0 %vm348_vm0, %v322_v13 }
  0x64   : > { %10082 = vmatmul.msk.f32.gmra.mxu0 %vm348_vm0, %v323_v14 }
  0x6c   : > { %10083 = vmatmul.msk.f32.gmra.mxu0 %vm348_vm0, %v324_v15 }
  0x74   : > { %10084 = vmatmul.msk.f32.gmra.mxu0 %vm348_vm0, %v325_v16 }
  0x7c   : > { %10085 = vmatmul.msk.f32.gmra.mxu0 %vm348_vm0, %v326_v17 }
  0x84   : > { %10086 = vmatmul.msk.f32.gmra.mxu0 %vm348_vm0, %v327_v18 }
  0x8c   : > { %10087 = vmatmul.msk.f32.gmra.mxu0 %vm348_vm0, %v328_v19 }
  0x91   : > { %v462_v21 = vpop.f32.mrf.mxu0 }
  0x92   : > { %v11549_v23 = vadd.f32 %v11545_v20, %v462_v21 }
  0x94   : > { %17186 = vst [vmem:[#allocation2_spill] sm:$0xff] %v11549_v23  ;;  %10088 = vmatmul.msk.f32.gmra.mxu0 %vm348_vm0, %v329_v22  ;;  %718 = vrot.lane.b32.xlu1 %v11549_v23, %s11427_s15 }
  0x95   : > { %654 = vrot.lane.b32.xlu2 %v11549_v23, %s11428_s16  ;;  %590 = vrot.lane.b32.xlu0 %v11549_v23, %s11429_s17 }
  0x99   : > { %v465_v24 = vpop.f32.mrf.mxu0 }
  0x9a   : > { %v11560_v26 = vadd.f32 %v11545_v20, %v465_v24 }
  0x9c   : > { %17187 = vst [vmem:[#allocation3_spill] sm:$0xff] %v11560_v26  ;;  %10089 = vmatmul.msk.f32.gmra.mxu0 %vm348_vm0, %v330_v25  ;;  %810 = vrot.lane.b32.xlu1 %v11560_v26, %s11430_s18 }
  0x9d   : > { %720 = vrot.lane.b32.xlu2 %v11560_v26, %s11427_s15  ;;  %783 = vrot.lane.b32.xlu0 %v11549_v23, %s11430_s18 }
  0xa1   : > { %v468_v27 = vpop.f32.mrf.mxu0 }
  0xa2   : > { %v11571_v29 = vadd.f32 %v11545_v20, %v468_v27 }
  0xa4   : > { %17188 = vst [vmem:[#allocation4_spill] sm:$0xff] %v11571_v29  ;;  %10090 = vmatmul.msk.f32.gmra.mxu0 %vm348_vm0, %v331_v28  ;;  %594 = vrot.lane.b32.xlu1 %v11571_v29, %s11429_s17 }
  0xa5   : > { %836 = vrot.lane.b32.xlu2 %v11571_v29, %s11430_s18  ;;  %592 = vrot.lane.b32.xlu0 %v11560_v26, %s11429_s17 }
  0xa9   : > { %v471_v30 = vpop.f32.mrf.mxu0 }
  0xaa   : > { %v11582_v32 = vadd.f32 %v11545_v20, %v471_v30 }
  0xac   : > { %17189 = vst [vmem:[#allocation5_spill] sm:$0xff] %v11582_v32  ;;  %10091 = vmatmul.msk.f32.gmra.mxu0 %vm348_vm0, %v332_v31  ;;  %658 = vrot.lane.b32.xlu1 %v11571_v29, %s11428_s16 }
  0xad   : > { %660 = vrot.lane.b32.xlu2 %v11582_v32, %s11428_s16  ;;  %656 = vrot.lane.b32.xlu0 %v11560_v26, %s11428_s16 }
  0xb1   : > { %v474_v33 = vpop.f32.mrf.mxu0 }
  0xb2   : > { %v11593_v35 = vadd.f32 %v11545_v20, %v474_v33 }
  0xb4   : > { %17190 = vst [vmem:[#allocation6_spill] sm:$0xff] %v11593_v35  ;;  %10092 = vmatmul.msk.f32.gmra.mxu0 %vm348_vm0, %v333_v34  ;;  %596 = vrot.lane.b32.xlu1 %v11582_v32, %s11429_s17 }
  0xb5   : > { %598 = vrot.lane.b32.xlu2 %v11593_v35, %s11429_s17  ;;  %722 = vrot.lane.b32.xlu0 %v11571_v29, %s11427_s15 }
  0xb9   : > { %v477_v37 = vpop.f32.mrf.mxu0 }
  0xba   : > { %v11611_v38 = vadd.f32 %v11545_v20, %v477_v37 }
  0xbc   : > { %10093 = vmatmul.msk.f32.gmra.mxu0 %vm348_vm0, %v334_v36  ;;  %724 = vrot.lane.b32.xlu1 %v11582_v32, %s11427_s15  ;;  %17191 = vst [vmem:[#allocation7_spill] sm:$0xff] %v11611_v38 }
  0xbd   : > { %726 = vrot.lane.b32.xlu2 %v11593_v35, %s11427_s15  ;;  %862 = vrot.lane.b32.xlu0 %v11582_v32, %s11430_s18 }
  0xc1   : > { %v480_v41 = vpop.f32.mrf.mxu0 }
  0xc2   : > { %v11630_v42 = vadd.f32 %v11545_v20, %v480_v41 }
  0xc4   : > { %10094 = vmatmul.msk.f32.gmra.mxu0 %vm348_vm0, %v335_v39  ;;  %888 = vrot.lane.b32.xlu1 %v11593_v35, %s11430_s18  ;;  %17192 = vst [vmem:[#allocation8_spill] sm:$0xff] %v11630_v42 }
  0xc5   : > { %600 = vrot.lane.b32.xlu2 %v11611_v38, %s11429_s17  ;;  %662 = vrot.lane.b32.xlu0 %v11593_v35, %s11428_s16 }
  0xc9   : > { %v483_v44 = vpop.f32.mrf.mxu0 }
  0xca   : > { %v11642_v46 = vadd.f32 %v11545_v20, %v483_v44 }
  0xcc   : > { %10095 = vmatmul.msk.f32.gmra.mxu0 %vm348_vm0, %v336_v40  ;;  %664 = vrot.lane.b32.xlu1 %v11611_v38, %s11428_s16  ;;  %17193 = vst [vmem:[#allocation9_spill] sm:$0xff] %v11642_v46 }
  0xcd   : > { %914 = vrot.lane.b32.xlu2 %v11611_v38, %s11430_s18  ;;  %728 = vrot.lane.b32.xlu0 %v11611_v38, %s11427_s15 }
  0xd1   : > { %v486_v47 = vpop.f32.mrf.mxu0 }
  0xd2   : > { %v11652_v48 = vadd.f32 %v11545_v20, %v486_v47 }
  0xd4   : > { %10096 = vmatmul.msk.f32.gmra.mxu0 %vm348_vm0, %v337_v43  ;;  %730 = vrot.lane.b32.xlu1 %v11630_v42, %s11427_s15  ;;  %17194 = vst [vmem:[#allocation10_spill] sm:$0xff] %v11652_v48 }
  0xd5   : > { %666 = vrot.lane.b32.xlu2 %v11630_v42, %s11428_s16  ;;  %602 = vrot.lane.b32.xlu0 %v11630_v42, %s11429_s17 }
  0xd9   : > { %v489_v51 = vpop.f32.mrf.mxu0 }
  0xda   : > { %v11674_v54 = vadd.f32 %v11545_v20, %v489_v51 }
  0xdc   : > { %10097 = vmatmul.msk.f32.gmra.mxu0 %vm348_vm0, %v338_v45  ;;  %604 = vrot.lane.b32.xlu1 %v11642_v46, %s11429_s17  ;;  %17196 = vst [vmem:[#allocation12_spill] sm:$0xff] %v11674_v54 }
  0xdd   : > { %732 = vrot.lane.b32.xlu2 %v11642_v46, %s11427_s15  ;;  %940 = vrot.lane.b32.xlu0 %v11630_v42, %s11430_s18 }
  0xe1   : > { %v492_v55 = vpop.f32.mrf.mxu0 }
  0xe2   : > { %v11686_v57 = vadd.f32 %v11545_v20, %v492_v55 }
  0xe4   : > { %10098 = vmatmul.msk.f32.gmra.mxu0 %vm348_vm0, %v339_v49  ;;  %966 = vrot.lane.b32.xlu1 %v11642_v46, %s11430_s18  ;;  %17198 = vst [vmem:[#allocation14_spill] sm:$0xff] %v11686_v57 }
  0xe5   : > { %606 = vrot.lane.b32.xlu2 %v11652_v48, %s11429_s17  ;;  %668 = vrot.lane.b32.xlu0 %v11642_v46, %s11428_s16 }
  0xe9   : > { %v495_v61 = vpop.f32.mrf.mxu0 }
  0xea   : > { %v11698_v62 = vadd.f32 %v11545_v20, %v495_v61 }
  0xec   : > { %10099 = vmatmul.msk.f32.gmra.mxu0 %vm348_vm0, %v340_v50  ;;  %670 = vrot.lane.b32.xlu1 %v11652_v48, %s11428_s16  ;;  %17199 = vst [vmem:[#allocation15_spill] sm:$0xff] %v11698_v62 }
  0xed   : > { %992 = vrot.lane.b32.xlu2 %v11652_v48, %s11430_s18  ;;  %734 = vrot.lane.b32.xlu0 %v11652_v48, %s11427_s15 }
  0xef   : > { %v11670_v52 = vpop.permute.xlu2 %654 }
  0xf0   : > { %17195 = vst [vmem:[#allocation11_spill] sm:$0xff] %v11670_v52 }
  0xf1   : > { %v498_v3 = vpop.f32.mrf.mxu0 }
  0xf2   : > { %v11724_v7 = vadd.f32 %v11545_v20, %v498_v3 }
  0xf4   : > { %10100 = vmatmul.msk.f32.gmra.mxu0 %vm348_vm0, %v341_v53  ;;  %736 = vrot.lane.b32.xlu1 %v11674_v54, %s11427_s15  ;;  %17204 = vst [vmem:[#allocation20_spill] sm:$0xff] %v11724_v7 }
  0xf5   : > { %672 = vrot.lane.b32.xlu2 %v11674_v54, %s11428_s16  ;;  %608 = vrot.lane.b32.xlu0 %v11674_v54, %s11429_s17 }
  0xf7   : > { %v11683_v56 = vpop.permute.xlu2 %720 }
  0xf8   : > { %17197 = vst [vmem:[#allocation13_spill] sm:$0xff] %v11683_v56 }
  0xf9   : > { %v501_v8 = vpop.f32.mrf.mxu0 }
  0xfa   : > { %v11744_v12 = vadd.f32 %v11545_v20, %v501_v8 }
  0xfc   : > { %10101 = vmatmul.msk.f32.gmra.mxu0 %vm348_vm0, %v342_v58  ;;  %610 = vrot.lane.b32.xlu1 %v11686_v57, %s11429_s17  ;;  %17208 = vst [vmem:[#allocation24_spill] sm:$0xff] %v11744_v12 }
  0xfd   : > { %738 = vrot.lane.b32.xlu2 %v11686_v57, %s11427_s15  ;;  %1018 = vrot.lane.b32.xlu0 %v11674_v54, %s11430_s18 }
  0xff   : > { %v837_v59 = vpop.permute.xlu2 %836 }
 0x101   : > { %v504_v16 = vpop.f32.mrf.mxu0 }
 0x102   : > { %v11761_v17 = vadd.f32 %v11545_v20, %v504_v16 }
 0x104   : > { %10102 = vmatmul.msk.f32.gmra.mxu0 %vm348_vm0, %v343_v60  ;;  %1044 = vrot.lane.b32.xlu1 %v11686_v57, %s11430_s18  ;;  %17212 = vst [vmem:[#allocation28_spill] sm:$0xff] %v11761_v17 }
 0x105   : > { %612 = vrot.lane.b32.xlu2 %v11698_v62, %s11429_s17  ;;  %674 = vrot.lane.b32.xlu0 %v11686_v57, %s11428_s16 }
 0x106   : > { %v11707_v63 = vpop.permute.xlu1 %718 }
 0x107   : > { %17200 = vst [vmem:[#allocation16_spill] sm:$0xff] %v11707_v63  ;;  %v11709_v0 = vpop.permute.xlu2 %660  ;;  %v11711_v1 = vpop.permute.xlu0 %590 }
 0x108   : > { %17201 = vst [vmem:[#allocation17_spill] sm:$0xff] %v11709_v0 }
 0x109   : > { %17202 = vst [vmem:[#allocation18_spill] sm:$0xff] %v11711_v1  ;;  %v507_v22 = vpop.f32.mrf.mxu0 }
 0x10a   : > { %v11790_v28 = vadd.f32 %v11545_v20, %v507_v22 }
 0x10c   : > { %10103 = vmatmul.msk.f32.gmra.mxu0 %vm348_vm0, %v344_v2  ;;  %676 = vrot.lane.b32.xlu1 %v11698_v62, %s11428_s16  ;;  %17217 = vst [vmem:[#allocation33_spill] sm:$0xff] %v11790_v28 }
 0x10d   : > { %1070 = vrot.lane.b32.xlu2 %v11698_v62, %s11430_s18  ;;  %740 = vrot.lane.b32.xlu0 %v11698_v62, %s11427_s15 }
 0x10e   : > { %v811_v4 = vpop.permute.xlu1 %810 }
 0x10f   : > { %v11721_v5 = vpop.permute.xlu2 %598  ;;  %v784_v6 = vpop.permute.xlu0 %783 }
 0x110   : > { %17203 = vst [vmem:[#allocation19_spill] sm:$0xff] %v11721_v5  ;;  %10104 = vmatpush.xpose.msk.msrb.mxu0 %vm785_vm1, %v784_v6 }
 0x111   : > { %v510_v30 = vpop.f32.mrf.mxu0 }
 0x112   : > { %v11806_v36 = vadd.f32 %v11545_v20, %v510_v30 }
 0x114   : > { %10106 = vmatpush.xpose.msk.msra.mxu0 %vm785_vm1, %v811_v4  ;;  %742 = vrot.lane.b32.xlu1 %v11724_v7, %s11427_s15  ;;  %17220 = vst [vmem:[#allocation36_spill] sm:$0xff] %v11806_v36 }
 0x115   : > { %10105 = vmatmul.msk.f32.vlgmr.msrb.gmra.mxu0 %vm785_vm1, %v11549_v23  ;;  %678 = vrot.lane.b32.xlu2 %v11724_v7, %s11428_s16 }
 0x116   : > { %614 = vrot.lane.b32.xlu0 %v11724_v7, %s11429_s17  ;;  %v11737_v9 = vpop.permute.xlu1 %594 }
 0x117   : > { %17205 = vst [vmem:[#allocation21_spill] sm:$0xff] %v11737_v9  ;;  %v11739_v10 = vpop.permute.xlu2 %726  ;;  %v11741_v11 = vpop.permute.xlu0 %592 }
 0x118   : > { %10108 = vmatpush.xpose.msk.msrb.mxu0 %vm785_vm1, %v837_v59  ;;  %17206 = vst [vmem:[#allocation22_spill] sm:$0xff] %v11739_v10 }
 0x119   : > { %17207 = vst [vmem:[#allocation23_spill] sm:$0xff] %v11741_v11  ;;  %v513_v45 = vpop.f32.mrf.mxu0 }
 0x11a   : > { %v11834_v47 = vadd.f32 %v11545_v20, %v513_v45 }
 0x11c   : > { %616 = vrot.lane.b32.xlu1 %v11744_v12, %s11429_s17  ;;  %17226 = vst [vmem:[#allocation42_spill] sm:$0xff] %v11834_v47 }
 0x11d   : > { %10107 = vmatmul.msk.f32.vlgmr.msra.gmra.mxu0 %vm785_vm1, %v11560_v26  ;;  %744 = vrot.lane.b32.xlu2 %v11744_v12, %s11427_s15 }
 0x11e   : > { %1096 = vrot.lane.b32.xlu0 %v11724_v7, %s11430_s18  ;;  %v11754_v13 = vpop.permute.xlu1 %658 }
 0x11f   : > { %17209 = vst [vmem:[#allocation25_spill] sm:$0xff] %v11754_v13  ;;  %v11756_v14 = vpop.permute.xlu2 %600  ;;  %v11758_v15 = vpop.permute.xlu0 %656 }
 0x120   : > { %17210 = vst [vmem:[#allocation26_spill] sm:$0xff] %v11756_v14 }
 0x121   : > { %17211 = vst [vmem:[#allocation27_spill] sm:$0xff] %v11758_v15  ;;  %v516_v53 = vpop.f32.mrf.mxu0 }
 0x122   : > { %v11863_v60 = vadd.f32 %v11545_v20, %v516_v53 }
 0x124   : > { %1122 = vrot.lane.b32.xlu1 %v11744_v12, %s11430_s18  ;;  %17231 = vst [vmem:[#allocation47_spill] sm:$0xff] %v11863_v60 }
 0x125   : > { %10109 = vmatmul.msk.f32.vlgmr.msrb.gmra.mxu0 %vm785_vm1, %v11571_v29  ;;  %618 = vrot.lane.b32.xlu2 %v11761_v17, %s11429_s17 }
 0x126   : > { %680 = vrot.lane.b32.xlu0 %v11744_v12, %s11428_s16  ;;  %v11771_v18 = vpop.permute.xlu1 %596 }
 0x127   : > { %17213 = vst [vmem:[#allocation29_spill] sm:$0xff] %v11771_v18  ;;  %v915_v19 = vpop.permute.xlu2 %914  ;;  %v11773_v21 = vpop.permute.xlu0 %722 }
 0x128   : > { %17214 = vst [vmem:[#allocation30_spill] sm:$0xff] %v11773_v21  ;;  %10114 = vmatpush.xpose.msk.msra.mxu3 %vm785_vm1, %v915_v19 }
 0x129   : > { %v519_v4 = vpop.f32.mrf.mxu0 }
 0x12a   : > { %v11880_v6 = vadd.f32 %v11545_v20, %v519_v4 }
 0x12b   : > { %10115 = vmatmul.msk.f32.vlgmr.msra.gmra.mxu3 %vm785_vm1, %v11611_v38 }
 0x12c   : > { %682 = vrot.lane.b32.xlu1 %v11761_v17, %s11428_s16  ;;  %17235 = vst [vmem:[#allocation51_spill] sm:$0xff] %v11880_v6 }
 0x12d   : > { %1148 = vrot.lane.b32.xlu2 %v11761_v17, %s11430_s18 }
 0x12e   : > { %746 = vrot.lane.b32.xlu0 %v11761_v17, %s11427_s15  ;;  %v11784_v24 = vpop.permute.xlu1 %724 }
 0x12f   : > { %17215 = vst [vmem:[#allocation31_spill] sm:$0xff] %v11784_v24  ;;  %v11786_v25 = vpop.permute.xlu2 %666  ;;  %v863_v27 = vpop.permute.xlu0 %862 }
 0x130   : > { %17216 = vst [vmem:[#allocation32_spill] sm:$0xff] %v11786_v25  ;;  %10110 = vmatpush.xpose.msk.msra.mxu1 %vm785_vm1, %v863_v27 }
 0x133   : > { %10111 = vmatmul.msk.f32.vlgmr.msra.gmra.mxu1 %vm785_vm1, %v11582_v32 }
 0x134   : > { %748 = vrot.lane.b32.xlu1 %v11790_v28, %s11427_s15 }
 0x135   : > { %1616 = vrot.lane.b32.xlu2 %v11711_v1, %s11430_s18 }
 0x136   : > { %620 = vrot.lane.b32.xlu0 %v11790_v28, %s11429_s17  ;;  %v889_v31 = vpop.permute.xlu1 %888 }
 0x137   : > { %v11800_v33 = vpop.permute.xlu2 %732  ;;  %v11802_v34 = vpop.permute.xlu0 %662  ;;  %10112 = vmatpush.xpose.msk.msra.mxu2 %vm785_vm1, %v889_v31 }
 0x138   : > { %17218 = vst [vmem:[#allocation34_spill] sm:$0xff] %v11800_v33  ;;  %v522_v31 = vpop.f32.mrf.mxu0 }
 0x139   : > { %17219 = vst [vmem:[#allocation35_spill] sm:$0xff] %v11802_v34 }
 0x13a   : > { %10113 = vmatmul.msk.f32.vlgmr.msra.gmra.mxu2 %vm785_vm1, %v11593_v35 }
 0x13c   : > { %622 = vrot.lane.b32.xlu1 %v11806_v36, %s11429_s17 }
 0x13d   : > { %684 = vrot.lane.b32.xlu2 %v11790_v28, %s11428_s16 }
 0x13e   : > { %1174 = vrot.lane.b32.xlu0 %v11790_v28, %s11430_s18  ;;  %v11816_v37 = vpop.permute.xlu1 %664 }
 0x13f   : > { %17221 = vst [vmem:[#allocation37_spill] sm:$0xff] %v11816_v37  ;;  %v11818_v39 = vpop.permute.xlu2 %606  ;;  %v11820_v40 = vpop.permute.xlu0 %728 }
 0x140   : > { %17222 = vst [vmem:[#allocation38_spill] sm:$0xff] %v11818_v39 }
 0x141   : > { %17223 = vst [vmem:[#allocation39_spill] sm:$0xff] %v11820_v40 }
 0x144   : > { %1200 = vrot.lane.b32.xlu1 %v11806_v36, %s11430_s18 }
 0x145   : > { %750 = vrot.lane.b32.xlu2 %v11806_v36, %s11427_s15 }
 0x146   : > { %1642 = vrot.lane.b32.xlu0 %v11741_v11, %s11430_s18  ;;  %v11828_v41 = vpop.permute.xlu1 %730 }
 0x147   : > { %17224 = vst [vmem:[#allocation40_spill] sm:$0xff] %v11828_v41  ;;  %v993_v43 = vpop.permute.xlu2 %992  ;;  %v11830_v44 = vpop.permute.xlu0 %602 }
 0x148   : > { %17225 = vst [vmem:[#allocation41_spill] sm:$0xff] %v11830_v44  ;;  %10120 = vmatpush.xpose.msk.msrb.mxu3 %vm785_vm1, %v993_v43  ;;  %v11907_v43 = vadd.f32 %v11545_v20, %v522_v31 }
 0x14a   : > { %17240 = vst [vmem:[#allocation56_spill] sm:$0xff] %v11907_v43 }
 0x14b   : > { %10121 = vmatmul.msk.f32.vlgmr.msrb.gmra.mxu3 %vm785_vm1, %v11652_v48 }
 0x14c   : > { %1668 = vrot.lane.b32.xlu1 %v11737_v9, %s11430_s18 }
 0x14d   : > { %624 = vrot.lane.b32.xlu2 %v11834_v47, %s11429_s17 }
 0x14e   : > { %686 = vrot.lane.b32.xlu0 %v11806_v36, %s11428_s16  ;;  %v11844_v49 = vpop.permute.xlu1 %604 }
 0x14f   : > { %17227 = vst [vmem:[#allocation43_spill] sm:$0xff] %v11844_v49  ;;  %v11846_v50 = vpop.permute.xlu2 %672  ;;  %v941_v51 = vpop.permute.xlu0 %940 }
 0x150   : > { %17228 = vst [vmem:[#allocation44_spill] sm:$0xff] %v11846_v50  ;;  %10116 = vmatpush.xpose.msk.msrb.mxu1 %vm785_vm1, %v941_v51 }
 0x153   : > { %10117 = vmatmul.msk.f32.vlgmr.msrb.gmra.mxu1 %vm785_vm1, %v11630_v42 }
 0x154   : > { %688 = vrot.lane.b32.xlu1 %v11834_v47, %s11428_s16 }
 0x155   : > { %1226 = vrot.lane.b32.xlu2 %v11834_v47, %s11430_s18 }
 0x156   : > { %752 = vrot.lane.b32.xlu0 %v11834_v47, %s11427_s15  ;;  %v967_v55 = vpop.permute.xlu1 %966 }
 0x157   : > { %v11857_v58 = vpop.permute.xlu2 %738  ;;  %v11859_v59 = vpop.permute.xlu0 %668  ;;  %10118 = vmatpush.xpose.msk.msrb.mxu2 %vm785_vm1, %v967_v55 }
 0x158   : > { %17229 = vst [vmem:[#allocation45_spill] sm:$0xff] %v11857_v58  ;;  %v525_v55 = vpop.f32.mrf.mxu0 }
 0x159   : > { %17230 = vst [vmem:[#allocation46_spill] sm:$0xff] %v11859_v59  ;;  %v11937_v31 = vadd.f32 %v11545_v20, %v525_v55 }
 0x15a   : > { %10119 = vmatmul.msk.f32.vlgmr.msrb.gmra.mxu2 %vm785_vm1, %v11642_v46 }
 0x15b   : > { %17246 = vst [vmem:[#allocation62_spill] sm:$0xff] %v11937_v31 }
 0x15c   : > { %754 = vrot.lane.b32.xlu1 %v11863_v60, %s11427_s15 }
 0x15d   : > { %1694 = vrot.lane.b32.xlu2 %v11771_v18, %s11430_s18 }
 0x15e   : > { %626 = vrot.lane.b32.xlu0 %v11863_v60, %s11429_s17  ;;  %v11873_v61 = vpop.permute.xlu1 %670 }
 0x15f   : > { %17232 = vst [vmem:[#allocation48_spill] sm:$0xff] %v11873_v61  ;;  %v11875_v2 = vpop.permute.xlu2 %612  ;;  %v11877_v3 = vpop.permute.xlu0 %734 }
 0x160   : > { %17233 = vst [vmem:[#allocation49_spill] sm:$0xff] %v11875_v2 }
 0x161   : > { %17234 = vst [vmem:[#allocation50_spill] sm:$0xff] %v11877_v3 }
 0x164   : > { %628 = vrot.lane.b32.xlu1 %v11880_v6, %s11429_s17 }
 0x165   : > { %690 = vrot.lane.b32.xlu2 %v11863_v60, %s11428_s16 }
 0x166   : > { %1252 = vrot.lane.b32.xlu0 %v11863_v60, %s11430_s18  ;;  %v11888_v8 = vpop.permute.xlu1 %736 }
 0x167   : > { %17236 = vst [vmem:[#allocation52_spill] sm:$0xff] %v11888_v8  ;;  %v1071_v16 = vpop.permute.xlu2 %1070  ;;  %v11890_v19 = vpop.permute.xlu0 %608 }
 0x168   : > { %17237 = vst [vmem:[#allocation53_spill] sm:$0xff] %v11890_v19  ;;  %10126 = vmatpush.xpose.msk.msra.mxu3 %vm785_vm1, %v1071_v16 }
 0x16b   : > { %10127 = vmatmul.msk.f32.vlgmr.msra.gmra.mxu3 %vm785_vm1, %v11698_v62 }
 0x16c   : > { %1278 = vrot.lane.b32.xlu1 %v11880_v6, %s11430_s18 }
 0x16d   : > { %756 = vrot.lane.b32.xlu2 %v11880_v6, %s11427_s15 }
 0x16e   : > { %1720 = vrot.lane.b32.xlu0 %v11721_v5, %s11430_s18  ;;  %v11901_v22 = vpop.permute.xlu1 %610 }
 0x16f   : > { %17238 = vst [vmem:[#allocation54_spill] sm:$0xff] %v11901_v22  ;;  %v11903_v27 = vpop.permute.xlu2 %678  ;;  %v1019_v30 = vpop.permute.xlu0 %1018 }
 0x170   : > { %17239 = vst [vmem:[#allocation55_spill] sm:$0xff] %v11903_v27  ;;  %10122 = vmatpush.xpose.msk.msra.mxu1 %vm785_vm1, %v1019_v30 }
 0x173   : > { %10123 = vmatmul.msk.f32.vlgmr.msra.gmra.mxu1 %vm785_vm1, %v11674_v54 }
 0x174   : > { %1746 = vrot.lane.b32.xlu1 %v11756_v14, %s11430_s18 }
 0x175   : > { %630 = vrot.lane.b32.xlu2 %v11907_v43, %s11429_s17 }
 0x176   : > { %692 = vrot.lane.b32.xlu0 %v11880_v6, %s11428_s16  ;;  %v1045_v45 = vpop.permute.xlu1 %1044 }
 0x177   : > { %v11917_v51 = vpop.permute.xlu2 %744  ;;  %v11919_v53 = vpop.permute.xlu0 %674  ;;  %10124 = vmatpush.xpose.msk.msra.mxu2 %vm785_vm1, %v1045_v45 }
 0x178   : > { %17241 = vst [vmem:[#allocation57_spill] sm:$0xff] %v11917_v51  ;;  %v528_v45 = vpop.f32.mrf.mxu0 }
 0x179   : > { %17242 = vst [vmem:[#allocation58_spill] sm:$0xff] %v11919_v53  ;;  %v11950_v48 = vadd.f32 %v11545_v20, %v528_v45 }
 0x17a   : > { %10125 = vmatmul.msk.f32.vlgmr.msra.gmra.mxu2 %vm785_vm1, %v11686_v57 }
 0x17b   : > { %17249 = vst [vmem:[#allocation65_spill] sm:$0xff] %v11950_v48 }
 0x17c   : > { %694 = vrot.lane.b32.xlu1 %v11907_v43, %s11428_s16 }
 0x17d   : > { %1304 = vrot.lane.b32.xlu2 %v11907_v43, %s11430_s18 }
 0x17e   : > { %758 = vrot.lane.b32.xlu0 %v11907_v43, %s11427_s15  ;;  %v11930_v4 = vpop.permute.xlu1 %676 }
 0x17f   : > { %17243 = vst [vmem:[#allocation59_spill] sm:$0xff] %v11930_v4  ;;  %v11932_v16 = vpop.permute.xlu2 %618  ;;  %v11934_v30 = vpop.permute.xlu0 %740 }
 0x180   : > { %17244 = vst [vmem:[#allocation60_spill] sm:$0xff] %v11932_v16 }
 0x181   : > { %17245 = vst [vmem:[#allocation61_spill] sm:$0xff] %v11934_v30 }
 0x184   : > { %760 = vrot.lane.b32.xlu1 %v11937_v31, %s11427_s15 }
 0x185   : > { %1772 = vrot.lane.b32.xlu2 %v11830_v44, %s11430_s18 }
 0x186   : > { %632 = vrot.lane.b32.xlu0 %v11937_v31, %s11429_s17  ;;  %v11945_v62 = vpop.permute.xlu1 %742 }
 0x187   : > { %17247 = vst [vmem:[#allocation63_spill] sm:$0xff] %v11945_v62  ;;  %v1149_v57 = vpop.permute.xlu2 %1148 }
 0x188   : > { %v11947_v54 = vpop.permute.xlu0 %614  ;;  %10132 = vmatpush.xpose.msk.msrb.mxu3 %vm785_vm1, %v1149_v57 }
 0x189   : > { %17248 = vst [vmem:[#allocation64_spill] sm:$0xff] %v11947_v54 }
 0x18b   : > { %10133 = vmatmul.msk.f32.vlgmr.msrb.gmra.mxu3 %vm785_vm1, %v11761_v17 }
 0x18c   : > { %634 = vrot.lane.b32.xlu1 %v11950_v48, %s11429_s17 }
 0x18d   : > { %696 = vrot.lane.b32.xlu2 %v11937_v31, %s11428_s16 }
 0x18e   : > { %1330 = vrot.lane.b32.xlu0 %v11937_v31, %s11430_s18  ;;  %v11961_v55 = vpop.permute.xlu1 %616 }
 0x18f   : > { %17250 = vst [vmem:[#allocation66_spill] sm:$0xff] %v11961_v55  ;;  %v11963_v46 = vpop.permute.xlu2 %1616 }
 0x190   : > { %v1097_v45 = vpop.permute.xlu0 %1096 }
 0x191   : > { %10128 = vmatpush.xpose.msk.msrb.mxu1 %vm785_vm1, %v1097_v45  ;;  %v531_v45 = vpop.f32.mrf.mxu0 }
 0x194   : > { %10129 = vmatmul.msk.f32.vlgmr.msrb.gmra.mxu1 %vm785_vm1, %v11724_v7  ;;  %1356 = vrot.lane.b32.xlu1 %v11950_v48, %s11430_s18  ;;  %v11982_v7 = vadd.f32 %v11545_v20, %v531_v45 }
 0x195   : > { %762 = vrot.lane.b32.xlu2 %v11950_v48, %s11427_s15 }
 0x196   : > { %1798 = vrot.lane.b32.xlu0 %v11844_v49, %s11430_s18  ;;  %v1123_v57 = vpop.permute.xlu1 %1122  ;;  %17253 = vst [vmem:[#allocation69_spill] sm:$0xff] %v11982_v7 }
 0x197   : > { %v11974_v17 = vpop.permute.xlu2 %684  ;;  %10130 = vmatpush.xpose.msk.msrb.mxu2 %vm785_vm1, %v1123_v57 }
 0x198   : > { %17251 = vst [vmem:[#allocation67_spill] sm:$0xff] %v11974_v17  ;;  %v11976_v42 = vpop.permute.xlu0 %680 }
 0x199   : > { %17252 = vst [vmem:[#allocation68_spill] sm:$0xff] %v11976_v42  ;;  %v534_v45 = vpop.f32.mrf.mxu0 }
 0x19a   : > { %10131 = vmatmul.msk.f32.vlgmr.msrb.gmra.mxu2 %vm785_vm1, %v11744_v12  ;;  %v12009_v32 = vadd.f32 %v11545_v20, %v534_v45 }
 0x19c   : > { %1824 = vrot.lane.b32.xlu1 %v11818_v39, %s11430_s18  ;;  %17260 = vst [vmem:[#allocation76_spill] sm:$0xff] %v12009_v32 }
 0x19d   : > { %636 = vrot.lane.b32.xlu2 %v11982_v7, %s11429_s17 }
 0x19e   : > { %698 = vrot.lane.b32.xlu0 %v11950_v48, %s11428_s16  ;;  %v11990_v38 = vpop.permute.xlu1 %682 }
 0x19f   : > { %17254 = vst [vmem:[#allocation70_spill] sm:$0xff] %v11990_v38  ;;  %v11992_v35 = vpop.permute.xlu2 %750 }
 0x1a0   : > { %17255 = vst [vmem:[#allocation71_spill] sm:$0xff] %v11992_v35  ;;  %v11994_v57 = vpop.permute.xlu0 %746 }
 0x1a1   : > { %17256 = vst [vmem:[#allocation72_spill] sm:$0xff] %v11994_v57  ;;  %v537_v57 = vpop.f32.mrf.mxu0 }
 0x1a2   : > { %v12022_v45 = vadd.f32 %v11545_v20, %v537_v57 }
 0x1a4   : > { %700 = vrot.lane.b32.xlu1 %v11982_v7, %s11428_s16  ;;  %17262 = vst [vmem:[#allocation78_spill] sm:$0xff] %v12022_v45 }
 0x1a5   : > { %1382 = vrot.lane.b32.xlu2 %v11982_v7, %s11430_s18 }
 0x1a6   : > { %764 = vrot.lane.b32.xlu0 %v11982_v7, %s11427_s15  ;;  %v12002_v12 = vpop.permute.xlu1 %748 }
 0x1a7   : > { %17257 = vst [vmem:[#allocation73_spill] sm:$0xff] %v12002_v12  ;;  %v12004_v26 = vpop.permute.xlu2 %624 }
 0x1a8   : > { %17258 = vst [vmem:[#allocation74_spill] sm:$0xff] %v12004_v26  ;;  %v12006_v23 = vpop.permute.xlu0 %620 }
 0x1a9   : > { %17259 = vst [vmem:[#allocation75_spill] sm:$0xff] %v12006_v23  ;;  %v540_v62 = vpop.f32.mrf.mxu0 }
 0x1ac   : > { %766 = vrot.lane.b32.xlu1 %v12009_v32, %s11427_s15 }
 0x1ad   : > { %1850 = vrot.lane.b32.xlu2 %v11890_v19, %s11430_s18 }
 0x1ae   : > { %638 = vrot.lane.b32.xlu0 %v12009_v32, %s11429_s17  ;;  %v12017_v29 = vpop.permute.xlu1 %622 }
 0x1af   : > { %17261 = vst [vmem:[#allocation77_spill] sm:$0xff] %v12017_v29  ;;  %v1227_v35 = vpop.permute.xlu2 %1226 }
 0x1b0   : > { %v1175_v12 = vpop.permute.xlu0 %1174  ;;  %10138 = vmatpush.xpose.msk.msra.mxu3 %vm785_vm1, %v1227_v35 }
 0x1b1   : > { %10134 = vmatpush.xpose.msk.msra.mxu1 %vm785_vm1, %v1175_v12  ;;  %v543_v8 = vpop.f32.mrf.mxu0 }
 0x1b3   : > { %10139 = vmatmul.msk.f32.vlgmr.msra.gmra.mxu3 %vm785_vm1, %v11834_v47 }
 0x1b4   : > { %10135 = vmatmul.msk.f32.vlgmr.msra.gmra.mxu1 %vm785_vm1, %v11790_v28  ;;  %640 = vrot.lane.b32.xlu1 %v12022_v45, %s11429_s17 }
 0x1b5   : > { %702 = vrot.lane.b32.xlu2 %v12009_v32, %s11428_s16 }
 0x1b6   : > { %1408 = vrot.lane.b32.xlu0 %v12009_v32, %s11430_s18  ;;  %v1201_v35 = vpop.permute.xlu1 %1200 }
 0x1b7   : > { %v12034_v12 = vpop.permute.xlu2 %1694  ;;  %10136 = vmatpush.xpose.msk.msra.mxu2 %vm785_vm1, %v1201_v35  ;;  %v12054_v35 = vadd.f32 %v11545_v20, %v540_v62 }
 0x1b8   : > { %v12036_v57 = vpop.permute.xlu0 %1642 }
 0x1b9   : > { %17265 = vst [vmem:[#allocation81_spill] sm:$0xff] %v12054_v35 }
 0x1ba   : > { %10137 = vmatmul.msk.f32.vlgmr.msra.gmra.mxu2 %vm785_vm1, %v11806_v36 }
 0x1bc   : > { %1434 = vrot.lane.b32.xlu1 %v12022_v45, %s11430_s18 }
 0x1bd   : > { %768 = vrot.lane.b32.xlu2 %v12022_v45, %s11427_s15 }
 0x1be   : > { %1876 = vrot.lane.b32.xlu0 %v11901_v22, %s11430_s18  ;;  %v12047_v47 = vpop.permute.xlu1 %1668 }
 0x1bf   : > { %v12049_v28 = vpop.permute.xlu2 %690 }
 0x1c0   : > { %17263 = vst [vmem:[#allocation79_spill] sm:$0xff] %v12049_v28  ;;  %v12051_v51 = vpop.permute.xlu0 %686 }
 0x1c1   : > { %17264 = vst [vmem:[#allocation80_spill] sm:$0xff] %v12051_v51 }
 0x1c4   : > { %1902 = vrot.lane.b32.xlu1 %v11875_v2, %s11430_s18 }
 0x1c5   : > { %642 = vrot.lane.b32.xlu2 %v12054_v35, %s11429_s17 }
 0x1c6   : > { %704 = vrot.lane.b32.xlu0 %v12022_v45, %s11428_s16  ;;  %v12062_v36 = vpop.permute.xlu1 %688 }
 0x1c7   : > { %17266 = vst [vmem:[#allocation82_spill] sm:$0xff] %v12062_v36  ;;  %v12064_v30 = vpop.permute.xlu2 %756 }
 0x1c8   : > { %17267 = vst [vmem:[#allocation83_spill] sm:$0xff] %v12064_v30  ;;  %v12066_v58 = vpop.permute.xlu0 %752  ;;  %v12081_v30 = vadd.f32 %v11545_v20, %v543_v8 }
 0x1c9   : > { %17268 = vst [vmem:[#allocation84_spill] sm:$0xff] %v12066_v58  ;;  %v546_v58 = vpop.f32.mrf.mxu0 }
 0x1ca   : > { %17272 = vst [vmem:[#allocation88_spill] sm:$0xff] %v12081_v30  ;;  %v12092_v40 = vadd.f32 %v11545_v20, %v546_v58 }
 0x1cc   : > { %706 = vrot.lane.b32.xlu1 %v12054_v35, %s11428_s16  ;;  %17274 = vst [vmem:[#allocation90_spill] sm:$0xff] %v12092_v40 }
 0x1cd   : > { %1460 = vrot.lane.b32.xlu2 %v12054_v35, %s11430_s18 }
 0x1ce   : > { %770 = vrot.lane.b32.xlu0 %v12054_v35, %s11427_s15  ;;  %v12074_v62 = vpop.permute.xlu1 %754 }
 0x1cf   : > { %17269 = vst [vmem:[#allocation85_spill] sm:$0xff] %v12074_v62  ;;  %v12076_v3 = vpop.permute.xlu2 %630 }
 0x1d0   : > { %17270 = vst [vmem:[#allocation86_spill] sm:$0xff] %v12076_v3  ;;  %v12078_v33 = vpop.permute.xlu0 %626 }
 0x1d1   : > { %17271 = vst [vmem:[#allocation87_spill] sm:$0xff] %v12078_v33  ;;  %v549_v10 = vpop.f32.mrf.mxu0 }
 0x1d4   : > { %772 = vrot.lane.b32.xlu1 %v12081_v30, %s11427_s15 }
 0x1d5   : > { %1928 = vrot.lane.b32.xlu2 %v11947_v54, %s11430_s18 }
 0x1d6   : > { %644 = vrot.lane.b32.xlu0 %v12081_v30, %s11429_s17  ;;  %v12089_v41 = vpop.permute.xlu1 %628 }
 0x1d7   : > { %17273 = vst [vmem:[#allocation89_spill] sm:$0xff] %v12089_v41  ;;  %v1305_v62 = vpop.permute.xlu2 %1304 }
 0x1d8   : > { %v1253_v2 = vpop.permute.xlu0 %1252  ;;  %10144 = vmatpush.xpose.msk.msrb.mxu3 %vm785_vm1, %v1305_v62 }
 0x1d9   : > { %10140 = vmatpush.xpose.msk.msrb.mxu1 %vm785_vm1, %v1253_v2 }
 0x1db   : > { %10145 = vmatmul.msk.f32.vlgmr.msrb.gmra.mxu3 %vm785_vm1, %v11907_v43 }
 0x1dc   : > { %10141 = vmatmul.msk.f32.vlgmr.msrb.gmra.mxu1 %vm785_vm1, %v11863_v60  ;;  %646 = vrot.lane.b32.xlu1 %v12092_v40, %s11429_s17 }
 0x1dd   : > { %708 = vrot.lane.b32.xlu2 %v12081_v30, %s11428_s16 }
 0x1de   : > { %1486 = vrot.lane.b32.xlu0 %v12081_v30, %s11430_s18  ;;  %v1279_v58 = vpop.permute.xlu1 %1278 }
 0x1df   : > { %v12106_v8 = vpop.permute.xlu2 %1772  ;;  %10142 = vmatpush.xpose.msk.msrb.mxu2 %vm785_vm1, %v1279_v58  ;;  %v12126_v58 = vadd.f32 %v11545_v20, %v549_v10  ;;  %v552_v10 = vpop.f32.mrf.mxu0 }
 0x1e0   : > { %v12108_v2 = vpop.permute.xlu0 %1720 }
 0x1e1   : > { %17277 = vst [vmem:[#allocation93_spill] sm:$0xff] %v12126_v58 }
 0x1e2   : > { %10143 = vmatmul.msk.f32.vlgmr.msrb.gmra.mxu2 %vm785_vm1, %v11880_v6 }
 0x1e4   : > { %1512 = vrot.lane.b32.xlu1 %v12092_v40, %s11430_s18 }
 0x1e5   : > { %774 = vrot.lane.b32.xlu2 %v12092_v40, %s11427_s15 }
 0x1e6   : > { %1954 = vrot.lane.b32.xlu0 %v11961_v55, %s11430_s18  ;;  %v12119_v62 = vpop.permute.xlu1 %1746 }
 0x1e7   : > { %v12121_v43 = vpop.permute.xlu2 %696  ;;  %v555_v56 = vpop.f32.mrf.mxu0 }
 0x1e8   : > { %17275 = vst [vmem:[#allocation91_spill] sm:$0xff] %v12121_v43  ;;  %v12123_v60 = vpop.permute.xlu0 %692 }
 0x1e9   : > { %17276 = vst [vmem:[#allocation92_spill] sm:$0xff] %v12123_v60 }
 0x1ec   : > { %1980 = vrot.lane.b32.xlu1 %v11932_v16, %s11430_s18 }
 0x1ed   : > { %648 = vrot.lane.b32.xlu2 %v12126_v58, %s11429_s17 }
 0x1ee   : > { %710 = vrot.lane.b32.xlu0 %v12092_v40, %s11428_s16  ;;  %v12134_v6 = vpop.permute.xlu1 %694 }
 0x1ef   : > { %17278 = vst [vmem:[#allocation94_spill] sm:$0xff] %v12134_v6  ;;  %v12136_v55 = vpop.permute.xlu2 %762 }
 0x1f0   : > { %17279 = vst [vmem:[#allocation95_spill] sm:$0xff] %v12136_v55  ;;  %v12138_v24 = vpop.permute.xlu0 %758  ;;  %v12153_v55 = vadd.f32 %v11545_v20, %v552_v10  ;;  %v12166_v10 = vadd.f32 %v11545_v20, %v555_v56 }
 0x1f1   : > { %17280 = vst [vmem:[#allocation96_spill] sm:$0xff] %v12138_v24 }
 0x1f2   : > { %17284 = vst [vmem:[#allocation100_spill] sm:$0xff] %v12153_v55 }
 0x1f3   : > { %17286 = vst [vmem:[#allocation102_spill] sm:$0xff] %v12166_v10 }
 0x1f4   : > { %712 = vrot.lane.b32.xlu1 %v12126_v58, %s11428_s16 }
 0x1f5   : > { %1538 = vrot.lane.b32.xlu2 %v12126_v58, %s11430_s18 }
 0x1f6   : > { %776 = vrot.lane.b32.xlu0 %v12126_v58, %s11427_s15  ;;  %v12146_v16 = vpop.permute.xlu1 %760 }
 0x1f7   : > { %17281 = vst [vmem:[#allocation97_spill] sm:$0xff] %v12146_v16  ;;  %v12148_v22 = vpop.permute.xlu2 %636 }
 0x1f8   : > { %17282 = vst [vmem:[#allocation98_spill] sm:$0xff] %v12148_v22  ;;  %v12150_v39 = vpop.permute.xlu0 %632 }
 0x1f9   : > { %17283 = vst [vmem:[#allocation99_spill] sm:$0xff] %v12150_v39 }
 0x1fc   : > { %778 = vrot.lane.b32.xlu1 %v12153_v55, %s11427_s15 }
 0x1fd   : > { %2006 = vrot.lane.b32.xlu2 %v12006_v23, %s11430_s18 }
 0x1fe   : > { %650 = vrot.lane.b32.xlu0 %v12153_v55, %s11429_s17  ;;  %v12161_v24 = vpop.permute.xlu1 %634 }
 0x1ff   : > { %17285 = vst [vmem:[#allocation101_spill] sm:$0xff] %v12161_v24  ;;  %v1383_v21 = vpop.permute.xlu2 %1382 }
 0x200   : > { %v1331_v16 = vpop.permute.xlu0 %1330  ;;  %10150 = vmatpush.xpose.msk.msra.mxu3 %vm785_vm1, %v1383_v21 }
 0x201   : > { %10146 = vmatpush.xpose.msk.msra.mxu1 %vm785_vm1, %v1331_v16 }
 0x203   : > { %10151 = vmatmul.msk.f32.vlgmr.msra.gmra.mxu3 %vm785_vm1, %v11982_v7 }
 0x204   : > { %10147 = vmatmul.msk.f32.vlgmr.msra.gmra.mxu1 %vm785_vm1, %v11937_v31  ;;  %652 = vrot.lane.b32.xlu1 %v12166_v10, %s11429_s17 }
 0x205   : > { %714 = vrot.lane.b32.xlu2 %v12153_v55, %s11428_s16 }
 0x206   : > { %1564 = vrot.lane.b32.xlu0 %v12153_v55, %s11430_s18  ;;  %v1357_v21 = vpop.permute.xlu1 %1356 }
 0x207   : > { %v12178_v16 = vpop.permute.xlu2 %1850  ;;  %10148 = vmatpush.xpose.msk.msra.mxu2 %vm785_vm1, %v1357_v21 }
 0x208   : > { %v12180_v20 = vpop.permute.xlu0 %1798 }
 0x20a   : > { %10149 = vmatmul.msk.f32.vlgmr.msra.gmra.mxu2 %vm785_vm1, %v11950_v48 }
 0x20c   : > { %1590 = vrot.lane.b32.xlu1 %v12166_v10, %s11430_s18 }
 0x20d   : > { %780 = vrot.lane.b32.xlu2 %v12166_v10, %s11427_s15 }
 0x20e   : > { %2032 = vrot.lane.b32.xlu0 %v12017_v29, %s11430_s18  ;;  %v12191_v56 = vpop.permute.xlu1 %1824 }
 0x20f   : > { %v12193_v7 = vpop.permute.xlu2 %702 }
 0x210   : > { %17287 = vst [vmem:[#allocation103_spill] sm:$0xff] %v12193_v7  ;;  %v12195_v31 = vpop.permute.xlu0 %698 }
 0x211   : > { %17288 = vst [vmem:[#allocation104_spill] sm:$0xff] %v12195_v31 }
 0x214   : > { %2058 = vrot.lane.b32.xlu1 %v12004_v26, %s11430_s18 }
 0x215   : > { %2474 = vrot.lane.b32.xlu2 %v11758_v15, %s11430_s18 }
 0x216   : > { %716 = vrot.lane.b32.xlu0 %v12166_v10, %s11428_s16  ;;  %v12203_v21 = vpop.permute.xlu1 %700 }
 0x217   : > { %17289 = vst [vmem:[#allocation105_spill] sm:$0xff] %v12203_v21  ;;  %v12205_v48 = vpop.permute.xlu2 %768 }
 0x218   : > { %17290 = vst [vmem:[#allocation106_spill] sm:$0xff] %v12205_v48  ;;  %v12207_v29 = vpop.permute.xlu0 %764 }
 0x219   : > { %17291 = vst [vmem:[#allocation107_spill] sm:$0xff] %v12207_v29 }
 0x21c   : > { %2448 = vrot.lane.b32.xlu1 %v11670_v52, %s11430_s18 }
 0x21d   : > { %2084 = vrot.lane.b32.xlu2 %v12078_v33, %s11430_s18 }
 0x21e   : > { %2500 = vrot.lane.b32.xlu0 %v11754_v13, %s11430_s18  ;;  %v12215_v26 = vpop.permute.xlu1 %766 }
 0x21f   : > { %17292 = vst [vmem:[#allocation108_spill] sm:$0xff] %v12215_v26  ;;  %v12217_v63 = vpop.permute.xlu2 %642 }
 0x220   : > { %17293 = vst [vmem:[#allocation109_spill] sm:$0xff] %v12217_v63  ;;  %v12219_v15 = vpop.permute.xlu0 %638 }
 0x221   : > { %17294 = vst [vmem:[#allocation110_spill] sm:$0xff] %v12219_v15 }
 0x224   : > { %2526 = vrot.lane.b32.xlu1 %v11709_v0, %s11430_s18 }
 0x225   : > { %2552 = vrot.lane.b32.xlu2 %v11802_v34, %s11430_s18 }
 0x226   : > { %2110 = vrot.lane.b32.xlu0 %v12089_v41, %s11430_s18  ;;  %v12227_v52 = vpop.permute.xlu1 %640 }
 0x227   : > { %17295 = vst [vmem:[#allocation111_spill] sm:$0xff] %v12227_v52  ;;  %v1461_v13 = vpop.permute.xlu2 %1460 }
 0x228   : > { %v1409_v48 = vpop.permute.xlu0 %1408  ;;  %10156 = vmatpush.xpose.msk.msrb.mxu3 %vm785_vm1, %v1461_v13 }
 0x229   : > { %10152 = vmatpush.xpose.msk.msrb.mxu1 %vm785_vm1, %v1409_v48 }
 0x22b   : > { %10157 = vmatmul.msk.f32.vlgmr.msrb.gmra.mxu3 %vm785_vm1, %v12054_v35 }
 0x22c   : > { %10153 = vmatmul.msk.f32.vlgmr.msrb.gmra.mxu1 %vm785_vm1, %v12009_v32  ;;  %2136 = vrot.lane.b32.xlu1 %v12076_v3, %s11430_s18 }
 0x22d   : > { %2630 = vrot.lane.b32.xlu2 %v11859_v59, %s11430_s18 }
 0x22e   : > { %2578 = vrot.lane.b32.xlu0 %v11816_v37, %s11430_s18  ;;  %v1435_v0 = vpop.permute.xlu1 %1434 }
 0x22f   : > { %v1929_v34 = vpop.permute.xlu2 %1928  ;;  %10154 = vmatpush.xpose.msk.msrb.mxu2 %vm785_vm1, %v1435_v0 }
 0x230   : > { %v12241_v48 = vpop.permute.xlu0 %1876 }
 0x232   : > { %10155 = vmatmul.msk.f32.vlgmr.msrb.gmra.mxu2 %vm785_vm1, %v12022_v45 }
 0x234   : > { %2604 = vrot.lane.b32.xlu1 %v11786_v25, %s11430_s18 }
 0x235   : > { %2162 = vrot.lane.b32.xlu2 %v12150_v39, %s11430_s18 }
 0x236   : > { %2656 = vrot.lane.b32.xlu0 %v11873_v61, %s11430_s18  ;;  %v12252_v13 = vpop.permute.xlu1 %1902 }
 0x237   : > { %v12254_v35 = vpop.permute.xlu2 %708 }
 0x238   : > { %17296 = vst [vmem:[#allocation112_spill] sm:$0xff] %v12254_v35  ;;  %v12256_v32 = vpop.permute.xlu0 %704 }
 0x239   : > { %17297 = vst [vmem:[#allocation113_spill] sm:$0xff] %v12256_v32 }
 0x23c   : > { %2682 = vrot.lane.b32.xlu1 %v11846_v50, %s11430_s18 }
 0x23d   : > { %2708 = vrot.lane.b32.xlu2 %v11919_v53, %s11430_s18 }
 0x23e   : > { %2188 = vrot.lane.b32.xlu0 %v12161_v24, %s11430_s18  ;;  %v12264_v0 = vpop.permute.xlu1 %706 }
 0x23f   : > { %17298 = vst [vmem:[#allocation114_spill] sm:$0xff] %v12264_v0  ;;  %v12266_v45 = vpop.permute.xlu2 %774 }
 0x240   : > { %17299 = vst [vmem:[#allocation115_spill] sm:$0xff] %v12266_v45  ;;  %v12268_v61 = vpop.permute.xlu0 %770 }
 0x241   : > { %17300 = vst [vmem:[#allocation116_spill] sm:$0xff] %v12268_v61 }
 0x244   : > { %2214 = vrot.lane.b32.xlu1 %v12148_v22, %s11430_s18 }
 0x245   : > { %2786 = vrot.lane.b32.xlu2 %v11976_v42, %s11430_s18 }
 0x246   : > { %2734 = vrot.lane.b32.xlu0 %v11930_v4, %s11430_s18  ;;  %v12276_v37 = vpop.permute.xlu1 %772 }
 0x247   : > { %17301 = vst [vmem:[#allocation117_spill] sm:$0xff] %v12276_v37  ;;  %v12278_v50 = vpop.permute.xlu2 %648 }
 0x248   : > { %17302 = vst [vmem:[#allocation118_spill] sm:$0xff] %v12278_v50  ;;  %v12280_v25 = vpop.permute.xlu0 %644 }
 0x249   : > { %17303 = vst [vmem:[#allocation119_spill] sm:$0xff] %v12280_v25 }
 0x24c   : > { %2760 = vrot.lane.b32.xlu1 %v11903_v27, %s11430_s18 }
 0x24d   : > { %2240 = vrot.lane.b32.xlu2 %v12219_v15, %s11430_s18 }
 0x24e   : > { %2812 = vrot.lane.b32.xlu0 %v11990_v38, %s11430_s18  ;;  %v12288_v53 = vpop.permute.xlu1 %646 }
 0x24f   : > { %17304 = vst [vmem:[#allocation120_spill] sm:$0xff] %v12288_v53  ;;  %v1539_v4 = vpop.permute.xlu2 %1538 }
 0x250   : > { %v1487_v59 = vpop.permute.xlu0 %1486  ;;  %10162 = vmatpush.xpose.msk.msra.mxu3 %vm785_vm1, %v1539_v4 }
 0x251   : > { %10158 = vmatpush.xpose.msk.msra.mxu1 %vm785_vm1, %v1487_v59 }
 0x253   : > { %10163 = vmatmul.msk.f32.vlgmr.msra.gmra.mxu3 %vm785_vm1, %v12126_v58 }
 0x254   : > { %10168 = vmatpush.xpose.msk.msrb.mxu3 %vm785_vm1, %v11963_v46  ;;  %10159 = vmatmul.msk.f32.vlgmr.msra.gmra.mxu1 %vm785_vm1, %v12081_v30 }
 0x255   : > { %2838 = vrot.lane.b32.xlu1 %v11974_v17, %s11430_s18  ;;  %2864 = vrot.lane.b32.xlu2 %v12051_v51, %s11430_s18 }
 0x256   : > { %2266 = vrot.lane.b32.xlu0 %v12227_v52, %s11430_s18  ;;  %v1513_v59 = vpop.permute.xlu1 %1512 }
 0x257   : > { %v2007_v46 = vpop.permute.xlu2 %2006  ;;  %10160 = vmatpush.xpose.msk.msra.mxu2 %vm785_vm1, %v1513_v59 }
 0x258   : > { %10174 = vmatpush.xpose.msk.msra.mxu3 %vm785_vm1, %v12034_v12  ;;  %v12306_v4 = vpop.permute.xlu0 %1954 }
 0x25a   : > { %10161 = vmatmul.msk.f32.vlgmr.msra.gmra.mxu2 %vm785_vm1, %v12092_v40 }
 0x25b   : > { %10169 = vmatmul.msk.f32.vlgmr.msrb.gmra.mxu3 %vm785_vm1, %v11711_v1 }
 0x25c   : > { %10180 = vmatpush.xpose.msk.msrb.mxu3 %vm785_vm1, %v12106_v8 }
 0x25d   : > { %2292 = vrot.lane.b32.xlu1 %v12217_v63, %s11430_s18  ;;  %2942 = vrot.lane.b32.xlu2 %v12123_v60, %s11430_s18 }
 0x25e   : > { %2890 = vrot.lane.b32.xlu0 %v12062_v36, %s11430_s18  ;;  %v12321_v12 = vpop.permute.xlu1 %1980 }
 0x25f   : > { %v12323_v59 = vpop.permute.xlu2 %714 }
 0x260   : > { %17305 = vst [vmem:[#allocation121_spill] sm:$0xff] %v12323_v59  ;;  %v12325_v58 = vpop.permute.xlu0 %710 }
 0x261   : > { %17306 = vst [vmem:[#allocation122_spill] sm:$0xff] %v12325_v58 }
 0x263   : > { %10175 = vmatmul.msk.f32.vlgmr.msra.gmra.mxu3 %vm785_vm1, %v11771_v18 }
 0x264   : > { %10186 = vmatpush.xpose.msk.msra.mxu3 %vm785_vm1, %v12178_v16 }
 0x265   : > { %2916 = vrot.lane.b32.xlu1 %v12049_v28, %s11430_s18  ;;  %2318 = vrot.lane.b32.xlu2 %v12280_v25, %s11430_s18 }
 0x266   : > { %2968 = vrot.lane.b32.xlu0 %v12134_v6, %s11430_s18  ;;  %v12337_v8 = vpop.permute.xlu1 %712 }
 0x267   : > { %17307 = vst [vmem:[#allocation123_spill] sm:$0xff] %v12337_v8  ;;  %v12339_v1 = vpop.permute.xlu2 %780 }
 0x268   : > { %17308 = vst [vmem:[#allocation124_spill] sm:$0xff] %v12339_v1  ;;  %v12341_v40 = vpop.permute.xlu0 %776 }
 0x269   : > { %17309 = vst [vmem:[#allocation125_spill] sm:$0xff] %v12341_v40 }
 0x26b   : > { %10181 = vmatmul.msk.f32.vlgmr.msrb.gmra.mxu3 %vm785_vm1, %v11830_v44 }
 0x26c   : > { %10192 = vmatpush.xpose.msk.msrb.mxu3 %vm785_vm1, %v1929_v34 }
 0x26d   : > { %2994 = vrot.lane.b32.xlu1 %v12121_v43, %s11430_s18  ;;  %3020 = vrot.lane.b32.xlu2 %v12195_v31, %s11430_s18 }
 0x26e   : > { %2344 = vrot.lane.b32.xlu0 %v12288_v53, %s11430_s18  ;;  %v12352_v16 = vpop.permute.xlu1 %778 }
 0x26f   : > { %17310 = vst [vmem:[#allocation126_spill] sm:$0xff] %v12352_v16  ;;  %v12354_v18 = vpop.permute.xlu2 %2474 }
 0x270   : > { %v12356_v30 = vpop.permute.xlu0 %650 }
 0x271   : > { %17311 = vst [vmem:[#allocation127_spill] sm:$0xff] %v12356_v30 }
 0x273   : > { %10187 = vmatmul.msk.f32.vlgmr.msra.gmra.mxu3 %vm785_vm1, %v11890_v19  ;;  %v17320_v19 = vld [vmem:[#allocation22_spill] sm:$0xff] }
 0x274   : > { %10198 = vmatpush.xpose.msk.msra.mxu3 %vm785_vm1, %v2007_v46 }
 0x275   : > { %2370 = vrot.lane.b32.xlu1 %v12278_v50, %s11430_s18  ;;  %3098 = vrot.lane.b32.xlu2 %v12256_v32, %s11430_s18 }
 0x276   : > { %3046 = vrot.lane.b32.xlu0 %v12203_v21, %s11430_s18  ;;  %v12367_v34 = vpop.permute.xlu1 %652 }
 0x277   : > { %17312 = vst [vmem:[#allocation128_spill] sm:$0xff] %v12367_v34  ;;  %v2085_v44 = vpop.permute.xlu2 %2084 }
 0x278   : > { %v1565_v6 = vpop.permute.xlu0 %1564 }
 0x279   : > { %10164 = vmatpush.xpose.msk.msrb.mxu1 %vm785_vm1, %v1565_v6 }
 0x27b   : > { %10193 = vmatmul.msk.f32.vlgmr.msrb.gmra.mxu3 %vm785_vm1, %v11947_v54  ;;  %v17317_v54 = vld [vmem:[#allocation38_spill] sm:$0xff] }
 0x27c   : > { %10165 = vmatmul.msk.f32.vlgmr.msrb.gmra.mxu1 %vm785_vm1, %v12153_v55  ;;  %10204 = vmatpush.xpose.msk.msrb.mxu3 %vm785_vm1, %v2085_v44 }
 0x27d   : > { %10170 = vmatpush.xpose.msk.msra.mxu1 %vm785_vm1, %v12036_v57  ;;  %3072 = vrot.lane.b32.xlu1 %v12193_v7, %s11430_s18 }
 0x27e   : > { %3124 = vrot.lane.b32.xlu0 %v12264_v0, %s11430_s18  ;;  %2396 = vrot.lane.b32.xlu2 %v12356_v30, %s11430_s18  ;;  %v1591_v6 = vpop.permute.xlu1 %1590 }
 0x27f   : > { %v12385_v57 = vpop.permute.xlu2 %2552  ;;  %10166 = vmatpush.xpose.msk.msrb.mxu2 %vm785_vm1, %v1591_v6 }
 0x280   : > { %v2033_v46 = vpop.permute.xlu0 %2032 }
 0x281   : > { %10176 = vmatpush.xpose.msk.msrb.mxu1 %vm785_vm1, %v12108_v2 }
 0x282   : > { %10167 = vmatmul.msk.f32.vlgmr.msrb.gmra.mxu2 %vm785_vm1, %v12166_v10 }
 0x283   : > { %10172 = vmatpush.xpose.msk.msra.mxu2 %vm785_vm1, %v12047_v47  ;;  %10199 = vmatmul.msk.f32.vlgmr.msra.gmra.mxu3 %vm785_vm1, %v12006_v23 }
 0x284   : > { %10171 = vmatmul.msk.f32.vlgmr.msra.gmra.mxu1 %vm785_vm1, %v11741_v11  ;;  %v17326_v11 = vld [vmem:[#allocation50_spill] sm:$0xff] }
 0x285   : > { %10182 = vmatpush.xpose.msk.msra.mxu1 %vm785_vm1, %v12180_v20  ;;  %3150 = vrot.lane.b32.xlu1 %v12254_v35, %s11430_s18 }
 0x286   : > { %2422 = vrot.lane.b32.xlu0 %v12367_v34, %s11430_s18  ;;  %3176 = vrot.lane.b32.xlu2 %v12325_v58, %s11430_s18  ;;  %v2059_v44 = vpop.permute.xlu1 %2058 }
 0x287   : > { %10178 = vmatpush.xpose.msk.msrb.mxu2 %vm785_vm1, %v12119_v62  ;;  %v12406_v47 = vpop.permute.xlu2 %2630 }
 0x288   : > { %v12408_v2 = vpop.permute.xlu0 %716 }
 0x289   : > { %17313 = vst [vmem:[#allocation129_spill] sm:$0xff] %v12408_v2 }
 0x28a   : > { %10173 = vmatmul.msk.f32.vlgmr.msra.gmra.mxu2 %vm785_vm1, %v11737_v9  ;;  %v17325_v9 = vld [vmem:[#allocation34_spill] sm:$0xff] }
 0x28b   : > { %10184 = vmatpush.xpose.msk.msra.mxu2 %vm785_vm1, %v12191_v56  ;;  %10205 = vmatmul.msk.f32.vlgmr.msrb.gmra.mxu3 %vm785_vm1, %v12078_v33  ;;  %v17314_v56 = vld [vmem:[#allocation16_spill] sm:$0xff] }
 0x28c   : > { %10177 = vmatmul.msk.f32.vlgmr.msrb.gmra.mxu1 %vm785_vm1, %v11721_v5 }
 0x28d   : > { %10188 = vmatpush.xpose.msk.msrb.mxu1 %vm785_vm1, %v12241_v48  ;;  %3228 = vrot.lane.b32.xlu1 %v12323_v59, %s11430_s18  ;;  %v17315_v48 = vld [vmem:[#allocation13_spill] sm:$0xff] }
 0x28e   : > { %3202 = vrot.lane.b32.xlu0 %v12337_v8, %s11430_s18  ;;  %3254 = vrot.lane.b32.xlu2 %v12408_v2, %s11430_s18  ;;  %v12426_v62 = vpop.permute.xlu1 %2448 }
 0x28f   : > { %v2163_v20 = vpop.permute.xlu2 %2162 }
 0x290   : > { %v12428_v6 = vpop.permute.xlu0 %2500  ;;  %10210 = vmatpush.xpose.msk.msra.mxu3 %vm785_vm1, %v2163_v20  ;;  %v17316_v20 = vld [vmem:[#allocation30_spill] sm:$0xff] }
 0x292   : > { %10179 = vmatmul.msk.f32.vlgmr.msrb.gmra.mxu2 %vm785_vm1, %v11756_v14  ;;  %v17321_v14 = vld [vmem:[#allocation39_spill] sm:$0xff] }
 0x293   : > { %10190 = vmatpush.xpose.msk.msrb.mxu2 %vm785_vm1, %v12252_v13  ;;  %10211 = vmatmul.msk.f32.vlgmr.msra.gmra.mxu3 %vm785_vm1, %v12150_v39  ;;  %v17319_v39 = vld [vmem:[#allocation31_spill] sm:$0xff] }
 0x294   : > { %10183 = vmatmul.msk.f32.vlgmr.msra.gmra.mxu1 %vm785_vm1, %v11844_v49 }
 0x295   : > { %10194 = vmatpush.xpose.msk.msra.mxu1 %vm785_vm1, %v12306_v4  ;;  %3306 = vrot.lane.b32.xlu1 %v17315_v48, %s11430_s18  ;;  %v17318_v4 = vld [vmem:[#allocation54_spill] sm:$0xff] }
 0x296   : > { %3280 = vrot.lane.b32.xlu0 %v17314_v56, %s11430_s18  ;;  %3332 = vrot.lane.b32.xlu2 %v17316_v20, %s11430_s18  ;;  %v12447_v33 = vpop.permute.xlu1 %2526 }
 0x297   : > { %v12449_v23 = vpop.permute.xlu2 %2708 }
 0x298   : > { %v2111_v13 = vpop.permute.xlu0 %2110 }
 0x29a   : > { %10185 = vmatmul.msk.f32.vlgmr.msra.gmra.mxu2 %vm785_vm1, %v17317_v54 }
 0x29b   : > { %10196 = vmatpush.xpose.msk.msra.mxu2 %vm785_vm1, %v12321_v12  ;;  %v17323_v12 = vld [vmem:[#allocation66_spill] sm:$0xff] }
 0x29c   : > { %10189 = vmatmul.msk.f32.vlgmr.msrb.gmra.mxu1 %vm785_vm1, %v17318_v4  ;;  %v17322_v4 = vld [vmem:[#allocation49_spill] sm:$0xff] }
 0x29d   : > { %10200 = vmatpush.xpose.msk.msrb.mxu1 %vm785_vm1, %v2033_v46  ;;  %3384 = vrot.lane.b32.xlu1 %v17320_v19, %s11430_s18  ;;  %v17324_v46 = vld [vmem:[#allocation40_spill] sm:$0xff]  ;;  %v17331_v19 = vld [vmem:[#allocation61_spill] sm:$0xff] }
 0x29e   : > { %3358 = vrot.lane.b32.xlu0 %v17319_v39, %s11430_s18  ;;  %3410 = vrot.lane.b32.xlu2 %v17321_v14, %s11430_s18  ;;  %v2137_v49 = vpop.permute.xlu1 %2136 }
 0x29f   : > { %v12464_v5 = vpop.permute.xlu2 %2786 }
 0x2a0   : > { %v12466_v54 = vpop.permute.xlu0 %2578 }
 0x2a2   : > { %10191 = vmatmul.msk.f32.vlgmr.msrb.gmra.mxu2 %vm785_vm1, %v17322_v4 }
 0x2a3   : > { %10202 = vmatpush.xpose.msk.msrb.mxu2 %vm785_vm1, %v2059_v44  ;;  %v17328_v44 = vld [vmem:[#allocation77_spill] sm:$0xff] }
 0x2a4   : > { %10195 = vmatmul.msk.f32.vlgmr.msra.gmra.mxu1 %vm785_vm1, %v17323_v12  ;;  %v17327_v12 = vld [vmem:[#allocation60_spill] sm:$0xff] }
 0x2a5   : > { %10206 = vmatpush.xpose.msk.msra.mxu1 %vm785_vm1, %v2111_v13  ;;  %3462 = vrot.lane.b32.xlu1 %v17325_v9, %s11430_s18  ;;  %v17329_v13 = vld [vmem:[#allocation52_spill] sm:$0xff] }
 0x2a6   : > { %3436 = vrot.lane.b32.xlu0 %v17324_v46, %s11430_s18  ;;  %3488 = vrot.lane.b32.xlu2 %v17326_v11, %s11430_s18  ;;  %v12480_v10 = vpop.permute.xlu1 %2604  ;;  %v17330_v11 = vld [vmem:[#allocation45_spill] sm:$0xff] }
 0x2a7   : > { %v2241_v55 = vpop.permute.xlu2 %2240 }
 0x2a8   : > { %v12482_v4 = vpop.permute.xlu0 %2656  ;;  %10216 = vmatpush.xpose.msk.msrb.mxu3 %vm785_vm1, %v2241_v55 }
 0x2aa   : > { %10197 = vmatmul.msk.f32.vlgmr.msra.gmra.mxu2 %vm785_vm1, %v17327_v12 }
 0x2ab   : > { %10208 = vmatpush.xpose.msk.msra.mxu2 %vm785_vm1, %v2137_v49  ;;  %10217 = vmatmul.msk.f32.vlgmr.msrb.gmra.mxu3 %vm785_vm1, %v12219_v15  ;;  %v17332_v49 = vld [vmem:[#allocation74_spill] sm:$0xff]  ;;  %v17333_v15 = vld [vmem:[#allocation63_spill] sm:$0xff] }
 0x2ac   : > { %10201 = vmatmul.msk.f32.vlgmr.msrb.gmra.mxu1 %vm785_vm1, %v17328_v44  ;;  %v17334_v44 = vld [vmem:[#allocation57_spill] sm:$0xff] }
 0x2ad   : > { %3540 = vrot.lane.b32.xlu1 %v17330_v11, %s11430_s18 }
 0x2ae   : > { %3514 = vrot.lane.b32.xlu0 %v17329_v13, %s11430_s18  ;;  %3566 = vrot.lane.b32.xlu2 %v17331_v19, %s11430_s18  ;;  %v12498_v55 = vpop.permute.xlu1 %2682  ;;  %v17335_v13 = vld [vmem:[#allocation72_spill] sm:$0xff] }
 0x2af   : > { %v12500_v12 = vpop.permute.xlu2 %2864 }
 0x2b0   : > { %v2189_v56 = vpop.permute.xlu0 %2188 }
 0x2b1   : > { %10212 = vmatpush.xpose.msk.msrb.mxu1 %vm785_vm1, %v2189_v56  ;;  %v17336_v56 = vld [vmem:[#allocation73_spill] sm:$0xff] }
 0x2b2   : > { %10203 = vmatmul.msk.f32.vlgmr.msrb.gmra.mxu2 %vm785_vm1, %v17332_v49  ;;  %v17337_v49 = vld [vmem:[#allocation71_spill] sm:$0xff] }
 0x2b4   : > { %10207 = vmatmul.msk.f32.vlgmr.msra.gmra.mxu1 %vm785_vm1, %v12089_v41  ;;  %v17338_v41 = vld [vmem:[#allocation84_spill] sm:$0xff] }
 0x2b5   : > { %3618 = vrot.lane.b32.xlu1 %v17334_v44, %s11430_s18 }
 0x2b6   : > { %3592 = vrot.lane.b32.xlu0 %v17333_v15, %s11430_s18  ;;  %3644 = vrot.lane.b32.xlu2 %v17335_v13, %s11430_s18  ;;  %v2215_v14 = vpop.permute.xlu1 %2214 }
 0x2b7   : > { %v12513_v11 = vpop.permute.xlu2 %2942  ;;  %10214 = vmatpush.xpose.msk.msrb.mxu2 %vm785_vm1, %v2215_v14  ;;  %v17339_v14 = vld [vmem:[#allocation83_spill] sm:$0xff] }
 0x2b8   : > { %v12515_v8 = vpop.permute.xlu0 %2734 }
 0x2ba   : > { %10209 = vmatmul.msk.f32.vlgmr.msra.gmra.mxu2 %vm785_vm1, %v12076_v3  ;;  %v17341_v3 = vld [vmem:[#allocation96_spill] sm:$0xff] }
 0x2bc   : > { %10213 = vmatmul.msk.f32.vlgmr.msrb.gmra.mxu1 %vm785_vm1, %v12161_v24  ;;  %v17340_v24 = vld [vmem:[#allocation85_spill] sm:$0xff] }
 0x2bd   : > { %3696 = vrot.lane.b32.xlu1 %v17337_v49, %s11430_s18 }
 0x2be   : > { %3670 = vrot.lane.b32.xlu0 %v17336_v56, %s11430_s18  ;;  %3722 = vrot.lane.b32.xlu2 %v17338_v41, %s11430_s18  ;;  %v12528_v15 = vpop.permute.xlu1 %2760 }
 0x2bf   : > { %v2319_v44 = vpop.permute.xlu2 %2318 }
 0x2c0   : > { %v12530_v13 = vpop.permute.xlu0 %2812  ;;  %10222 = vmatpush.xpose.msk.msra.mxu3 %vm785_vm1, %v2319_v44 }
 0x2c2   : > { %10215 = vmatmul.msk.f32.vlgmr.msrb.gmra.mxu2 %vm785_vm1, %v12148_v22  ;;  %v17343_v22 = vld [vmem:[#allocation97_spill] sm:$0xff] }
 0x2c3   : > { %10223 = vmatmul.msk.f32.vlgmr.msra.gmra.mxu3 %vm785_vm1, %v12280_v25  ;;  %v17342_v25 = vld [vmem:[#allocation95_spill] sm:$0xff] }
 0x2c5   : > { %3774 = vrot.lane.b32.xlu1 %v17339_v14, %s11430_s18  ;;  %v17355_v14 = vld [vmem:[#allocation25_spill] sm:$0xff] }
 0x2c6   : > { %3748 = vrot.lane.b32.xlu0 %v17340_v24, %s11430_s18  ;;  %3800 = vrot.lane.b32.xlu2 %v17341_v3, %s11430_s18 }
 0x2c7   : > { %v12543_v49 = vpop.permute.xlu1 %2838  ;;  %v12545_v41 = vpop.permute.xlu2 %3020 }
 0x2c8   : > { %v2267_v44 = vpop.permute.xlu0 %2266 }
 0x2c9   : > { %10218 = vmatpush.xpose.msk.msra.mxu1 %vm785_vm1, %v2267_v44  ;;  %v17344_v44 = vld [vmem:[#allocation106_spill] sm:$0xff] }
 0x2cc   : > { %10219 = vmatmul.msk.f32.vlgmr.msra.gmra.mxu1 %vm785_vm1, %v12227_v52 }
 0x2cd   : > { %3852 = vrot.lane.b32.xlu1 %v17342_v25, %s11430_s18 }
 0x2ce   : > { %3826 = vrot.lane.b32.xlu0 %v17343_v22, %s11430_s18  ;;  %3878 = vrot.lane.b32.xlu2 %v12207_v29, %s11430_s18 }
 0x2cf   : > { %v2293_v3 = vpop.permute.xlu1 %2292  ;;  %v12556_v24 = vpop.permute.xlu2 %3098 }
 0x2d0   : > { %v12558_v48 = vpop.permute.xlu0 %2890  ;;  %10220 = vmatpush.xpose.msk.msra.mxu2 %vm785_vm1, %v2293_v3  ;;  %v12582_v3 = vpop.f32.mrf.mxu1 }
 0x2d3   : > { %10221 = vmatmul.msk.f32.vlgmr.msra.gmra.mxu2 %vm785_vm1, %v12217_v63 }
 0x2d5   : > { %3930 = vrot.lane.b32.xlu1 %v17344_v44, %s11430_s18  ;;  %v17346_v44 = vld [vmem:[#allocation35_spill] sm:$0xff] }
 0x2d6   : > { %3904 = vrot.lane.b32.xlu0 %v12215_v26, %s11430_s18  ;;  %3956 = vrot.lane.b32.xlu2 %v12268_v61, %s11430_s18  ;;  %v807_v61 = vpop.f32.mrf.mxu0 }
 0x2d7   : > { %v12569_v52 = vpop.permute.xlu1 %2916 }
 0x2d8   : > { %v12571_v22 = vpop.permute.xlu0 %2968  ;;  %v2397_v25 = vpop.permute.xlu2 %2396 }
 0x2d9   : > { %10228 = vmatpush.xpose.msk.msrb.mxu3 %vm785_vm1, %v2397_v25  ;;  %v12605_v26 = vpop.f32.mrf.mxu1 }
 0x2dc   : > { %10229 = vmatmul.msk.f32.vlgmr.msrb.gmra.mxu3 %vm785_vm1, %v12356_v30  ;;  %v12593_v30 = vpop.f32.mrf.mxu2 }
 0x2dd   : > { %10234 = vmatpush.xpose.msk.msra.mxu3 %vm785_vm1, %v12354_v18  ;;  %4008 = vrot.lane.b32.xlu1 %v12266_v45, %s11430_s18  ;;  %v17345_v45 = vld [vmem:[#allocation27_spill] sm:$0xff] }
 0x2de   : > { %3982 = vrot.lane.b32.xlu0 %v12276_v37, %s11430_s18  ;;  %4034 = vrot.lane.b32.xlu2 %v12341_v40, %s11430_s18  ;;  %v17347_v37 = vld [vmem:[#allocation11_spill] sm:$0xff] }
 0x2df   : > { %v12588_v25 = vpop.permute.xlu1 %2994 }
 0x2e0   : > { %v2345_v18 = vpop.permute.xlu0 %2344  ;;  %v12590_v63 = vpop.permute.xlu2 %3176 }
 0x2e1   : > { %10240 = vmatpush.xpose.msk.msrb.mxu3 %vm785_vm1, %v12385_v57  ;;  %10224 = vmatpush.xpose.msk.msrb.mxu1 %vm785_vm1, %v2345_v18  ;;  %v12595_v57 = vpop.f32.mrf.mxu3 }
 0x2e4   : > { %10225 = vmatmul.msk.f32.vlgmr.msrb.gmra.mxu1 %vm785_vm1, %v12288_v53  ;;  %10235 = vmatmul.msk.f32.vlgmr.msra.gmra.mxu3 %vm785_vm1, %v17345_v45  ;;  %v12616_v45 = vpop.f32.mrf.mxu2 }
 0x2e5   : > { %10246 = vmatpush.xpose.msk.msra.mxu3 %vm785_vm1, %v12406_v47  ;;  %4086 = vrot.lane.b32.xlu1 %v12339_v1, %s11430_s18 }
 0x2e6   : > { %4060 = vrot.lane.b32.xlu0 %v12352_v16, %s11430_s18 }
 0x2e7   : > { %v2371_v18 = vpop.permute.xlu1 %2370 }
 0x2e8   : > { %v12609_v40 = vpop.permute.xlu0 %3046  ;;  %10226 = vmatpush.xpose.msk.msrb.mxu2 %vm785_vm1, %v2371_v18  ;;  %v12612_v53 = vpop.permute.xlu2 %3254 }
 0x2e9   : > { %v12620_v47 = vpop.f32.mrf.mxu3  ;;  %v12628_v18 = vpop.f32.mrf.mxu1 }
 0x2eb   : > { %10227 = vmatmul.msk.f32.vlgmr.msrb.gmra.mxu2 %vm785_vm1, %v12278_v50 }
 0x2ec   : > { %10232 = vmatpush.xpose.msk.msra.mxu2 %vm785_vm1, %v12426_v62  ;;  %10241 = vmatmul.msk.f32.vlgmr.msrb.gmra.mxu3 %vm785_vm1, %v17346_v44  ;;  %v12634_v50 = vpop.f32.mrf.mxu2 }
 0x2ed   : > { %10252 = vmatpush.xpose.msk.msrb.mxu3 %vm785_vm1, %v12449_v23  ;;  %v17348_v23 = vld [vmem:[#allocation46_spill] sm:$0xff] }
 0x2ef   : > { %v12630_v62 = vpop.permute.xlu1 %3072 }
 0x2f0   : > { %10238 = vmatpush.xpose.msk.msrb.mxu2 %vm785_vm1, %v12447_v33  ;;  %v12632_v16 = vpop.permute.xlu0 %3124  ;;  %v12636_v1 = vpop.permute.xlu2 %3332 }
 0x2f1   : > { %v12640_v33 = vpop.f32.mrf.mxu3  ;;  %v12648_v44 = vpop.f32.mrf.mxu1 }
 0x2f3   : > { %10233 = vmatmul.msk.f32.vlgmr.msra.gmra.mxu2 %vm785_vm1, %v17347_v37 }
 0x2f4   : > { %10244 = vmatpush.xpose.msk.msra.mxu2 %vm785_vm1, %v12480_v10  ;;  %10247 = vmatmul.msk.f32.vlgmr.msra.gmra.mxu3 %vm785_vm1, %v17348_v23  ;;  %v12654_v37 = vpop.f32.mrf.mxu2  ;;  %v17349_v10 = vld [vmem:[#allocation17_spill] sm:$0xff]  ;;  %v833_v23 = vpop.f32.mrf.mxu0 }
 0x2f5   : > { %10258 = vmatpush.xpose.msk.msra.mxu3 %vm785_vm1, %v12464_v5 }
 0x2f7   : > { %v12650_v29 = vpop.permute.xlu1 %3150 }
 0x2f8   : > { %v2423_v46 = vpop.permute.xlu0 %2422  ;;  %v12671_v5 = vpop.permute.xlu2 %3410 }
 0x2f9   : > { %10230 = vmatpush.xpose.msk.msra.mxu1 %vm785_vm1, %v2423_v46  ;;  %v12660_v0 = vpop.f32.mrf.mxu3  ;;  %17350 = vst [vmem:[#allocation130_spill] sm:$0xff] %v12671_v5  ;;  %v12679_v46 = vpop.f32.mrf.mxu1 }
 0x2fb   : > { %10239 = vmatmul.msk.f32.vlgmr.msrb.gmra.mxu2 %vm785_vm1, %v17349_v10 }
 0x2fc   : > { %10231 = vmatmul.msk.f32.vlgmr.msra.gmra.mxu1 %vm785_vm1, %v12367_v34  ;;  %10250 = vmatpush.xpose.msk.msrb.mxu2 %vm785_vm1, %v12498_v55  ;;  %v12682_v55 = vld [vmem:[%s12669_s26] sm:$0xff]  ;;  %v12688_v59 = vpop.f32.mrf.mxu2 }
 0x2fd   : > { %10236 = vmatpush.xpose.msk.msrb.mxu1 %vm785_vm1, %v12428_v6  ;;  %v17351_v6 = vld [vmem:[#allocation58_spill] sm:$0xff]  ;;  %v12691_v5 = vadd.f32 %v807_v61, %v12682_v55 }
 0x2fe   : > { %10253 = vmatmul.msk.f32.vlgmr.msrb.gmra.mxu3 %vm785_vm1, %v17351_v6  ;;  %v17354_v6 = vld [vmem:[#allocation32_spill] sm:$0xff] }
 0x2ff   : > { %10264 = vmatpush.xpose.msk.msrb.mxu3 %vm785_vm1, %v12500_v12  ;;  %v12684_v10 = vpop.permute.xlu1 %3228  ;;  %17353 = vst [vmem:[#allocation132_spill] sm:$0xff] %v12691_v5  ;;  %v859_v12 = vpop.f32.mrf.mxu0 }
 0x300   : > { %v12686_v34 = vpop.permute.xlu0 %3202 }
 0x301   : > { %10242 = vmatpush.xpose.msk.msra.mxu1 %vm785_vm1, %v12466_v54  ;;  %17352 = vst [vmem:[#allocation131_spill] sm:$0xff] %v12686_v34  ;;  %v12695_v54 = vpop.f32.mrf.mxu3  ;;  %v12707_v61 = vpop.f32.mrf.mxu1  ;;  %v17358_v34 = vld [vmem:[#allocation44_spill] sm:$0xff] }
 0x303   : > { %10245 = vmatmul.msk.f32.vlgmr.msra.gmra.mxu2 %vm785_vm1, %v17354_v6  ;;  %v12709_v6 = vpop.permute.xlu2 %3488 }
 0x304   : > { %10237 = vmatmul.msk.f32.vlgmr.msrb.gmra.mxu1 %vm785_vm1, %v17355_v14  ;;  %10256 = vmatpush.xpose.msk.msra.mxu2 %vm785_vm1, %v12528_v15  ;;  %17356 = vst [vmem:[#allocation133_spill] sm:$0xff] %v12709_v6  ;;  %v4112_v14 = vsel %vm785_vm1, %v12691_v5, -inf  ;;  %v12729_v6 = vadd.f32 %v833_v23, %v12682_v55  ;;  %v17359_v5 = vld [vmem:[#allocation37_spill] sm:$0xff] }
 0x305   : > { %10248 = vmatpush.xpose.msk.msrb.mxu1 %vm785_vm1, %v12482_v4  ;;  %v12717_v4 = vpop.f32.mrf.mxu2 }
 0x306   : > { %10259 = vmatmul.msk.f32.vlgmr.msra.gmra.mxu3 %vm785_vm1, %v11976_v42  ;;  %v12720_v42 = vadd.f32 %v859_v12, %v12682_v55 }
 0x307   : > { %10270 = vmatpush.xpose.msk.msra.mxu3 %vm785_vm1, %v12513_v11  ;;  %4113 = vmax.xlane.f32.xlu2 %v4112_v14  ;;  %v12713_v20 = vpop.permute.xlu1 %3306  ;;  %v12724_v11 = vadd.f32 %v12582_v3, %v12682_v55 }
 0x308   : > { %v12715_v15 = vpop.permute.xlu0 %3280  ;;  %v4118_v23 = vsel %vm785_vm1, %v12720_v42, -inf }
 0x309   : > { %17357 = vst [vmem:[#allocation134_spill] sm:$0xff] %v12724_v11  ;;  %v12731_v14 = vpop.f32.mrf.mxu3  ;;  %v4121_v3 = vsel %vm785_vm1, %v12724_v11, -inf  ;;  %v12747_v12 = vpop.f32.mrf.mxu1  ;;  %v17360_v11 = vld [vmem:[#allocation48_spill] sm:$0xff] }
 0x30b   : > { %10251 = vmatmul.msk.f32.vlgmr.msrb.gmra.mxu2 %vm785_vm1, %v17358_v34 }
 0x30c   : > { %10243 = vmatmul.msk.f32.vlgmr.msra.gmra.mxu1 %vm785_vm1, %v17359_v5  ;;  %10262 = vmatpush.xpose.msk.msrb.mxu2 %vm785_vm1, %v12543_v49  ;;  %v3567_v49 = vpop.permute.xlu2 %3566 }
 0x30d   : > { %10254 = vmatpush.xpose.msk.msra.mxu1 %vm785_vm1, %v12515_v8  ;;  %v4115_v8 = vsel %vm785_vm1, %v12729_v6, -inf  ;;  %v12753_v5 = vpop.f32.mrf.mxu2 }
 0x30e   : > { %10265 = vmatmul.msk.f32.vlgmr.msrb.gmra.mxu3 %vm785_vm1, %v12051_v51 }
 0x30f   : > { %10276 = vmatpush.xpose.msk.msrb.mxu3 %vm785_vm1, %v12545_v41  ;;  %4122 = vmax.xlane.f32.xlu2 %v4121_v3  ;;  %v12749_v34 = vpop.permute.xlu1 %3384  ;;  %v12758_v41 = vadd.f32 %v12593_v30, %v12682_v55  ;;  %v12762_v3 = vadd.f32 %v12605_v26, %v12682_v55 }
 0x310   : > { %4119 = vmax.xlane.f32.xlu1 %v4118_v23  ;;  %4116 = vmax.xlane.f32.xlu0 %v4115_v8  ;;  %v3359_v51 = vpop.permute.xlu0 %3358  ;;  %v12768_v23 = vadd.f32 %v12595_v57, %v12682_v55 }
 0x311   : > { %10302 = vmatpush.xpose.msk.msra.mxu0 %vm785_vm1, %v3359_v51  ;;  %v12770_v8 = vpop.f32.mrf.mxu3  ;;  %v4124_v26 = vsel %vm785_vm1, %v12758_v41, -inf  ;;  %v4130_v51 = vsel %vm785_vm1, %v12762_v3, -inf }
 0x312   : > { %v4127_v30 = vsel %vm785_vm1, %v12768_v23, -inf }
 0x313   : > { %10257 = vmatmul.msk.f32.vlgmr.msra.gmra.mxu2 %vm785_vm1, %v11903_v27  ;;  %v17410_v27 = vld [vmem:[#allocation71_spill] sm:$0xff] }
 0x314   : > { %10249 = vmatmul.msk.f32.vlgmr.msrb.gmra.mxu1 %vm785_vm1, %v17360_v11  ;;  %10268 = vmatpush.xpose.msk.msra.mxu2 %vm785_vm1, %v12569_v52 }
 0x315   : > { %10260 = vmatpush.xpose.msk.msrb.mxu1 %vm785_vm1, %v12530_v13  ;;  %10303 = vmatmul.msk.f32.vlgmr.msra.gmra.mxu0 %vm785_vm1, %v17319_v39  ;;  %v12790_v13 = vpop.f32.mrf.mxu1  ;;  %v12800_v39 = vadd.f32 %v12616_v45, %v12682_v55 }
 0x316   : > { %10271 = vmatmul.msk.f32.vlgmr.msra.gmra.mxu3 %vm785_vm1, %v12123_v60  ;;  %v17389_v60 = vld [vmem:[#allocation52_spill] sm:$0xff] }
 0x317   : > { %10282 = vmatpush.xpose.msk.msra.mxu3 %vm785_vm1, %v12556_v24  ;;  %4125 = vmax.xlane.f32.xlu2 %v4124_v26  ;;  %v3463_v52 = vpop.permute.xlu1 %3462  ;;  %v12795_v24 = vpop.f32.mrf.mxu2  ;;  %v12804_v26 = vadd.f32 %v12628_v18, %v12682_v55  ;;  %v4133_v45 = vsel %vm785_vm1, %v12800_v39, -inf }
 0x318   : > { %4131 = vmax.xlane.f32.xlu1 %v4130_v51  ;;  %4128 = vmax.xlane.f32.xlu0 %v4127_v30  ;;  %v12792_v57 = vpop.permute.xlu0 %3436  ;;  %v12806_v51 = vpop.permute.xlu2 %3644 }
 0x319   : > { %10310 = vmatpush.xpose.msk.msrb.mxu0 %vm785_vm1, %v3463_v52  ;;  %v12812_v52 = vadd.f32 %v12620_v47, %v12682_v55  ;;  %v12814_v30 = vpop.f32.mrf.mxu3  ;;  %v4139_v47 = vsel %vm785_vm1, %v12804_v26, -inf }
 0x31b   : > { %10263 = vmatmul.msk.f32.vlgmr.msrb.gmra.mxu2 %vm785_vm1, %v11974_v17  ;;  %v17404_v17 = vld [vmem:[#allocation63_spill] sm:$0xff] }
 0x31c   : > { %10274 = vmatpush.xpose.msk.msrb.mxu2 %vm785_vm1, %v12588_v25 }
 0x31d   : > { %10318 = vmatpush.xpose.msk.msra.mxu0 %vm785_vm1, %v3567_v49  ;;  %v17361_v49 = vld [vmem:[#allocation59_spill] sm:$0xff]  ;;  %v12836_v18 = vpop.f32.mrf.mxu1 }
 0x31e   : > { %10255 = vmatmul.msk.f32.vlgmr.msra.gmra.mxu1 %vm785_vm1, %v17361_v49  ;;  %10277 = vmatmul.msk.f32.vlgmr.msrb.gmra.mxu3 %vm785_vm1, %v12195_v31  ;;  %v17414_v49 = vld [vmem:[#allocation106_spill] sm:$0xff] }
 0x31f   : > { %10266 = vmatpush.xpose.msk.msra.mxu1 %vm785_vm1, %v12558_v48  ;;  %10288 = vmatpush.xpose.msk.msrb.mxu3 %vm785_vm1, %v12590_v63  ;;  %v12832_v25 = vpop.permute.xlu1 %3540  ;;  %v4136_v48 = vsel %vm785_vm1, %v12812_v52, -inf  ;;  %v12840_v31 = vpop.f32.mrf.mxu2 }
 0x320   : > { %10311 = vmatmul.msk.f32.vlgmr.msrb.gmra.mxu0 %vm785_vm1, %v17325_v9  ;;  %4134 = vmax.xlane.f32.xlu2 %v4133_v45  ;;  %v12838_v63 = vpop.permute.xlu0 %3514  ;;  %v12844_v9 = vadd.f32 %v12634_v50, %v12682_v55  ;;  %v12848_v45 = vadd.f32 %v12648_v44, %v12682_v55  ;;  %v12862_v50 = vpop.permute.xlu2 %3722 }
 0x321   : > { %4140 = vmax.xlane.f32.xlu1 %v4139_v47  ;;  %4137 = vmax.xlane.f32.xlu0 %v4136_v48  ;;  %v12854_v47 = vadd.f32 %v12640_v33, %v12682_v55  ;;  %v12856_v48 = vpop.f32.mrf.mxu3 }
 0x322   : > { %v4142_v44 = vsel %vm785_vm1, %v12844_v9, -inf }
 0x323   : > { %10269 = vmatmul.msk.f32.vlgmr.msra.gmra.mxu2 %vm785_vm1, %v12049_v28 }
 0x324   : > { %10280 = vmatpush.xpose.msk.msra.mxu2 %vm785_vm1, %v12630_v62  ;;  %v4148_v62 = vsel %vm785_vm1, %v12848_v45, -inf }
 0x326   : > { %10261 = vmatmul.msk.f32.vlgmr.msrb.gmra.mxu1 %vm785_vm1, %v11990_v38  ;;  %10283 = vmatmul.msk.f32.vlgmr.msra.gmra.mxu3 %vm785_vm1, %v12256_v32  ;;  %v12880_v32 = vpop.f32.mrf.mxu1  ;;  %v17377_v38 = vld [vmem:[#allocation123_spill] sm:$0xff] }
 0x327   : > { %10272 = vmatpush.xpose.msk.msrb.mxu1 %vm785_vm1, %v12571_v22  ;;  %10294 = vmatpush.xpose.msk.msra.mxu3 %vm785_vm1, %v12612_v53  ;;  %v12876_v33 = vpop.permute.xlu1 %3618  ;;  %v4145_v22 = vsel %vm785_vm1, %v12854_v47, -inf  ;;  %v12884_v28 = vpop.f32.mrf.mxu2 }
 0x328   : > { %10319 = vmatmul.msk.f32.vlgmr.msra.gmra.mxu0 %vm785_vm1, %v17331_v19  ;;  %4143 = vmax.xlane.f32.xlu2 %v4142_v44  ;;  %v12882_v53 = vpop.permute.xlu0 %3592  ;;  %v12888_v19 = vadd.f32 %v12654_v37, %v12682_v55  ;;  %v12892_v44 = vadd.f32 %v12679_v46, %v12682_v55  ;;  %v12912_v46 = vpop.permute.xlu2 %3800 }
 0x329   : > { %4149 = vmax.xlane.f32.xlu1 %v4148_v62  ;;  %4146 = vmax.xlane.f32.xlu0 %v4145_v22  ;;  %v12898_v62 = vadd.f32 %v12660_v0, %v12682_v55  ;;  %v12908_v37 = vpop.f32.mrf.mxu3 }
 0x32a   : > { %v4151_v0 = vsel %vm785_vm1, %v12888_v19, -inf  ;;  %v4157_v22 = vsel %vm785_vm1, %v12892_v44, -inf }
 0x32b   : > { %10275 = vmatmul.msk.f32.vlgmr.msrb.gmra.mxu2 %vm785_vm1, %v12121_v43  ;;  %v12929_v43 = vadd.f32 %v12707_v61, %v12682_v55 }
 0x32c   : > { %10286 = vmatpush.xpose.msk.msrb.mxu2 %vm785_vm1, %v12650_v29 }
 0x32e   : > { %10267 = vmatmul.msk.f32.vlgmr.msra.gmra.mxu1 %vm785_vm1, %v12062_v36  ;;  %10289 = vmatmul.msk.f32.vlgmr.msrb.gmra.mxu3 %vm785_vm1, %v12325_v58  ;;  %v12931_v36 = vpop.f32.mrf.mxu1 }
 0x32f   : > { %10278 = vmatpush.xpose.msk.msra.mxu1 %vm785_vm1, %v12609_v40  ;;  %10300 = vmatpush.xpose.msk.msrb.mxu3 %vm785_vm1, %v12636_v1  ;;  %v12918_v29 = vpop.permute.xlu1 %3696  ;;  %v4154_v40 = vsel %vm785_vm1, %v12898_v62, -inf  ;;  %v12925_v1 = vadd.f32 %v12688_v59, %v12682_v55 }
 0x330   : > { %4152 = vmax.xlane.f32.xlu2 %v4151_v0  ;;  %v3671_v58 = vpop.permute.xlu0 %3670  ;;  %v12937_v0 = vadd.f32 %v12695_v54, %v12682_v55  ;;  %v4166_v54 = vsel %vm785_vm1, %v12929_v43, -inf }
 0x331   : > { %4158 = vmax.xlane.f32.xlu1 %v4157_v22  ;;  %4155 = vmax.xlane.f32.xlu0 %v4154_v40  ;;  %v12939_v22 = vpop.f32.mrf.mxu2  ;;  %v4160_v59 = vsel %vm785_vm1, %v12925_v1, -inf  ;;  %v12957_v61 = vpop.f32.mrf.mxu3 }
 0x332   : > { %10326 = vmatpush.xpose.msk.msrb.mxu0 %vm785_vm1, %v3671_v58  ;;  %v17362_v58 = vld [vmem:[#allocation94_spill] sm:$0xff]  ;;  %v3879_v40 = vpop.permute.xlu2 %3878 }
 0x333   : > { %10281 = vmatmul.msk.f32.vlgmr.msra.gmra.mxu2 %vm785_vm1, %v12193_v7  ;;  %v17367_v7 = vld [vmem:[#allocation121_spill] sm:$0xff] }
 0x334   : > { %10292 = vmatpush.xpose.msk.msra.mxu2 %vm785_vm1, %v12684_v10 }
 0x335   : > { %10327 = vmatmul.msk.f32.vlgmr.msrb.gmra.mxu0 %vm785_vm1, %v17336_v56  ;;  %v12965_v56 = vadd.f32 %v12717_v4, %v12682_v55  ;;  %v17363_v4 = vld [vmem:[#allocation131_spill] sm:$0xff] }
 0x336   : > { %10273 = vmatmul.msk.f32.vlgmr.msrb.gmra.mxu1 %vm785_vm1, %v17362_v58  ;;  %10295 = vmatmul.msk.f32.vlgmr.msra.gmra.mxu3 %vm785_vm1, %v12408_v2  ;;  %v12969_v2 = vadd.f32 %v12747_v12, %v12682_v55  ;;  %v17364_v12 = vld [vmem:[#allocation30_spill] sm:$0xff]  ;;  %v17375_v58 = vld [vmem:[#allocation13_spill] sm:$0xff] }
 0x337   : > { %10284 = vmatpush.xpose.msk.msrb.mxu1 %vm785_vm1, %v12632_v16  ;;  %10308 = vmatpush.xpose.msk.msra.mxu3 %vm785_vm1, %v12792_v57  ;;  %v3775_v10 = vpop.permute.xlu1 %3774  ;;  %v4163_v16 = vsel %vm785_vm1, %v12937_v0, -inf }
 0x338   : > { %4161 = vmax.xlane.f32.xlu2 %v4160_v59  ;;  %v3749_v57 = vpop.permute.xlu0 %3748  ;;  %10334 = vmatpush.xpose.msk.msra.mxu0 %vm785_vm1, %v3775_v10  ;;  %v12975_v59 = vadd.f32 %v12731_v14, %v12682_v55  ;;  %v17365_v14 = vld [vmem:[#allocation83_spill] sm:$0xff] }
 0x339   : > { %4167 = vmax.xlane.f32.xlu1 %v4166_v54  ;;  %4164 = vmax.xlane.f32.xlu0 %v4163_v16  ;;  %v12981_v54 = vpop.f32.mrf.mxu1  ;;  %v12987_v10 = vpop.f32.mrf.mxu2  ;;  %v4169_v16 = vsel %vm785_vm1, %v12965_v56, -inf }
 0x33b   : > { %10287 = vmatmul.msk.f32.vlgmr.msrb.gmra.mxu2 %vm785_vm1, %v12254_v35  ;;  %v13009_v35 = vpop.f32.mrf.mxu3 }
 0x33c   : > { %10342 = vmatpush.xpose.msk.msrb.mxu0 %vm785_vm1, %v3879_v40  ;;  %10298 = vmatpush.xpose.msk.msrb.mxu2 %vm785_vm1, %v12713_v20  ;;  %v4175_v20 = vsel %vm785_vm1, %v12969_v2, -inf }
 0x33d   : > { %10335 = vmatmul.msk.f32.vlgmr.msra.gmra.mxu0 %vm785_vm1, %v17365_v14  ;;  %v13007_v14 = vadd.f32 %v12790_v13, %v12682_v55  ;;  %v17372_v13 = vld [vmem:[#allocation107_spill] sm:$0xff] }
 0x33e   : > { %10279 = vmatmul.msk.f32.vlgmr.msra.gmra.mxu1 %vm785_vm1, %v12203_v21  ;;  %10301 = vmatmul.msk.f32.vlgmr.msrb.gmra.mxu3 %vm785_vm1, %v17364_v12  ;;  %v13049_v21 = vadd.f32 %v12836_v18, %v12682_v55 }
 0x33f   : > { %10290 = vmatpush.xpose.msk.msra.mxu1 %vm785_vm1, %v17363_v4  ;;  %10316 = vmatpush.xpose.msk.msrb.mxu3 %vm785_vm1, %v12832_v25  ;;  %v3853_v40 = vpop.permute.xlu1 %3852  ;;  %v4172_v4 = vsel %vm785_vm1, %v12975_v59, -inf  ;;  %v13003_v25 = vadd.f32 %v12753_v5, %v12682_v55  ;;  %17366 = vst [vmem:[#allocation131_spill] sm:$0xff] %v13007_v14  ;;  %v17371_v5 = vld [vmem:[#allocation40_spill] sm:$0xff] }
 0x340   : > { %4170 = vmax.xlane.f32.xlu2 %v4169_v16  ;;  %v12999_v12 = vpop.permute.xlu0 %3826  ;;  %v13015_v16 = vadd.f32 %v12770_v8, %v12682_v55  ;;  %17374 = vst [vmem:[#allocation136_spill] sm:$0xff] %v13049_v21  ;;  %v4193_v18 = vsel %vm785_vm1, %v13049_v21, -inf }
 0x341   : > { %4176 = vmax.xlane.f32.xlu1 %v4175_v20  ;;  %4173 = vmax.xlane.f32.xlu0 %v4172_v4  ;;  %v17369_v20 = vld [vmem:[#allocation114_spill] sm:$0xff]  ;;  %v13029_v8 = vpop.f32.mrf.mxu1 }
 0x342   : > { %17368 = vst [vmem:[#allocation135_spill] sm:$0xff] %v13015_v16  ;;  %v17370_v4 = vld [vmem:[#allocation130_spill] sm:$0xff] }
 0x343   : > { %10293 = vmatmul.msk.f32.vlgmr.msra.gmra.mxu2 %vm785_vm1, %v17367_v7  ;;  %v4178_v7 = vsel %vm785_vm1, %v13003_v25, -inf }
 0x344   : > { %10306 = vmatpush.xpose.msk.msra.mxu2 %vm785_vm1, %v17370_v4  ;;  %v4184_v4 = vsel %vm785_vm1, %v13007_v14, -inf }
 0x345   : > { %10343 = vmatmul.msk.f32.vlgmr.msrb.gmra.mxu0 %vm785_vm1, %v17372_v13  ;;  %v13045_v13 = vadd.f32 %v12795_v24, %v12682_v55  ;;  %v17378_v24 = vld [vmem:[#allocation45_spill] sm:$0xff] }
 0x346   : > { %10285 = vmatmul.msk.f32.vlgmr.msrb.gmra.mxu1 %vm785_vm1, %v17369_v20  ;;  %10309 = vmatmul.msk.f32.vlgmr.msra.gmra.mxu3 %vm785_vm1, %v17371_v5  ;;  %v13035_v20 = vpop.f32.mrf.mxu2  ;;  %v4181_v5 = vsel %vm785_vm1, %v13015_v16, -inf }
 0x347   : > { %10296 = vmatpush.xpose.msk.msrb.mxu1 %vm785_vm1, %v12715_v15  ;;  %10324 = vmatpush.xpose.msk.msra.mxu3 %vm785_vm1, %v12806_v51  ;;  %v13037_v15 = vpop.permute.xlu1 %3930  ;;  %17373 = vst [vmem:[#allocation130_spill] sm:$0xff] %v13045_v13 }
 0x348   : > { %4179 = vmax.xlane.f32.xlu2 %v4178_v7  ;;  %v13041_v51 = vpop.permute.xlu0 %3904  ;;  %v13055_v7 = vadd.f32 %v12814_v30, %v12682_v55  ;;  %v4187_v30 = vsel %vm785_vm1, %v13045_v13, -inf }
 0x349   : > { %4185 = vmax.xlane.f32.xlu1 %v4184_v4  ;;  %4182 = vmax.xlane.f32.xlu0 %v4181_v5  ;;  %v13061_v5 = vpop.f32.mrf.mxu3 }
 0x34a   : > { %17376 = vst [vmem:[#allocation137_spill] sm:$0xff] %v13055_v7 }
 0x34b   : > { %10299 = vmatmul.msk.f32.vlgmr.msrb.gmra.mxu2 %vm785_vm1, %v17375_v58  ;;  %v13076_v58 = vpop.f32.mrf.mxu1 }
 0x34c   : > { %10314 = vmatpush.xpose.msk.msrb.mxu2 %vm785_vm1, %v12838_v63  ;;  %v4190_v63 = vsel %vm785_vm1, %v13055_v7, -inf }
 0x34e   : > { %10291 = vmatmul.msk.f32.vlgmr.msra.gmra.mxu1 %vm785_vm1, %v17377_v38  ;;  %10317 = vmatmul.msk.f32.vlgmr.msrb.gmra.mxu3 %vm785_vm1, %v17378_v24  ;;  %v13078_v24 = vpop.f32.mrf.mxu2  ;;  %v17381_v38 = vld [vmem:[#allocation39_spill] sm:$0xff] }
 0x34f   : > { %10304 = vmatpush.xpose.msk.msra.mxu1 %vm785_vm1, %v12749_v34  ;;  %10332 = vmatpush.xpose.msk.msrb.mxu3 %vm785_vm1, %v3749_v57  ;;  %v13072_v4 = vpop.permute.xlu1 %4008  ;;  %v13083_v57 = vadd.f32 %v12840_v31, %v12682_v55  ;;  %v17385_v31 = vld [vmem:[#allocation72_spill] sm:$0xff] }
 0x350   : > { %4188 = vmax.xlane.f32.xlu2 %v4187_v30  ;;  %v3983_v34 = vpop.permute.xlu0 %3982  ;;  %v13087_v30 = vadd.f32 %v12880_v32, %v12682_v55  ;;  %v17386_v32 = vld [vmem:[#allocation117_spill] sm:$0xff] }
 0x351   : > { %4194 = vmax.xlane.f32.xlu1 %v4193_v18  ;;  %4191 = vmax.xlane.f32.xlu0 %v4190_v63  ;;  %17379 = vst [vmem:[#allocation138_spill] sm:$0xff] %v13083_v57  ;;  %v13093_v18 = vadd.f32 %v12856_v48, %v12682_v55  ;;  %v17383_v63 = vld [vmem:[#allocation16_spill] sm:$0xff]  ;;  %v4196_v48 = vsel %vm785_vm1, %v13083_v57, -inf }
 0x352   : > { %10350 = vmatpush.xpose.msk.msra.mxu0 %vm785_vm1, %v3983_v34  ;;  %17380 = vst [vmem:[#allocation139_spill] sm:$0xff] %v13087_v30  ;;  %v17384_v34 = vld [vmem:[#allocation133_spill] sm:$0xff] }
 0x353   : > { %10307 = vmatmul.msk.f32.vlgmr.msra.gmra.mxu2 %vm785_vm1, %v17381_v38  ;;  %17382 = vst [vmem:[#allocation140_spill] sm:$0xff] %v13093_v18  ;;  %v13106_v38 = vpop.f32.mrf.mxu3 }
 0x354   : > { %10322 = vmatpush.xpose.msk.msra.mxu2 %vm785_vm1, %v12876_v33 }
 0x355   : > { %10351 = vmatmul.msk.f32.vlgmr.msra.gmra.mxu0 %vm785_vm1, %v17386_v32  ;;  %v13121_v32 = vadd.f32 %v12884_v28, %v12682_v55  ;;  %v17392_v28 = vld [vmem:[#allocation85_spill] sm:$0xff] }
 0x356   : > { %10297 = vmatmul.msk.f32.vlgmr.msrb.gmra.mxu1 %vm785_vm1, %v17383_v63  ;;  %10325 = vmatmul.msk.f32.vlgmr.msra.gmra.mxu3 %vm785_vm1, %v17385_v31  ;;  %v4202_v63 = vsel %vm785_vm1, %v13087_v30, -inf  ;;  %v13123_v31 = vpop.f32.mrf.mxu1 }
 0x357   : > { %10312 = vmatpush.xpose.msk.msrb.mxu1 %vm785_vm1, %v17384_v34  ;;  %10340 = vmatpush.xpose.msk.msra.mxu3 %vm785_vm1, %v3853_v40  ;;  %v4087_v33 = vpop.permute.xlu1 %4086  ;;  %v4199_v34 = vsel %vm785_vm1, %v13093_v18, -inf  ;;  %v13117_v40 = vadd.f32 %v12931_v36, %v12682_v55  ;;  %17388 = vst [vmem:[#allocation141_spill] sm:$0xff] %v13121_v32  ;;  %v3957_v36 = vpop.permute.xlu2 %3956 }
 0x358   : > { %4197 = vmax.xlane.f32.xlu2 %v4196_v48  ;;  %10358 = vmatpush.xpose.msk.msrb.mxu0 %vm785_vm1, %v4087_v33  ;;  %v13129_v48 = vadd.f32 %v12908_v37, %v12682_v55  ;;  %v17391_v33 = vld [vmem:[#allocation22_spill] sm:$0xff]  ;;  %v4205_v37 = vsel %vm785_vm1, %v13121_v32, -inf }
 0x359   : > { %4203 = vmax.xlane.f32.xlu1 %v4202_v63  ;;  %4200 = vmax.xlane.f32.xlu0 %v4199_v34  ;;  %17387 = vst [vmem:[#allocation133_spill] sm:$0xff] %v13117_v40  ;;  %v13131_v63 = vpop.f32.mrf.mxu2  ;;  %v17393_v34 = vld [vmem:[#allocation124_spill] sm:$0xff] }
 0x35a   : > { %17390 = vst [vmem:[#allocation142_spill] sm:$0xff] %v13129_v48 }
 0x35b   : > { %10315 = vmatmul.msk.f32.vlgmr.msrb.gmra.mxu2 %vm785_vm1, %v17389_v60  ;;  %v4211_v60 = vsel %vm785_vm1, %v13117_v40, -inf }
 0x35c   : > { %10330 = vmatpush.xpose.msk.msrb.mxu2 %vm785_vm1, %v12862_v50  ;;  %v4208_v50 = vsel %vm785_vm1, %v13129_v48, -inf }
 0x35d   : > { %10359 = vmatmul.msk.f32.vlgmr.msrb.gmra.mxu0 %vm785_vm1, %v17393_v34  ;;  %v13158_v34 = vadd.f32 %v12939_v22, %v12682_v55  ;;  %v17399_v22 = vld [vmem:[#allocation95_spill] sm:$0xff] }
 0x35e   : > { %10305 = vmatmul.msk.f32.vlgmr.msra.gmra.mxu1 %vm785_vm1, %v17391_v33  ;;  %10333 = vmatmul.msk.f32.vlgmr.msrb.gmra.mxu3 %vm785_vm1, %v17392_v28  ;;  %v17396_v28 = vld [vmem:[#allocation57_spill] sm:$0xff]  ;;  %v17398_v33 = vld [vmem:[#allocation50_spill] sm:$0xff] }
 0x35f   : > { %10320 = vmatpush.xpose.msk.msra.mxu1 %vm785_vm1, %v12882_v53  ;;  %10348 = vmatpush.xpose.msk.msrb.mxu3 %vm785_vm1, %v3957_v36  ;;  %v13150_v53 = vpop.f32.mrf.mxu3  ;;  %v13154_v36 = vadd.f32 %v12981_v54, %v12682_v55  ;;  %17395 = vst [vmem:[#allocation144_spill] sm:$0xff] %v13158_v34  ;;  %v4061_v54 = vpop.permute.xlu0 %4060 }
 0x360   : > { %4206 = vmax.xlane.f32.xlu2 %v4205_v37  ;;  %v13164_v37 = vadd.f32 %v12957_v61, %v12682_v55  ;;  %v4214_v61 = vsel %vm785_vm1, %v13158_v34, -inf }
 0x361   : > { %4212 = vmax.xlane.f32.xlu1 %v4211_v60  ;;  %4209 = vmax.xlane.f32.xlu0 %v4208_v50  ;;  %17394 = vst [vmem:[#allocation143_spill] sm:$0xff] %v13154_v36  ;;  %v13170_v60 = vpop.f32.mrf.mxu1  ;;  %v13176_v50 = vpop.f32.mrf.mxu2 }
 0x362   : > { %17397 = vst [vmem:[#allocation145_spill] sm:$0xff] %v13164_v37 }
 0x363   : > { %10323 = vmatmul.msk.f32.vlgmr.msra.gmra.mxu2 %vm785_vm1, %v17396_v28  ;;  %v4220_v28 = vsel %vm785_vm1, %v13154_v36, -inf }
 0x364   : > { %10338 = vmatpush.xpose.msk.msra.mxu2 %vm785_vm1, %v12999_v12  ;;  %v4217_v12 = vsel %vm785_vm1, %v13164_v37, -inf }
 0x366   : > { %10313 = vmatmul.msk.f32.vlgmr.msrb.gmra.mxu1 %vm785_vm1, %v17398_v33  ;;  %10341 = vmatmul.msk.f32.vlgmr.msra.gmra.mxu3 %vm785_vm1, %v17399_v22  ;;  %v13189_v22 = vadd.f32 %v13029_v8, %v12682_v55  ;;  %v17402_v33 = vld [vmem:[#allocation84_spill] sm:$0xff] }
 0x367   : > { %10328 = vmatpush.xpose.msk.msrb.mxu1 %vm785_vm1, %v12918_v29  ;;  %10356 = vmatpush.xpose.msk.msra.mxu3 %vm785_vm1, %v4061_v54  ;;  %v13185_v29 = vpop.f32.mrf.mxu3  ;;  %v13193_v54 = vadd.f32 %v12987_v10, %v12682_v55  ;;  %v17405_v8 = vld [vmem:[#allocation116_spill] sm:$0xff] }
 0x368   : > { %4215 = vmax.xlane.f32.xlu2 %v4214_v61  ;;  %17400 = vst [vmem:[#allocation146_spill] sm:$0xff] %v13189_v22  ;;  %v13199_v61 = vadd.f32 %v13009_v35, %v12682_v55  ;;  %v4229_v35 = vsel %vm785_vm1, %v13189_v22, -inf }
 0x369   : > { %4221 = vmax.xlane.f32.xlu1 %v4220_v28  ;;  %4218 = vmax.xlane.f32.xlu0 %v4217_v12  ;;  %17401 = vst [vmem:[#allocation147_spill] sm:$0xff] %v13193_v54  ;;  %v2133_v10 = vpop.f32.mrf.mxu1  ;;  %v4223_v28 = vsel %vm785_vm1, %v13193_v54, -inf  ;;  %v13213_v12 = vpop.f32.mrf.mxu2 }
 0x36a   : > { %17403 = vst [vmem:[#allocation148_spill] sm:$0xff] %v13199_v61  ;;  %v13301_v22 = vadd.f32 %v2133_v10, %v12682_v55 }
 0x36b   : > { %10331 = vmatmul.msk.f32.vlgmr.msrb.gmra.mxu2 %vm785_vm1, %v17402_v33  ;;  %v4226_v33 = vsel %vm785_vm1, %v13199_v61, -inf }
 0x36c   : > { %10346 = vmatpush.xpose.msk.msrb.mxu2 %vm785_vm1, %v13037_v15  ;;  %v13223_v15 = vadd.f32 %v13035_v20, %v12682_v55  ;;  %17422 = vst [vmem:[#allocation158_spill] sm:$0xff] %v13301_v22 }
 0x36e   : > { %10321 = vmatmul.msk.f32.vlgmr.msra.gmra.mxu1 %vm785_vm1, %v17404_v17  ;;  %10349 = vmatmul.msk.f32.vlgmr.msrb.gmra.mxu3 %vm785_vm1, %v17405_v8  ;;  %17407 = vst [vmem:[#allocation150_spill] sm:$0xff] %v13223_v15  ;;  %v4035_v8 = vpop.permute.xlu2 %4034  ;;  %v17408_v17 = vld [vmem:[#allocation97_spill] sm:$0xff]  ;;  %v4232_v20 = vsel %vm785_vm1, %v13223_v15, -inf }
 0x36f   : > { %10336 = vmatpush.xpose.msk.msra.mxu1 %vm785_vm1, %v12912_v46  ;;  %v13219_v46 = vadd.f32 %v13076_v58, %v12682_v55  ;;  %v17411_v58 = vld [vmem:[#allocation126_spill] sm:$0xff] }
 0x370   : > { %4224 = vmax.xlane.f32.xlu2 %v4223_v28  ;;  %v13229_v28 = vadd.f32 %v13061_v5, %v12682_v55 }
 0x371   : > { %4230 = vmax.xlane.f32.xlu1 %v4229_v35  ;;  %4227 = vmax.xlane.f32.xlu0 %v4226_v33  ;;  %17406 = vst [vmem:[#allocation149_spill] sm:$0xff] %v13219_v46  ;;  %v2185_v33 = vpop.f32.mrf.mxu3  ;;  %v4238_v35 = vsel %vm785_vm1, %v13219_v46, -inf }
 0x372   : > { %17409 = vst [vmem:[#allocation151_spill] sm:$0xff] %v13229_v28  ;;  %v4235_v5 = vsel %vm785_vm1, %v13229_v28, -inf }
 0x373   : > { %10339 = vmatmul.msk.f32.vlgmr.msra.gmra.mxu2 %vm785_vm1, %v17408_v17  ;;  %v2211_v17 = vpop.f32.mrf.mxu1 }
 0x374   : > { %10354 = vmatpush.xpose.msk.msra.mxu2 %vm785_vm1, %v4035_v8  ;;  %v13244_v8 = vpop.f32.mrf.mxu2 }
 0x376   : > { %10329 = vmatmul.msk.f32.vlgmr.msrb.gmra.mxu1 %vm785_vm1, %v17410_v27  ;;  %10357 = vmatmul.msk.f32.vlgmr.msra.gmra.mxu3 %vm785_vm1, %v17411_v58  ;;  %v13252_v58 = vadd.f32 %v13078_v24, %v12682_v55 }
 0x377   : > { %10344 = vmatpush.xpose.msk.msrb.mxu1 %vm785_vm1, %v13041_v51  ;;  %v13248_v51 = vadd.f32 %v13123_v31, %v12682_v55 }
 0x378   : > { %4233 = vmax.xlane.f32.xlu2 %v4232_v20  ;;  %17413 = vst [vmem:[#allocation153_spill] sm:$0xff] %v13252_v58  ;;  %v13260_v20 = vadd.f32 %v13106_v38, %v12682_v55  ;;  %v4241_v24 = vsel %vm785_vm1, %v13252_v58, -inf }
 0x379   : > { %4239 = vmax.xlane.f32.xlu1 %v4238_v35  ;;  %4236 = vmax.xlane.f32.xlu0 %v4235_v5  ;;  %17412 = vst [vmem:[#allocation152_spill] sm:$0xff] %v13248_v51  ;;  %v17416_v35 = vld [vmem:[#allocation96_spill] sm:$0xff]  ;;  %v2263_v5 = vpop.f32.mrf.mxu3  ;;  %v4247_v31 = vsel %vm785_vm1, %v13248_v51, -inf }
 0x37a   : > { %v13254_v27 = vpop.xlane.xlu2 %4113  ;;  %17415 = vst [vmem:[#allocation154_spill] sm:$0xff] %v13260_v20  ;;  %v17421_v51 = vld [vmem:[#allocation108_spill] sm:$0xff] }
 0x37b   : > { %10347 = vmatmul.msk.f32.vlgmr.msrb.gmra.mxu2 %vm785_vm1, %v17414_v49  ;;  %v4244_v49 = vsel %vm785_vm1, %v13260_v20, -inf  ;;  %v2289_v38 = vpop.f32.mrf.mxu1 }
 0x37c   : > { %v2315_v11 = vpop.f32.mrf.mxu2  ;;  %v13352_v54 = vadd.f32 %v2289_v38, %v12682_v55 }
 0x37e   : > { %10337 = vmatmul.msk.f32.vlgmr.msra.gmra.mxu1 %vm785_vm1, %v17416_v35  ;;  %v13274_v35 = vadd.f32 %v13170_v60, %v12682_v55  ;;  %17430 = vst [vmem:[#allocation165_spill] sm:$0xff] %v13352_v54 }
 0x37f   : > { %10352 = vmatpush.xpose.msk.msra.mxu1 %vm785_vm1, %v13072_v4  ;;  %v13278_v4 = vadd.f32 %v13131_v63, %v12682_v55 }
 0x380   : > { %4242 = vmax.xlane.f32.xlu2 %v4241_v24  ;;  %17417 = vst [vmem:[#allocation155_spill] sm:$0xff] %v13274_v35  ;;  %v17419_v24 = vld [vmem:[#allocation125_spill] sm:$0xff]  ;;  %v4256_v20 = vsel %vm785_vm1, %v13274_v35, -inf }
 0x381   : > { %4248 = vmax.xlane.f32.xlu1 %v4247_v31  ;;  %4245 = vmax.xlane.f32.xlu0 %v4244_v49  ;;  %17418 = vst [vmem:[#allocation156_spill] sm:$0xff] %v13278_v4  ;;  %v13288_v31 = vadd.f32 %v13150_v53, %v12682_v55  ;;  %v2341_v60 = vpop.f32.mrf.mxu3  ;;  %v4250_v63 = vsel %vm785_vm1, %v13278_v4, -inf }
 0x382   : > { %v13280_v46 = vpop.xlane.xlu2 %4122 }
 0x383   : > { %v13282_v58 = vpop.xlane.xlu1 %4119  ;;  %10355 = vmatmul.msk.f32.vlgmr.msra.gmra.mxu2 %vm785_vm1, %v17419_v24  ;;  %17420 = vst [vmem:[#allocation157_spill] sm:$0xff] %v13288_v31  ;;  %v13290_v49 = vpop.xlane.xlu0 %4116  ;;  %v4253_v24 = vsel %vm785_vm1, %v13288_v31, -inf }
 0x384   : > { %v2367_v28 = vpop.f32.mrf.mxu1  ;;  %v2393_v53 = vpop.f32.mrf.mxu2 }
 0x385   : > { %v13373_v34 = vadd.f32 %v2367_v28, %v12682_v55 }
 0x386   : > { %10345 = vmatmul.msk.f32.vlgmr.msrb.gmra.mxu1 %vm785_vm1, %v17421_v51  ;;  %v13305_v51 = vadd.f32 %v13176_v50, %v12682_v55  ;;  %v4265_v50 = vsel %vm785_vm1, %v13301_v22, -inf }
 0x387   : > { %17433 = vst [vmem:[#allocation168_spill] sm:$0xff] %v13373_v34 }
 0x388   : > { %4251 = vmax.xlane.f32.xlu2 %v4250_v63  ;;  %17423 = vst [vmem:[#allocation159_spill] sm:$0xff] %v13305_v51  ;;  %v13313_v63 = vadd.f32 %v13185_v29, %v12682_v55  ;;  %v4259_v10 = vsel %vm785_vm1, %v13305_v51, -inf  ;;  %v13326_v29 = vadd.f32 %v2211_v17, %v12682_v55  ;;  %v13335_v51 = vadd.f32 %v2185_v33, %v12682_v55 }
 0x389   : > { %4257 = vmax.xlane.f32.xlu1 %v4256_v20  ;;  %4254 = vmax.xlane.f32.xlu0 %v4253_v24  ;;  %v17425_v20 = vld [vmem:[#allocation115_spill] sm:$0xff]  ;;  %v2419_v24 = vpop.f32.mrf.mxu3  ;;  %v13349_v33 = vadd.f32 %v13244_v8, %v12682_v55  ;;  %v4283_v8 = vsel %vm785_vm1, %v13352_v54, -inf }
 0x38a   : > { %v13307_v15 = vpop.xlane.xlu2 %4125  ;;  %17424 = vst [vmem:[#allocation160_spill] sm:$0xff] %v13313_v63  ;;  %v4262_v31 = vsel %vm785_vm1, %v13313_v63, -inf  ;;  %v4274_v17 = vsel %vm785_vm1, %v13326_v29, -inf }
 0x38b   : > { %v13309_v4 = vpop.xlane.xlu1 %4131  ;;  %v13315_v35 = vpop.xlane.xlu0 %4128  ;;  %17426 = vst [vmem:[#allocation161_spill] sm:$0xff] %v13326_v29 }
 0x38c   : > { %v2445_v61 = vpop.f32.mrf.mxu1  ;;  %17428 = vst [vmem:[#allocation163_spill] sm:$0xff] %v13335_v51  ;;  %v2471_v63 = vpop.f32.mrf.mxu2 }
 0x38d   : > { %17429 = vst [vmem:[#allocation164_spill] sm:$0xff] %v13349_v33  ;;  %v13394_v32 = vadd.f32 %v2445_v61, %v12682_v55 }
 0x38e   : > { %10353 = vmatmul.msk.f32.vlgmr.msra.gmra.mxu1 %vm785_vm1, %v17425_v20  ;;  %v13330_v20 = vadd.f32 %v13213_v12, %v12682_v55  ;;  %v4271_v12 = vsel %vm785_vm1, %v13335_v51, -inf }
 0x38f   : > { %17436 = vst [vmem:[#allocation171_spill] sm:$0xff] %v13394_v32 }
 0x390   : > { %4260 = vmax.xlane.f32.xlu2 %v4259_v10  ;;  %17427 = vst [vmem:[#allocation162_spill] sm:$0xff] %v13330_v20 }
 0x391   : > { %4266 = vmax.xlane.f32.xlu1 %v4265_v50  ;;  %4263 = vmax.xlane.f32.xlu0 %v4262_v31  ;;  %v2497_v50 = vpop.f32.mrf.mxu3  ;;  %v4268_v31 = vsel %vm785_vm1, %v13330_v20, -inf  ;;  %v13357_v20 = vadd.f32 %v2263_v5, %v12682_v55  ;;  %v13370_v5 = vadd.f32 %v2315_v11, %v12682_v55  ;;  %v4292_v11 = vsel %vm785_vm1, %v13373_v34, -inf }
 0x393   : > { %v13332_v36 = vpop.xlane.xlu2 %4134  ;;  %17431 = vst [vmem:[#allocation166_spill] sm:$0xff] %v13357_v20  ;;  %v4280_v38 = vsel %vm785_vm1, %v13357_v20, -inf }
 0x394   : > { %v13337_v22 = vpop.xlane.xlu1 %4140  ;;  %v13339_v10 = vpop.xlane.xlu0 %4137  ;;  %17432 = vst [vmem:[#allocation167_spill] sm:$0xff] %v13370_v5 }
 0x395   : > { %v2523_v37 = vpop.f32.mrf.mxu1  ;;  %v2549_v51 = vpop.f32.mrf.mxu2 }
 0x398   : > { %4269 = vmax.xlane.f32.xlu2 %v4268_v31 }
 0x399   : > { %4275 = vmax.xlane.f32.xlu1 %v4274_v17  ;;  %4272 = vmax.xlane.f32.xlu0 %v4271_v12  ;;  %v4277_v17 = vsel %vm785_vm1, %v13349_v33, -inf  ;;  %v2575_v12 = vpop.f32.mrf.mxu3  ;;  %v13378_v33 = vadd.f32 %v2341_v60, %v12682_v55  ;;  %v13391_v60 = vadd.f32 %v2393_v53, %v12682_v55  ;;  %v4301_v53 = vsel %vm785_vm1, %v13394_v32, -inf }
 0x39b   : > { %v13354_v40 = vpop.xlane.xlu2 %4143  ;;  %17434 = vst [vmem:[#allocation169_spill] sm:$0xff] %v13378_v33  ;;  %v4289_v28 = vsel %vm785_vm1, %v13378_v33, -inf }
 0x39c   : > { %v13359_v29 = vpop.xlane.xlu1 %4149  ;;  %v13361_v31 = vpop.xlane.xlu0 %4146  ;;  %17435 = vst [vmem:[#allocation170_spill] sm:$0xff] %v13391_v60 }
 0x39d   : > { %v2601_v54 = vpop.f32.mrf.mxu1 }
 0x3a0   : > { %4278 = vmax.xlane.f32.xlu2 %v4277_v17 }
 0x3a1   : > { %4284 = vmax.xlane.f32.xlu1 %v4283_v8  ;;  %4281 = vmax.xlane.f32.xlu0 %v4280_v38  ;;  %v4286_v8 = vsel %vm785_vm1, %v13370_v5, -inf  ;;  %v2627_v38 = vpop.f32.mrf.mxu2  ;;  %v2653_v20 = vpop.f32.mrf.mxu3  ;;  %v13399_v5 = vadd.f32 %v2419_v24, %v12682_v55  ;;  %v13412_v24 = vadd.f32 %v2471_v63, %v12682_v55 }
 0x3a3   : > { %v13375_v48 = vpop.xlane.xlu2 %4152  ;;  %17437 = vst [vmem:[#allocation172_spill] sm:$0xff] %v13399_v5  ;;  %v4298_v61 = vsel %vm785_vm1, %v13399_v5, -inf  ;;  %v13436_v5 = vadd.f32 %v2601_v54, %v12682_v55 }
 0x3a4   : > { %v13380_v30 = vpop.xlane.xlu1 %4158  ;;  %v13382_v17 = vpop.xlane.xlu0 %4155  ;;  %17438 = vst [vmem:[#allocation173_spill] sm:$0xff] %v13412_v24 }
 0x3a5   : > { %v2679_v33 = vpop.f32.mrf.mxu1  ;;  %17442 = vst [vmem:[#allocation177_spill] sm:$0xff] %v13436_v5 }
 0x3a8   : > { %4287 = vmax.xlane.f32.xlu2 %v4286_v8 }
 0x3a9   : > { %4293 = vmax.xlane.f32.xlu1 %v4292_v11  ;;  %4290 = vmax.xlane.f32.xlu0 %v4289_v28  ;;  %v4295_v11 = vsel %vm785_vm1, %v13391_v60, -inf  ;;  %v13415_v28 = vadd.f32 %v2523_v37, %v12682_v55  ;;  %v2705_v21 = vpop.f32.mrf.mxu2  ;;  %v13420_v60 = vadd.f32 %v2497_v50, %v12682_v55  ;;  %v2731_v32 = vpop.f32.mrf.mxu3  ;;  %v13433_v50 = vadd.f32 %v2549_v51, %v12682_v55 }
 0x3aa   : > { %v4319_v51 = vsel %vm785_vm1, %v13436_v5, -inf }
 0x3ab   : > { %v13396_v18 = vpop.xlane.xlu2 %4161  ;;  %17439 = vst [vmem:[#allocation174_spill] sm:$0xff] %v13415_v28  ;;  %v4310_v63 = vsel %vm785_vm1, %v13415_v28, -inf  ;;  %v4307_v37 = vsel %vm785_vm1, %v13420_v60, -inf }
 0x3ac   : > { %v13401_v34 = vpop.xlane.xlu1 %4167  ;;  %v13403_v8 = vpop.xlane.xlu0 %4164  ;;  %17440 = vst [vmem:[#allocation175_spill] sm:$0xff] %v13420_v60 }
 0x3ad   : > { %17441 = vst [vmem:[#allocation176_spill] sm:$0xff] %v13433_v50 }
 0x3b0   : > { %4296 = vmax.xlane.f32.xlu2 %v4295_v11 }
 0x3b1   : > { %4302 = vmax.xlane.f32.xlu1 %v4301_v53  ;;  %4299 = vmax.xlane.f32.xlu0 %v4298_v61  ;;  %v4304_v53 = vsel %vm785_vm1, %v13412_v24, -inf  ;;  %v2757_v61 = vpop.f32.mrf.mxu1  ;;  %v13441_v24 = vadd.f32 %v2575_v12, %v12682_v55  ;;  %v2783_v28 = vpop.f32.mrf.mxu2  ;;  %v13454_v12 = vadd.f32 %v2627_v38, %v12682_v55 }
 0x3b2   : > { %v2809_v60 = vpop.f32.mrf.mxu3 }
 0x3b3   : > { %v13417_v57 = vpop.xlane.xlu2 %4170  ;;  %17443 = vst [vmem:[#allocation178_spill] sm:$0xff] %v13441_v24  ;;  %v4316_v54 = vsel %vm785_vm1, %v13441_v24, -inf  ;;  %v13478_v24 = vadd.f32 %v2757_v61, %v12682_v55 }
 0x3b4   : > { %v13422_v7 = vpop.xlane.xlu1 %4176  ;;  %v13424_v11 = vpop.xlane.xlu0 %4173  ;;  %17446 = vst [vmem:[#allocation181_spill] sm:$0xff] %v13454_v12 }
 0x3b5   : > { %17452 = vst [vmem:[#allocation187_spill] sm:$0xff] %v13478_v24 }
 0x3b8   : > { %4305 = vmax.xlane.f32.xlu2 %v4304_v53 }
 0x3b9   : > { %4311 = vmax.xlane.f32.xlu1 %v4310_v63  ;;  %4308 = vmax.xlane.f32.xlu0 %v4307_v37  ;;  %v4313_v63 = vsel %vm785_vm1, %v13433_v50, -inf  ;;  %v13457_v37 = vadd.f32 %v2679_v33, %v12682_v55  ;;  %v13462_v50 = vadd.f32 %v2653_v20, %v12682_v55  ;;  %v2861_v5 = vpop.f32.mrf.mxu2  ;;  %v13475_v20 = vadd.f32 %v2705_v21, %v12682_v55 }
 0x3ba   : > { %v4337_v21 = vsel %vm785_vm1, %v13478_v24, -inf }
 0x3bb   : > { %v13438_v14 = vpop.xlane.xlu2 %4179  ;;  %17447 = vst [vmem:[#allocation182_spill] sm:$0xff] %v13457_v37  ;;  %v4328_v38 = vsel %vm785_vm1, %v13457_v37, -inf  ;;  %v4325_v33 = vsel %vm785_vm1, %v13462_v50, -inf }
 0x3bc   : > { %v13443_v13 = vpop.xlane.xlu1 %4185  ;;  %v13445_v53 = vpop.xlane.xlu0 %4182  ;;  %17448 = vst [vmem:[#allocation183_spill] sm:$0xff] %v13462_v50 }
 0x3bd   : > { %17444 = vst [vmem:[#allocation179_spill] sm:$0xff] %v13443_v13  ;;  %v2835_v13 = vpop.f32.mrf.mxu1 }
 0x3be   : > { %17445 = vst [vmem:[#allocation180_spill] sm:$0xff] %v13445_v53 }
 0x3bf   : > { %17451 = vst [vmem:[#allocation186_spill] sm:$0xff] %v13475_v20 }
 0x3c0   : > { %4314 = vmax.xlane.f32.xlu2 %v4313_v63 }
 0x3c1   : > { %4320 = vmax.xlane.f32.xlu1 %v4319_v51  ;;  %4317 = vmax.xlane.f32.xlu0 %v4316_v54  ;;  %v4322_v51 = vsel %vm785_vm1, %v13454_v12, -inf  ;;  %v2887_v54 = vpop.f32.mrf.mxu3  ;;  %v13483_v12 = vadd.f32 %v2731_v32, %v12682_v55  ;;  %v13496_v32 = vadd.f32 %v2783_v28, %v12682_v55 }
 0x3c3   : > { %v13459_v16 = vpop.xlane.xlu2 %4188  ;;  %17453 = vst [vmem:[#allocation188_spill] sm:$0xff] %v13483_v12  ;;  %v4334_v61 = vsel %vm785_vm1, %v13483_v12, -inf }
 0x3c4   : > { %v13464_v53 = vpop.xlane.xlu1 %4194  ;;  %v13466_v63 = vpop.xlane.xlu0 %4191  ;;  %17456 = vst [vmem:[#allocation191_spill] sm:$0xff] %v13496_v32 }
 0x3c5   : > { %17449 = vst [vmem:[#allocation184_spill] sm:$0xff] %v13464_v53  ;;  %v2913_v37 = vpop.f32.mrf.mxu1 }
 0x3c6   : > { %17450 = vst [vmem:[#allocation185_spill] sm:$0xff] %v13466_v63 }
 0x3c8   : > { %4323 = vmax.xlane.f32.xlu2 %v4322_v51 }
 0x3c9   : > { %4329 = vmax.xlane.f32.xlu1 %v4328_v38  ;;  %4326 = vmax.xlane.f32.xlu0 %v4325_v33  ;;  %v4331_v38 = vsel %vm785_vm1, %v13475_v20, -inf  ;;  %v2939_v33 = vpop.f32.mrf.mxu2  ;;  %v2965_v50 = vpop.f32.mrf.mxu3  ;;  %v13504_v20 = vadd.f32 %v2809_v60, %v12682_v55  ;;  %v13517_v60 = vadd.f32 %v2861_v5, %v12682_v55 }
 0x3cb   : > { %v13480_v53 = vpop.xlane.xlu2 %4197  ;;  %17459 = vst [vmem:[#allocation194_spill] sm:$0xff] %v13504_v20 }
 0x3cc   : > { %v13485_v63 = vpop.xlane.xlu1 %4203  ;;  %v13487_v51 = vpop.xlane.xlu0 %4200  ;;  %17462 = vst [vmem:[#allocation197_spill] sm:$0xff] %v13517_v60 }
 0x3cd   : > { %17454 = vst [vmem:[#allocation189_spill] sm:$0xff] %v13485_v63  ;;  %v13499_v63 = vadd.f32 %v2835_v13, %v12682_v55  ;;  %v2991_v12 = vpop.f32.mrf.mxu1  ;;  %v4343_v13 = vsel %vm785_vm1, %v13504_v20, -inf }
 0x3ce   : > { %17455 = vst [vmem:[#allocation190_spill] sm:$0xff] %v13487_v51  ;;  %v13541_v20 = vadd.f32 %v2991_v12, %v12682_v55 }
 0x3cf   : > { %17457 = vst [vmem:[#allocation192_spill] sm:$0xff] %v13499_v63  ;;  %v4346_v28 = vsel %vm785_vm1, %v13499_v63, -inf }
 0x3d0   : > { %4332 = vmax.xlane.f32.xlu2 %v4331_v38  ;;  %17467 = vst [vmem:[#allocation202_spill] sm:$0xff] %v13541_v20 }
 0x3d1   : > { %4338 = vmax.xlane.f32.xlu1 %v4337_v21  ;;  %4335 = vmax.xlane.f32.xlu0 %v4334_v61  ;;  %v4340_v21 = vsel %vm785_vm1, %v13496_v32, -inf  ;;  %v13520_v61 = vadd.f32 %v2913_v37, %v12682_v55  ;;  %v13525_v32 = vadd.f32 %v2887_v54, %v12682_v55  ;;  %v3043_v63 = vpop.f32.mrf.mxu3  ;;  %v13538_v54 = vadd.f32 %v2939_v33, %v12682_v55 }
 0x3d2   : > { %v4364_v33 = vsel %vm785_vm1, %v13541_v20, -inf }
 0x3d3   : > { %v13501_v51 = vpop.xlane.xlu2 %4206  ;;  %17463 = vst [vmem:[#allocation198_spill] sm:$0xff] %v13520_v61  ;;  %v4355_v5 = vsel %vm785_vm1, %v13520_v61, -inf  ;;  %v4352_v37 = vsel %vm785_vm1, %v13525_v32, -inf }
 0x3d4   : > { %17458 = vst [vmem:[#allocation193_spill] sm:$0xff] %v13501_v51  ;;  %v13506_v24 = vpop.xlane.xlu1 %4212  ;;  %v13508_v38 = vpop.xlane.xlu0 %4209 }
 0x3d5   : > { %17460 = vst [vmem:[#allocation195_spill] sm:$0xff] %v13506_v24  ;;  %v3017_v24 = vpop.f32.mrf.mxu2 }
 0x3d6   : > { %17461 = vst [vmem:[#allocation196_spill] sm:$0xff] %v13508_v38 }
 0x3d7   : > { %17464 = vst [vmem:[#allocation199_spill] sm:$0xff] %v13525_v32 }
 0x3d8   : > { %4341 = vmax.xlane.f32.xlu2 %v4340_v21  ;;  %17466 = vst [vmem:[#allocation201_spill] sm:$0xff] %v13538_v54 }
 0x3d9   : > { %4347 = vmax.xlane.f32.xlu1 %v4346_v28  ;;  %4344 = vmax.xlane.f32.xlu0 %v4343_v13  ;;  %v4349_v28 = vsel %vm785_vm1, %v13517_v60, -inf  ;;  %v3069_v13 = vpop.f32.mrf.mxu1  ;;  %v13546_v60 = vadd.f32 %v2965_v50, %v12682_v55  ;;  %v13559_v55 = vld [vmem:[%s12669_s26] sm:$0xff] }
 0x3da   : > { %v13562_v50 = vadd.f32 %v13559_v55, %v3017_v24 }
 0x3db   : > { %v13522_v38 = vpop.xlane.xlu2 %4215  ;;  %17469 = vst [vmem:[#allocation204_spill] sm:$0xff] %v13546_v60  ;;  %v4361_v12 = vsel %vm785_vm1, %v13546_v60, -inf }
 0x3dc   : > { %v13527_v51 = vpop.xlane.xlu1 %4221  ;;  %v13529_v21 = vpop.xlane.xlu0 %4218  ;;  %17472 = vst [vmem:[#allocation207_spill] sm:$0xff] %v13562_v50 }
 0x3dd   : > { %17465 = vst [vmem:[#allocation200_spill] sm:$0xff] %v13527_v51  ;;  %v3095_v32 = vpop.f32.mrf.mxu2 }
 0x3e0   : > { %4350 = vmax.xlane.f32.xlu2 %v4349_v28 }
 0x3e1   : > { %4356 = vmax.xlane.f32.xlu1 %v4355_v5  ;;  %4353 = vmax.xlane.f32.xlu0 %v4352_v37  ;;  %v3121_v5 = vpop.f32.mrf.mxu3  ;;  %v4358_v37 = vsel %vm785_vm1, %v13538_v54, -inf  ;;  %v13570_v54 = vadd.f32 %v13559_v55, %v3043_v63  ;;  %v13583_v63 = vadd.f32 %v13559_v55, %v3095_v32 }
 0x3e3   : > { %v13543_v51 = vpop.xlane.xlu2 %4224  ;;  %17475 = vst [vmem:[#allocation210_spill] sm:$0xff] %v13570_v54 }
 0x3e4   : > { %17468 = vst [vmem:[#allocation203_spill] sm:$0xff] %v13543_v51  ;;  %v13548_v61 = vpop.xlane.xlu1 %4230  ;;  %v13550_v28 = vpop.xlane.xlu0 %4227 }
 0x3e5   : > { %17470 = vst [vmem:[#allocation205_spill] sm:$0xff] %v13548_v61  ;;  %v13565_v61 = vadd.f32 %v13559_v55, %v3069_v13  ;;  %v4370_v13 = vsel %vm785_vm1, %v13570_v54, -inf }
 0x3e6   : > { %17471 = vst [vmem:[#allocation206_spill] sm:$0xff] %v13550_v28  ;;  %v3147_v28 = vpop.f32.mrf.mxu1 }
 0x3e7   : > { %17473 = vst [vmem:[#allocation208_spill] sm:$0xff] %v13565_v61  ;;  %v4373_v24 = vsel %vm785_vm1, %v13565_v61, -inf }
 0x3e8   : > { %4359 = vmax.xlane.f32.xlu2 %v4358_v37  ;;  %17478 = vst [vmem:[#allocation213_spill] sm:$0xff] %v13583_v63 }
 0x3e9   : > { %4365 = vmax.xlane.f32.xlu1 %v4364_v33  ;;  %4362 = vmax.xlane.f32.xlu0 %v4361_v12  ;;  %v3173_v33 = vpop.f32.mrf.mxu2  ;;  %v4367_v12 = vsel %vm785_vm1, %v13562_v50, -inf  ;;  %v3199_v60 = vpop.f32.mrf.mxu3  ;;  %v13591_v50 = vadd.f32 %v13559_v55, %v3121_v5 }
 0x3ea   : > { %v13604_v54 = vadd.f32 %v13559_v55, %v3173_v33 }
 0x3eb   : > { %v13567_v51 = vpop.xlane.xlu2 %4233  ;;  %17480 = vst [vmem:[#allocation215_spill] sm:$0xff] %v13591_v50 }
 0x3ec   : > { %17474 = vst [vmem:[#allocation209_spill] sm:$0xff] %v13567_v51  ;;  %v13572_v37 = vpop.xlane.xlu1 %4239  ;;  %v13574_v20 = vpop.xlane.xlu0 %4236 }
 0x3ed   : > { %17476 = vst [vmem:[#allocation211_spill] sm:$0xff] %v13572_v37  ;;  %v13586_v37 = vadd.f32 %v13559_v55, %v3147_v28  ;;  %v4379_v28 = vsel %vm785_vm1, %v13591_v50, -inf }
 0x3ee   : > { %17477 = vst [vmem:[#allocation212_spill] sm:$0xff] %v13574_v20  ;;  %v3225_v61 = vpop.f32.mrf.mxu1 }
 0x3ef   : > { %17479 = vst [vmem:[#allocation214_spill] sm:$0xff] %v13586_v37  ;;  %v4382_v32 = vsel %vm785_vm1, %v13586_v37, -inf }
 0x3f0   : > { %4368 = vmax.xlane.f32.xlu2 %v4367_v12  ;;  %17483 = vst [vmem:[#allocation218_spill] sm:$0xff] %v13604_v54 }
 0x3f1   : > { %4374 = vmax.xlane.f32.xlu1 %v4373_v24  ;;  %4371 = vmax.xlane.f32.xlu0 %v4370_v13  ;;  %v4376_v24 = vsel %vm785_vm1, %v13583_v63, -inf  ;;  %v3251_v13 = vpop.f32.mrf.mxu2  ;;  %v3277_v5 = vpop.f32.mrf.mxu3  ;;  %v13612_v63 = vadd.f32 %v13559_v55, %v3199_v60 }
 0x3f2   : > { %v13625_v60 = vadd.f32 %v13559_v55, %v3251_v13 }
 0x3f3   : > { %v13588_v20 = vpop.xlane.xlu2 %4242  ;;  %17486 = vst [vmem:[#allocation221_spill] sm:$0xff] %v13612_v63 }
 0x3f4   : > { %v13593_v51 = vpop.xlane.xlu1 %4248  ;;  %v13595_v12 = vpop.xlane.xlu0 %4245  ;;  %17489 = vst [vmem:[#allocation224_spill] sm:$0xff] %v13625_v60 }
 0x3f5   : > { %17481 = vst [vmem:[#allocation216_spill] sm:$0xff] %v13593_v51  ;;  %v13607_v51 = vadd.f32 %v13559_v55, %v3225_v61  ;;  %v4388_v61 = vsel %vm785_vm1, %v13612_v63, -inf }
 0x3f6   : > { %17482 = vst [vmem:[#allocation217_spill] sm:$0xff] %v13595_v12  ;;  %v3303_v33 = vpop.f32.mrf.mxu1 }
 0x3f7   : > { %17484 = vst [vmem:[#allocation219_spill] sm:$0xff] %v13607_v51 }
 0x3f8   : > { %4377 = vmax.xlane.f32.xlu2 %v4376_v24 }
 0x3f9   : > { %4383 = vmax.xlane.f32.xlu1 %v4382_v32  ;;  %4380 = vmax.xlane.f32.xlu0 %v4379_v28  ;;  %v4385_v32 = vsel %vm785_vm1, %v13604_v54, -inf  ;;  %v4391_v28 = vsel %vm785_vm1, %v13607_v51, -inf  ;;  %v3329_v50 = vpop.f32.mrf.mxu2  ;;  %v13633_v54 = vadd.f32 %v13559_v55, %v3277_v5 }
 0x3fa   : > { %v13649_v63 = vadd.f32 %v13559_v55, %v3329_v50 }
 0x3fb   : > { %v13609_v12 = vpop.xlane.xlu2 %4251  ;;  %17492 = vst [vmem:[#allocation227_spill] sm:$0xff] %v13633_v54 }
 0x3fc   : > { %17485 = vst [vmem:[#allocation220_spill] sm:$0xff] %v13609_v12  ;;  %v13614_v37 = vpop.xlane.xlu1 %4257  ;;  %v13616_v24 = vpop.xlane.xlu0 %4254 }
 0x3fd   : > { %17487 = vst [vmem:[#allocation222_spill] sm:$0xff] %v13614_v37  ;;  %v13628_v37 = vadd.f32 %v13559_v55, %v3303_v33  ;;  %v3355_v12 = vpop.f32.mrf.mxu3  ;;  %v4397_v33 = vsel %vm785_vm1, %v13633_v54, -inf }
 0x3fe   : > { %17488 = vst [vmem:[#allocation223_spill] sm:$0xff] %v13616_v24 }
 0x3ff   : > { %17490 = vst [vmem:[#allocation225_spill] sm:$0xff] %v13628_v37  ;;  %v4400_v13 = vsel %vm785_vm1, %v13628_v37, -inf }
 0x400   : > { %4386 = vmax.xlane.f32.xlu2 %v4385_v32  ;;  %17496 = vst [vmem:[#allocation231_spill] sm:$0xff] %v13649_v63 }
 0x401   : > { %4392 = vmax.xlane.f32.xlu1 %v4391_v28  ;;  %4389 = vmax.xlane.f32.xlu0 %v4388_v61  ;;  %v4394_v28 = vsel %vm785_vm1, %v13625_v60, -inf  ;;  %v3381_v61 = vpop.f32.mrf.mxu0  ;;  %v13654_v60 = vadd.f32 %v13559_v55, %v3355_v12 }
 0x402   : > { %v13646_v5 = vadd.f32 %v13559_v55, %v3381_v61 }
 0x403   : > { %v13630_v24 = vpop.xlane.xlu2 %4260  ;;  %17498 = vst [vmem:[#allocation233_spill] sm:$0xff] %v13654_v60  ;;  %v4406_v50 = vsel %vm785_vm1, %v13654_v60, -inf }
 0x404   : > { %17491 = vst [vmem:[#allocation226_spill] sm:$0xff] %v13630_v24  ;;  %v13635_v51 = vpop.xlane.xlu1 %4266  ;;  %v13637_v32 = vpop.xlane.xlu0 %4263  ;;  %v4409_v61 = vsel %vm785_vm1, %v13646_v5, -inf }
 0x405   : > { %17493 = vst [vmem:[#allocation228_spill] sm:$0xff] %v13635_v51  ;;  %v3407_v51 = vpop.f32.mrf.mxu1  ;;  %v3433_v24 = vpop.f32.mrf.mxu2 }
 0x406   : > { %17494 = vst [vmem:[#allocation229_spill] sm:$0xff] %v13637_v32  ;;  %v13670_v54 = vadd.f32 %v13559_v55, %v3407_v51 }
 0x407   : > { %17495 = vst [vmem:[#allocation230_spill] sm:$0xff] %v13646_v5 }
 0x408   : > { %4395 = vmax.xlane.f32.xlu2 %v4394_v28  ;;  %17502 = vst [vmem:[#allocation237_spill] sm:$0xff] %v13670_v54 }
 0x409   : > { %4401 = vmax.xlane.f32.xlu1 %v4400_v13  ;;  %4398 = vmax.xlane.f32.xlu0 %v4397_v33  ;;  %v4403_v13 = vsel %vm785_vm1, %v13649_v63, -inf  ;;  %v3459_v33 = vpop.f32.mrf.mxu3  ;;  %v13675_v63 = vadd.f32 %v13559_v55, %v3433_v24 }
 0x40a   : > { %v13667_v12 = vadd.f32 %v13559_v55, %v3459_v33 }
 0x40b   : > { %v13651_v32 = vpop.xlane.xlu2 %4269  ;;  %17504 = vst [vmem:[#allocation239_spill] sm:$0xff] %v13675_v63  ;;  %v4415_v51 = vsel %vm785_vm1, %v13675_v63, -inf }
 0x40c   : > { %17497 = vst [vmem:[#allocation232_spill] sm:$0xff] %v13651_v32  ;;  %v13656_v37 = vpop.xlane.xlu1 %4275  ;;  %v13658_v28 = vpop.xlane.xlu0 %4272  ;;  %v4418_v33 = vsel %vm785_vm1, %v13667_v12, -inf }
 0x40d   : > { %17499 = vst [vmem:[#allocation234_spill] sm:$0xff] %v13656_v37  ;;  %v3511_v32 = vpop.f32.mrf.mxu1 }
 0x40e   : > { %17500 = vst [vmem:[#allocation235_spill] sm:$0xff] %v13658_v28 }
 0x40f   : > { %17501 = vst [vmem:[#allocation236_spill] sm:$0xff] %v13667_v12 }
 0x410   : > { %4404 = vmax.xlane.f32.xlu2 %v4403_v13  ;;  %v3485_v13 = vpop.f32.mrf.mxu0 }
 0x411   : > { %4410 = vmax.xlane.f32.xlu1 %v4409_v61  ;;  %4407 = vmax.xlane.f32.xlu0 %v4406_v50  ;;  %v4412_v61 = vsel %vm785_vm1, %v13670_v54, -inf  ;;  %v3537_v50 = vpop.f32.mrf.mxu2  ;;  %v13688_v24 = vadd.f32 %v13559_v55, %v3485_v13  ;;  %v3563_v60 = vpop.f32.mrf.mxu3  ;;  %v13696_v54 = vadd.f32 %v13559_v55, %v3511_v32 }
 0x412   : > { %v13709_v32 = vadd.f32 %v13559_v55, %v3563_v60 }
 0x413   : > { %v13672_v37 = vpop.xlane.xlu2 %4278  ;;  %17507 = vst [vmem:[#allocation242_spill] sm:$0xff] %v13688_v24 }
 0x414   : > { %17503 = vst [vmem:[#allocation238_spill] sm:$0xff] %v13672_v37  ;;  %v13677_v28 = vpop.xlane.xlu1 %4284  ;;  %v13679_v5 = vpop.xlane.xlu0 %4281 }
 0x415   : > { %17505 = vst [vmem:[#allocation240_spill] sm:$0xff] %v13677_v28  ;;  %v13691_v28 = vadd.f32 %v13559_v55, %v3537_v50  ;;  %v3615_v63 = vpop.f32.mrf.mxu1  ;;  %v4424_v50 = vsel %vm785_vm1, %v13696_v54, -inf }
 0x416   : > { %17506 = vst [vmem:[#allocation241_spill] sm:$0xff] %v13679_v5 }
 0x417   : > { %17508 = vst [vmem:[#allocation243_spill] sm:$0xff] %v13691_v28  ;;  %v4427_v13 = vsel %vm785_vm1, %v13691_v28, -inf }
 0x418   : > { %4413 = vmax.xlane.f32.xlu2 %v4412_v61  ;;  %17510 = vst [vmem:[#allocation245_spill] sm:$0xff] %v13696_v54 }
 0x419   : > { %4419 = vmax.xlane.f32.xlu1 %v4418_v33  ;;  %4416 = vmax.xlane.f32.xlu0 %v4415_v51  ;;  %v4421_v33 = vsel %vm785_vm1, %v13688_v24, -inf  ;;  %v3589_v51 = vpop.f32.mrf.mxu0  ;;  %17513 = vst [vmem:[#allocation248_spill] sm:$0xff] %v13709_v32  ;;  %v3667_v37 = vpop.f32.mrf.mxu3 }
 0x41a   : > { %v13717_v24 = vadd.f32 %v13559_v55, %v3589_v51 }
 0x41b   : > { %v13693_v5 = vpop.xlane.xlu2 %4287 }
 0x41c   : > { %17509 = vst [vmem:[#allocation244_spill] sm:$0xff] %v13693_v5  ;;  %v13698_v12 = vpop.xlane.xlu1 %4293  ;;  %v13700_v61 = vpop.xlane.xlu0 %4290 }
 0x41d   : > { %17511 = vst [vmem:[#allocation246_spill] sm:$0xff] %v13698_v12  ;;  %v3641_v12 = vpop.f32.mrf.mxu2 }
 0x41e   : > { %17512 = vst [vmem:[#allocation247_spill] sm:$0xff] %v13700_v61  ;;  %v13712_v61 = vadd.f32 %v13559_v55, %v3615_v63  ;;  %v4433_v63 = vsel %vm785_vm1, %v13717_v24, -inf  ;;  %v13733_v54 = vadd.f32 %v13559_v55, %v3641_v12 }
 0x41f   : > { %17516 = vst [vmem:[#allocation251_spill] sm:$0xff] %v13717_v24 }
 0x420   : > { %4422 = vmax.xlane.f32.xlu2 %v4421_v33  ;;  %17514 = vst [vmem:[#allocation249_spill] sm:$0xff] %v13712_v61  ;;  %v4436_v60 = vsel %vm785_vm1, %v13712_v61, -inf }
 0x421   : > { %4428 = vmax.xlane.f32.xlu1 %v4427_v13  ;;  %4425 = vmax.xlane.f32.xlu0 %v4424_v50  ;;  %v4430_v13 = vsel %vm785_vm1, %v13709_v32, -inf  ;;  %v3693_v50 = vpop.f32.mrf.mxu0  ;;  %17520 = vst [vmem:[#allocation255_spill] sm:$0xff] %v13733_v54  ;;  %v13738_v32 = vadd.f32 %v13559_v55, %v3667_v37 }
 0x422   : > { %v13730_v51 = vadd.f32 %v13559_v55, %v3693_v50 }
 0x423   : > { %v13714_v5 = vpop.xlane.xlu2 %4296  ;;  %17522 = vst [vmem:[#allocation257_spill] sm:$0xff] %v13738_v32  ;;  %v4442_v12 = vsel %vm785_vm1, %v13738_v32, -inf }
 0x424   : > { %17515 = vst [vmem:[#allocation250_spill] sm:$0xff] %v13714_v5  ;;  %v13719_v28 = vpop.xlane.xlu1 %4302  ;;  %v13721_v33 = vpop.xlane.xlu0 %4299  ;;  %v4445_v50 = vsel %vm785_vm1, %v13730_v51, -inf }
 0x425   : > { %17517 = vst [vmem:[#allocation252_spill] sm:$0xff] %v13719_v28  ;;  %v3719_v28 = vpop.f32.mrf.mxu1  ;;  %v3745_v5 = vpop.f32.mrf.mxu2 }
 0x426   : > { %17518 = vst [vmem:[#allocation253_spill] sm:$0xff] %v13721_v33  ;;  %v13754_v24 = vadd.f32 %v13559_v55, %v3719_v28 }
 0x427   : > { %17519 = vst [vmem:[#allocation254_spill] sm:$0xff] %v13730_v51 }
 0x428   : > { %4431 = vmax.xlane.f32.xlu2 %v4430_v13  ;;  %17526 = vst [vmem:[#allocation261_spill] sm:$0xff] %v13754_v24 }
 0x429   : > { %4437 = vmax.xlane.f32.xlu1 %v4436_v60  ;;  %4434 = vmax.xlane.f32.xlu0 %v4433_v63  ;;  %v4439_v60 = vsel %vm785_vm1, %v13733_v54, -inf  ;;  %v3771_v63 = vpop.f32.mrf.mxu3  ;;  %v13759_v54 = vadd.f32 %v13559_v55, %v3745_v5 }
 0x42a   : > { %v13751_v37 = vadd.f32 %v13559_v55, %v3771_v63 }
 0x42b   : > { %v13735_v33 = vpop.xlane.xlu2 %4305  ;;  %17528 = vst [vmem:[#allocation263_spill] sm:$0xff] %v13759_v54  ;;  %v4451_v28 = vsel %vm785_vm1, %v13759_v54, -inf }
 0x42c   : > { %17521 = vst [vmem:[#allocation256_spill] sm:$0xff] %v13735_v33  ;;  %v13740_v61 = vpop.xlane.xlu1 %4311  ;;  %v13742_v13 = vpop.xlane.xlu0 %4308  ;;  %v4454_v63 = vsel %vm785_vm1, %v13751_v37, -inf }
 0x42d   : > { %17523 = vst [vmem:[#allocation258_spill] sm:$0xff] %v13740_v61  ;;  %v3823_v33 = vpop.f32.mrf.mxu1 }
 0x42e   : > { %17524 = vst [vmem:[#allocation259_spill] sm:$0xff] %v13742_v13 }
 0x42f   : > { %17525 = vst [vmem:[#allocation260_spill] sm:$0xff] %v13751_v37 }
 0x430   : > { %4440 = vmax.xlane.f32.xlu2 %v4439_v60  ;;  %v3797_v60 = vpop.f32.mrf.mxu0 }
 0x431   : > { %4446 = vmax.xlane.f32.xlu1 %v4445_v50  ;;  %4443 = vmax.xlane.f32.xlu0 %v4442_v12  ;;  %v4448_v50 = vsel %vm785_vm1, %v13754_v24, -inf  ;;  %v3849_v12 = vpop.f32.mrf.mxu2  ;;  %v13772_v5 = vadd.f32 %v13559_v55, %v3797_v60  ;;  %v3875_v32 = vpop.f32.mrf.mxu3  ;;  %v13780_v24 = vadd.f32 %v13559_v55, %v3823_v33 }
 0x432   : > { %v13793_v33 = vadd.f32 %v13559_v55, %v3875_v32 }
 0x433   : > { %v13756_v61 = vpop.xlane.xlu2 %4314  ;;  %17531 = vst [vmem:[#allocation266_spill] sm:$0xff] %v13772_v5 }
 0x434   : > { %17527 = vst [vmem:[#allocation262_spill] sm:$0xff] %v13756_v61  ;;  %v13761_v13 = vpop.xlane.xlu1 %4320  ;;  %v13763_v51 = vpop.xlane.xlu0 %4317 }
 0x435   : > { %17529 = vst [vmem:[#allocation264_spill] sm:$0xff] %v13761_v13  ;;  %v13775_v13 = vadd.f32 %v13559_v55, %v3849_v12  ;;  %v3927_v54 = vpop.f32.mrf.mxu1  ;;  %v4460_v12 = vsel %vm785_vm1, %v13780_v24, -inf }
 0x436   : > { %17530 = vst [vmem:[#allocation265_spill] sm:$0xff] %v13763_v51 }
 0x437   : > { %17532 = vst [vmem:[#allocation267_spill] sm:$0xff] %v13775_v13  ;;  %v4463_v60 = vsel %vm785_vm1, %v13775_v13, -inf }
 0x438   : > { %4449 = vmax.xlane.f32.xlu2 %v4448_v50  ;;  %17534 = vst [vmem:[#allocation269_spill] sm:$0xff] %v13780_v24 }
 0x439   : > { %4455 = vmax.xlane.f32.xlu1 %v4454_v63  ;;  %4452 = vmax.xlane.f32.xlu0 %v4451_v28  ;;  %v4457_v63 = vsel %vm785_vm1, %v13772_v5, -inf  ;;  %v3901_v28 = vpop.f32.mrf.mxu0  ;;  %17537 = vst [vmem:[#allocation272_spill] sm:$0xff] %v13793_v33  ;;  %v3953_v61 = vpop.f32.mrf.mxu2 }
 0x43a   : > { %v13801_v5 = vadd.f32 %v13559_v55, %v3901_v28  ;;  %v13817_v24 = vadd.f32 %v13559_v55, %v3953_v61 }
 0x43b   : > { %v13777_v51 = vpop.xlane.xlu2 %4323 }
 0x43c   : > { %17533 = vst [vmem:[#allocation268_spill] sm:$0xff] %v13777_v51  ;;  %v13782_v37 = vpop.xlane.xlu1 %4329  ;;  %v13784_v50 = vpop.xlane.xlu0 %4326 }
 0x43d   : > { %17535 = vst [vmem:[#allocation270_spill] sm:$0xff] %v13782_v37  ;;  %v13796_v37 = vadd.f32 %v13559_v55, %v3927_v54  ;;  %v4469_v54 = vsel %vm785_vm1, %v13801_v5, -inf }
 0x43e   : > { %17536 = vst [vmem:[#allocation271_spill] sm:$0xff] %v13784_v50 }
 0x43f   : > { %17538 = vst [vmem:[#allocation273_spill] sm:$0xff] %v13796_v37  ;;  %v4472_v32 = vsel %vm785_vm1, %v13796_v37, -inf }
 0x440   : > { %4458 = vmax.xlane.f32.xlu2 %v4457_v63  ;;  %17539 = vst [vmem:[#allocation274_spill] sm:$0xff] %v13801_v5  ;;  %v3979_v63 = vpop.f32.mrf.mxu3 }
 0x441   : > { %4464 = vmax.xlane.f32.xlu1 %v4463_v60  ;;  %4461 = vmax.xlane.f32.xlu0 %v4460_v12  ;;  %v4466_v60 = vsel %vm785_vm1, %v13793_v33, -inf  ;;  %v4005_v12 = vpop.f32.mrf.mxu0  ;;  %17543 = vst [vmem:[#allocation278_spill] sm:$0xff] %v13817_v24  ;;  %v13822_v33 = vadd.f32 %v13559_v55, %v3979_v63 }
 0x442   : > { %v13814_v28 = vadd.f32 %v13559_v55, %v4005_v12  ;;  %v4475_v12 = vsel %vm785_vm1, %v13817_v24, -inf }
 0x443   : > { %v13798_v50 = vpop.xlane.xlu2 %4332  ;;  %17545 = vst [vmem:[#allocation280_spill] sm:$0xff] %v13822_v33  ;;  %v4478_v63 = vsel %vm785_vm1, %v13822_v33, -inf }
 0x444   : > { %v13803_v13 = vpop.xlane.xlu1 %4338  ;;  %v13805_v51 = vpop.xlane.xlu0 %4335  ;;  %17542 = vst [vmem:[#allocation277_spill] sm:$0xff] %v13814_v28  ;;  %v4481_v61 = vsel %vm785_vm1, %v13814_v28, -inf }
 0x445   : > { %17540 = vst [vmem:[#allocation275_spill] sm:$0xff] %v13803_v13 }
 0x446   : > { %17541 = vst [vmem:[#allocation276_spill] sm:$0xff] %v13805_v51 }
 0x448   : > { %4467 = vmax.xlane.f32.xlu2 %v4466_v60  ;;  %v4497_v60 = vsub.f32 %v12729_v6, %v13290_v49  ;;  %v4083_v5 = vpop.f32.mrf.mxu3 }
 0x449   : > { %4473 = vmax.xlane.f32.xlu1 %v4472_v32  ;;  %4470 = vmax.xlane.f32.xlu0 %v4469_v54  ;;  %v17548_v32 = vld [vmem:[#allocation132_spill] sm:$0xff]  ;;  %v13839_v49 = vadd.f32 %v13559_v55, %v4083_v5  ;;  %v4500_v5 = vsub.f32 %v12758_v41, %v13307_v15 }
 0x44a   : > { %v4496_v54 = vsub.f32 %v17548_v32, %v13254_v27 }
 0x44b   : > { %v13819_v13 = vpop.xlane.xlu2 %4341  ;;  %17549 = vst [vmem:[#allocation132_spill] sm:$0xff] %v13839_v49 }
 0x44c   : > { %17544 = vst [vmem:[#allocation279_spill] sm:$0xff] %v13819_v13  ;;  %v13824_v51 = vpop.xlane.xlu1 %4347  ;;  %v13826_v37 = vpop.xlane.xlu0 %4344  ;;  %v4624_v6 = vmul.f32 1.442695, %v4496_v54 }
 0x44d   : > { %17546 = vst [vmem:[#allocation281_spill] sm:$0xff] %v13824_v51  ;;  %v4031_v13 = vpop.f32.mrf.mxu1  ;;  %v4057_v51 = vpop.f32.mrf.mxu2 }
 0x44e   : > { %17547 = vst [vmem:[#allocation282_spill] sm:$0xff] %v13826_v37  ;;  %v4626_v37 = vmul.f32 1.442695, %v4497_v60  ;;  %v13842_v27 = vadd.f32 %v13559_v55, %v4031_v13  ;;  %v13847_v28 = vadd.f32 %v13559_v55, %v4057_v51  ;;  %v17552_v13 = vld [vmem:[#allocation134_spill] sm:$0xff]  ;;  %v4490_v51 = vsel %vm785_vm1, %v13839_v49, -inf }
 0x44f   : > { %v4499_v60 = vsub.f32 %v17552_v13, %v13280_v46 }
 0x450   : > { %4476 = vmax.xlane.f32.xlu2 %v4475_v12  ;;  %17550 = vst [vmem:[#allocation283_spill] sm:$0xff] %v13842_v27  ;;  %10890 = vpow2.f32 %v4626_v37  ;;  %v4484_v54 = vsel %vm785_vm1, %v13842_v27, -inf  ;;  %v4487_v33 = vsel %vm785_vm1, %v13847_v28, -inf }
 0x451   : > { %4482 = vmax.xlane.f32.xlu1 %v4481_v61  ;;  %4479 = vmax.xlane.f32.xlu0 %v4478_v63  ;;  %17551 = vst [vmem:[#allocation284_spill] sm:$0xff] %v13847_v28  ;;  %v4498_v61 = vsub.f32 %v12720_v42, %v13282_v58  ;;  %10892 = vpow2.f32 %v4624_v6  ;;  %v4109_v63 = vpop.f32.mrf.mxu0  ;;  %v4632_v58 = vmul.f32 1.442695, %v4500_v5  ;;  %v4630_v41 = vmul.f32 1.442695, %v4499_v60 }
 0x452   : > { %v13866_v15 = vadd.f32 %v13559_v55, %v4109_v63  ;;  %v4502_v55 = vsub.f32 %v12762_v3, %v13309_v4 }
 0x453   : > { %v13844_v32 = vpop.xlane.xlu2 %4350  ;;  %v4628_v42 = vmul.f32 1.442695, %v4498_v61  ;;  %v4501_v61 = vsub.f32 %v12768_v23, %v13315_v35 }
 0x454   : > { %v13849_v12 = vpop.xlane.xlu1 %4356  ;;  %v13851_v24 = vpop.xlane.xlu0 %4353  ;;  %17553 = vst [vmem:[#allocation134_spill] sm:$0xff] %v13866_v15  ;;  %v4493_v5 = vsel %vm785_vm1, %v13866_v15, -inf }
 0x455   : > { %10894 = vpow2.f32 %v4628_v42  ;;  %v4634_v23 = vmul.f32 1.442695, %v4501_v61  ;;  %v4506_v61 = vsub.f32 %v12844_v9, %v13354_v40 }
 0x456   : > { %v13870_v37 = vpop.eup %10890  ;;  %10896 = vpow2.f32 %v4632_v58 }
 0x457   : > { %17554 = vst [vmem:[#allocation285_spill] sm:$0xff] %v13870_v37  ;;  %10898 = vpow2.f32 %v4630_v41  ;;  %v4883_v60 = vsel %vm785_vm1, %v13870_v37, 0.0  ;;  %v4504_v41 = vsub.f32 %v12812_v52, %v13339_v10  ;;  %v4644_v10 = vmul.f32 1.442695, %v4506_v61 }
 0x458   : > { %4485 = vmax.xlane.f32.xlu2 %v4484_v54  ;;  %v13876_v54 = vpop.eup %10892  ;;  %10900 = vpow2.f32 %v4634_v23  ;;  %v4508_v61 = vsub.f32 %v12848_v45, %v13359_v29 }
 0x459   : > { %4491 = vmax.xlane.f32.xlu1 %v4490_v51  ;;  %4488 = vmax.xlane.f32.xlu0 %v4487_v33  ;;  %17555 = vst [vmem:[#allocation286_spill] sm:$0xff] %v13876_v54  ;;  %v4503_v33 = vsub.f32 %v12800_v39, %v13332_v36  ;;  %v4880_v51 = vsel %vm785_vm1, %v13876_v54, 0.0  ;;  %v4636_v39 = vmul.f32 1.442695, %v4502_v55  ;;  %v4640_v52 = vmul.f32 1.442695, %v4504_v41 }
 0x45a   : > { %v4509_v41 = vsub.f32 %v12888_v19, %v13375_v48  ;;  %v4648_v19 = vmul.f32 1.442695, %v4508_v61 }
 0x45b   : > { %v13868_v46 = vpop.xlane.xlu2 %4359  ;;  %v4638_v35 = vmul.f32 1.442695, %v4503_v33  ;;  %v13890_v63 = vpop.eup %10894  ;;  %v4505_v33 = vsub.f32 %v12804_v26, %v13337_v22 }
 0x45c   : > { %v13872_v6 = vpop.xlane.xlu1 %4365  ;;  %v13874_v13 = vpop.xlane.xlu0 %4362  ;;  %17556 = vst [vmem:[#allocation287_spill] sm:$0xff] %v13890_v63  ;;  %v4886_v55 = vsel %vm785_vm1, %v13890_v63, 0.0 }
 0x45d   : > { %v13894_v3 = vpop.eup %10896  ;;  %10902 = vpow2.f32 %v4638_v35  ;;  %v4642_v9 = vmul.f32 1.442695, %v4505_v33 }
 0x45e   : > { %17557 = vst [vmem:[#allocation288_spill] sm:$0xff] %v13894_v3  ;;  %v13900_v58 = vpop.eup %10898  ;;  %10904 = vpow2.f32 %v4636_v39  ;;  %v4507_v39 = vsub.f32 %v12854_v47, %v13361_v31  ;;  %v4650_v31 = vmul.f32 1.442695, %v4509_v41  ;;  %v4511_v41 = vsub.f32 %v12892_v44, %v13380_v30 }
 0x45f   : > { %17558 = vst [vmem:[#allocation289_spill] sm:$0xff] %v13900_v58  ;;  %10906 = vpow2.f32 %v4640_v52 }
 0x460   : > { %4494 = vmax.xlane.f32.xlu2 %v4493_v5  ;;  %v4892_v5 = vsel %vm785_vm1, %v13894_v3, 0.0  ;;  %10908 = vpow2.f32 %v4644_v10  ;;  %v4646_v47 = vmul.f32 1.442695, %v4507_v39  ;;  %v4512_v39 = vsub.f32 %v12925_v1, %v13396_v18 }
 0x461   : > { %4884 = vadd.xlane.f32.xlu1 %v4883_v60  ;;  %4881 = vadd.xlane.f32.xlu0 %v4880_v51  ;;  %v4889_v60 = vsel %vm785_vm1, %v13900_v58, 0.0  ;;  %v13914_v51 = vpop.eup %10900  ;;  %10910 = vpow2.f32 %v4642_v9  ;;  %v4510_v9 = vsub.f32 %v12898_v62, %v13382_v17  ;;  %v4654_v1 = vmul.f32 1.442695, %v4511_v41 }
 0x462   : > { %17559 = vst [vmem:[#allocation290_spill] sm:$0xff] %v13914_v51  ;;  %v4895_v33 = vsel %vm785_vm1, %v13914_v51, 0.0  ;;  %10912 = vpow2.f32 %v4646_v47  ;;  %v4656_v17 = vmul.f32 1.442695, %v4512_v39  ;;  %v4514_v39 = vsub.f32 %v12929_v43, %v13401_v34 }
 0x463   : > { %v13892_v36 = vpop.xlane.xlu2 %4368  ;;  %v13918_v26 = vpop.eup %10902  ;;  %10914 = vpow2.f32 %v4650_v31  ;;  %v4652_v62 = vmul.f32 1.442695, %v4510_v9  ;;  %v4515_v9 = vsub.f32 %v12965_v56, %v13417_v57 }
 0x464   : > { %v13896_v4 = vpop.xlane.xlu1 %4374  ;;  %v13898_v42 = vpop.xlane.xlu0 %4371  ;;  %17560 = vst [vmem:[#allocation291_spill] sm:$0xff] %v13918_v26  ;;  %10916 = vpow2.f32 %v4648_v19  ;;  %v4513_v19 = vsub.f32 %v12937_v0, %v13403_v8  ;;  %v4660_v56 = vmul.f32 1.442695, %v4514_v39 }
 0x465   : > { %v13924_v35 = vpop.eup %10904  ;;  %10918 = vpow2.f32 %v4652_v62  ;;  %v4662_v8 = vmul.f32 1.442695, %v4515_v9  ;;  %v4517_v9 = vsub.f32 %v12969_v2, %v13422_v7 }
 0x466   : > { %17561 = vst [vmem:[#allocation292_spill] sm:$0xff] %v13924_v35  ;;  %10920 = vpow2.f32 %v4656_v17  ;;  %v4658_v0 = vmul.f32 1.442695, %v4513_v19  ;;  %v4518_v19 = vsub.f32 %v13003_v25, %v13438_v14 }
 0x467   : > { %10922 = vpow2.f32 %v4654_v1  ;;  %v4516_v1 = vsub.f32 %v12975_v59, %v13424_v11  ;;  %v4666_v14 = vmul.f32 1.442695, %v4517_v9  ;;  %v17577_v9 = vld [vmem:[#allocation179_spill] sm:$0xff] }
 0x468   : > { %4887 = vadd.xlane.f32.xlu2 %v4886_v55  ;;  %v4901_v55 = vsel %vm785_vm1, %v13918_v26, 0.0  ;;  %10924 = vpow2.f32 %v4658_v0  ;;  %v4668_v11 = vmul.f32 1.442695, %v4518_v19 }
 0x469   : > { %4893 = vadd.xlane.f32.xlu1 %v4892_v5  ;;  %4890 = vadd.xlane.f32.xlu0 %v4889_v60  ;;  %v4898_v5 = vsel %vm785_vm1, %v13924_v35, 0.0  ;;  %v13938_v60 = vpop.eup %10906  ;;  %10926 = vpow2.f32 %v4662_v8  ;;  %v4664_v59 = vmul.f32 1.442695, %v4516_v1  ;;  %v17576_v1 = vld [vmem:[#allocation130_spill] sm:$0xff] }
 0x46a   : > { %17562 = vst [vmem:[#allocation293_spill] sm:$0xff] %v13938_v60  ;;  %v13942_v45 = vpop.eup %10908  ;;  %v4904_v61 = vsel %vm785_vm1, %v13938_v60, 0.0  ;;  %10928 = vpow2.f32 %v4660_v56  ;;  %v17574_v56 = vld [vmem:[#allocation180_spill] sm:$0xff]  ;;  %v4521_v19 = vsub.f32 %v17576_v1, %v13459_v16 }
 0x46b   : > { %v13916_v40 = vpop.xlane.xlu2 %4377  ;;  %17563 = vst [vmem:[#allocation294_spill] sm:$0xff] %v13942_v45  ;;  %v13948_v10 = vpop.eup %10910  ;;  %10930 = vpow2.f32 %v4664_v59 }
 0x46c   : > { %v13920_v22 = vpop.xlane.xlu1 %4383  ;;  %v13922_v23 = vpop.xlane.xlu0 %4380  ;;  %17564 = vst [vmem:[#allocation295_spill] sm:$0xff] %v13948_v10  ;;  %10932 = vpow2.f32 %v4668_v11  ;;  %v4674_v11 = vmul.f32 1.442695, %v4521_v19 }
 0x46d   : > { %10934 = vpow2.f32 %v4666_v14 }
 0x470   : > { %4896 = vadd.xlane.f32.xlu2 %v4895_v33  ;;  %v4910_v33 = vsel %vm785_vm1, %v13942_v45, 0.0 }
 0x471   : > { %4902 = vadd.xlane.f32.xlu1 %v4901_v55  ;;  %4899 = vadd.xlane.f32.xlu0 %v4898_v5  ;;  %v4907_v55 = vsel %vm785_vm1, %v13948_v10, 0.0  ;;  %v13962_v5 = vpop.eup %10912 }
 0x472   : > { %17565 = vst [vmem:[#allocation296_spill] sm:$0xff] %v13962_v5  ;;  %v13966_v44 = vpop.eup %10914  ;;  %v4913_v41 = vsel %vm785_vm1, %v13962_v5, 0.0 }
 0x473   : > { %v13940_v48 = vpop.xlane.xlu2 %4386  ;;  %17566 = vst [vmem:[#allocation297_spill] sm:$0xff] %v13966_v44  ;;  %v13972_v31 = vpop.eup %10916 }
 0x474   : > { %v13944_v29 = vpop.xlane.xlu1 %4392  ;;  %v13946_v52 = vpop.xlane.xlu0 %4389  ;;  %17567 = vst [vmem:[#allocation298_spill] sm:$0xff] %v13972_v31 }
 0x478   : > { %4905 = vadd.xlane.f32.xlu2 %v4904_v61  ;;  %v4919_v61 = vsel %vm785_vm1, %v13966_v44, 0.0 }
 0x479   : > { %4911 = vadd.xlane.f32.xlu1 %v4910_v33  ;;  %4908 = vadd.xlane.f32.xlu0 %v4907_v55  ;;  %v4916_v33 = vsel %vm785_vm1, %v13972_v31, 0.0  ;;  %v13986_v55 = vpop.eup %10918 }
 0x47a   : > { %17568 = vst [vmem:[#allocation299_spill] sm:$0xff] %v13986_v55  ;;  %v13990_v43 = vpop.eup %10920  ;;  %v4922_v39 = vsel %vm785_vm1, %v13986_v55, 0.0 }
 0x47b   : > { %v13964_v18 = vpop.xlane.xlu2 %4395  ;;  %17569 = vst [vmem:[#allocation300_spill] sm:$0xff] %v13990_v43  ;;  %v13996_v17 = vpop.eup %10922 }
 0x47c   : > { %v13968_v30 = vpop.xlane.xlu1 %4401  ;;  %v13970_v47 = vpop.xlane.xlu0 %4398  ;;  %17570 = vst [vmem:[#allocation301_spill] sm:$0xff] %v13996_v17 }
 0x480   : > { %4914 = vadd.xlane.f32.xlu2 %v4913_v41  ;;  %v4928_v41 = vsel %vm785_vm1, %v13990_v43, 0.0 }
 0x481   : > { %4920 = vadd.xlane.f32.xlu1 %v4919_v61  ;;  %4917 = vadd.xlane.f32.xlu0 %v4916_v33  ;;  %v4925_v61 = vsel %vm785_vm1, %v13996_v17, 0.0  ;;  %v14010_v33 = vpop.eup %10924 }
 0x482   : > { %17571 = vst [vmem:[#allocation302_spill] sm:$0xff] %v14010_v33  ;;  %v14014_v2 = vpop.eup %10926  ;;  %v4931_v17 = vsel %vm785_vm1, %v14010_v33, 0.0 }
 0x483   : > { %v13988_v57 = vpop.xlane.xlu2 %4404  ;;  %17572 = vst [vmem:[#allocation303_spill] sm:$0xff] %v14014_v2  ;;  %v14020_v8 = vpop.eup %10928  ;;  %v4937_v55 = vsel %vm785_vm1, %v14014_v2, 0.0 }
 0x484   : > { %v13992_v34 = vpop.xlane.xlu1 %4410  ;;  %v13994_v62 = vpop.xlane.xlu0 %4407  ;;  %17573 = vst [vmem:[#allocation304_spill] sm:$0xff] %v14020_v8  ;;  %v4934_v59 = vsel %vm785_vm1, %v14020_v8, 0.0  ;;  %v17583_v8 = vld [vmem:[#allocation137_spill] sm:$0xff] }
 0x488   : > { %4923 = vadd.xlane.f32.xlu2 %v4922_v39  ;;  %v17575_v39 = vld [vmem:[#allocation135_spill] sm:$0xff] }
 0x489   : > { %4929 = vadd.xlane.f32.xlu1 %v4928_v41  ;;  %4926 = vadd.xlane.f32.xlu0 %v4925_v61  ;;  %v4519_v41 = vsub.f32 %v17575_v39, %v17574_v56  ;;  %v17578_v61 = vld [vmem:[#allocation131_spill] sm:$0xff]  ;;  %v14034_v39 = vpop.eup %10930 }
 0x48a   : > { %v4520_v43 = vsub.f32 %v17578_v61, %v17577_v9  ;;  %17579 = vst [vmem:[#allocation180_spill] sm:$0xff] %v14034_v39  ;;  %v14038_v1 = vpop.eup %10932  ;;  %v4940_v31 = vsel %vm785_vm1, %v14034_v39, 0.0  ;;  %v17595_v39 = vld [vmem:[#allocation139_spill] sm:$0xff] }
 0x48b   : > { %v14012_v25 = vpop.xlane.xlu2 %4413  ;;  %v4670_v56 = vmul.f32 1.442695, %v4519_v41  ;;  %17580 = vst [vmem:[#allocation135_spill] sm:$0xff] %v14038_v1  ;;  %v14044_v2 = vpop.eup %10934  ;;  %v17584_v41 = vld [vmem:[#allocation138_spill] sm:$0xff]  ;;  %v4946_v44 = vsel %vm785_vm1, %v14038_v1, 0.0 }
 0x48c   : > { %v14016_v7 = vpop.xlane.xlu1 %4419  ;;  %v14018_v0 = vpop.xlane.xlu0 %4416  ;;  %v4672_v16 = vmul.f32 1.442695, %v4520_v43  ;;  %17581 = vst [vmem:[#allocation130_spill] sm:$0xff] %v14044_v2  ;;  %v4524_v19 = vsub.f32 %v17584_v41, %v13480_v53  ;;  %v17585_v43 = vld [vmem:[#allocation184_spill] sm:$0xff] }
 0x48d   : > { %10936 = vpow2.f32 %v4670_v56  ;;  %v4943_v56 = vsel %vm785_vm1, %v14044_v2, 0.0 }
 0x48e   : > { %10938 = vpow2.f32 %v4674_v11  ;;  %v4680_v11 = vmul.f32 1.442695, %v4524_v19  ;;  %v17593_v19 = vld [vmem:[#allocation141_spill] sm:$0xff] }
 0x48f   : > { %10940 = vpow2.f32 %v4672_v16 }
 0x490   : > { %4932 = vadd.xlane.f32.xlu2 %v4931_v17  ;;  %v17582_v17 = vld [vmem:[#allocation185_spill] sm:$0xff] }
 0x491   : > { %4938 = vadd.xlane.f32.xlu1 %v4937_v55  ;;  %4935 = vadd.xlane.f32.xlu0 %v4934_v59  ;;  %v4522_v55 = vsub.f32 %v17583_v8, %v17582_v17  ;;  %v17586_v59 = vld [vmem:[#allocation136_spill] sm:$0xff] }
 0x492   : > { %v4523_v33 = vsub.f32 %v17586_v59, %v17585_v43 }
 0x493   : > { %v14036_v14 = vpop.xlane.xlu2 %4422  ;;  %v4676_v8 = vmul.f32 1.442695, %v4522_v55  ;;  %v14058_v17 = vpop.eup %10936  ;;  %v17592_v55 = vld [vmem:[#allocation193_spill] sm:$0xff] }
 0x494   : > { %v14040_v9 = vpop.xlane.xlu1 %4428  ;;  %v14042_v61 = vpop.xlane.xlu0 %4425  ;;  %17587 = vst [vmem:[#allocation179_spill] sm:$0xff] %v14058_v17  ;;  %v4678_v53 = vmul.f32 1.442695, %v4523_v33  ;;  %v17594_v33 = vld [vmem:[#allocation189_spill] sm:$0xff]  ;;  %v4949_v45 = vsel %vm785_vm1, %v14058_v17, 0.0 }
 0x495   : > { %v14062_v41 = vpop.eup %10938  ;;  %10942 = vpow2.f32 %v4676_v8  ;;  %v4526_v5 = vsub.f32 %v17595_v39, %v17594_v33 }
 0x496   : > { %17588 = vst [vmem:[#allocation131_spill] sm:$0xff] %v14062_v41  ;;  %v14068_v1 = vpop.eup %10940  ;;  %10944 = vpow2.f32 %v4680_v11  ;;  %v4955_v10 = vsel %vm785_vm1, %v14062_v41, 0.0 }
 0x497   : > { %17589 = vst [vmem:[#allocation185_spill] sm:$0xff] %v14068_v1  ;;  %10946 = vpow2.f32 %v4678_v53  ;;  %v4952_v8 = vsel %vm785_vm1, %v14068_v1, 0.0  ;;  %v4684_v53 = vmul.f32 1.442695, %v4526_v5  ;;  %v17602_v5 = vld [vmem:[#allocation195_spill] sm:$0xff] }
 0x498   : > { %4941 = vadd.xlane.f32.xlu2 %v4940_v31  ;;  %v17591_v31 = vld [vmem:[#allocation140_spill] sm:$0xff] }
 0x499   : > { %4947 = vadd.xlane.f32.xlu1 %v4946_v44  ;;  %4944 = vadd.xlane.f32.xlu0 %v4943_v56  ;;  %v17590_v44 = vld [vmem:[#allocation190_spill] sm:$0xff]  ;;  %v4527_v56 = vsub.f32 %v17593_v19, %v17592_v55 }
 0x49a   : > { %v4525_v2 = vsub.f32 %v17591_v31, %v17590_v44 }
 0x49b   : > { %v14060_v16 = vpop.xlane.xlu2 %4431  ;;  %v4686_v11 = vmul.f32 1.442695, %v4527_v56  ;;  %v14082_v31 = vpop.eup %10942 }
 0x49c   : > { %v14064_v43 = vpop.xlane.xlu1 %4437  ;;  %v14066_v59 = vpop.xlane.xlu0 %4434  ;;  %v4682_v44 = vmul.f32 1.442695, %v4525_v2  ;;  %17596 = vst [vmem:[#allocation137_spill] sm:$0xff] %v14082_v31  ;;  %v17601_v2 = vld [vmem:[#allocation144_spill] sm:$0xff]  ;;  %v4958_v60 = vsel %vm785_vm1, %v14082_v31, 0.0 }
 0x49d   : > { %v14086_v39 = vpop.eup %10944  ;;  %v4530_v56 = vsub.f32 %v17601_v2, %v13522_v38 }
 0x49e   : > { %17597 = vst [vmem:[#allocation138_spill] sm:$0xff] %v14086_v39  ;;  %v14092_v41 = vpop.eup %10946  ;;  %10948 = vpow2.f32 %v4682_v44  ;;  %v4964_v35 = vsel %vm785_vm1, %v14086_v39, 0.0 }
 0x49f   : > { %17598 = vst [vmem:[#allocation184_spill] sm:$0xff] %v14092_v41  ;;  %10950 = vpow2.f32 %v4686_v11  ;;  %v4961_v44 = vsel %vm785_vm1, %v14092_v41, 0.0  ;;  %v4692_v11 = vmul.f32 1.442695, %v4530_v56  ;;  %v17609_v56 = vld [vmem:[#allocation147_spill] sm:$0xff] }
 0x4a0   : > { %4950 = vadd.xlane.f32.xlu2 %v4949_v45  ;;  %v17599_v45 = vld [vmem:[#allocation196_spill] sm:$0xff]  ;;  %10952 = vpow2.f32 %v4684_v53  ;;  %v17611_v41 = vld [vmem:[#allocation143_spill] sm:$0xff] }
 0x4a1   : > { %4956 = vadd.xlane.f32.xlu1 %v4955_v10  ;;  %4953 = vadd.xlane.f32.xlu0 %v4952_v8  ;;  %v17600_v10 = vld [vmem:[#allocation142_spill] sm:$0xff]  ;;  %v17603_v8 = vld [vmem:[#allocation133_spill] sm:$0xff] }
 0x4a2   : > { %v4528_v1 = vsub.f32 %v17600_v10, %v17599_v45  ;;  %v4529_v17 = vsub.f32 %v17603_v8, %v17602_v5 }
 0x4a3   : > { %v14084_v55 = vpop.xlane.xlu2 %4440 }
 0x4a4   : > { %v14088_v19 = vpop.xlane.xlu1 %4446  ;;  %v14090_v33 = vpop.xlane.xlu0 %4443  ;;  %v4688_v45 = vmul.f32 1.442695, %v4528_v1  ;;  %v4690_v38 = vmul.f32 1.442695, %v4529_v17  ;;  %v17608_v1 = vld [vmem:[#allocation203_spill] sm:$0xff]  ;;  %v17610_v17 = vld [vmem:[#allocation200_spill] sm:$0xff] }
 0x4a5   : > { %v14106_v10 = vpop.eup %10948  ;;  %v4532_v31 = vsub.f32 %v17611_v41, %v17610_v17 }
 0x4a6   : > { %17604 = vst [vmem:[#allocation136_spill] sm:$0xff] %v14106_v10  ;;  %v14110_v2 = vpop.eup %10950  ;;  %10954 = vpow2.f32 %v4688_v45  ;;  %v4967_v26 = vsel %vm785_vm1, %v14106_v10, 0.0  ;;  %v17620_v10 = vld [vmem:[#allocation146_spill] sm:$0xff] }
 0x4a7   : > { %17605 = vst [vmem:[#allocation190_spill] sm:$0xff] %v14110_v2  ;;  %v14116_v39 = vpop.eup %10952  ;;  %10956 = vpow2.f32 %v4692_v11  ;;  %v4973_v51 = vsel %vm785_vm1, %v14110_v2, 0.0 }
 0x4a8   : > { %4959 = vadd.xlane.f32.xlu2 %v4958_v60  ;;  %17606 = vst [vmem:[#allocation140_spill] sm:$0xff] %v14116_v39  ;;  %10958 = vpow2.f32 %v4690_v38  ;;  %v4970_v45 = vsel %vm785_vm1, %v14116_v39, 0.0  ;;  %v4696_v38 = vmul.f32 1.442695, %v4532_v31  ;;  %v17619_v31 = vld [vmem:[#allocation205_spill] sm:$0xff] }
 0x4a9   : > { %4965 = vadd.xlane.f32.xlu1 %v4964_v35  ;;  %4962 = vadd.xlane.f32.xlu0 %v4961_v44  ;;  %v17607_v35 = vld [vmem:[#allocation145_spill] sm:$0xff]  ;;  %v4533_v44 = vsub.f32 %v17609_v56, %v17608_v1  ;;  %v4535_v3 = vsub.f32 %v17620_v10, %v17619_v31 }
 0x4aa   : > { %v4531_v60 = vsub.f32 %v17607_v35, %v13529_v21 }
 0x4ab   : > { %v14108_v53 = vpop.xlane.xlu2 %4449  ;;  %v4698_v11 = vmul.f32 1.442695, %v4533_v44  ;;  %v17618_v44 = vld [vmem:[#allocation150_spill] sm:$0xff] }
 0x4ac   : > { %v14112_v5 = vpop.xlane.xlu1 %4455  ;;  %v14114_v8 = vpop.xlane.xlu0 %4452  ;;  %v4694_v21 = vmul.f32 1.442695, %v4531_v60  ;;  %v17617_v60 = vld [vmem:[#allocation209_spill] sm:$0xff] }
 0x4ad   : > { %v14130_v35 = vpop.eup %10954 }
 0x4ae   : > { %17612 = vst [vmem:[#allocation193_spill] sm:$0xff] %v14130_v35  ;;  %v14134_v41 = vpop.eup %10956  ;;  %10960 = vpow2.f32 %v4694_v21  ;;  %v4976_v58 = vsel %vm785_vm1, %v14130_v35, 0.0 }
 0x4af   : > { %17613 = vst [vmem:[#allocation141_spill] sm:$0xff] %v14134_v41  ;;  %v14140_v2 = vpop.eup %10958  ;;  %10962 = vpow2.f32 %v4698_v11  ;;  %v4982_v63 = vsel %vm785_vm1, %v14134_v41, 0.0 }
 0x4b0   : > { %4968 = vadd.xlane.f32.xlu2 %v4967_v26  ;;  %17614 = vst [vmem:[#allocation189_spill] sm:$0xff] %v14140_v2  ;;  %v17616_v26 = vld [vmem:[#allocation148_spill] sm:$0xff]  ;;  %10964 = vpow2.f32 %v4696_v38  ;;  %v4979_v21 = vsel %vm785_vm1, %v14140_v2, 0.0  ;;  %v4702_v38 = vmul.f32 1.442695, %v4535_v3  ;;  %v17627_v3 = vld [vmem:[#allocation211_spill] sm:$0xff] }
 0x4b1   : > { %4974 = vadd.xlane.f32.xlu1 %v4973_v51  ;;  %4971 = vadd.xlane.f32.xlu0 %v4970_v45  ;;  %v17615_v51 = vld [vmem:[#allocation206_spill] sm:$0xff]  ;;  %v4536_v45 = vsub.f32 %v17618_v44, %v17617_v60 }
 0x4b2   : > { %v4534_v39 = vsub.f32 %v17616_v26, %v17615_v51 }
 0x4b3   : > { %v14132_v1 = vpop.xlane.xlu2 %4458  ;;  %v4704_v11 = vmul.f32 1.442695, %v4536_v45 }
 0x4b4   : > { %v14136_v56 = vpop.xlane.xlu1 %4464  ;;  %v14138_v17 = vpop.xlane.xlu0 %4461  ;;  %v4700_v51 = vmul.f32 1.442695, %v4534_v39  ;;  %v17626_v39 = vld [vmem:[#allocation153_spill] sm:$0xff] }
 0x4b5   : > { %v14154_v26 = vpop.eup %10960  ;;  %v4539_v45 = vsub.f32 %v17626_v39, %v13588_v20 }
 0x4b6   : > { %17621 = vst [vmem:[#allocation139_spill] sm:$0xff] %v14154_v26  ;;  %v14158_v10 = vpop.eup %10962  ;;  %10966 = vpow2.f32 %v4700_v51  ;;  %v4985_v54 = vsel %vm785_vm1, %v14154_v26, 0.0  ;;  %v17638_v26 = vld [vmem:[#allocation152_spill] sm:$0xff] }
 0x4b7   : > { %17622 = vst [vmem:[#allocation196_spill] sm:$0xff] %v14158_v10  ;;  %v14164_v41 = vpop.eup %10964  ;;  %10968 = vpow2.f32 %v4704_v11  ;;  %v4991_v37 = vsel %vm785_vm1, %v14158_v10, 0.0  ;;  %v4710_v11 = vmul.f32 1.442695, %v4539_v45  ;;  %v17636_v45 = vld [vmem:[#allocation156_spill] sm:$0xff] }
 0x4b8   : > { %4977 = vadd.xlane.f32.xlu2 %v4976_v58  ;;  %17623 = vst [vmem:[#allocation142_spill] sm:$0xff] %v14164_v41  ;;  %v17625_v58 = vld [vmem:[#allocation151_spill] sm:$0xff]  ;;  %10970 = vpow2.f32 %v4702_v38  ;;  %v4988_v51 = vsel %vm785_vm1, %v14164_v41, 0.0 }
 0x4b9   : > { %4983 = vadd.xlane.f32.xlu1 %v4982_v63  ;;  %4980 = vadd.xlane.f32.xlu0 %v4979_v21  ;;  %v17624_v63 = vld [vmem:[#allocation212_spill] sm:$0xff]  ;;  %v17628_v21 = vld [vmem:[#allocation149_spill] sm:$0xff] }
 0x4ba   : > { %v4537_v2 = vsub.f32 %v17625_v58, %v17624_v63  ;;  %v4538_v35 = vsub.f32 %v17628_v21, %v17627_v3 }
 0x4bb   : > { %v14156_v60 = vpop.xlane.xlu2 %4467 }
 0x4bc   : > { %v14160_v44 = vpop.xlane.xlu1 %4473  ;;  %v14162_v31 = vpop.xlane.xlu0 %4470  ;;  %v4706_v63 = vmul.f32 1.442695, %v4537_v2  ;;  %v4708_v20 = vmul.f32 1.442695, %v4538_v35  ;;  %v17635_v2 = vld [vmem:[#allocation220_spill] sm:$0xff] }
 0x4bd   : > { %v14178_v58 = vpop.eup %10966  ;;  %v17637_v35 = vld [vmem:[#allocation216_spill] sm:$0xff] }
 0x4be   : > { %17629 = vst [vmem:[#allocation144_spill] sm:$0xff] %v14178_v58  ;;  %v14182_v39 = vpop.eup %10968  ;;  %10972 = vpow2.f32 %v4706_v63  ;;  %v4541_v49 = vsub.f32 %v17638_v26, %v17637_v35  ;;  %v4994_v15 = vsel %vm785_vm1, %v14178_v58, 0.0  ;;  %v17649_v58 = vld [vmem:[#allocation155_spill] sm:$0xff] }
 0x4bf   : > { %17630 = vst [vmem:[#allocation195_spill] sm:$0xff] %v14182_v39  ;;  %v14188_v10 = vpop.eup %10970  ;;  %10974 = vpow2.f32 %v4710_v11  ;;  %v5000_v28 = vsel %vm785_vm1, %v14182_v39, 0.0 }
 0x4c0   : > { %4986 = vadd.xlane.f32.xlu2 %v4985_v54  ;;  %17632 = vst [vmem:[#allocation145_spill] sm:$0xff] %v14188_v10  ;;  %v17634_v54 = vld [vmem:[#allocation154_spill] sm:$0xff]  ;;  %10976 = vpow2.f32 %v4708_v20  ;;  %v4997_v63 = vsel %vm785_vm1, %v14188_v10, 0.0  ;;  %v4714_v20 = vmul.f32 1.442695, %v4541_v49 }
 0x4c1   : > { %4992 = vadd.xlane.f32.xlu1 %v4991_v37  ;;  %4989 = vadd.xlane.f32.xlu0 %v4988_v51  ;;  %v17633_v37 = vld [vmem:[#allocation217_spill] sm:$0xff]  ;;  %v4542_v51 = vsub.f32 %v17636_v45, %v17635_v2  ;;  %v17648_v49 = vld [vmem:[#allocation222_spill] sm:$0xff] }
 0x4c2   : > { %v4540_v41 = vsub.f32 %v17634_v54, %v17633_v37 }
 0x4c3   : > { %v14180_v38 = vpop.xlane.xlu2 %4476  ;;  %v4716_v11 = vmul.f32 1.442695, %v4542_v51  ;;  %v17647_v51 = vld [vmem:[#allocation159_spill] sm:$0xff] }
 0x4c4   : > { %v14184_v3 = vpop.xlane.xlu1 %4482  ;;  %v14186_v21 = vpop.xlane.xlu0 %4479  ;;  %v4712_v37 = vmul.f32 1.442695, %v4540_v41  ;;  %v17646_v41 = vld [vmem:[#allocation226_spill] sm:$0xff] }
 0x4c5   : > { %17631 = vst [vmem:[#allocation133_spill] sm:$0xff] %v14184_v3  ;;  %v14202_v54 = vpop.eup %10972  ;;  %v4544_v3 = vsub.f32 %v17649_v58, %v17648_v49 }
 0x4c6   : > { %17639 = vst [vmem:[#allocation203_spill] sm:$0xff] %v14202_v54  ;;  %v14206_v26 = vpop.eup %10974  ;;  %10978 = vpow2.f32 %v4712_v37  ;;  %v5003_v27 = vsel %vm785_vm1, %v14202_v54, 0.0  ;;  %v17661_v54 = vld [vmem:[#allocation158_spill] sm:$0xff] }
 0x4c7   : > { %17640 = vst [vmem:[#allocation147_spill] sm:$0xff] %v14206_v26  ;;  %v14212_v39 = vpop.eup %10976  ;;  %10980 = vpow2.f32 %v4716_v11 }
 0x4c8   : > { %4995 = vadd.xlane.f32.xlu2 %v4994_v15  ;;  %17643 = vst [vmem:[#allocation206_spill] sm:$0xff] %v14212_v39  ;;  %v17645_v15 = vld [vmem:[#allocation157_spill] sm:$0xff]  ;;  %10982 = vpow2.f32 %v4714_v20  ;;  %v5006_v37 = vsel %vm785_vm1, %v14212_v39, 0.0  ;;  %v4720_v20 = vmul.f32 1.442695, %v4544_v3  ;;  %v17660_v3 = vld [vmem:[#allocation228_spill] sm:$0xff] }
 0x4c9   : > { %5001 = vadd.xlane.f32.xlu1 %v5000_v28  ;;  %4998 = vadd.xlane.f32.xlu0 %v4997_v63  ;;  %v17644_v28 = vld [vmem:[#allocation223_spill] sm:$0xff]  ;;  %v4545_v63 = vsub.f32 %v17647_v51, %v17646_v41 }
 0x4ca   : > { %v4543_v10 = vsub.f32 %v17645_v15, %v17644_v28 }
 0x4cb   : > { %v14204_v2 = vpop.xlane.xlu2 %4485  ;;  %v4722_v11 = vmul.f32 1.442695, %v4545_v63  ;;  %v17659_v63 = vld [vmem:[#allocation162_spill] sm:$0xff] }
 0x4cc   : > { %v14208_v45 = vpop.xlane.xlu1 %4491  ;;  %v14210_v35 = vpop.xlane.xlu0 %4488  ;;  %v4718_v28 = vmul.f32 1.442695, %v4543_v10  ;;  %v17658_v10 = vld [vmem:[#allocation232_spill] sm:$0xff] }
 0x4cd   : > { %17641 = vst [vmem:[#allocation200_spill] sm:$0xff] %v14208_v45  ;;  %v5009_v45 = vsel %vm785_vm1, %v14206_v26, 0.0  ;;  %v14226_v15 = vpop.eup %10978 }
 0x4ce   : > { %17642 = vst [vmem:[#allocation143_spill] sm:$0xff] %v14210_v35  ;;  %v14230_v58 = vpop.eup %10980  ;;  %10984 = vpow2.f32 %v4718_v28  ;;  %v5012_v35 = vsel %vm785_vm1, %v14226_v15, 0.0 }
 0x4cf   : > { %17650 = vst [vmem:[#allocation148_spill] sm:$0xff] %v14226_v15  ;;  %v14236_v26 = vpop.eup %10982  ;;  %10986 = vpow2.f32 %v4722_v11  ;;  %v17673_v15 = vld [vmem:[#allocation161_spill] sm:$0xff] }
 0x4d0   : > { %5004 = vadd.xlane.f32.xlu2 %v5003_v27  ;;  %17652 = vst [vmem:[#allocation150_spill] sm:$0xff] %v14230_v58  ;;  %v17656_v27 = vld [vmem:[#allocation229_spill] sm:$0xff]  ;;  %10988 = vpow2.f32 %v4720_v20  ;;  %v5015_v28 = vsel %vm785_vm1, %v14236_v26, 0.0 }
 0x4d1   : > { %5010 = vadd.xlane.f32.xlu1 %v5009_v45  ;;  %5007 = vadd.xlane.f32.xlu0 %v5006_v37  ;;  %17655 = vst [vmem:[#allocation212_spill] sm:$0xff] %v14236_v26  ;;  %v17657_v45 = vld [vmem:[#allocation160_spill] sm:$0xff]  ;;  %v4548_v37 = vsub.f32 %v17659_v63, %v17658_v10 }
 0x4d2   : > { %v4546_v39 = vsub.f32 %v17657_v45, %v17656_v27 }
 0x4d3   : > { %v14228_v41 = vpop.xlane.xlu2 %4494  ;;  %v4728_v11 = vmul.f32 1.442695, %v4548_v37  ;;  %v17671_v37 = vld [vmem:[#allocation164_spill] sm:$0xff] }
 0x4d4   : > { %17651 = vst [vmem:[#allocation209_spill] sm:$0xff] %v14228_v41  ;;  %v14232_v51 = vpop.xlane.xlu1 %4884  ;;  %v14234_v49 = vpop.xlane.xlu0 %4881  ;;  %v4547_v41 = vsub.f32 %v17661_v54, %v17660_v3  ;;  %v4724_v27 = vmul.f32 1.442695, %v4546_v39  ;;  %v17670_v39 = vld [vmem:[#allocation238_spill] sm:$0xff] }
 0x4d5   : > { %17653 = vst [vmem:[#allocation205_spill] sm:$0xff] %v14232_v51  ;;  %v14250_v45 = vpop.eup %10984 }
 0x4d6   : > { %17654 = vst [vmem:[#allocation146_spill] sm:$0xff] %v14234_v49  ;;  %v5018_v49 = vsel %vm785_vm1, %v14230_v58, 0.0  ;;  %v4726_v20 = vmul.f32 1.442695, %v4547_v41  ;;  %v14254_v54 = vpop.eup %10986  ;;  %10990 = vpow2.f32 %v4724_v27  ;;  %v17672_v41 = vld [vmem:[#allocation234_spill] sm:$0xff]  ;;  %v5021_v51 = vsel %vm785_vm1, %v14250_v45, 0.0 }
 0x4d7   : > { %17662 = vst [vmem:[#allocation151_spill] sm:$0xff] %v14250_v45  ;;  %v14260_v58 = vpop.eup %10988  ;;  %10992 = vpow2.f32 %v4728_v11  ;;  %v17685_v45 = vld [vmem:[#allocation165_spill] sm:$0xff] }
 0x4d8   : > { %5013 = vadd.xlane.f32.xlu2 %v5012_v35  ;;  %17664 = vst [vmem:[#allocation211_spill] sm:$0xff] %v14254_v54  ;;  %v17668_v35 = vld [vmem:[#allocation235_spill] sm:$0xff]  ;;  %10994 = vpow2.f32 %v4726_v20  ;;  %v5024_v27 = vsel %vm785_vm1, %v14260_v58, 0.0 }
 0x4d9   : > { %5019 = vadd.xlane.f32.xlu1 %v5018_v49  ;;  %5016 = vadd.xlane.f32.xlu0 %v5015_v28  ;;  %17667 = vst [vmem:[#allocation154_spill] sm:$0xff] %v14260_v58  ;;  %v17669_v49 = vld [vmem:[#allocation163_spill] sm:$0xff]  ;;  %v4551_v28 = vsub.f32 %v17671_v37, %v17670_v39 }
 0x4da   : > { %v4549_v26 = vsub.f32 %v17669_v49, %v17668_v35 }
 0x4db   : > { %v14252_v10 = vpop.xlane.xlu2 %4887  ;;  %v4734_v11 = vmul.f32 1.442695, %v4551_v28  ;;  %v17683_v28 = vld [vmem:[#allocation167_spill] sm:$0xff] }
 0x4dc   : > { %17663 = vst [vmem:[#allocation153_spill] sm:$0xff] %v14252_v10  ;;  %v14256_v63 = vpop.xlane.xlu1 %4893  ;;  %v14258_v3 = vpop.xlane.xlu0 %4890  ;;  %v4550_v10 = vsub.f32 %v17673_v15, %v17672_v41  ;;  %v4730_v35 = vmul.f32 1.442695, %v4549_v26  ;;  %v17682_v26 = vld [vmem:[#allocation244_spill] sm:$0xff] }
 0x4dd   : > { %17665 = vst [vmem:[#allocation149_spill] sm:$0xff] %v14256_v63  ;;  %v5027_v63 = vsel %vm785_vm1, %v14254_v54, 0.0  ;;  %v14274_v49 = vpop.eup %10990 }
 0x4de   : > { %17666 = vst [vmem:[#allocation217_spill] sm:$0xff] %v14258_v3  ;;  %v4732_v20 = vmul.f32 1.442695, %v4550_v10  ;;  %v14278_v15 = vpop.eup %10992  ;;  %10996 = vpow2.f32 %v4730_v35  ;;  %v17684_v10 = vld [vmem:[#allocation240_spill] sm:$0xff]  ;;  %v5030_v3 = vsel %vm785_vm1, %v14274_v49, 0.0 }
 0x4df   : > { %17674 = vst [vmem:[#allocation220_spill] sm:$0xff] %v14274_v49  ;;  %v14284_v54 = vpop.eup %10994  ;;  %10998 = vpow2.f32 %v4734_v11  ;;  %v17697_v49 = vld [vmem:[#allocation168_spill] sm:$0xff] }
 0x4e0   : > { %5022 = vadd.xlane.f32.xlu2 %v5021_v51  ;;  %17676 = vst [vmem:[#allocation216_spill] sm:$0xff] %v14278_v15  ;;  %v17680_v51 = vld [vmem:[#allocation241_spill] sm:$0xff]  ;;  %11000 = vpow2.f32 %v4732_v20  ;;  %v5033_v35 = vsel %vm785_vm1, %v14284_v54, 0.0 }
 0x4e1   : > { %5028 = vadd.xlane.f32.xlu1 %v5027_v63  ;;  %5025 = vadd.xlane.f32.xlu0 %v5024_v27  ;;  %17679 = vst [vmem:[#allocation157_spill] sm:$0xff] %v14284_v54  ;;  %v17681_v63 = vld [vmem:[#allocation166_spill] sm:$0xff]  ;;  %v4554_v27 = vsub.f32 %v17683_v28, %v17682_v26 }
 0x4e2   : > { %v4552_v58 = vsub.f32 %v17681_v63, %v17680_v51 }
 0x4e3   : > { %v14276_v39 = vpop.xlane.xlu2 %4896  ;;  %v4740_v11 = vmul.f32 1.442695, %v4554_v27  ;;  %v17695_v27 = vld [vmem:[#allocation170_spill] sm:$0xff] }
 0x4e4   : > { %17675 = vst [vmem:[#allocation156_spill] sm:$0xff] %v14276_v39  ;;  %v14280_v37 = vpop.xlane.xlu1 %4902  ;;  %v14282_v41 = vpop.xlane.xlu0 %4899  ;;  %v4553_v39 = vsub.f32 %v17685_v45, %v17684_v10  ;;  %v4736_v51 = vmul.f32 1.442695, %v4552_v58  ;;  %v17694_v58 = vld [vmem:[#allocation250_spill] sm:$0xff] }
 0x4e5   : > { %17677 = vst [vmem:[#allocation152_spill] sm:$0xff] %v14280_v37  ;;  %v14298_v63 = vpop.eup %10996 }
 0x4e6   : > { %17678 = vst [vmem:[#allocation223_spill] sm:$0xff] %v14282_v41  ;;  %v5036_v41 = vsel %vm785_vm1, %v14278_v15, 0.0  ;;  %v4738_v20 = vmul.f32 1.442695, %v4553_v39  ;;  %v14302_v45 = vpop.eup %10998  ;;  %11002 = vpow2.f32 %v4736_v51  ;;  %v17696_v39 = vld [vmem:[#allocation246_spill] sm:$0xff]  ;;  %v5039_v37 = vsel %vm785_vm1, %v14298_v63, 0.0 }
 0x4e7   : > { %17686 = vst [vmem:[#allocation226_spill] sm:$0xff] %v14298_v63  ;;  %v14308_v15 = vpop.eup %11000  ;;  %11004 = vpow2.f32 %v4740_v11  ;;  %v17709_v63 = vld [vmem:[#allocation171_spill] sm:$0xff] }
 0x4e8   : > { %5031 = vadd.xlane.f32.xlu2 %v5030_v3  ;;  %17688 = vst [vmem:[#allocation222_spill] sm:$0xff] %v14302_v45  ;;  %v17692_v3 = vld [vmem:[#allocation247_spill] sm:$0xff]  ;;  %11006 = vpow2.f32 %v4738_v20  ;;  %v5042_v51 = vsel %vm785_vm1, %v14308_v15, 0.0 }
 0x4e9   : > { %5037 = vadd.xlane.f32.xlu1 %v5036_v41  ;;  %5034 = vadd.xlane.f32.xlu0 %v5033_v35  ;;  %17691 = vst [vmem:[#allocation160_spill] sm:$0xff] %v14308_v15  ;;  %v17693_v41 = vld [vmem:[#allocation169_spill] sm:$0xff]  ;;  %v4557_v35 = vsub.f32 %v17695_v27, %v17694_v58 }
 0x4ea   : > { %v4555_v54 = vsub.f32 %v17693_v41, %v17692_v3 }
 0x4eb   : > { %v14300_v26 = vpop.xlane.xlu2 %4905  ;;  %v4746_v11 = vmul.f32 1.442695, %v4557_v35  ;;  %v17707_v35 = vld [vmem:[#allocation173_spill] sm:$0xff] }
 0x4ec   : > { %17687 = vst [vmem:[#allocation159_spill] sm:$0xff] %v14300_v26  ;;  %v14304_v28 = vpop.xlane.xlu1 %4911  ;;  %v14306_v10 = vpop.xlane.xlu0 %4908  ;;  %v4556_v26 = vsub.f32 %v17697_v49, %v17696_v39  ;;  %v4742_v3 = vmul.f32 1.442695, %v4555_v54  ;;  %v17706_v54 = vld [vmem:[#allocation256_spill] sm:$0xff] }
 0x4ed   : > { %17689 = vst [vmem:[#allocation155_spill] sm:$0xff] %v14304_v28  ;;  %v5045_v28 = vsel %vm785_vm1, %v14302_v45, 0.0  ;;  %v14322_v41 = vpop.eup %11002 }
 0x4ee   : > { %17690 = vst [vmem:[#allocation229_spill] sm:$0xff] %v14306_v10  ;;  %v4744_v20 = vmul.f32 1.442695, %v4556_v26  ;;  %v14326_v49 = vpop.eup %11004  ;;  %11008 = vpow2.f32 %v4742_v3  ;;  %v17708_v26 = vld [vmem:[#allocation252_spill] sm:$0xff]  ;;  %v5048_v10 = vsel %vm785_vm1, %v14322_v41, 0.0 }
 0x4ef   : > { %17698 = vst [vmem:[#allocation232_spill] sm:$0xff] %v14322_v41  ;;  %v14332_v45 = vpop.eup %11006  ;;  %11010 = vpow2.f32 %v4746_v11  ;;  %v17721_v41 = vld [vmem:[#allocation174_spill] sm:$0xff] }
 0x4f0   : > { %5040 = vadd.xlane.f32.xlu2 %v5039_v37  ;;  %17700 = vst [vmem:[#allocation228_spill] sm:$0xff] %v14326_v49  ;;  %v17704_v37 = vld [vmem:[#allocation253_spill] sm:$0xff]  ;;  %11012 = vpow2.f32 %v4744_v20  ;;  %v5051_v3 = vsel %vm785_vm1, %v14332_v45, 0.0 }
 0x4f1   : > { %5046 = vadd.xlane.f32.xlu1 %v5045_v28  ;;  %5043 = vadd.xlane.f32.xlu0 %v5042_v51  ;;  %17703 = vst [vmem:[#allocation163_spill] sm:$0xff] %v14332_v45  ;;  %v17705_v28 = vld [vmem:[#allocation172_spill] sm:$0xff]  ;;  %v4560_v51 = vsub.f32 %v17707_v35, %v17706_v54 }
 0x4f2   : > { %v4558_v15 = vsub.f32 %v17705_v28, %v17704_v37 }
 0x4f3   : > { %v14324_v58 = vpop.xlane.xlu2 %4914  ;;  %v4752_v11 = vmul.f32 1.442695, %v4560_v51  ;;  %v17719_v51 = vld [vmem:[#allocation176_spill] sm:$0xff] }
 0x4f4   : > { %17699 = vst [vmem:[#allocation162_spill] sm:$0xff] %v14324_v58  ;;  %v14328_v27 = vpop.xlane.xlu1 %4920  ;;  %v14330_v39 = vpop.xlane.xlu0 %4917  ;;  %v4559_v58 = vsub.f32 %v17709_v63, %v17708_v26  ;;  %v4748_v37 = vmul.f32 1.442695, %v4558_v15  ;;  %v17718_v15 = vld [vmem:[#allocation262_spill] sm:$0xff] }
 0x4f5   : > { %17701 = vst [vmem:[#allocation158_spill] sm:$0xff] %v14328_v27  ;;  %v14346_v28 = vpop.eup %11008 }
 0x4f6   : > { %17702 = vst [vmem:[#allocation235_spill] sm:$0xff] %v14330_v39  ;;  %v5054_v39 = vsel %vm785_vm1, %v14326_v49, 0.0  ;;  %v4750_v20 = vmul.f32 1.442695, %v4559_v58  ;;  %v14350_v63 = vpop.eup %11010  ;;  %11014 = vpow2.f32 %v4748_v37  ;;  %v17720_v58 = vld [vmem:[#allocation258_spill] sm:$0xff]  ;;  %v5057_v27 = vsel %vm785_vm1, %v14346_v28, 0.0 }
 0x4f7   : > { %17710 = vst [vmem:[#allocation238_spill] sm:$0xff] %v14346_v28  ;;  %v14356_v49 = vpop.eup %11012  ;;  %11016 = vpow2.f32 %v4752_v11  ;;  %v17732_v28 = vld [vmem:[#allocation177_spill] sm:$0xff] }
 0x4f8   : > { %5049 = vadd.xlane.f32.xlu2 %v5048_v10  ;;  %17712 = vst [vmem:[#allocation234_spill] sm:$0xff] %v14350_v63  ;;  %v17716_v10 = vld [vmem:[#allocation259_spill] sm:$0xff]  ;;  %11018 = vpow2.f32 %v4750_v20  ;;  %v5060_v37 = vsel %vm785_vm1, %v14356_v49, 0.0 }
 0x4f9   : > { %5055 = vadd.xlane.f32.xlu1 %v5054_v39  ;;  %5052 = vadd.xlane.f32.xlu0 %v5051_v3  ;;  %17715 = vst [vmem:[#allocation166_spill] sm:$0xff] %v14356_v49  ;;  %v17717_v39 = vld [vmem:[#allocation175_spill] sm:$0xff]  ;;  %v4563_v3 = vsub.f32 %v17719_v51, %v17718_v15 }
 0x4fa   : > { %v4561_v45 = vsub.f32 %v17717_v39, %v17716_v10 }
 0x4fb   : > { %v14348_v54 = vpop.xlane.xlu2 %4923  ;;  %v4758_v11 = vmul.f32 1.442695, %v4563_v3  ;;  %v17730_v3 = vld [vmem:[#allocation181_spill] sm:$0xff] }
 0x4fc   : > { %17711 = vst [vmem:[#allocation164_spill] sm:$0xff] %v14348_v54  ;;  %v14352_v35 = vpop.xlane.xlu1 %4929  ;;  %v14354_v26 = vpop.xlane.xlu0 %4926  ;;  %v4562_v54 = vsub.f32 %v17721_v41, %v17720_v58  ;;  %v4754_v10 = vmul.f32 1.442695, %v4561_v45  ;;  %v17729_v45 = vld [vmem:[#allocation268_spill] sm:$0xff] }
 0x4fd   : > { %17713 = vst [vmem:[#allocation161_spill] sm:$0xff] %v14352_v35  ;;  %v5063_v35 = vsel %vm785_vm1, %v14350_v63, 0.0  ;;  %v14370_v39 = vpop.eup %11014 }
 0x4fe   : > { %17714 = vst [vmem:[#allocation241_spill] sm:$0xff] %v14354_v26  ;;  %v4756_v20 = vmul.f32 1.442695, %v4562_v54  ;;  %v14374_v41 = vpop.eup %11016  ;;  %11020 = vpow2.f32 %v4754_v10  ;;  %v17731_v54 = vld [vmem:[#allocation264_spill] sm:$0xff]  ;;  %v5066_v26 = vsel %vm785_vm1, %v14370_v39, 0.0 }
 0x4ff   : > { %17722 = vst [vmem:[#allocation244_spill] sm:$0xff] %v14370_v39  ;;  %v14380_v63 = vpop.eup %11018  ;;  %11022 = vpow2.f32 %v4758_v11 }
 0x500   : > { %5058 = vadd.xlane.f32.xlu2 %v5057_v27  ;;  %17724 = vst [vmem:[#allocation240_spill] sm:$0xff] %v14374_v41  ;;  %v17727_v27 = vld [vmem:[#allocation265_spill] sm:$0xff]  ;;  %11024 = vpow2.f32 %v4756_v20  ;;  %v5069_v10 = vsel %vm785_vm1, %v14380_v63, 0.0 }
 0x501   : > { %5064 = vadd.xlane.f32.xlu1 %v5063_v35  ;;  %5061 = vadd.xlane.f32.xlu0 %v5060_v37  ;;  %17726 = vst [vmem:[#allocation247_spill] sm:$0xff] %v14380_v63  ;;  %v17728_v35 = vld [vmem:[#allocation178_spill] sm:$0xff]  ;;  %v4566_v37 = vsub.f32 %v17730_v3, %v17729_v45 }
 0x502   : > { %v4564_v49 = vsub.f32 %v17728_v35, %v17727_v27 }
 0x503   : > { %v14372_v15 = vpop.xlane.xlu2 %4932  ;;  %v4764_v11 = vmul.f32 1.442695, %v4566_v37 }
 0x504   : > { %17723 = vst [vmem:[#allocation167_spill] sm:$0xff] %v14372_v15  ;;  %v14376_v51 = vpop.xlane.xlu1 %4938  ;;  %v14378_v58 = vpop.xlane.xlu0 %4935  ;;  %v4565_v15 = vsub.f32 %v17732_v28, %v17731_v54  ;;  %v4760_v27 = vmul.f32 1.442695, %v4564_v49  ;;  %v17741_v49 = vld [vmem:[#allocation186_spill] sm:$0xff] }
 0x505   : > { %17725 = vst [vmem:[#allocation165_spill] sm:$0xff] %v14378_v58  ;;  %v5072_v58 = vsel %vm785_vm1, %v14374_v41, 0.0  ;;  %v14394_v35 = vpop.eup %11020  ;;  %v4569_v37 = vsub.f32 %v17741_v49, %v13798_v50 }
 0x506   : > { %17733 = vst [vmem:[#allocation169_spill] sm:$0xff] %v14394_v35  ;;  %v4762_v20 = vmul.f32 1.442695, %v4565_v15  ;;  %v14398_v28 = vpop.eup %11022  ;;  %11026 = vpow2.f32 %v4760_v27  ;;  %v17742_v15 = vld [vmem:[#allocation270_spill] sm:$0xff] }
 0x507   : > { %17735 = vst [vmem:[#allocation170_spill] sm:$0xff] %v14398_v28  ;;  %v14404_v41 = vpop.eup %11024  ;;  %11028 = vpow2.f32 %v4764_v11  ;;  %v4770_v11 = vmul.f32 1.442695, %v4569_v37  ;;  %v17752_v37 = vld [vmem:[#allocation191_spill] sm:$0xff] }
 0x508   : > { %5067 = vadd.xlane.f32.xlu2 %v5066_v26  ;;  %17738 = vst [vmem:[#allocation253_spill] sm:$0xff] %v14404_v41  ;;  %v17739_v26 = vld [vmem:[#allocation271_spill] sm:$0xff]  ;;  %11030 = vpow2.f32 %v4762_v20  ;;  %v5078_v27 = vsel %vm785_vm1, %v14404_v41, 0.0 }
 0x509   : > { %5073 = vadd.xlane.f32.xlu1 %v5072_v58  ;;  %5070 = vadd.xlane.f32.xlu0 %v5069_v10  ;;  %v17740_v58 = vld [vmem:[#allocation183_spill] sm:$0xff]  ;;  %v17743_v10 = vld [vmem:[#allocation182_spill] sm:$0xff] }
 0x50a   : > { %v4567_v63 = vsub.f32 %v17740_v58, %v17739_v26  ;;  %v4568_v39 = vsub.f32 %v17743_v10, %v17742_v15 }
 0x50b   : > { %v14396_v45 = vpop.xlane.xlu2 %4941 }
 0x50c   : > { %17734 = vst [vmem:[#allocation250_spill] sm:$0xff] %v14396_v45  ;;  %v14400_v3 = vpop.xlane.xlu1 %4947  ;;  %v14402_v54 = vpop.xlane.xlu0 %4944  ;;  %v5075_v45 = vsel %vm785_vm1, %v14394_v35, 0.0  ;;  %v4766_v26 = vmul.f32 1.442695, %v4567_v63  ;;  %v4768_v50 = vmul.f32 1.442695, %v4568_v39 }
 0x50d   : > { %17736 = vst [vmem:[#allocation246_spill] sm:$0xff] %v14400_v3  ;;  %v5081_v3 = vsel %vm785_vm1, %v14398_v28, 0.0  ;;  %v14418_v58 = vpop.eup %11026  ;;  %v17751_v63 = vld [vmem:[#allocation279_spill] sm:$0xff] }
 0x50e   : > { %17737 = vst [vmem:[#allocation168_spill] sm:$0xff] %v14402_v54  ;;  %v14422_v49 = vpop.eup %11028  ;;  %11032 = vpow2.f32 %v4766_v26  ;;  %v17753_v39 = vld [vmem:[#allocation275_spill] sm:$0xff]  ;;  %v5084_v54 = vsel %vm785_vm1, %v14418_v58, 0.0 }
 0x50f   : > { %17744 = vst [vmem:[#allocation172_spill] sm:$0xff] %v14418_v58  ;;  %v14428_v28 = vpop.eup %11030  ;;  %11034 = vpow2.f32 %v4770_v11  ;;  %v17754_v35 = vld [vmem:[#allocation187_spill] sm:$0xff] }
 0x510   : > { %5076 = vadd.xlane.f32.xlu2 %v5075_v45  ;;  %17746 = vst [vmem:[#allocation173_spill] sm:$0xff] %v14422_v49  ;;  %v17749_v45 = vld [vmem:[#allocation276_spill] sm:$0xff]  ;;  %11036 = vpow2.f32 %v4768_v50  ;;  %v5087_v26 = vsel %vm785_vm1, %v14428_v28, 0.0 }
 0x511   : > { %5082 = vadd.xlane.f32.xlu1 %v5081_v3  ;;  %5079 = vadd.xlane.f32.xlu0 %v5078_v27  ;;  %17748 = vst [vmem:[#allocation171_spill] sm:$0xff] %v14428_v28  ;;  %v17750_v3 = vld [vmem:[#allocation188_spill] sm:$0xff]  ;;  %v4572_v27 = vsub.f32 %v17752_v37, %v17751_v63 }
 0x512   : > { %v4570_v41 = vsub.f32 %v17750_v3, %v17749_v45 }
 0x513   : > { %v14420_v20 = vpop.xlane.xlu2 %4950  ;;  %v4776_v11 = vmul.f32 1.442695, %v4572_v27 }
 0x514   : > { %17745 = vst [vmem:[#allocation256_spill] sm:$0xff] %v14420_v20  ;;  %v14424_v15 = vpop.xlane.xlu1 %4956  ;;  %v14426_v10 = vpop.xlane.xlu0 %4953  ;;  %v4571_v20 = vsub.f32 %v17754_v35, %v17753_v39  ;;  %v4772_v45 = vmul.f32 1.442695, %v4570_v41  ;;  %v17762_v41 = vld [vmem:[#allocation197_spill] sm:$0xff] }
 0x515   : > { %17747 = vst [vmem:[#allocation252_spill] sm:$0xff] %v14426_v10  ;;  %v5090_v10 = vsel %vm785_vm1, %v14422_v49, 0.0  ;;  %v14442_v3 = vpop.eup %11032  ;;  %v4575_v27 = vsub.f32 %v17762_v41, %v13844_v32 }
 0x516   : > { %17755 = vst [vmem:[#allocation259_spill] sm:$0xff] %v14442_v3  ;;  %v4774_v50 = vmul.f32 1.442695, %v4571_v20  ;;  %v14446_v35 = vpop.eup %11034  ;;  %11038 = vpow2.f32 %v4772_v45  ;;  %v17763_v20 = vld [vmem:[#allocation281_spill] sm:$0xff] }
 0x517   : > { %17757 = vst [vmem:[#allocation262_spill] sm:$0xff] %v14446_v35  ;;  %v14452_v49 = vpop.eup %11036  ;;  %11040 = vpow2.f32 %v4776_v11  ;;  %v4782_v11 = vmul.f32 1.442695, %v4575_v27 }
 0x518   : > { %5085 = vadd.xlane.f32.xlu2 %v5084_v54  ;;  %17759 = vst [vmem:[#allocation258_spill] sm:$0xff] %v14452_v49  ;;  %v17760_v54 = vld [vmem:[#allocation282_spill] sm:$0xff]  ;;  %11042 = vpow2.f32 %v4774_v50  ;;  %v5096_v45 = vsel %vm785_vm1, %v14452_v49, 0.0 }
 0x519   : > { %5091 = vadd.xlane.f32.xlu1 %v5090_v10  ;;  %5088 = vadd.xlane.f32.xlu0 %v5087_v26  ;;  %v17761_v10 = vld [vmem:[#allocation194_spill] sm:$0xff]  ;;  %v17764_v26 = vld [vmem:[#allocation192_spill] sm:$0xff] }
 0x51a   : > { %v4573_v28 = vsub.f32 %v17761_v10, %v17760_v54  ;;  %v4574_v58 = vsub.f32 %v17764_v26, %v17763_v20 }
 0x51b   : > { %v14444_v63 = vpop.xlane.xlu2 %4959 }
 0x51c   : > { %17756 = vst [vmem:[#allocation175_spill] sm:$0xff] %v14444_v63  ;;  %v14448_v37 = vpop.xlane.xlu1 %4965  ;;  %v14450_v39 = vpop.xlane.xlu0 %4962  ;;  %v5093_v63 = vsel %vm785_vm1, %v14442_v3, 0.0  ;;  %v4778_v54 = vmul.f32 1.442695, %v4573_v28  ;;  %v4780_v32 = vmul.f32 1.442695, %v4574_v58 }
 0x51d   : > { %17758 = vst [vmem:[#allocation176_spill] sm:$0xff] %v14448_v37  ;;  %v5099_v37 = vsel %vm785_vm1, %v14446_v35, 0.0  ;;  %v14466_v10 = vpop.eup %11038  ;;  %v17769_v28 = vld [vmem:[#allocation201_spill] sm:$0xff]  ;;  %v17770_v58 = vld [vmem:[#allocation198_spill] sm:$0xff] }
 0x51e   : > { %17765 = vst [vmem:[#allocation174_spill] sm:$0xff] %v14466_v10  ;;  %v14470_v41 = vpop.eup %11040  ;;  %11044 = vpow2.f32 %v4778_v54  ;;  %v4578_v27 = vsub.f32 %v17769_v28, %v13868_v46  ;;  %v5102_v49 = vsel %vm785_vm1, %v14466_v10, 0.0 }
 0x51f   : > { %17766 = vst [vmem:[#allocation265_spill] sm:$0xff] %v14470_v41  ;;  %v14476_v35 = vpop.eup %11042  ;;  %11046 = vpow2.f32 %v4782_v11  ;;  %v5108_v3 = vsel %vm785_vm1, %v14470_v41, 0.0 }
 0x520   : > { %5094 = vadd.xlane.f32.xlu2 %v5093_v63  ;;  %17767 = vst [vmem:[#allocation178_spill] sm:$0xff] %v14476_v35  ;;  %v17768_v63 = vld [vmem:[#allocation199_spill] sm:$0xff]  ;;  %11048 = vpow2.f32 %v4780_v32  ;;  %v5105_v54 = vsel %vm785_vm1, %v14476_v35, 0.0  ;;  %v4788_v11 = vmul.f32 1.442695, %v4578_v27 }
 0x521   : > { %5100 = vadd.xlane.f32.xlu1 %v5099_v37  ;;  %5097 = vadd.xlane.f32.xlu0 %v5096_v45  ;;  %v4576_v37 = vsub.f32 %v17768_v63, %v13851_v24  ;;  %v4577_v45 = vsub.f32 %v17770_v58, %v13849_v12 }
 0x523   : > { %v14468_v50 = vpop.xlane.xlu2 %4968  ;;  %v4784_v24 = vmul.f32 1.442695, %v4576_v37  ;;  %v4786_v46 = vmul.f32 1.442695, %v4577_v45  ;;  %v17775_v37 = vld [vmem:[#allocation207_spill] sm:$0xff]  ;;  %v17776_v45 = vld [vmem:[#allocation202_spill] sm:$0xff] }
 0x524   : > { %v14472_v20 = vpop.xlane.xlu1 %4974  ;;  %v14474_v26 = vpop.xlane.xlu0 %4971  ;;  %v4581_v27 = vsub.f32 %v17775_v37, %v13892_v36 }
 0x525   : > { %v14490_v63 = vpop.eup %11044  ;;  %11050 = vpow2.f32 %v4784_v24 }
 0x526   : > { %17771 = vst [vmem:[#allocation268_spill] sm:$0xff] %v14490_v63  ;;  %v14494_v12 = vpop.eup %11046  ;;  %11052 = vpow2.f32 %v4788_v11  ;;  %v5111_v35 = vsel %vm785_vm1, %v14490_v63, 0.0  ;;  %v4794_v11 = vmul.f32 1.442695, %v4581_v27 }
 0x527   : > { %17772 = vst [vmem:[#allocation181_spill] sm:$0xff] %v14494_v12  ;;  %v14500_v41 = vpop.eup %11048  ;;  %11054 = vpow2.f32 %v4786_v46  ;;  %v5117_v10 = vsel %vm785_vm1, %v14494_v12, 0.0 }
 0x528   : > { %5103 = vadd.xlane.f32.xlu2 %v5102_v49  ;;  %17773 = vst [vmem:[#allocation264_spill] sm:$0xff] %v14500_v41  ;;  %v17774_v49 = vld [vmem:[#allocation204_spill] sm:$0xff]  ;;  %v5114_v24 = vsel %vm785_vm1, %v14500_v41, 0.0 }
 0x529   : > { %5109 = vadd.xlane.f32.xlu1 %v5108_v3  ;;  %5106 = vadd.xlane.f32.xlu0 %v5105_v54  ;;  %v4579_v3 = vsub.f32 %v17774_v49, %v13874_v13  ;;  %v4580_v54 = vsub.f32 %v17776_v45, %v13872_v6 }
 0x52b   : > { %v14492_v32 = vpop.xlane.xlu2 %4977  ;;  %v4790_v13 = vmul.f32 1.442695, %v4579_v3  ;;  %v14514_v49 = vpop.eup %11050  ;;  %v4792_v36 = vmul.f32 1.442695, %v4580_v54  ;;  %v17781_v3 = vld [vmem:[#allocation213_spill] sm:$0xff]  ;;  %v17782_v54 = vld [vmem:[#allocation208_spill] sm:$0xff] }
 0x52c   : > { %v14496_v28 = vpop.xlane.xlu1 %4983  ;;  %v14498_v58 = vpop.xlane.xlu0 %4980  ;;  %17777 = vst [vmem:[#allocation177_spill] sm:$0xff] %v14514_v49  ;;  %v4584_v27 = vsub.f32 %v17781_v3, %v13916_v40  ;;  %v5120_v41 = vsel %vm785_vm1, %v14514_v49, 0.0 }
 0x52d   : > { %v14518_v6 = vpop.eup %11052  ;;  %11056 = vpow2.f32 %v4790_v13 }
 0x52e   : > { %17778 = vst [vmem:[#allocation271_spill] sm:$0xff] %v14518_v6  ;;  %v14524_v12 = vpop.eup %11054  ;;  %11058 = vpow2.f32 %v4794_v11  ;;  %v5126_v63 = vsel %vm785_vm1, %v14518_v6, 0.0  ;;  %v4800_v11 = vmul.f32 1.442695, %v4584_v27 }
 0x52f   : > { %17779 = vst [vmem:[#allocation183_spill] sm:$0xff] %v14524_v12  ;;  %11060 = vpow2.f32 %v4792_v36  ;;  %v5123_v13 = vsel %vm785_vm1, %v14524_v12, 0.0 }
 0x530   : > { %5112 = vadd.xlane.f32.xlu2 %v5111_v35  ;;  %v17780_v35 = vld [vmem:[#allocation210_spill] sm:$0xff] }
 0x531   : > { %5118 = vadd.xlane.f32.xlu1 %v5117_v10  ;;  %5115 = vadd.xlane.f32.xlu0 %v5114_v24  ;;  %v4582_v10 = vsub.f32 %v17780_v35, %v13898_v42  ;;  %v4583_v24 = vsub.f32 %v17782_v54, %v13896_v4 }
 0x533   : > { %v14516_v46 = vpop.xlane.xlu2 %4986  ;;  %v4796_v42 = vmul.f32 1.442695, %v4582_v10  ;;  %v14538_v35 = vpop.eup %11056  ;;  %v4798_v40 = vmul.f32 1.442695, %v4583_v24  ;;  %v17787_v10 = vld [vmem:[#allocation218_spill] sm:$0xff] }
 0x534   : > { %v14520_v37 = vpop.xlane.xlu1 %4992  ;;  %v14522_v45 = vpop.xlane.xlu0 %4989  ;;  %17783 = vst [vmem:[#allocation186_spill] sm:$0xff] %v14538_v35  ;;  %v4587_v27 = vsub.f32 %v17787_v10, %v13940_v48  ;;  %v17788_v24 = vld [vmem:[#allocation214_spill] sm:$0xff]  ;;  %v5129_v12 = vsel %vm785_vm1, %v14538_v35, 0.0 }
 0x535   : > { %v14542_v4 = vpop.eup %11058  ;;  %11062 = vpow2.f32 %v4796_v42 }
 0x536   : > { %17784 = vst [vmem:[#allocation270_spill] sm:$0xff] %v14542_v4  ;;  %v14548_v6 = vpop.eup %11060  ;;  %11064 = vpow2.f32 %v4800_v11  ;;  %v5135_v49 = vsel %vm785_vm1, %v14542_v4, 0.0  ;;  %v4806_v11 = vmul.f32 1.442695, %v4587_v27 }
 0x537   : > { %17785 = vst [vmem:[#allocation182_spill] sm:$0xff] %v14548_v6  ;;  %11066 = vpow2.f32 %v4798_v40  ;;  %v5132_v42 = vsel %vm785_vm1, %v14548_v6, 0.0 }
 0x538   : > { %5121 = vadd.xlane.f32.xlu2 %v5120_v41  ;;  %v17786_v41 = vld [vmem:[#allocation215_spill] sm:$0xff] }
 0x539   : > { %5127 = vadd.xlane.f32.xlu1 %v5126_v63  ;;  %5124 = vadd.xlane.f32.xlu0 %v5123_v13  ;;  %v4585_v63 = vsub.f32 %v17786_v41, %v13922_v23  ;;  %v4586_v13 = vsub.f32 %v17788_v24, %v13920_v22 }
 0x53b   : > { %v14540_v36 = vpop.xlane.xlu2 %4995  ;;  %v4802_v23 = vmul.f32 1.442695, %v4585_v63  ;;  %v14562_v41 = vpop.eup %11062  ;;  %v4804_v48 = vmul.f32 1.442695, %v4586_v13  ;;  %v17793_v63 = vld [vmem:[#allocation224_spill] sm:$0xff]  ;;  %v17794_v13 = vld [vmem:[#allocation219_spill] sm:$0xff] }
 0x53c   : > { %v14544_v3 = vpop.xlane.xlu1 %5001  ;;  %v14546_v54 = vpop.xlane.xlu0 %4998  ;;  %17789 = vst [vmem:[#allocation276_spill] sm:$0xff] %v14562_v41  ;;  %v4590_v27 = vsub.f32 %v17793_v63, %v13964_v18  ;;  %v5138_v6 = vsel %vm785_vm1, %v14562_v41, 0.0 }
 0x53d   : > { %v14566_v22 = vpop.eup %11064  ;;  %11068 = vpow2.f32 %v4802_v23 }
 0x53e   : > { %17790 = vst [vmem:[#allocation188_spill] sm:$0xff] %v14566_v22  ;;  %v14572_v4 = vpop.eup %11066  ;;  %11070 = vpow2.f32 %v4806_v11  ;;  %v5144_v35 = vsel %vm785_vm1, %v14566_v22, 0.0  ;;  %v4812_v11 = vmul.f32 1.442695, %v4590_v27 }
 0x53f   : > { %17791 = vst [vmem:[#allocation279_spill] sm:$0xff] %v14572_v4  ;;  %11072 = vpow2.f32 %v4804_v48  ;;  %v5141_v23 = vsel %vm785_vm1, %v14572_v4, 0.0 }
 0x540   : > { %5130 = vadd.xlane.f32.xlu2 %v5129_v12  ;;  %v17792_v12 = vld [vmem:[#allocation221_spill] sm:$0xff] }
 0x541   : > { %5136 = vadd.xlane.f32.xlu1 %v5135_v49  ;;  %5133 = vadd.xlane.f32.xlu0 %v5132_v42  ;;  %v4588_v49 = vsub.f32 %v17792_v12, %v13946_v52  ;;  %v4589_v42 = vsub.f32 %v17794_v13, %v13944_v29 }
 0x543   : > { %v14564_v40 = vpop.xlane.xlu2 %5004  ;;  %v4808_v52 = vmul.f32 1.442695, %v4588_v49  ;;  %v14586_v12 = vpop.eup %11068  ;;  %v4810_v18 = vmul.f32 1.442695, %v4589_v42  ;;  %v17799_v49 = vld [vmem:[#allocation231_spill] sm:$0xff]  ;;  %v17800_v42 = vld [vmem:[#allocation225_spill] sm:$0xff] }
 0x544   : > { %v14568_v10 = vpop.xlane.xlu1 %5010  ;;  %v14570_v24 = vpop.xlane.xlu0 %5007  ;;  %17795 = vst [vmem:[#allocation191_spill] sm:$0xff] %v14586_v12  ;;  %v4593_v27 = vsub.f32 %v17799_v49, %v13988_v57  ;;  %v5147_v4 = vsel %vm785_vm1, %v14586_v12, 0.0 }
 0x545   : > { %v14590_v29 = vpop.eup %11070  ;;  %11074 = vpow2.f32 %v4808_v52 }
 0x546   : > { %17796 = vst [vmem:[#allocation275_spill] sm:$0xff] %v14590_v29  ;;  %v14596_v22 = vpop.eup %11072  ;;  %11076 = vpow2.f32 %v4812_v11  ;;  %v5153_v41 = vsel %vm785_vm1, %v14590_v29, 0.0  ;;  %v4818_v11 = vmul.f32 1.442695, %v4593_v27 }
 0x547   : > { %17797 = vst [vmem:[#allocation187_spill] sm:$0xff] %v14596_v22  ;;  %11078 = vpow2.f32 %v4810_v18  ;;  %v5150_v52 = vsel %vm785_vm1, %v14596_v22, 0.0 }
 0x548   : > { %5139 = vadd.xlane.f32.xlu2 %v5138_v6  ;;  %v17798_v6 = vld [vmem:[#allocation227_spill] sm:$0xff] }
 0x549   : > { %5145 = vadd.xlane.f32.xlu1 %v5144_v35  ;;  %5142 = vadd.xlane.f32.xlu0 %v5141_v23  ;;  %v4591_v35 = vsub.f32 %v17798_v6, %v13970_v47  ;;  %v4592_v23 = vsub.f32 %v17800_v42, %v13968_v30 }
 0x54b   : > { %v14588_v48 = vpop.xlane.xlu2 %5013  ;;  %v4814_v47 = vmul.f32 1.442695, %v4591_v35  ;;  %v14610_v6 = vpop.eup %11074  ;;  %v4816_v57 = vmul.f32 1.442695, %v4592_v23  ;;  %v17805_v35 = vld [vmem:[#allocation237_spill] sm:$0xff]  ;;  %v17806_v23 = vld [vmem:[#allocation230_spill] sm:$0xff] }
 0x54c   : > { %v14592_v63 = vpop.xlane.xlu1 %5019  ;;  %v14594_v13 = vpop.xlane.xlu0 %5016  ;;  %17801 = vst [vmem:[#allocation282_spill] sm:$0xff] %v14610_v6  ;;  %v4596_v27 = vsub.f32 %v17805_v35, %v14012_v25  ;;  %v5156_v22 = vsel %vm785_vm1, %v14610_v6, 0.0 }
 0x54d   : > { %v14614_v30 = vpop.eup %11076  ;;  %11080 = vpow2.f32 %v4814_v47 }
 0x54e   : > { %17802 = vst [vmem:[#allocation194_spill] sm:$0xff] %v14614_v30  ;;  %v14620_v29 = vpop.eup %11078  ;;  %11082 = vpow2.f32 %v4818_v11  ;;  %v5162_v12 = vsel %vm785_vm1, %v14614_v30, 0.0  ;;  %v4824_v11 = vmul.f32 1.442695, %v4596_v27 }
 0x54f   : > { %17803 = vst [vmem:[#allocation197_spill] sm:$0xff] %v14620_v29  ;;  %11084 = vpow2.f32 %v4816_v57  ;;  %v5159_v47 = vsel %vm785_vm1, %v14620_v29, 0.0 }
 0x550   : > { %5148 = vadd.xlane.f32.xlu2 %v5147_v4  ;;  %v17804_v4 = vld [vmem:[#allocation233_spill] sm:$0xff] }
 0x551   : > { %5154 = vadd.xlane.f32.xlu1 %v5153_v41  ;;  %5151 = vadd.xlane.f32.xlu0 %v5150_v52  ;;  %v4594_v41 = vsub.f32 %v17804_v4, %v13994_v62  ;;  %v4595_v52 = vsub.f32 %v17806_v23, %v13992_v34 }
 0x553   : > { %v14612_v18 = vpop.xlane.xlu2 %5022  ;;  %v4820_v62 = vmul.f32 1.442695, %v4594_v41  ;;  %v14634_v4 = vpop.eup %11080  ;;  %v4822_v25 = vmul.f32 1.442695, %v4595_v52  ;;  %v17811_v41 = vld [vmem:[#allocation242_spill] sm:$0xff]  ;;  %v17812_v52 = vld [vmem:[#allocation236_spill] sm:$0xff] }
 0x554   : > { %v14616_v49 = vpop.xlane.xlu1 %5028  ;;  %v14618_v42 = vpop.xlane.xlu0 %5025  ;;  %17807 = vst [vmem:[#allocation281_spill] sm:$0xff] %v14634_v4  ;;  %v4599_v27 = vsub.f32 %v17811_v41, %v14036_v14  ;;  %v5165_v29 = vsel %vm785_vm1, %v14634_v4, 0.0 }
 0x555   : > { %v14638_v34 = vpop.eup %11082  ;;  %11086 = vpow2.f32 %v4820_v62 }
 0x556   : > { %17808 = vst [vmem:[#allocation192_spill] sm:$0xff] %v14638_v34  ;;  %v14644_v30 = vpop.eup %11084  ;;  %11088 = vpow2.f32 %v4824_v11  ;;  %v5171_v6 = vsel %vm785_vm1, %v14638_v34, 0.0  ;;  %v4830_v11 = vmul.f32 1.442695, %v4599_v27 }
 0x557   : > { %17809 = vst [vmem:[#allocation199_spill] sm:$0xff] %v14644_v30  ;;  %11090 = vpow2.f32 %v4822_v25  ;;  %v5168_v62 = vsel %vm785_vm1, %v14644_v30, 0.0 }
 0x558   : > { %5157 = vadd.xlane.f32.xlu2 %v5156_v22  ;;  %v17810_v22 = vld [vmem:[#allocation239_spill] sm:$0xff] }
 0x559   : > { %5163 = vadd.xlane.f32.xlu1 %v5162_v12  ;;  %5160 = vadd.xlane.f32.xlu0 %v5159_v47  ;;  %v4597_v12 = vsub.f32 %v17810_v22, %v14018_v0  ;;  %v4598_v47 = vsub.f32 %v17812_v52, %v14016_v7 }
 0x55b   : > { %v14636_v57 = vpop.xlane.xlu2 %5031  ;;  %v4826_v0 = vmul.f32 1.442695, %v4597_v12  ;;  %v14658_v22 = vpop.eup %11086  ;;  %v4828_v14 = vmul.f32 1.442695, %v4598_v47  ;;  %v17819_v12 = vld [vmem:[#allocation248_spill] sm:$0xff]  ;;  %v17820_v47 = vld [vmem:[#allocation243_spill] sm:$0xff] }
 0x55c   : > { %v14640_v35 = vpop.xlane.xlu1 %5037  ;;  %v14642_v23 = vpop.xlane.xlu0 %5034  ;;  %17813 = vst [vmem:[#allocation201_spill] sm:$0xff] %v14658_v22  ;;  %v4602_v27 = vsub.f32 %v17819_v12, %v14060_v16  ;;  %v5174_v30 = vsel %vm785_vm1, %v14658_v22, 0.0 }
 0x55d   : > { %v14662_v7 = vpop.eup %11088  ;;  %11092 = vpow2.f32 %v4826_v0 }
 0x55e   : > { %17814 = vst [vmem:[#allocation198_spill] sm:$0xff] %v14662_v7  ;;  %v14668_v34 = vpop.eup %11090  ;;  %11094 = vpow2.f32 %v4830_v11  ;;  %v5180_v4 = vsel %vm785_vm1, %v14662_v7, 0.0  ;;  %v4836_v11 = vmul.f32 1.442695, %v4602_v27 }
 0x55f   : > { %17817 = vst [vmem:[#allocation202_spill] sm:$0xff] %v14668_v34  ;;  %11096 = vpow2.f32 %v4828_v14  ;;  %v5177_v0 = vsel %vm785_vm1, %v14668_v34, 0.0 }
 0x560   : > { %5166 = vadd.xlane.f32.xlu2 %v5165_v29  ;;  %v17818_v29 = vld [vmem:[#allocation245_spill] sm:$0xff] }
 0x561   : > { %5172 = vadd.xlane.f32.xlu1 %v5171_v6  ;;  %5169 = vadd.xlane.f32.xlu0 %v5168_v62  ;;  %v4600_v6 = vsub.f32 %v17818_v29, %v14042_v61  ;;  %v4601_v62 = vsub.f32 %v17820_v47, %v14040_v9 }
 0x563   : > { %v14660_v25 = vpop.xlane.xlu2 %5040  ;;  %v4832_v61 = vmul.f32 1.442695, %v4600_v6  ;;  %v14682_v29 = vpop.eup %11092  ;;  %v4834_v16 = vmul.f32 1.442695, %v4601_v62  ;;  %v17828_v6 = vld [vmem:[#allocation255_spill] sm:$0xff]  ;;  %v17829_v62 = vld [vmem:[#allocation249_spill] sm:$0xff] }
 0x564   : > { %v14664_v41 = vpop.xlane.xlu1 %5046  ;;  %v14666_v52 = vpop.xlane.xlu0 %5043  ;;  %17821 = vst [vmem:[#allocation210_spill] sm:$0xff] %v14682_v29  ;;  %v4605_v27 = vsub.f32 %v17828_v6, %v14084_v55  ;;  %v5183_v34 = vsel %vm785_vm1, %v14682_v29, 0.0 }
 0x565   : > { %17815 = vst [vmem:[#allocation204_spill] sm:$0xff] %v14664_v41  ;;  %v14686_v9 = vpop.eup %11094  ;;  %11098 = vpow2.f32 %v4832_v61 }
 0x566   : > { %17816 = vst [vmem:[#allocation207_spill] sm:$0xff] %v14666_v52  ;;  %v14692_v7 = vpop.eup %11096  ;;  %11100 = vpow2.f32 %v4836_v11  ;;  %v5189_v22 = vsel %vm785_vm1, %v14686_v9, 0.0  ;;  %v4842_v11 = vmul.f32 1.442695, %v4605_v27  ;;  %v18052_v52 = vld [vmem:[#allocation289_spill] sm:$0xff] }
 0x567   : > { %17823 = vst [vmem:[#allocation208_spill] sm:$0xff] %v14686_v9  ;;  %11102 = vpow2.f32 %v4834_v16  ;;  %v5186_v61 = vsel %vm785_vm1, %v14692_v7, 0.0 }
 0x568   : > { %5175 = vadd.xlane.f32.xlu2 %v5174_v30  ;;  %17826 = vst [vmem:[#allocation214_spill] sm:$0xff] %v14692_v7  ;;  %v17827_v30 = vld [vmem:[#allocation251_spill] sm:$0xff] }
 0x569   : > { %5181 = vadd.xlane.f32.xlu1 %v5180_v4  ;;  %5178 = vadd.xlane.f32.xlu0 %v5177_v0  ;;  %v4603_v4 = vsub.f32 %v17827_v30, %v14066_v59  ;;  %v4604_v0 = vsub.f32 %v17829_v62, %v14064_v43 }
 0x56b   : > { %v14684_v14 = vpop.xlane.xlu2 %5049  ;;  %v4838_v59 = vmul.f32 1.442695, %v4603_v4  ;;  %v14706_v30 = vpop.eup %11098  ;;  %v4840_v55 = vmul.f32 1.442695, %v4604_v0  ;;  %v17837_v4 = vld [vmem:[#allocation261_spill] sm:$0xff]  ;;  %v17838_v0 = vld [vmem:[#allocation254_spill] sm:$0xff] }
 0x56c   : > { %17822 = vst [vmem:[#allocation213_spill] sm:$0xff] %v14684_v14  ;;  %v14688_v12 = vpop.xlane.xlu1 %5055  ;;  %v14690_v47 = vpop.xlane.xlu0 %5052  ;;  %v4608_v27 = vsub.f32 %v17837_v4, %v14108_v53  ;;  %v5192_v7 = vsel %vm785_vm1, %v14706_v30, 0.0 }
 0x56d   : > { %17824 = vst [vmem:[#allocation215_spill] sm:$0xff] %v14688_v12  ;;  %v14710_v43 = vpop.eup %11100  ;;  %11104 = vpow2.f32 %v4838_v59 }
 0x56e   : > { %17825 = vst [vmem:[#allocation218_spill] sm:$0xff] %v14690_v47  ;;  %v14716_v9 = vpop.eup %11102  ;;  %11106 = vpow2.f32 %v4842_v11  ;;  %v5198_v29 = vsel %vm785_vm1, %v14710_v43, 0.0  ;;  %v4848_v11 = vmul.f32 1.442695, %v4608_v27 }
 0x56f   : > { %17830 = vst [vmem:[#allocation221_spill] sm:$0xff] %v14706_v30  ;;  %11108 = vpow2.f32 %v4840_v55  ;;  %v5195_v59 = vsel %vm785_vm1, %v14716_v9, 0.0 }
 0x570   : > { %5184 = vadd.xlane.f32.xlu2 %v5183_v34  ;;  %17832 = vst [vmem:[#allocation219_spill] sm:$0xff] %v14710_v43  ;;  %v17836_v34 = vld [vmem:[#allocation257_spill] sm:$0xff] }
 0x571   : > { %5190 = vadd.xlane.f32.xlu1 %v5189_v22  ;;  %5187 = vadd.xlane.f32.xlu0 %v5186_v61  ;;  %17835 = vst [vmem:[#allocation225_spill] sm:$0xff] %v14716_v9  ;;  %v4606_v22 = vsub.f32 %v17836_v34, %v14090_v33  ;;  %v4607_v61 = vsub.f32 %v17838_v0, %v14088_v19 }
 0x573   : > { %v14708_v16 = vpop.xlane.xlu2 %5058  ;;  %v4844_v33 = vmul.f32 1.442695, %v4606_v22  ;;  %v14730_v34 = vpop.eup %11104  ;;  %v4846_v53 = vmul.f32 1.442695, %v4607_v61  ;;  %v17846_v22 = vld [vmem:[#allocation266_spill] sm:$0xff]  ;;  %v17847_v61 = vld [vmem:[#allocation260_spill] sm:$0xff] }
 0x574   : > { %17831 = vst [vmem:[#allocation224_spill] sm:$0xff] %v14708_v16  ;;  %v14712_v6 = vpop.xlane.xlu1 %5064  ;;  %v14714_v62 = vpop.xlane.xlu0 %5061  ;;  %v4611_v27 = vsub.f32 %v17846_v22, %v14132_v1  ;;  %v5201_v9 = vsel %vm785_vm1, %v14730_v34, 0.0 }
 0x575   : > { %17833 = vst [vmem:[#allocation227_spill] sm:$0xff] %v14712_v6  ;;  %v14734_v19 = vpop.eup %11106  ;;  %11110 = vpow2.f32 %v4844_v33  ;;  %v18050_v6 = vld [vmem:[#allocation235_spill] sm:$0xff] }
 0x576   : > { %17834 = vst [vmem:[#allocation231_spill] sm:$0xff] %v14714_v62  ;;  %v14740_v43 = vpop.eup %11108  ;;  %11112 = vpow2.f32 %v4848_v11  ;;  %v5207_v30 = vsel %vm785_vm1, %v14734_v19, 0.0  ;;  %v4854_v11 = vmul.f32 1.442695, %v4611_v27 }
 0x577   : > { %17839 = vst [vmem:[#allocation233_spill] sm:$0xff] %v14730_v34  ;;  %11114 = vpow2.f32 %v4846_v53  ;;  %v5204_v33 = vsel %vm785_vm1, %v14740_v43, 0.0 }
 0x578   : > { %5193 = vadd.xlane.f32.xlu2 %v5192_v7  ;;  %17841 = vst [vmem:[#allocation230_spill] sm:$0xff] %v14734_v19  ;;  %v17845_v7 = vld [vmem:[#allocation263_spill] sm:$0xff] }
 0x579   : > { %5199 = vadd.xlane.f32.xlu1 %v5198_v29  ;;  %5196 = vadd.xlane.f32.xlu0 %v5195_v59  ;;  %17844 = vst [vmem:[#allocation236_spill] sm:$0xff] %v14740_v43  ;;  %v4609_v29 = vsub.f32 %v17845_v7, %v14114_v8  ;;  %v4610_v59 = vsub.f32 %v17847_v61, %v14112_v5 }
 0x57b   : > { %v14732_v55 = vpop.xlane.xlu2 %5067  ;;  %v4850_v8 = vmul.f32 1.442695, %v4609_v29  ;;  %v14754_v7 = vpop.eup %11110  ;;  %v4852_v1 = vmul.f32 1.442695, %v4610_v59  ;;  %v17855_v29 = vld [vmem:[#allocation272_spill] sm:$0xff]  ;;  %v17856_v59 = vld [vmem:[#allocation267_spill] sm:$0xff] }
 0x57c   : > { %17840 = vst [vmem:[#allocation237_spill] sm:$0xff] %v14732_v55  ;;  %v14736_v4 = vpop.xlane.xlu1 %5073  ;;  %v14738_v0 = vpop.xlane.xlu0 %5070  ;;  %v4614_v27 = vsub.f32 %v17855_v29, %v14156_v60  ;;  %v5210_v43 = vsel %vm785_vm1, %v14754_v7, 0.0 }
 0x57d   : > { %17842 = vst [vmem:[#allocation239_spill] sm:$0xff] %v14736_v4  ;;  %v14758_v5 = vpop.eup %11112  ;;  %11116 = vpow2.f32 %v4850_v8  ;;  %v18034_v4 = vld [vmem:[#allocation70_spill] sm:$0xff] }
 0x57e   : > { %17843 = vst [vmem:[#allocation242_spill] sm:$0xff] %v14738_v0  ;;  %v14764_v19 = vpop.eup %11114  ;;  %11118 = vpow2.f32 %v4854_v11  ;;  %v5216_v34 = vsel %vm785_vm1, %v14758_v5, 0.0  ;;  %v4860_v11 = vmul.f32 1.442695, %v4614_v27 }
 0x57f   : > { %17848 = vst [vmem:[#allocation245_spill] sm:$0xff] %v14754_v7  ;;  %11120 = vpow2.f32 %v4852_v1  ;;  %v5213_v8 = vsel %vm785_vm1, %v14764_v19, 0.0 }
 0x580   : > { %5202 = vadd.xlane.f32.xlu2 %v5201_v9  ;;  %17850 = vst [vmem:[#allocation243_spill] sm:$0xff] %v14758_v5  ;;  %v17854_v9 = vld [vmem:[#allocation269_spill] sm:$0xff] }
 0x581   : > { %5208 = vadd.xlane.f32.xlu1 %v5207_v30  ;;  %5205 = vadd.xlane.f32.xlu0 %v5204_v33  ;;  %17853 = vst [vmem:[#allocation249_spill] sm:$0xff] %v14764_v19  ;;  %v4612_v30 = vsub.f32 %v17854_v9, %v14138_v17  ;;  %v4613_v33 = vsub.f32 %v17856_v59, %v14136_v56 }
 0x583   : > { %v14756_v53 = vpop.xlane.xlu2 %5076  ;;  %v4856_v17 = vmul.f32 1.442695, %v4612_v30  ;;  %v14778_v9 = vpop.eup %11116  ;;  %v4858_v60 = vmul.f32 1.442695, %v4613_v33  ;;  %v17864_v30 = vld [vmem:[#allocation278_spill] sm:$0xff]  ;;  %v17865_v33 = vld [vmem:[#allocation273_spill] sm:$0xff] }
 0x584   : > { %17849 = vst [vmem:[#allocation248_spill] sm:$0xff] %v14756_v53  ;;  %v14760_v22 = vpop.xlane.xlu1 %5082  ;;  %v14762_v61 = vpop.xlane.xlu0 %5079  ;;  %v4617_v27 = vsub.f32 %v17864_v30, %v14180_v38  ;;  %v5219_v19 = vsel %vm785_vm1, %v14778_v9, 0.0  ;;  %v18033_v53 = vld [vmem:[#allocation92_spill] sm:$0xff] }
 0x585   : > { %17851 = vst [vmem:[#allocation251_spill] sm:$0xff] %v14760_v22  ;;  %v14782_v56 = vpop.eup %11118  ;;  %11122 = vpow2.f32 %v4856_v17 }
 0x586   : > { %17852 = vst [vmem:[#allocation255_spill] sm:$0xff] %v14762_v61  ;;  %v14788_v5 = vpop.eup %11120  ;;  %11124 = vpow2.f32 %v4860_v11  ;;  %v5225_v7 = vsel %vm785_vm1, %v14782_v56, 0.0  ;;  %v4866_v11 = vmul.f32 1.442695, %v4617_v27 }
 0x587   : > { %17857 = vst [vmem:[#allocation257_spill] sm:$0xff] %v14778_v9  ;;  %11126 = vpow2.f32 %v4858_v60  ;;  %v5222_v17 = vsel %vm785_vm1, %v14788_v5, 0.0 }
 0x588   : > { %5211 = vadd.xlane.f32.xlu2 %v5210_v43  ;;  %17859 = vst [vmem:[#allocation254_spill] sm:$0xff] %v14782_v56  ;;  %v17863_v43 = vld [vmem:[#allocation274_spill] sm:$0xff] }
 0x589   : > { %5217 = vadd.xlane.f32.xlu1 %v5216_v34  ;;  %5214 = vadd.xlane.f32.xlu0 %v5213_v8  ;;  %17862 = vst [vmem:[#allocation260_spill] sm:$0xff] %v14788_v5  ;;  %v4615_v34 = vsub.f32 %v17863_v43, %v14162_v31  ;;  %v4616_v8 = vsub.f32 %v17865_v33, %v14160_v44 }
 0x58b   : > { %v14780_v1 = vpop.xlane.xlu2 %5085  ;;  %v4862_v31 = vmul.f32 1.442695, %v4615_v34  ;;  %v14802_v43 = vpop.eup %11122  ;;  %v4864_v38 = vmul.f32 1.442695, %v4616_v8  ;;  %v17873_v34 = vld [vmem:[#allocation283_spill] sm:$0xff]  ;;  %v17874_v8 = vld [vmem:[#allocation133_spill] sm:$0xff] }
 0x58c   : > { %17858 = vst [vmem:[#allocation261_spill] sm:$0xff] %v14780_v1  ;;  %v14784_v29 = vpop.xlane.xlu1 %5091  ;;  %v14786_v59 = vpop.xlane.xlu0 %5088  ;;  %v4620_v27 = vsub.f32 %v17873_v34, %v14204_v2  ;;  %v5228_v9 = vsel %vm785_vm1, %v14802_v43, 0.0 }
 0x58d   : > { %17860 = vst [vmem:[#allocation263_spill] sm:$0xff] %v14784_v29  ;;  %v14806_v44 = vpop.eup %11124  ;;  %11128 = vpow2.f32 %v4862_v31 }
 0x58e   : > { %17861 = vst [vmem:[#allocation266_spill] sm:$0xff] %v14786_v59  ;;  %v14812_v56 = vpop.eup %11126  ;;  %11130 = vpow2.f32 %v4866_v11  ;;  %v4872_v11 = vmul.f32 1.442695, %v4620_v27  ;;  %v17885_v27 = vld [vmem:[#allocation134_spill] sm:$0xff] }
 0x58f   : > { %17866 = vst [vmem:[#allocation269_spill] sm:$0xff] %v14802_v43  ;;  %11132 = vpow2.f32 %v4864_v38  ;;  %v5231_v31 = vsel %vm785_vm1, %v14812_v56, 0.0  ;;  %v17887_v43 = vld [vmem:[#allocation132_spill] sm:$0xff] }
 0x590   : > { %5220 = vadd.xlane.f32.xlu2 %v5219_v19  ;;  %17868 = vst [vmem:[#allocation267_spill] sm:$0xff] %v14806_v44  ;;  %v17872_v19 = vld [vmem:[#allocation280_spill] sm:$0xff] }
 0x591   : > { %5226 = vadd.xlane.f32.xlu1 %v5225_v7  ;;  %5223 = vadd.xlane.f32.xlu0 %v5222_v17  ;;  %17871 = vst [vmem:[#allocation273_spill] sm:$0xff] %v14812_v56  ;;  %v4618_v7 = vsub.f32 %v17872_v19, %v14186_v21  ;;  %v17875_v17 = vld [vmem:[#allocation277_spill] sm:$0xff] }
 0x592   : > { %v4619_v5 = vsub.f32 %v17875_v17, %v17874_v8 }
 0x593   : > { %v14804_v60 = vpop.xlane.xlu2 %5094  ;;  %v4868_v21 = vmul.f32 1.442695, %v4618_v7  ;;  %v14826_v19 = vpop.eup %11128  ;;  %v17884_v7 = vld [vmem:[#allocation209_spill] sm:$0xff] }
 0x594   : > { %17867 = vst [vmem:[#allocation272_spill] sm:$0xff] %v14804_v60  ;;  %v14808_v30 = vpop.xlane.xlu1 %5100  ;;  %v14810_v33 = vpop.xlane.xlu0 %5097  ;;  %v4870_v2 = vmul.f32 1.442695, %v4619_v5  ;;  %v17886_v5 = vld [vmem:[#allocation200_spill] sm:$0xff]  ;;  %v18024_v60 = vld [vmem:[#allocation58_spill] sm:$0xff] }
 0x595   : > { %17869 = vst [vmem:[#allocation274_spill] sm:$0xff] %v14808_v30  ;;  %v14830_v34 = vpop.eup %11130  ;;  %11134 = vpow2.f32 %v4868_v21  ;;  %v5237_v30 = vsel %vm785_vm1, %v14826_v19, 0.0 }
 0x596   : > { %17870 = vst [vmem:[#allocation278_spill] sm:$0xff] %v14810_v33  ;;  %v5234_v33 = vsel %vm785_vm1, %v14806_v44, 0.0  ;;  %v14836_v44 = vpop.eup %11132  ;;  %11136 = vpow2.f32 %v4872_v11 }
 0x597   : > { %17876 = vst [vmem:[#allocation280_spill] sm:$0xff] %v14826_v19  ;;  %11138 = vpow2.f32 %v4870_v2  ;;  %v5240_v21 = vsel %vm785_vm1, %v14836_v44, 0.0 }
 0x598   : > { %5229 = vadd.xlane.f32.xlu2 %v5228_v9  ;;  %17878 = vst [vmem:[#allocation133_spill] sm:$0xff] %v14830_v34  ;;  %v17882_v9 = vld [vmem:[#allocation143_spill] sm:$0xff] }
 0x599   : > { %5235 = vadd.xlane.f32.xlu1 %v5234_v33  ;;  %5232 = vadd.xlane.f32.xlu0 %v5231_v31  ;;  %17881 = vst [vmem:[#allocation306_spill] sm:$0xff] %v14836_v44  ;;  %v17883_v33 = vld [vmem:[#allocation284_spill] sm:$0xff]  ;;  %v4623_v31 = vsub.f32 %v17885_v27, %v17884_v7 }
 0x59a   : > { %v4621_v56 = vsub.f32 %v17883_v33, %v17882_v9 }
 0x59b   : > { %v14828_v38 = vpop.xlane.xlu2 %5103  ;;  %v4878_v11 = vmul.f32 1.442695, %v4623_v31  ;;  %v14850_v33 = vpop.eup %11134 }
 0x59c   : > { %17877 = vst [vmem:[#allocation283_spill] sm:$0xff] %v14828_v38  ;;  %v14832_v8 = vpop.xlane.xlu1 %5109  ;;  %v14834_v17 = vpop.xlane.xlu0 %5106  ;;  %v4622_v38 = vsub.f32 %v17887_v43, %v17886_v5  ;;  %v4874_v9 = vmul.f32 1.442695, %v4621_v56  ;;  %v5246_v56 = vsel %vm785_vm1, %v14850_v33, 0.0 }
 0x59d   : > { %17879 = vst [vmem:[#allocation277_spill] sm:$0xff] %v14832_v8  ;;  %v5243_v8 = vsel %vm785_vm1, %v14830_v34, 0.0  ;;  %v14854_v43 = vpop.eup %11136 }
 0x59e   : > { %17880 = vst [vmem:[#allocation305_spill] sm:$0xff] %v14834_v17  ;;  %v4876_v2 = vmul.f32 1.442695, %v4622_v38  ;;  %v14860_v34 = vpop.eup %11138  ;;  %11140 = vpow2.f32 %v4874_v9 }
 0x59f   : > { %17888 = vst [vmem:[#allocation143_spill] sm:$0xff] %v14850_v33  ;;  %11142 = vpow2.f32 %v4878_v11  ;;  %v5249_v38 = vsel %vm785_vm1, %v14860_v34, 0.0 }
 0x5a0   : > { %5238 = vadd.xlane.f32.xlu2 %v5237_v30  ;;  %17890 = vst [vmem:[#allocation209_spill] sm:$0xff] %v14854_v43  ;;  %11144 = vpow2.f32 %v4876_v2  ;;  %v5252_v30 = vsel %vm785_vm1, %v14854_v43, 0.0 }
 0x5a1   : > { %5244 = vadd.xlane.f32.xlu1 %v5243_v8  ;;  %5241 = vadd.xlane.f32.xlu0 %v5240_v21  ;;  %17893 = vst [vmem:[#allocation132_spill] sm:$0xff] %v14860_v34 }
 0x5a3   : > { %v14852_v7 = vpop.xlane.xlu2 %5112 }
 0x5a4   : > { %17889 = vst [vmem:[#allocation284_spill] sm:$0xff] %v14852_v7  ;;  %v14856_v27 = vpop.xlane.xlu1 %5118  ;;  %v14858_v5 = vpop.xlane.xlu0 %5115 }
 0x5a5   : > { %17891 = vst [vmem:[#allocation134_spill] sm:$0xff] %v14856_v27  ;;  %v14868_v8 = vpop.eup %11140  ;;  %v18012_v27 = vld [vmem:[#allocation48_spill] sm:$0xff] }
 0x5a6   : > { %17892 = vst [vmem:[#allocation200_spill] sm:$0xff] %v14858_v5  ;;  %v14872_v21 = vpop.eup %11142 }
 0x5a7   : > { %17894 = vst [vmem:[#allocation307_spill] sm:$0xff] %v14868_v8  ;;  %v14878_v2 = vpop.eup %11144 }
 0x5a8   : > { %5247 = vadd.xlane.f32.xlu2 %v5246_v56  ;;  %17896 = vst [vmem:[#allocation309_spill] sm:$0xff] %v14872_v21  ;;  %v5255_v56 = vsel %vm785_vm1, %v14868_v8, 0.0 }
 0x5a9   : > { %5253 = vadd.xlane.f32.xlu1 %v5252_v30  ;;  %5250 = vadd.xlane.f32.xlu0 %v5249_v38  ;;  %17899 = vst [vmem:[#allocation312_spill] sm:$0xff] %v14878_v2  ;;  %v5261_v30 = vsel %vm785_vm1, %v14872_v21, 0.0  ;;  %v5258_v38 = vsel %vm785_vm1, %v14878_v2, 0.0  ;;  %v17911_v2 = vld [vmem:[#allocation2_spill] sm:$0xff] }
 0x5ab   : > { %v14870_v31 = vpop.xlane.xlu2 %5121 }
 0x5ac   : > { %17895 = vst [vmem:[#allocation308_spill] sm:$0xff] %v14870_v31  ;;  %v14874_v9 = vpop.xlane.xlu1 %5127  ;;  %v14876_v11 = vpop.xlane.xlu0 %5124  ;;  %v17922_v31 = vld [vmem:[#allocation14_spill] sm:$0xff] }
 0x5ad   : > { %17897 = vst [vmem:[#allocation310_spill] sm:$0xff] %v14874_v9 }
 0x5ae   : > { %17898 = vst [vmem:[#allocation311_spill] sm:$0xff] %v14876_v11 }
 0x5b0   : > { %5256 = vadd.xlane.f32.xlu2 %v5255_v56  ;;  %v17907_v56 = vld [vmem:[#allocation4_spill] sm:$0xff] }
 0x5b1   : > { %5262 = vadd.xlane.f32.xlu1 %v5261_v30  ;;  %5259 = vadd.xlane.f32.xlu0 %v5258_v38  ;;  %v17908_v30 = vld [vmem:[#allocation5_spill] sm:$0xff] }
 0x5b2   : > { %v10573_v21 = vpack.i.bf16 %v17908_v30, %v17907_v56  ;;  %v17916_v56 = vld [vmem:[#allocation8_spill] sm:$0xff]  ;;  %v17917_v30 = vld [vmem:[#allocation9_spill] sm:$0xff] }
 0x5b3   : > { %v14886_v43 = vpop.xlane.xlu2 %5130 }
 0x5b4   : > { %17900 = vst [vmem:[#allocation313_spill] sm:$0xff] %v14886_v43  ;;  %v14888_v34 = vpop.xlane.xlu1 %5136  ;;  %v14890_v33 = vpop.xlane.xlu0 %5133  ;;  %v17914_v43 = vld [vmem:[#allocation7_spill] sm:$0xff] }
 0x5b5   : > { %17901 = vst [vmem:[#allocation314_spill] sm:$0xff] %v14888_v34 }
 0x5b6   : > { %17902 = vst [vmem:[#allocation315_spill] sm:$0xff] %v14890_v33  ;;  %v17912_v33 = vld [vmem:[#allocation3_spill] sm:$0xff] }
 0x5b7   : > { %v10568_v34 = vpack.i.bf16 %v17912_v33, %v17911_v2  ;;  %v17921_v33 = vld [vmem:[#allocation12_spill] sm:$0xff] }
 0x5bb   : > { %v14892_v44 = vpop.xlane.xlu2 %5139 }
 0x5bc   : > { %17903 = vst [vmem:[#allocation316_spill] sm:$0xff] %v14892_v44  ;;  %v14894_v19 = vpop.xlane.xlu1 %5145  ;;  %v14896_v8 = vpop.xlane.xlu0 %5142  ;;  %v17913_v44 = vld [vmem:[#allocation6_spill] sm:$0xff] }
 0x5bd   : > { %17904 = vst [vmem:[#allocation317_spill] sm:$0xff] %v14894_v19  ;;  %v10578_v19 = vpack.i.bf16 %v17914_v43, %v17913_v44  ;;  %v17923_v44 = vld [vmem:[#allocation15_spill] sm:$0xff] }
 0x5be   : > { %17905 = vst [vmem:[#allocation318_spill] sm:$0xff] %v14896_v8  ;;  %v10593_v43 = vpack.i.bf16 %v17923_v44, %v17922_v31  ;;  %v17932_v31 = vld [vmem:[#allocation42_spill] sm:$0xff] }
 0x5c3   : > { %v14898_v9 = vpop.xlane.xlu2 %5148 }
 0x5c4   : > { %17906 = vst [vmem:[#allocation319_spill] sm:$0xff] %v14898_v9  ;;  %v14902_v11 = vpop.xlane.xlu1 %5154  ;;  %v14904_v38 = vpop.xlane.xlu0 %5151 }
 0x5c5   : > { %17909 = vst [vmem:[#allocation4_spill] sm:$0xff] %v14902_v11  ;;  %10574 = vrot.lane.b32.xlu0 %v10573_v21, %s11431_s27  ;;  %v10583_v11 = vpack.i.bf16 %v17917_v30, %v17916_v56  ;;  %v17920_v21 = vld [vmem:[#allocation10_spill] sm:$0xff]  ;;  %v17926_v56 = vld [vmem:[#allocation24_spill] sm:$0xff] }
 0x5c6   : > { %17910 = vst [vmem:[#allocation5_spill] sm:$0xff] %v14904_v38  ;;  %v10588_v2 = vpack.i.bf16 %v17921_v33, %v17920_v21  ;;  %v17930_v21 = vld [vmem:[#allocation33_spill] sm:$0xff] }
 0x5c8   : > { %10569 = vrot.lane.b32.xlu2 %v10568_v34, %s11431_s27  ;;  %v17925_v34 = vld [vmem:[#allocation20_spill] sm:$0xff] }
 0x5c9   : > { %v10598_v30 = vpack.i.bf16 %v17926_v56, %v17925_v34  ;;  %v17935_v34 = vld [vmem:[#allocation51_spill] sm:$0xff] }
 0x5ca   : > { %10579 = vrot.lane.b32.xlu1 %v10578_v19, %s11431_s27 }
 0x5cb   : > { %v14913_v9 = vpop.xlane.xlu2 %5157 }
 0x5cc   : > { %17915 = vst [vmem:[#allocation2_spill] sm:$0xff] %v14913_v9  ;;  %v14917_v8 = vpop.xlane.xlu1 %5163  ;;  %v14919_v38 = vpop.xlane.xlu0 %5160  ;;  %v17931_v9 = vld [vmem:[#allocation36_spill] sm:$0xff] }
 0x5cd   : > { %17918 = vst [vmem:[#allocation3_spill] sm:$0xff] %v14917_v8  ;;  %10584 = vrot.lane.b32.xlu0 %v10583_v11, %s11431_s27  ;;  %v17929_v11 = vld [vmem:[#allocation28_spill] sm:$0xff]  ;;  %v10608_v44 = vpack.i.bf16 %v17932_v31, %v17931_v9  ;;  %v17941_v9 = vld [vmem:[#allocation69_spill] sm:$0xff] }
 0x5ce   : > { %17919 = vst [vmem:[#allocation6_spill] sm:$0xff] %v14919_v38  ;;  %v10603_v33 = vpack.i.bf16 %v17930_v21, %v17929_v11  ;;  %v17939_v11 = vld [vmem:[#allocation62_spill] sm:$0xff] }
 0x5d0   : > { %10589 = vrot.lane.b32.xlu2 %v10588_v2, %s11431_s27 }
 0x5d2   : > { %10594 = vrot.lane.b32.xlu1 %v10593_v43, %s11431_s27  ;;  %v17934_v43 = vld [vmem:[#allocation47_spill] sm:$0xff] }
 0x5d3   : > { %v14928_v19 = vpop.xlane.xlu2 %5166  ;;  %v10613_v56 = vpack.i.bf16 %v17935_v34, %v17934_v43  ;;  %v17944_v43 = vld [vmem:[#allocation78_spill] sm:$0xff] }
 0x5d4   : > { %17924 = vst [vmem:[#allocation7_spill] sm:$0xff] %v14928_v19  ;;  %v14932_v8 = vpop.xlane.xlu1 %5172  ;;  %v14934_v38 = vpop.xlane.xlu0 %5169  ;;  %v17940_v19 = vld [vmem:[#allocation65_spill] sm:$0xff] }
 0x5d5   : > { %17927 = vst [vmem:[#allocation8_spill] sm:$0xff] %v14932_v8  ;;  %10599 = vrot.lane.b32.xlu0 %v10598_v30, %s11431_s27  ;;  %v17938_v30 = vld [vmem:[#allocation56_spill] sm:$0xff]  ;;  %v10623_v31 = vpack.i.bf16 %v17941_v9, %v17940_v19  ;;  %v17950_v19 = vld [vmem:[#allocation93_spill] sm:$0xff] }
 0x5d6   : > { %17928 = vst [vmem:[#allocation9_spill] sm:$0xff] %v14934_v38  ;;  %v10618_v21 = vpack.i.bf16 %v17939_v11, %v17938_v30  ;;  %v17948_v30 = vld [vmem:[#allocation88_spill] sm:$0xff] }
 0x5d8   : > { %10604 = vrot.lane.b32.xlu2 %v10603_v33, %s11431_s27 }
 0x5da   : > { %10609 = vrot.lane.b32.xlu1 %v10608_v44, %s11431_s27  ;;  %v17943_v44 = vld [vmem:[#allocation76_spill] sm:$0xff] }
 0x5db   : > { %v14943_v2 = vpop.xlane.xlu2 %5175  ;;  %v10628_v34 = vpack.i.bf16 %v17944_v43, %v17943_v44  ;;  %v17953_v44 = vld [vmem:[#allocation102_spill] sm:$0xff] }
 0x5dc   : > { %17933 = vst [vmem:[#allocation10_spill] sm:$0xff] %v14943_v2  ;;  %v14947_v8 = vpop.xlane.xlu1 %5181  ;;  %v14949_v38 = vpop.xlane.xlu0 %5178  ;;  %v17949_v2 = vld [vmem:[#allocation90_spill] sm:$0xff] }
 0x5dd   : > { %17936 = vst [vmem:[#allocation12_spill] sm:$0xff] %v14947_v8  ;;  %10614 = vrot.lane.b32.xlu0 %v10613_v56, %s11431_s27  ;;  %v17947_v56 = vld [vmem:[#allocation81_spill] sm:$0xff]  ;;  %v10638_v9 = vpack.i.bf16 %v17950_v19, %v17949_v2 }
 0x5de   : > { %17937 = vst [vmem:[#allocation14_spill] sm:$0xff] %v14949_v38  ;;  %v10633_v11 = vpack.i.bf16 %v17948_v30, %v17947_v56  ;;  %v17957_v56 = vld [vmem:[#allocation23_spill] sm:$0xff]  ;;  %v17959_v2 = vld [vmem:[#allocation21_spill] sm:$0xff] }
 0x5e0   : > { %10619 = vrot.lane.b32.xlu2 %v10618_v21, %s11431_s27 }
 0x5e2   : > { %10624 = vrot.lane.b32.xlu1 %v10623_v31, %s11431_s27  ;;  %v17952_v31 = vld [vmem:[#allocation100_spill] sm:$0xff] }
 0x5e3   : > { %v14958_v33 = vpop.xlane.xlu2 %5184  ;;  %v10643_v43 = vpack.i.bf16 %v17953_v44, %v17952_v31 }
 0x5e4   : > { %17942 = vst [vmem:[#allocation15_spill] sm:$0xff] %v14958_v33  ;;  %v14962_v8 = vpop.xlane.xlu1 %5190  ;;  %v14964_v38 = vpop.xlane.xlu0 %5187  ;;  %v17958_v33 = vld [vmem:[#allocation29_spill] sm:$0xff] }
 0x5e5   : > { %17945 = vst [vmem:[#allocation20_spill] sm:$0xff] %v14962_v8  ;;  %10629 = vrot.lane.b32.xlu0 %v10628_v34, %s11431_s27  ;;  %v17956_v34 = vld [vmem:[#allocation18_spill] sm:$0xff]  ;;  %v10653_v19 = vpack.i.bf16 %v17959_v2, %v17958_v33  ;;  %v17970_v2 = vld [vmem:[#allocation64_spill] sm:$0xff] }
 0x5e6   : > { %17946 = vst [vmem:[#allocation24_spill] sm:$0xff] %v14964_v38  ;;  %v10648_v30 = vpack.i.bf16 %v17957_v56, %v17956_v34  ;;  %v17966_v34 = vld [vmem:[#allocation49_spill] sm:$0xff] }
 0x5e7   : > { %v17967_v56 = vld [vmem:[#allocation41_spill] sm:$0xff] }
 0x5e8   : > { %10634 = vrot.lane.b32.xlu2 %v10633_v11, %s11431_s27  ;;  %v17960_v11 = vld [vmem:[#allocation19_spill] sm:$0xff]  ;;  %v10668_v5 = vpack.i.bf16 %v17967_v56, %v17966_v34  ;;  %v17976_v34 = vld [vmem:[#allocation77_spill] sm:$0xff] }
 0x5ea   : > { %10639 = vrot.lane.b32.xlu1 %v10638_v9, %s11431_s27  ;;  %v17961_v9 = vld [vmem:[#allocation43_spill] sm:$0xff] }
 0x5eb   : > { %v14973_v21 = vpop.xlane.xlu2 %5193 }
 0x5ec   : > { %17951 = vst [vmem:[#allocation28_spill] sm:$0xff] %v14973_v21  ;;  %v14977_v8 = vpop.xlane.xlu0 %5196  ;;  %v14979_v38 = vpop.xlane.xlu1 %5199  ;;  %v10658_v21 = vpack.i.bf16 %v17961_v9, %v17960_v11 }
 0x5ed   : > { %17954 = vst [vmem:[#allocation33_spill] sm:$0xff] %v14977_v8  ;;  %10644 = vrot.lane.b32.xlu0 %v10643_v43, %s11431_s27  ;;  %v17964_v43 = vld [vmem:[#allocation26_spill] sm:$0xff] }
 0x5ee   : > { %17955 = vst [vmem:[#allocation36_spill] sm:$0xff] %v14979_v38  ;;  %v17965_v38 = vld [vmem:[#allocation38_spill] sm:$0xff] }
 0x5ef   : > { %v10663_v8 = vpack.i.bf16 %v17965_v38, %v17964_v43  ;;  %v17974_v38 = vld [vmem:[#allocation54_spill] sm:$0xff] }
 0x5f0   : > { %10649 = vrot.lane.b32.xlu2 %v10648_v30, %s11431_s27  ;;  %v17969_v30 = vld [vmem:[#allocation53_spill] sm:$0xff] }
 0x5f2   : > { %10654 = vrot.lane.b32.xlu1 %v10653_v19, %s11431_s27  ;;  %v10673_v19 = vpack.i.bf16 %v17970_v2, %v17969_v30  ;;  %v17979_v30 = vld [vmem:[#allocation60_spill] sm:$0xff] }
 0x5f3   : > { %v14990_v31 = vpop.xlane.xlu2 %5202 }
 0x5f4   : > { %17962 = vst [vmem:[#allocation42_spill] sm:$0xff] %v14990_v31  ;;  %v14992_v44 = vpop.xlane.xlu0 %5205  ;;  %v14999_v33 = vpop.xlane.xlu1 %5208 }
 0x5f5   : > { %17963 = vst [vmem:[#allocation47_spill] sm:$0xff] %v14992_v44  ;;  %10659 = vrot.lane.b32.xlu0 %v10658_v21, %s11431_s27  ;;  %v17973_v21 = vld [vmem:[#allocation75_spill] sm:$0xff]  ;;  %v17975_v44 = vld [vmem:[#allocation66_spill] sm:$0xff] }
 0x5f6   : > { %17968 = vst [vmem:[#allocation51_spill] sm:$0xff] %v14999_v33  ;;  %v10678_v43 = vpack.i.bf16 %v17974_v38, %v17973_v21  ;;  %v10683_v56 = vpack.i.bf16 %v17976_v34, %v17975_v44  ;;  %v17983_v21 = vld [vmem:[#allocation98_spill] sm:$0xff]  ;;  %v17984_v38 = vld [vmem:[#allocation87_spill] sm:$0xff] }
 0x5f7   : > { %v10698_v31 = vpack.i.bf16 %v17984_v38, %v17983_v21  ;;  %v17987_v34 = vld [vmem:[#allocation110_spill] sm:$0xff]  ;;  %v17993_v21 = vld [vmem:[#allocation120_spill] sm:$0xff] }
 0x5f8   : > { %10664 = vrot.lane.b32.xlu2 %v10663_v8, %s11431_s27 }
 0x5fa   : > { %10669 = vrot.lane.b32.xlu1 %v10668_v5, %s11431_s27  ;;  %v17978_v5 = vld [vmem:[#allocation89_spill] sm:$0xff] }
 0x5fb   : > { %v15005_v11 = vpop.xlane.xlu2 %5211  ;;  %v10688_v2 = vpack.i.bf16 %v17979_v30, %v17978_v5 }
 0x5fc   : > { %17971 = vst [vmem:[#allocation56_spill] sm:$0xff] %v15005_v11  ;;  %v15007_v9 = vpop.xlane.xlu0 %5214  ;;  %v15015_v8 = vpop.xlane.xlu1 %5217 }
 0x5fd   : > { %17972 = vst [vmem:[#allocation62_spill] sm:$0xff] %v15007_v9  ;;  %10674 = vrot.lane.b32.xlu0 %v10673_v19, %s11431_s27  ;;  %v17981_v19 = vld [vmem:[#allocation74_spill] sm:$0xff] }
 0x5fe   : > { %17977 = vst [vmem:[#allocation65_spill] sm:$0xff] %v15015_v8  ;;  %v17982_v9 = vld [vmem:[#allocation86_spill] sm:$0xff]  ;;  %v18011_v8 = vld [vmem:[#allocation37_spill] sm:$0xff] }
 0x5ff   : > { %v10693_v33 = vpack.i.bf16 %v17982_v9, %v17981_v19  ;;  %v17991_v9 = vld [vmem:[#allocation101_spill] sm:$0xff]  ;;  %v10743_v7 = vpack.i.bf16 %v18012_v27, %v18011_v8 }
 0x600   : > { %10679 = vrot.lane.b32.xlu2 %v10678_v43, %s11431_s27  ;;  %v17986_v43 = vld [vmem:[#allocation99_spill] sm:$0xff] }
 0x602   : > { %10684 = vrot.lane.b32.xlu1 %v10683_v56, %s11431_s27  ;;  %v10703_v56 = vpack.i.bf16 %v17987_v34, %v17986_v43  ;;  %v17996_v43 = vld [vmem:[#allocation109_spill] sm:$0xff] }
 0x603   : > { %v15020_v11 = vpop.xlane.xlu2 %5220 }
 0x604   : > { %17980 = vst [vmem:[#allocation69_spill] sm:$0xff] %v15020_v11  ;;  %v15027_v44 = vpop.xlane.xlu0 %5223  ;;  %v15033_v5 = vpop.xlane.xlu1 %5226  ;;  %v17992_v11 = vld [vmem:[#allocation111_spill] sm:$0xff] }
 0x605   : > { %10689 = vrot.lane.b32.xlu0 %v10688_v2, %s11431_s27  ;;  %17985 = vst [vmem:[#allocation76_spill] sm:$0xff] %v15027_v44  ;;  %v17990_v2 = vld [vmem:[#allocation119_spill] sm:$0xff]  ;;  %v10713_v38 = vpack.i.bf16 %v17993_v21, %v17992_v11 }
 0x606   : > { %17988 = vst [vmem:[#allocation78_spill] sm:$0xff] %v15033_v5  ;;  %v10708_v19 = vpack.i.bf16 %v17991_v9, %v17990_v2  ;;  %v18000_v2 = vld [vmem:[#allocation11_spill] sm:$0xff]  ;;  %v18001_v5 = vld [vmem:[#allocation17_spill] sm:$0xff] }
 0x607   : > { %v18002_v11 = vld [vmem:[#allocation127_spill] sm:$0xff] }
 0x608   : > { %10694 = vrot.lane.b32.xlu2 %v10693_v33, %s11431_s27  ;;  %v10728_v21 = vpack.i.bf16 %v18002_v11, %v18001_v5  ;;  %v18009_v5 = vld [vmem:[#allocation46_spill] sm:$0xff] }
 0x60a   : > { %10699 = vrot.lane.b32.xlu1 %v10698_v31, %s11431_s27  ;;  %v17995_v31 = vld [vmem:[#allocation128_spill] sm:$0xff] }
 0x60b   : > { %v15035_v30 = vpop.xlane.xlu2 %5229  ;;  %v10718_v34 = vpack.i.bf16 %v17996_v43, %v17995_v31  ;;  %v18006_v31 = vld [vmem:[#allocation35_spill] sm:$0xff] }
 0x60c   : > { %17989 = vst [vmem:[#allocation81_spill] sm:$0xff] %v15035_v30  ;;  %v15043_v33 = vpop.xlane.xlu0 %5232  ;;  %v15050_v30 = vpop.xlane.xlu1 %5235 }
 0x60d   : > { %10704 = vrot.lane.b32.xlu0 %v10703_v56, %s11431_s27  ;;  %17994 = vst [vmem:[#allocation88_spill] sm:$0xff] %v15043_v33  ;;  %v17999_v56 = vld [vmem:[#allocation118_spill] sm:$0xff] }
 0x60e   : > { %17998 = vst [vmem:[#allocation93_spill] sm:$0xff] %v15050_v30  ;;  %v10723_v9 = vpack.i.bf16 %v18000_v2, %v17999_v56  ;;  %v18004_v33 = vld [vmem:[#allocation146_spill] sm:$0xff]  ;;  %v18010_v2 = vld [vmem:[#allocation25_spill] sm:$0xff] }
 0x60f   : > { %v10738_v11 = vpack.i.bf16 %v18010_v2, %v18009_v5  ;;  %v18018_v5 = vld [vmem:[#allocation217_spill] sm:$0xff] }
 0x610   : > { %10709 = vrot.lane.b32.xlu2 %v10708_v19, %s11431_s27  ;;  %v18003_v19 = vld [vmem:[#allocation205_spill] sm:$0xff] }
 0x611   : > { %11146 = vrcp.f32 %v18003_v19 }
 0x612   : > { %10714 = vrot.lane.b32.xlu1 %v10713_v38, %s11431_s27  ;;  %11148 = vrcp.f32 %v18004_v33  ;;  %v18005_v38 = vld [vmem:[#allocation27_spill] sm:$0xff] }
 0x613   : > { %v15048_v44 = vpop.xlane.xlu2 %5238  ;;  %v10733_v43 = vpack.i.bf16 %v18006_v31, %v18005_v38  ;;  %v18014_v31 = vld [vmem:[#allocation59_spill] sm:$0xff] }
 0x614   : > { %17997 = vst [vmem:[#allocation90_spill] sm:$0xff] %v15048_v44  ;;  %v15063_v44 = vpop.xlane.xlu0 %5241 }
 0x615   : > { %10719 = vrot.lane.b32.xlu0 %v10718_v34, %s11431_s27  ;;  %18007 = vst [vmem:[#allocation100_spill] sm:$0xff] %v15063_v44  ;;  %v18016_v44 = vld [vmem:[#allocation153_spill] sm:$0xff] }
 0x616   : > { %11150 = vrcp.f32 %v18016_v44 }
 0x617   : > { %v11147_v30 = vpop.eup %11146  ;;  %11152 = vrcp.f32 %v18018_v5 }
 0x618   : > { %10724 = vrot.lane.b32.xlu2 %v10723_v9, %s11431_s27  ;;  %v11149_v56 = vpop.eup %11148  ;;  %v15072_v9 = vpop.xlane.xlu1 %5244 }
 0x619   : > { %18013 = vst [vmem:[#allocation18_spill] sm:$0xff] %v15072_v9  ;;  %v5392_v38 = vmul.f32 %v11149_v56, %v18004_v33  ;;  %v18022_v9 = vld [vmem:[#allocation149_spill] sm:$0xff] }
 0x61a   : > { %10729 = vrot.lane.b32.xlu1 %v10728_v21, %s11431_s27  ;;  %v5393_v21 = vmul.f32 %v11147_v30, %v18003_v19  ;;  %v18020_v19 = vld [vmem:[#allocation44_spill] sm:$0xff]  ;;  %11154 = vrcp.f32 %v18022_v9 }
 0x61b   : > { %v15065_v34 = vpop.xlane.xlu2 %5247  ;;  %v5520_v8 = vsub.f32 2.0, %v5392_v38 }
 0x61c   : > { %18008 = vst [vmem:[#allocation102_spill] sm:$0xff] %v15065_v34  ;;  %v18015_v34 = vld [vmem:[#allocation32_spill] sm:$0xff]  ;;  %v5521_v27 = vsub.f32 2.0, %v5393_v21  ;;  %v15084_v2 = vpop.xlane.xlu0 %5250 }
 0x61d   : > { %10734 = vrot.lane.b32.xlu0 %v10733_v43, %s11431_s27  ;;  %v10748_v43 = vpack.i.bf16 %v18015_v34, %v18014_v31  ;;  %18019 = vst [vmem:[#allocation29_spill] sm:$0xff] %v15084_v2  ;;  %v18025_v31 = vld [vmem:[#allocation156_spill] sm:$0xff]  ;;  %v5648_v21 = vmul.f32 %v11149_v56, %v5520_v8  ;;  %v18031_v56 = vld [vmem:[#allocation285_spill] sm:$0xff]  ;;  %v18032_v8 = vld [vmem:[#allocation286_spill] sm:$0xff] }
 0x61e   : > { %11156 = vrcp.f32 %v18025_v31  ;;  %v5649_v29 = vmul.f32 %v11147_v30, %v5521_v27  ;;  %v18027_v2 = vld [vmem:[#allocation152_spill] sm:$0xff] }
 0x61f   : > { %11158 = vrcp.f32 %v18027_v2 }
 0x620   : > { %10739 = vrot.lane.b32.xlu2 %v10738_v11, %s11431_s27  ;;  %v18021_v11 = vld [vmem:[#allocation55_spill] sm:$0xff]  ;;  %v15094_v38 = vpop.xlane.xlu1 %5253  ;;  %v5777_v27 = vmul.f32 %v18031_v56, %v5649_v29 }
 0x621   : > { %v10753_v33 = vpack.i.bf16 %v18021_v11, %v18020_v19  ;;  %18026 = vst [vmem:[#allocation21_spill] sm:$0xff] %v15094_v38  ;;  %v18028_v19 = vld [vmem:[#allocation68_spill] sm:$0xff]  ;;  %v5776_v38 = vmul.f32 %v18032_v8, %v5648_v21  ;;  %v18041_v21 = vld [vmem:[#allocation105_spill] sm:$0xff] }
 0x622   : > { %10744 = vrot.lane.b32.xlu1 %v10743_v7, %s11431_s27  ;;  %v18023_v7 = vld [vmem:[#allocation67_spill] sm:$0xff]  ;;  %v18029_v11 = vld [vmem:[#allocation80_spill] sm:$0xff] }
 0x623   : > { %v15081_v17 = vpop.xlane.xlu2 %5256  ;;  %v10758_v34 = vpack.i.bf16 %v18024_v60, %v18023_v7  ;;  %v10763_v59 = vpack.i.bf16 %v18029_v11, %v18028_v19  ;;  %v18030_v7 = vld [vmem:[#allocation223_spill] sm:$0xff]  ;;  %v10768_v19 = vpack.i.bf16 %v18034_v4, %v18033_v53  ;;  %v18035_v11 = vld [vmem:[#allocation82_spill] sm:$0xff]  ;;  %v18039_v4 = vld [vmem:[#allocation229_spill] sm:$0xff] }
 0x624   : > { %18017 = vst [vmem:[#allocation23_spill] sm:$0xff] %v15081_v17  ;;  %v11151_v17 = vpop.eup %11150  ;;  %11160 = vrcp.f32 %v18030_v7  ;;  %v15112_v62 = vpop.xlane.xlu0 %5259 }
 0x625   : > { %10749 = vrot.lane.b32.xlu0 %v10748_v43, %s11431_s27  ;;  %v11153_v43 = vpop.eup %11152  ;;  %v5394_v60 = vmul.f32 %v11151_v17, %v18016_v44  ;;  %v18036_v44 = vld [vmem:[#allocation94_spill] sm:$0xff]  ;;  %18038 = vst [vmem:[#allocation19_spill] sm:$0xff] %v15112_v62 }
 0x626   : > { %v11155_v61 = vpop.eup %11154  ;;  %v10773_v0 = vpack.i.bf16 %v18036_v44, %v18035_v11  ;;  %v18044_v11 = vld [vmem:[#allocation162_spill] sm:$0xff] }
 0x627   : > { %v11157_v30 = vpop.eup %11156  ;;  %v5396_v55 = vmul.f32 %v11155_v61, %v18022_v9  ;;  %v18040_v9 = vld [vmem:[#allocation155_spill] sm:$0xff] }
 0x628   : > { %10754 = vrot.lane.b32.xlu2 %v10753_v33, %s11431_s27  ;;  %v11159_v29 = vpop.eup %11158  ;;  %v15124_v8 = vpop.xlane.xlu1 %5262 }
 0x629   : > { %18043 = vst [vmem:[#allocation43_spill] sm:$0xff] %v15124_v8  ;;  %v18049_v8 = vld [vmem:[#allocation104_spill] sm:$0xff] }
 0x62a   : > { %10759 = vrot.lane.b32.xlu1 %v10758_v34, %s11431_s27  ;;  %v5395_v34 = vmul.f32 %v11153_v43, %v18018_v5  ;;  %v5397_v5 = vmul.f32 %v11157_v30, %v18025_v31 }
 0x62b   : > { %v10570_v1 = vpop.permute.xlu2 %10569 }
 0x62c   : > { %v10572_v33 = vunpack.i.h.bf16 %v10570_v1  ;;  %v10571_v22 = vunpack.i.l.bf16 %v10570_v1  ;;  %v18037_v1 = vld [vmem:[#allocation159_spill] sm:$0xff]  ;;  %v5523_v53 = vsub.f32 2.0, %v5395_v34  ;;  %v5525_v31 = vsub.f32 2.0, %v5397_v5 }
 0x62d   : > { %10764 = vrot.lane.b32.xlu0 %v10763_v59, %s11431_s27  ;;  %11162 = vrcp.f32 %v18037_v1  ;;  %v5522_v59 = vsub.f32 2.0, %v5394_v60 }
 0x62e   : > { %5925 = vmatpush.msrb.mxu1 %v10571_v22  ;;  %5951 = vmatpush.msrb.mxu2 %v10572_v33  ;;  %11164 = vrcp.f32 %v18039_v4  ;;  %v11161_v22 = vpop.eup %11160  ;;  %v18042_v33 = vld [vmem:[#allocation79_spill] sm:$0xff]  ;;  %v5651_v34 = vmul.f32 %v11153_v43, %v5523_v53  ;;  %v5653_v47 = vmul.f32 %v11157_v30, %v5525_v31  ;;  %v18055_v31 = vld [vmem:[#allocation164_spill] sm:$0xff] }
 0x62f   : > { %10360 = vmatmul.msk.f32.vlgmr.msrb.gmra.mxu1 %vm785_vm1, %v5776_v38  ;;  %10361 = vmatmul.msk.f32.vlgmr.msrb.gmra.mxu2 %vm785_vm1, %v5777_v27  ;;  %11166 = vrcp.f32 %v18040_v9  ;;  %v10778_v56 = vpack.i.bf16 %v18042_v33, %v18041_v21  ;;  %v5524_v38 = vsub.f32 2.0, %v5396_v55  ;;  %v5399_v27 = vmul.f32 %v11159_v29, %v18027_v2  ;;  %v18046_v55 = vld [vmem:[#allocation91_spill] sm:$0xff]  ;;  %v18048_v33 = vld [vmem:[#allocation112_spill] sm:$0xff] }
 0x630   : > { %10769 = vrot.lane.b32.xlu2 %v10768_v19, %s11431_s27  ;;  %v5650_v60 = vmul.f32 %v11151_v17, %v5522_v59  ;;  %11168 = vrcp.f32 %v18044_v11  ;;  %v18045_v19 = vld [vmem:[#allocation158_spill] sm:$0xff]  ;;  %v18047_v21 = vld [vmem:[#allocation103_spill] sm:$0xff]  ;;  %v10788_v17 = vpack.i.bf16 %v18049_v8, %v18048_v33  ;;  %v18053_v8 = vld [vmem:[#allocation113_spill] sm:$0xff] }
 0x631   : > { %11170 = vrcp.f32 %v18045_v19  ;;  %v10783_v2 = vpack.i.bf16 %v18047_v21, %v18046_v55  ;;  %v5652_v59 = vmul.f32 %v11155_v61, %v5524_v38  ;;  %v5527_v5 = vsub.f32 2.0, %v5399_v27  ;;  %v18057_v33 = vld [vmem:[#allocation290_spill] sm:$0xff] }
 0x632   : > { %10774 = vrot.lane.b32.xlu1 %v10773_v0, %s11431_s27  ;;  %v5398_v0 = vmul.f32 %v11161_v22, %v18030_v7  ;;  %11172 = vrcp.f32 %v18050_v6  ;;  %v18051_v7 = vld [vmem:[#allocation287_spill] sm:$0xff]  ;;  %v5779_v55 = vmul.f32 %v18052_v52, %v5651_v34  ;;  %v18056_v52 = vld [vmem:[#allocation288_spill] sm:$0xff] }
 0x633   : > { %v15127_v44 = vpop.eup %11162  ;;  %v10590_v16 = vpop.permute.xlu2 %10589  ;;  %v5778_v12 = vmul.f32 %v18051_v7, %v5650_v60  ;;  %v18054_v60 = vld [vmem:[#allocation122_spill] sm:$0xff]  ;;  %11174 = vrcp.f32 %v18055_v31  ;;  %v5780_v34 = vmul.f32 %v18056_v52, %v5652_v59 }
 0x634   : > { %v15132_v62 = vpop.eup %11164  ;;  %v5526_v21 = vsub.f32 2.0, %v5398_v0  ;;  %v5400_v61 = vmul.f32 %v15127_v44, %v18037_v1  ;;  %v10793_v30 = vpack.i.bf16 %v18054_v60, %v18053_v8  ;;  %v5655_v0 = vmul.f32 %v11159_v29, %v5527_v5 }
 0x635   : > { %10779 = vrot.lane.b32.xlu0 %v10778_v56, %s11431_s27  ;;  %v15139_v53 = vpop.eup %11166  ;;  %v5401_v38 = vmul.f32 %v15132_v62, %v18039_v4  ;;  %v10591_v52 = vunpack.i.l.bf16 %v10590_v16 }
 0x636   : > { %v15149_v27 = vpop.eup %11168  ;;  %v5402_v1 = vmul.f32 %v15139_v53, %v18040_v9  ;;  %v5654_v8 = vmul.f32 %v11161_v22, %v5526_v21  ;;  %v5528_v60 = vsub.f32 2.0, %v5400_v61  ;;  %v18060_v9 = vld [vmem:[#allocation114_spill] sm:$0xff]  ;;  %v18063_v22 = vld [vmem:[#allocation16_spill] sm:$0xff]  ;;  %v18064_v61 = vld [vmem:[#allocation291_spill] sm:$0xff] }
 0x637   : > { %v10575_v43 = vpop.permute.xlu0 %10574  ;;  %v5529_v59 = vsub.f32 2.0, %v5401_v38  ;;  %v5403_v29 = vmul.f32 %v15149_v27, %v18044_v11  ;;  %v5783_v38 = vmul.f32 %v18064_v61, %v5655_v0  ;;  %v10592_v11 = vunpack.i.h.bf16 %v10590_v16  ;;  %v18066_v0 = vld [vmem:[#allocation292_spill] sm:$0xff] }
 0x638   : > { %v10577_v56 = vunpack.i.h.bf16 %v10575_v43  ;;  %v10576_v14 = vunpack.i.l.bf16 %v10575_v43  ;;  %10784 = vrot.lane.b32.xlu2 %v10783_v2, %s11431_s27  ;;  %v15154_v2 = vpop.eup %11170  ;;  %v18058_v43 = vld [vmem:[#allocation241_spill] sm:$0xff]  ;;  %v5656_v16 = vmul.f32 %v15127_v44, %v5528_v60 }
 0x639   : > { %11176 = vrcp.f32 %v18058_v43 }
 0x63a   : > { %10789 = vrot.lane.b32.xlu1 %v10788_v17, %s11431_s27  ;;  %5977 = vmatpush.msrb.mxu3 %v10576_v14  ;;  %v5781_v17 = vmul.f32 %v18057_v33, %v5653_v47  ;;  %v5405_v47 = vmul.f32 %v15154_v2, %v18045_v19  ;;  %v5530_v33 = vsub.f32 2.0, %v5402_v1  ;;  %v5782_v1 = vmul.f32 %v18066_v0, %v5654_v8 }
 0x63b   : > { %6003 = vmatpush.msra.mxu0 %v10577_v56  ;;  %10362 = vmatmul.msk.f32.vlgmr.msrb.gmra.mxu3 %vm785_vm1, %v5778_v12  ;;  %v15163_v56 = vpop.eup %11172  ;;  %v18059_v12 = vld [vmem:[#allocation129_spill] sm:$0xff] }
 0x63c   : > { %10363 = vmatmul.msk.f32.vlgmr.msra.gmra.mxu0 %vm785_vm1, %v5779_v55  ;;  %v10580_v4 = vpop.permute.xlu1 %10579  ;;  %v10798_v5 = vpack.i.bf16 %v18060_v9, %v18059_v12  ;;  %v18061_v55 = vld [vmem:[#allocation161_spill] sm:$0xff]  ;;  %v5404_v19 = vmul.f32 %v15163_v56, %v18050_v6  ;;  %v18065_v12 = vld [vmem:[#allocation167_spill] sm:$0xff]  ;;  %v5531_v9 = vsub.f32 2.0, %v5403_v29  ;;  %v5658_v44 = vmul.f32 %v15139_v53, %v5530_v33 }
 0x63d   : > { %v10582_v7 = vunpack.i.h.bf16 %v10580_v4  ;;  %v10581_v14 = vunpack.i.l.bf16 %v10580_v4  ;;  %10794 = vrot.lane.b32.xlu0 %v10793_v30, %s11431_s27  ;;  %11178 = vrcp.f32 %v18061_v55  ;;  %v18062_v4 = vld [vmem:[#allocation123_spill] sm:$0xff]  ;;  %v15178_v30 = vpop.eup %11174  ;;  %v18067_v6 = vld [vmem:[#allocation13_spill] sm:$0xff] }
 0x63e   : > { %v10803_v21 = vpack.i.bf16 %v18063_v22, %v18062_v4  ;;  %11180 = vrcp.f32 %v18065_v12  ;;  %v18068_v22 = vld [vmem:[#allocation22_spill] sm:$0xff]  ;;  %v5532_v29 = vsub.f32 2.0, %v5404_v19  ;;  %v18073_v53 = vld [vmem:[#allocation295_spill] sm:$0xff] }
 0x63f   : > { %6029 = vmatpush.msra.mxu1 %v10581_v14  ;;  %6055 = vmatpush.msra.mxu2 %v10582_v7  ;;  %v10585_v41 = vpop.permute.xlu0 %10584  ;;  %v15188_v4 = vpop.eup %11176  ;;  %v10813_v61 = vpack.i.bf16 %v18068_v22, %v18067_v6  ;;  %11182 = vrcp.f32 %v14376_v51  ;;  %v18075_v6 = vld [vmem:[#allocation30_spill] sm:$0xff] }
 0x640   : > { %10364 = vmatmul.msk.f32.vlgmr.msra.gmra.mxu1 %vm785_vm1, %v5780_v34  ;;  %10365 = vmatmul.msk.f32.vlgmr.msra.gmra.mxu2 %vm785_vm1, %v5781_v17  ;;  %v10587_v7 = vunpack.i.h.bf16 %v10585_v41  ;;  %v10586_v14 = vunpack.i.l.bf16 %v10585_v41  ;;  %v5657_v34 = vmul.f32 %v15132_v62, %v5529_v59  ;;  %v10605_v17 = vpop.permute.xlu2 %10604  ;;  %v5533_v41 = vsub.f32 2.0, %v5405_v47  ;;  %v18071_v47 = vld [vmem:[#allocation165_spill] sm:$0xff] }
 0x641   : > { %10799 = vrot.lane.b32.xlu2 %v10798_v5, %s11431_s27  ;;  %6133 = vmatpush.msrb.mxu1 %v10591_v52  ;;  %v18069_v5 = vld [vmem:[#allocation31_spill] sm:$0xff]  ;;  %v18070_v52 = vld [vmem:[#allocation121_spill] sm:$0xff]  ;;  %v5406_v62 = vmul.f32 %v15178_v30, %v18055_v31  ;;  %11184 = vrcp.f32 %v18071_v47  ;;  %v5659_v31 = vmul.f32 %v15149_v27, %v5531_v9  ;;  %v5407_v0 = vmul.f32 %v15188_v4, %v18058_v43 }
 0x642   : > { %6159 = vmatpush.msrb.mxu2 %v10592_v11  ;;  %10804 = vrot.lane.b32.xlu1 %v10803_v21, %s11431_s27  ;;  %v10808_v8 = vpack.i.bf16 %v18070_v52, %v18069_v5  ;;  %v5785_v33 = vmul.f32 %v18073_v53, %v5657_v34  ;;  %v5661_v22 = vmul.f32 %v15154_v2, %v5533_v41  ;;  %v18076_v5 = vld [vmem:[#allocation250_spill] sm:$0xff]  ;;  %v10606_v52 = vunpack.i.l.bf16 %v10605_v17  ;;  %v18077_v34 = vld [vmem:[#allocation168_spill] sm:$0xff] }
 0x643   : > { %6081 = vmatpush.msra.mxu3 %v10586_v14  ;;  %6107 = vmatpush.msrb.mxu0 %v10587_v7  ;;  %v15200_v59 = vpop.eup %11178  ;;  %v18072_v7 = vld [vmem:[#allocation293_spill] sm:$0xff]  ;;  %11186 = vrcp.f32 %v18076_v5  ;;  %v10607_v43 = vunpack.i.h.bf16 %v10605_v17 }
 0x644   : > { %10366 = vmatmul.msk.f32.vlgmr.msra.gmra.mxu3 %vm785_vm1, %v5782_v1  ;;  %10367 = vmatmul.msk.f32.vlgmr.msrb.gmra.mxu0 %vm785_vm1, %v5783_v38  ;;  %v10595_v60 = vpop.permute.xlu1 %10594  ;;  %v5784_v14 = vmul.f32 %v18072_v7, %v5656_v16  ;;  %v15209_v38 = vpop.eup %11180  ;;  %v18074_v1 = vld [vmem:[#allocation34_spill] sm:$0xff]  ;;  %v5534_v16 = vsub.f32 2.0, %v5406_v62  ;;  %v5408_v27 = vmul.f32 %v15200_v59, %v18061_v55  ;;  %11188 = vrcp.f32 %v18077_v34  ;;  %v18079_v55 = vld [vmem:[#allocation296_spill] sm:$0xff] }
 0x645   : > { %v10597_v21 = vunpack.i.h.bf16 %v10595_v60  ;;  %v10596_v11 = vunpack.i.l.bf16 %v10595_v60  ;;  %10809 = vrot.lane.b32.xlu0 %v10808_v8, %s11431_s27  ;;  %v10818_v19 = vpack.i.bf16 %v18075_v6, %v18074_v1  ;;  %v5660_v8 = vmul.f32 %v15163_v56, %v5532_v29  ;;  %v15222_v60 = vpop.eup %11182  ;;  %v18078_v62 = vld [vmem:[#allocation294_spill] sm:$0xff] }
 0x646   : > { %v5535_v7 = vsub.f32 2.0, %v5407_v0  ;;  %v5409_v17 = vmul.f32 %v15209_v38, %v18065_v12  ;;  %v18080_v56 = vld [vmem:[#allocation246_spill] sm:$0xff]  ;;  %v5536_v0 = vsub.f32 2.0, %v5408_v27 }
 0x647   : > { %6185 = vmatpush.msrb.mxu3 %v10596_v11  ;;  %6211 = vmatpush.msra.mxu0 %v10597_v21  ;;  %v10600_v9 = vpop.permute.xlu0 %10599  ;;  %v5786_v21 = vmul.f32 %v18078_v62, %v5658_v44  ;;  %v5787_v11 = vmul.f32 %v18079_v55, %v5659_v31  ;;  %11190 = vrcp.f32 %v18080_v56  ;;  %v18082_v29 = vld [vmem:[#allocation50_spill] sm:$0xff]  ;;  %v5662_v31 = vmul.f32 %v15178_v30, %v5534_v16  ;;  %v18086_v62 = vld [vmem:[#allocation61_spill] sm:$0xff]  ;;  %v18088_v55 = vld [vmem:[#allocation52_spill] sm:$0xff] }
 0x648   : > { %10368 = vmatmul.msk.f32.vlgmr.msrb.gmra.mxu1 %vm785_vm1, %v5784_v14  ;;  %10369 = vmatmul.msk.f32.vlgmr.msrb.gmra.mxu2 %vm785_vm1, %v5785_v33  ;;  %v10602_v2 = vunpack.i.h.bf16 %v10600_v9  ;;  %v10601_v41 = vunpack.i.l.bf16 %v10600_v9  ;;  %v15229_v14 = vpop.eup %11184  ;;  %v18083_v33 = vld [vmem:[#allocation297_spill] sm:$0xff]  ;;  %v10620_v1 = vpop.permute.xlu2 %10619  ;;  %v5537_v30 = vsub.f32 2.0, %v5409_v17  ;;  %v5411_v16 = vmul.f32 %v15222_v60, %v14376_v51 }
 0x649   : > { %10814 = vrot.lane.b32.xlu2 %v10813_v61, %s11431_s27  ;;  %6289 = vmatpush.msra.mxu3 %v10606_v52  ;;  %v18081_v61 = vld [vmem:[#allocation39_spill] sm:$0xff]  ;;  %v5789_v44 = vmul.f32 %v18083_v33, %v5661_v22  ;;  %v15238_v6 = vpop.eup %11186  ;;  %v5663_v22 = vmul.f32 %v15188_v4, %v5535_v7  ;;  %v5410_v27 = vmul.f32 %v15229_v14, %v18071_v47  ;;  %v10622_v17 = vunpack.i.h.bf16 %v10620_v1 }
 0x64a   : > { %6315 = vmatpush.msrb.mxu0 %v10607_v43  ;;  %10819 = vrot.lane.b32.xlu1 %v10818_v19, %s11431_s27  ;;  %v10823_v53 = vpack.i.bf16 %v18082_v29, %v18081_v61  ;;  %v18084_v19 = vld [vmem:[#allocation298_spill] sm:$0xff]  ;;  %v18085_v43 = vld [vmem:[#allocation256_spill] sm:$0xff]  ;;  %v10621_v29 = vunpack.i.l.bf16 %v10620_v1  ;;  %v18090_v4 = vld [vmem:[#allocation299_spill] sm:$0xff]  ;;  %v5664_v51 = vmul.f32 %v15200_v59, %v5536_v0  ;;  %v5412_v47 = vmul.f32 %v15238_v6, %v18076_v5 }
 0x64b   : > { %6237 = vmatpush.msra.mxu1 %v10601_v41  ;;  %6263 = vmatpush.msra.mxu2 %v10602_v2  ;;  %v5788_v52 = vmul.f32 %v18084_v19, %v5660_v8  ;;  %11192 = vrcp.f32 %v18085_v43  ;;  %v15242_v41 = vpop.eup %11188  ;;  %v5790_v7 = vmul.f32 %v18090_v4, %v5662_v31  ;;  %v18091_v19 = vld [vmem:[#allocation252_spill] sm:$0xff]  ;;  %v18092_v59 = vld [vmem:[#allocation301_spill] sm:$0xff]  ;;  %v5665_v0 = vmul.f32 %v15209_v38, %v5537_v30 }
 0x64c   : > { %10370 = vmatmul.msk.f32.vlgmr.msrb.gmra.mxu3 %vm785_vm1, %v5786_v21  ;;  %10371 = vmatmul.msk.f32.vlgmr.msra.gmra.mxu0 %vm785_vm1, %v5787_v11  ;;  %v10610_v12 = vpop.permute.xlu1 %10609  ;;  %v18087_v21 = vld [vmem:[#allocation40_spill] sm:$0xff]  ;;  %v18089_v11 = vld [vmem:[#allocation63_spill] sm:$0xff]  ;;  %11194 = vrcp.f32 %v14424_v15  ;;  %v5791_v5 = vmul.f32 %v18092_v59, %v5663_v22  ;;  %v5539_v1 = vsub.f32 2.0, %v5411_v16 }
 0x64d   : > { %v10612_v9 = vunpack.i.h.bf16 %v10610_v12  ;;  %v10611_v2 = vunpack.i.l.bf16 %v10610_v12  ;;  %10824 = vrot.lane.b32.xlu0 %v10823_v53, %s11431_s27  ;;  %v10828_v8 = vpack.i.bf16 %v18087_v21, %v18086_v62  ;;  %v10833_v61 = vpack.i.bf16 %v18089_v11, %v18088_v55  ;;  %v15261_v33 = vpop.eup %11190  ;;  %v18095_v21 = vld [vmem:[#allocation300_spill] sm:$0xff]  ;;  %v18096_v11 = vld [vmem:[#allocation175_spill] sm:$0xff] }
 0x64e   : > { %v5413_v12 = vmul.f32 %v15242_v41, %v18077_v34  ;;  %11196 = vrcp.f32 %v18091_v19  ;;  %v18094_v34 = vld [vmem:[#allocation45_spill] sm:$0xff]  ;;  %v5792_v55 = vmul.f32 %v18095_v21, %v5664_v51  ;;  %v5414_v22 = vmul.f32 %v15261_v33, %v18080_v56  ;;  %v18102_v59 = vld [vmem:[#allocation72_spill] sm:$0xff] }
 0x64f   : > { %6341 = vmatpush.msrb.mxu1 %v10611_v2  ;;  %6367 = vmatpush.msrb.mxu2 %v10612_v9  ;;  %v10615_v53 = vpop.permute.xlu0 %10614  ;;  %v18093_v2 = vld [vmem:[#allocation73_spill] sm:$0xff]  ;;  %11198 = vrcp.f32 %v18096_v11  ;;  %v5667_v51 = vmul.f32 %v15222_v60, %v5539_v1 }
 0x650   : > { %10372 = vmatmul.msk.f32.vlgmr.msra.gmra.mxu1 %vm785_vm1, %v5788_v52  ;;  %10373 = vmatmul.msk.f32.vlgmr.msra.gmra.mxu2 %vm785_vm1, %v5789_v44  ;;  %v10617_v9 = vunpack.i.h.bf16 %v10615_v53  ;;  %v10616_v31 = vunpack.i.l.bf16 %v10615_v53  ;;  %v5538_v52 = vsub.f32 2.0, %v5410_v27  ;;  %v10838_v62 = vpack.i.bf16 %v18094_v34, %v18093_v2  ;;  %v18099_v53 = vld [vmem:[#allocation71_spill] sm:$0xff] }
 0x651   : > { %10829 = vrot.lane.b32.xlu2 %v10828_v8, %s11431_s27  ;;  %6445 = vmatpush.msra.mxu1 %v10621_v29  ;;  %v15270_v44 = vpop.eup %11192  ;;  %v5540_v8 = vsub.f32 2.0, %v5412_v47  ;;  %v5541_v16 = vsub.f32 2.0, %v5413_v12  ;;  %11200 = vrcp.f32 %v14450_v39  ;;  %v18097_v29 = vld [vmem:[#allocation302_spill] sm:$0xff] }
 0x652   : > { %6471 = vmatpush.msra.mxu2 %v10622_v17  ;;  %10834 = vrot.lane.b32.xlu1 %v10833_v61, %s11431_s27  ;;  %v15280_v30 = vpop.eup %11194  ;;  %v5793_v4 = vmul.f32 %v18097_v29, %v5665_v0  ;;  %v5666_v56 = vmul.f32 %v15229_v14, %v5538_v52  ;;  %v5415_v47 = vmul.f32 %v15270_v44, %v18085_v43  ;;  %v18098_v17 = vld [vmem:[#allocation57_spill] sm:$0xff]  ;;  %v5542_v14 = vsub.f32 2.0, %v5414_v22  ;;  %v10635_v0 = vpop.permute.xlu2 %10634 }
 0x653   : > { %6393 = vmatpush.msrb.mxu3 %v10616_v31  ;;  %6419 = vmatpush.msra.mxu0 %v10617_v9  ;;  %v10843_v12 = vpack.i.bf16 %v18099_v53, %v18098_v17  ;;  %v18100_v9 = vld [vmem:[#allocation176_spill] sm:$0xff]  ;;  %v18101_v31 = vld [vmem:[#allocation83_spill] sm:$0xff]  ;;  %v5668_v60 = vmul.f32 %v15238_v6, %v5540_v8  ;;  %v5417_v43 = vmul.f32 %v15280_v30, %v14424_v15  ;;  %v18108_v53 = vld [vmem:[#allocation130_spill] sm:$0xff] }
 0x654   : > { %10374 = vmatmul.msk.f32.vlgmr.msra.gmra.mxu3 %vm785_vm1, %v5790_v7  ;;  %10375 = vmatmul.msk.f32.vlgmr.msrb.gmra.mxu0 %vm785_vm1, %v5791_v5  ;;  %v10625_v38 = vpop.permute.xlu1 %10624  ;;  %v15289_v7 = vpop.eup %11196  ;;  %11202 = vrcp.f32 %v18100_v9  ;;  %v10848_v5 = vpack.i.bf16 %v18102_v59, %v18101_v31  ;;  %v5669_v52 = vmul.f32 %v15242_v41, %v5541_v16  ;;  %v18103_v6 = vld [vmem:[#allocation303_spill] sm:$0xff]  ;;  %v18104_v8 = vld [vmem:[#allocation304_spill] sm:$0xff]  ;;  %v5543_v15 = vsub.f32 2.0, %v5415_v47 }
 0x655   : > { %v10627_v27 = vunpack.i.h.bf16 %v10625_v38  ;;  %v10626_v61 = vunpack.i.l.bf16 %v10625_v38  ;;  %10839 = vrot.lane.b32.xlu0 %v10838_v62, %s11431_s27  ;;  %11204 = vrcp.f32 %v14468_v50  ;;  %v11199_v62 = vpop.eup %11198  ;;  %v5795_v21 = vmul.f32 %v18103_v6, %v5667_v51  ;;  %v18113_v6 = vld [vmem:[#allocation135_spill] sm:$0xff] }
 0x656   : > { %v5794_v22 = vmul.f32 %v18104_v8, %v5666_v56  ;;  %v5416_v38 = vmul.f32 %v15289_v7, %v18091_v19  ;;  %11206 = vrcp.f32 %v14472_v20  ;;  %v10637_v41 = vunpack.i.h.bf16 %v10635_v0 }
 0x657   : > { %6497 = vmatpush.msra.mxu3 %v10626_v61  ;;  %6523 = vmatpush.msrb.mxu0 %v10627_v27  ;;  %v10630_v1 = vpop.permute.xlu0 %10629  ;;  %v10636_v16 = vunpack.i.l.bf16 %v10635_v0  ;;  %v18105_v27 = vld [vmem:[#allocation84_spill] sm:$0xff]  ;;  %v5670_v56 = vmul.f32 %v15261_v33, %v5542_v14  ;;  %v5545_v47 = vsub.f32 2.0, %v5417_v43  ;;  %v5418_v31 = vmul.f32 %v11199_v62, %v18096_v11  ;;  %v18109_v0 = vld [vmem:[#allocation107_spill] sm:$0xff] }
 0x658   : > { %10376 = vmatmul.msk.f32.vlgmr.msrb.gmra.mxu1 %vm785_vm1, %v5792_v55  ;;  %10377 = vmatmul.msk.f32.vlgmr.msrb.gmra.mxu2 %vm785_vm1, %v5793_v4  ;;  %v10632_v2 = vunpack.i.h.bf16 %v10630_v1  ;;  %v10631_v34 = vunpack.i.l.bf16 %v10630_v1  ;;  %v15309_v55 = vpop.eup %11200  ;;  %v18106_v61 = vld [vmem:[#allocation96_spill] sm:$0xff]  ;;  %11208 = vrcp.f32 %v14474_v26  ;;  %v5544_v33 = vsub.f32 2.0, %v5416_v38  ;;  %v18110_v1 = vld [vmem:[#allocation85_spill] sm:$0xff] }
 0x659   : > { %10844 = vrot.lane.b32.xlu2 %v10843_v12, %s11431_s27  ;;  %v10853_v29 = vpack.i.bf16 %v18106_v61, %v18105_v27  ;;  %v18107_v4 = vld [vmem:[#allocation180_spill] sm:$0xff]  ;;  %v5797_v12 = vmul.f32 %v18108_v53, %v5669_v52  ;;  %v10858_v52 = vpack.i.bf16 %v18110_v1, %v18109_v0  ;;  %v5673_v8 = vmul.f32 %v15280_v30, %v5545_v47  ;;  %v18114_v30 = vld [vmem:[#allocation179_spill] sm:$0xff] }
 0x65a   : > { %10849 = vrot.lane.b32.xlu1 %v10848_v5, %s11431_s27  ;;  %6549 = vmatpush.msrb.mxu1 %v10631_v34  ;;  %v5796_v51 = vmul.f32 %v18107_v4, %v5668_v60  ;;  %v15318_v17 = vpop.eup %11202  ;;  %v5671_v5 = vmul.f32 %v15270_v44, %v5543_v15  ;;  %v5419_v60 = vmul.f32 %v15309_v55, %v14450_v39  ;;  %v18112_v11 = vld [vmem:[#allocation108_spill] sm:$0xff]  ;;  %11210 = vrcp.f32 %v14492_v32 }
 0x65b   : > { %6575 = vmatpush.msrb.mxu2 %v10632_v2  ;;  %v11205_v43 = vpop.eup %11204  ;;  %v18111_v2 = vld [vmem:[#allocation97_spill] sm:$0xff]  ;;  %v5420_v44 = vmul.f32 %v15318_v17, %v18100_v9  ;;  %v5546_v15 = vsub.f32 2.0, %v5418_v31  ;;  %11212 = vrcp.f32 %v14498_v58  ;;  %v5672_v9 = vmul.f32 %v15289_v7, %v5544_v33  ;;  %v18117_v7 = vld [vmem:[#allocation131_spill] sm:$0xff]  ;;  %v18119_v1 = vld [vmem:[#allocation116_spill] sm:$0xff] }
 0x65c   : > { %10378 = vmatmul.msk.f32.vlgmr.msrb.gmra.mxu3 %vm785_vm1, %v5794_v22  ;;  %10379 = vmatmul.msk.f32.vlgmr.msra.gmra.mxu0 %vm785_vm1, %v5795_v21  ;;  %v10640_v19 = vpop.permute.xlu1 %10639  ;;  %v10863_v34 = vpack.i.bf16 %v18112_v11, %v18111_v2  ;;  %v5798_v21 = vmul.f32 %v18113_v6, %v5670_v56  ;;  %v11207_v22 = vpop.eup %11206  ;;  %v5547_v27 = vsub.f32 2.0, %v5419_v60  ;;  %v5421_v61 = vmul.f32 %v11205_v43, %v14468_v50  ;;  %v18116_v56 = vld [vmem:[#allocation106_spill] sm:$0xff]  ;;  %v18121_v11 = vld [vmem:[#allocation115_spill] sm:$0xff] }
 0x65d   : > { %6601 = vmatpush.msrb.mxu3 %v10636_v16  ;;  %6627 = vmatpush.msra.mxu0 %v10637_v41  ;;  %v10641_v59 = vunpack.i.l.bf16 %v10640_v19  ;;  %v10642_v14 = vunpack.i.h.bf16 %v10640_v19  ;;  %v5799_v16 = vmul.f32 %v18114_v30, %v5671_v5  ;;  %v5423_v19 = vmul.f32 %v11207_v22, %v14472_v20 }
 0x65e   : > { %10854 = vrot.lane.b32.xlu0 %v10853_v29, %s11431_s27  ;;  %v10650_v29 = vpop.permute.xlu2 %10649  ;;  %v11209_v4 = vpop.eup %11208  ;;  %11214 = vrcp.f32 %v14496_v28  ;;  %v5801_v53 = vmul.f32 %v18117_v7, %v5673_v8  ;;  %v5548_v50 = vsub.f32 2.0, %v5420_v44  ;;  %v5675_v33 = vmul.f32 %v15309_v55, %v5547_v27 }
 0x65f   : > { %v10645_v39 = vpop.permute.xlu0 %10644  ;;  %11216 = vrcp.f32 %v14516_v46  ;;  %v5549_v20 = vsub.f32 2.0, %v5421_v61  ;;  %v5422_v60 = vmul.f32 %v11209_v4, %v14474_v26  ;;  %v10651_v2 = vunpack.i.l.bf16 %v10650_v29  ;;  %v18123_v26 = vld [vmem:[#allocation137_spill] sm:$0xff] }
 0x660   : > { %10380 = vmatmul.msk.f32.vlgmr.msra.gmra.mxu1 %vm785_vm1, %v5796_v51  ;;  %10381 = vmatmul.msk.f32.vlgmr.msra.gmra.mxu2 %vm785_vm1, %v5797_v12  ;;  %v10647_v38 = vunpack.i.h.bf16 %v10645_v39  ;;  %v10646_v41 = vunpack.i.l.bf16 %v10645_v39  ;;  %v18115_v51 = vld [vmem:[#allocation95_spill] sm:$0xff]  ;;  %v5674_v12 = vmul.f32 %v11199_v62, %v5546_v15  ;;  %v11211_v31 = vpop.eup %11210  ;;  %11218 = vrcp.f32 %v14520_v37 }
 0x661   : > { %10859 = vrot.lane.b32.xlu2 %v10858_v52, %s11431_s27  ;;  %6653 = vmatpush.msra.mxu1 %v10641_v59  ;;  %v10868_v47 = vpack.i.bf16 %v18116_v56, %v18115_v51  ;;  %v18118_v59 = vld [vmem:[#allocation185_spill] sm:$0xff]  ;;  %v11213_v0 = vpop.eup %11212  ;;  %v10652_v8 = vunpack.i.h.bf16 %v10650_v29  ;;  %v5676_v44 = vmul.f32 %v15318_v17, %v5548_v50  ;;  %v5424_v39 = vmul.f32 %v11211_v31, %v14492_v32  ;;  %v18125_v32 = vld [vmem:[#allocation126_spill] sm:$0xff]  ;;  %v18126_v51 = vld [vmem:[#allocation124_spill] sm:$0xff] }
 0x662   : > { %6679 = vmatpush.msra.mxu2 %v10642_v14  ;;  %10864 = vrot.lane.b32.xlu1 %v10863_v34, %s11431_s27  ;;  %v5800_v5 = vmul.f32 %v18118_v59, %v5672_v9  ;;  %v18120_v52 = vld [vmem:[#allocation117_spill] sm:$0xff]  ;;  %v5802_v55 = vmul.f32 %v18123_v26, %v5674_v12  ;;  %11220 = vrcp.f32 %v14522_v45  ;;  %v5677_v30 = vmul.f32 %v11205_v43, %v5549_v20  ;;  %v18128_v50 = vld [vmem:[#allocation136_spill] sm:$0xff] }
 0x663   : > { %v10873_v62 = vpack.i.bf16 %v18120_v52, %v18119_v1  ;;  %v18122_v34 = vld [vmem:[#allocation125_spill] sm:$0xff]  ;;  %v5425_v9 = vmul.f32 %v11213_v0, %v14498_v58  ;;  %v10883_v56 = vpack.i.bf16 %v18126_v51, %v18125_v32  ;;  %11222 = vrcp.f32 %v14540_v36  ;;  %v18127_v58 = vld [vmem:[#allocation138_spill] sm:$0xff] }
 0x664   : > { %10382 = vmatmul.msk.f32.vlgmr.msra.gmra.mxu3 %vm785_vm1, %v5798_v21  ;;  %10383 = vmatmul.msk.f32.vlgmr.msrb.gmra.mxu0 %vm785_vm1, %v5799_v16  ;;  %v10655_v14 = vpop.permute.xlu1 %10654  ;;  %v10878_v6 = vpack.i.bf16 %v18122_v34, %v18121_v11  ;;  %v5551_v21 = vsub.f32 2.0, %v5423_v19  ;;  %v11215_v15 = vpop.eup %11214  ;;  %v5550_v16 = vsub.f32 2.0, %v5422_v60  ;;  %v5804_v43 = vmul.f32 %v18127_v58, %v5676_v44  ;;  %v18130_v11 = vld [vmem:[#allocation140_spill] sm:$0xff] }
 0x665   : > { %6705 = vmatpush.msra.mxu3 %v10646_v41  ;;  %6731 = vmatpush.msrb.mxu0 %v10647_v38  ;;  %v18124_v38 = vld [vmem:[#allocation184_spill] sm:$0xff]  ;;  %v11217_v61 = vpop.eup %11216  ;;  %v10657_v17 = vunpack.i.h.bf16 %v10655_v14  ;;  %v10656_v29 = vunpack.i.l.bf16 %v10655_v14  ;;  %v5552_v7 = vsub.f32 2.0, %v5424_v39  ;;  %11224 = vrcp.f32 %v14546_v54  ;;  %v18131_v39 = vld [vmem:[#allocation193_spill] sm:$0xff] }
 0x666   : > { %10869 = vrot.lane.b32.xlu0 %v10868_v47, %s11431_s27  ;;  %v5803_v41 = vmul.f32 %v18124_v38, %v5675_v33  ;;  %v5679_v47 = vmul.f32 %v11207_v22, %v5551_v21  ;;  %v15374_v19 = vpop.permute.xlu2 %10664  ;;  %v11219_v12 = vpop.eup %11218  ;;  %v5805_v22 = vmul.f32 %v18128_v50, %v5677_v30  ;;  %v5678_v59 = vmul.f32 %v11209_v4, %v5550_v16  ;;  %v18132_v30 = vld [vmem:[#allocation189_spill] sm:$0xff] }
 0x667   : > { %v10660_v27 = vpop.permute.xlu0 %10659  ;;  %v5427_v33 = vmul.f32 %v11217_v61, %v14516_v46  ;;  %11226 = vrcp.f32 %v14544_v3  ;;  %v10666_v60 = vunpack.i.l.bf16 %v15374_v19  ;;  %v5680_v4 = vmul.f32 %v11211_v31, %v5552_v7 }
 0x668   : > { %10384 = vmatmul.msk.f32.vlgmr.msrb.gmra.mxu1 %vm785_vm1, %v5800_v5  ;;  %10385 = vmatmul.msk.f32.vlgmr.msrb.gmra.mxu2 %vm785_vm1, %v5801_v53  ;;  %v5426_v53 = vmul.f32 %v11215_v15, %v14496_v28  ;;  %v5553_v5 = vsub.f32 2.0, %v5425_v9  ;;  %v11221_v20 = vpop.eup %11220  ;;  %v10661_v14 = vunpack.i.l.bf16 %v10660_v27  ;;  %v18129_v28 = vld [vmem:[#allocation190_spill] sm:$0xff]  ;;  %v5429_v46 = vmul.f32 %v11219_v12, %v14520_v37 }
 0x669   : > { %10874 = vrot.lane.b32.xlu2 %v10873_v62, %s11431_s27  ;;  %6757 = vmatpush.msrb.mxu1 %v10651_v2  ;;  %v5807_v1 = vmul.f32 %v18129_v28, %v5679_v47  ;;  %11228 = vrcp.f32 %v14564_v40  ;;  %v11223_v2 = vpop.eup %11222  ;;  %v5806_v34 = vmul.f32 %v18130_v11, %v5678_v59  ;;  %v5555_v21 = vsub.f32 2.0, %v5427_v33 }
 0x66a   : > { %6783 = vmatpush.msrb.mxu2 %v10652_v8  ;;  %10879 = vrot.lane.b32.xlu1 %v10878_v6, %s11431_s27  ;;  %v5554_v62 = vsub.f32 2.0, %v5426_v53  ;;  %v5681_v6 = vmul.f32 %v11213_v0, %v5553_v5  ;;  %v5428_v8 = vmul.f32 %v11221_v20, %v14522_v45  ;;  %11230 = vrcp.f32 %v14568_v10 }
 0x66b   : > { %v11225_v26 = vpop.eup %11224  ;;  %11232 = vrcp.f32 %v14570_v24  ;;  %v5808_v0 = vmul.f32 %v18131_v39, %v5680_v4  ;;  %v5430_v45 = vmul.f32 %v11223_v2, %v14540_v36  ;;  %v5683_v9 = vmul.f32 %v11217_v61, %v5555_v21  ;;  %v18133_v61 = vld [vmem:[#allocation141_spill] sm:$0xff] }
 0x66c   : > { %10386 = vmatmul.msk.f32.vlgmr.msrb.gmra.mxu3 %vm785_vm1, %v5802_v55  ;;  %10387 = vmatmul.msk.f32.vlgmr.msra.gmra.mxu0 %vm785_vm1, %v5803_v41  ;;  %v15387_v52 = vpop.permute.xlu1 %10669  ;;  %v10662_v55 = vunpack.i.h.bf16 %v10660_v27  ;;  %v5682_v38 = vmul.f32 %v11215_v15, %v5554_v62  ;;  %v5557_v41 = vsub.f32 2.0, %v5429_v46  ;;  %v5809_v16 = vmul.f32 %v18132_v30, %v5681_v6  ;;  %v18137_v6 = vld [vmem:[#allocation144_spill] sm:$0xff] }
 0x66d   : > { %6809 = vmatpush.msrb.mxu3 %v10657_v17  ;;  %6835 = vmatpush.msra.mxu0 %v10656_v29  ;;  %v10672_v31 = vunpack.i.h.bf16 %v15387_v52  ;;  %v11227_v44 = vpop.eup %11226  ;;  %v5556_v27 = vsub.f32 2.0, %v5428_v8  ;;  %v5431_v17 = vmul.f32 %v11225_v26, %v14546_v54  ;;  %v10667_v32 = vunpack.i.h.bf16 %v15374_v19 }
 0x66e   : > { %10884 = vrot.lane.b32.xlu0 %v10883_v56, %s11431_s27  ;;  %v5432_v56 = vmul.f32 %v11227_v44, %v14544_v3  ;;  %11234 = vrcp.f32 %v14588_v48  ;;  %v15410_v15 = vpop.permute.xlu2 %10679  ;;  %v5810_v47 = vmul.f32 %v18133_v61, %v5682_v38  ;;  %v5685_v58 = vmul.f32 %v11219_v12, %v5557_v41 }
 0x66f   : > { %v15398_v37 = vpop.permute.xlu0 %10674  ;;  %v11229_v29 = vpop.eup %11228  ;;  %v5558_v54 = vsub.f32 2.0, %v5430_v45  ;;  %11236 = vrcp.f32 %v14594_v13  ;;  %v5684_v7 = vmul.f32 %v11221_v20, %v5556_v27  ;;  %v5559_v53 = vsub.f32 2.0, %v5431_v17  ;;  %v18140_v17 = vld [vmem:[#allocation203_spill] sm:$0xff] }
 0x670   : > { %10388 = vmatmul.msk.f32.vlgmr.msra.gmra.mxu1 %vm785_vm1, %v5804_v43  ;;  %10389 = vmatmul.msk.f32.vlgmr.msra.gmra.mxu2 %vm785_vm1, %v5805_v22  ;;  %v10676_v51 = vunpack.i.l.bf16 %v15398_v37  ;;  %v11231_v36 = vpop.eup %11230  ;;  %v18134_v43 = vld [vmem:[#allocation139_spill] sm:$0xff]  ;;  %v5433_v50 = vmul.f32 %v11229_v29, %v14564_v40  ;;  %11238 = vrcp.f32 %v14592_v63  ;;  %v10682_v22 = vunpack.i.h.bf16 %v15410_v15 }
 0x671   : > { %6861 = vmatpush.msra.mxu1 %v10661_v14  ;;  %6887 = vmatpush.msra.mxu2 %v10666_v60  ;;  %v11233_v19 = vpop.eup %11232  ;;  %v5811_v3 = vmul.f32 %v18134_v43, %v5683_v9  ;;  %v10671_v59 = vunpack.i.l.bf16 %v15387_v52  ;;  %v5560_v5 = vsub.f32 2.0, %v5432_v56  ;;  %v5686_v33 = vmul.f32 %v11223_v2, %v5558_v54  ;;  %v18135_v14 = vld [vmem:[#allocation196_spill] sm:$0xff]  ;;  %v18141_v54 = vld [vmem:[#allocation147_spill] sm:$0xff]  ;;  %v18142_v43 = vld [vmem:[#allocation206_spill] sm:$0xff] }
 0x672   : > { %v5435_v60 = vmul.f32 %v11231_v36, %v14568_v10  ;;  %v5434_v20 = vmul.f32 %v11233_v19, %v14570_v24  ;;  %11240 = vrcp.f32 %v14612_v18  ;;  %v5813_v28 = vmul.f32 %v18135_v14, %v5685_v58 }
 0x673   : > { %v5687_v4 = vmul.f32 %v11225_v26, %v5559_v53  ;;  %v5561_v62 = vsub.f32 2.0, %v5433_v50  ;;  %v10677_v11 = vunpack.i.h.bf16 %v15398_v37  ;;  %11242 = vrcp.f32 %v14616_v49 }
 0x674   : > { %10390 = vmatmul.msk.f32.vlgmr.msra.gmra.mxu3 %vm785_vm1, %v5806_v34  ;;  %10391 = vmatmul.msk.f32.vlgmr.msrb.gmra.mxu0 %vm785_vm1, %v5807_v1  ;;  %v15421_v12 = vpop.permute.xlu1 %10684  ;;  %v11235_v40 = vpop.eup %11234  ;;  %v18136_v1 = vld [vmem:[#allocation142_spill] sm:$0xff]  ;;  %v5688_v34 = vmul.f32 %v11227_v44, %v5560_v5  ;;  %v5814_v21 = vmul.f32 %v18137_v6, %v5686_v33  ;;  %v5563_v8 = vsub.f32 2.0, %v5435_v60  ;;  %v5562_v26 = vsub.f32 2.0, %v5434_v20  ;;  %v18143_v60 = vld [vmem:[#allocation204_spill] sm:$0xff] }
 0x675   : > { %6913 = vmatpush.msra.mxu3 %v10672_v31  ;;  %6939 = vmatpush.msrb.mxu0 %v10662_v55  ;;  %v5812_v52 = vmul.f32 %v18136_v1, %v5684_v7  ;;  %v11237_v46 = vpop.eup %11236  ;;  %v10686_v2 = vunpack.i.l.bf16 %v15421_v12  ;;  %11244 = vrcp.f32 %v14618_v42  ;;  %v18138_v55 = vld [vmem:[#allocation145_spill] sm:$0xff]  ;;  %v5689_v37 = vmul.f32 %v11229_v29, %v5561_v62  ;;  %v18145_v1 = vld [vmem:[#allocation148_spill] sm:$0xff] }
 0x676   : > { %v11239_v24 = vpop.eup %11238  ;;  %v5815_v31 = vmul.f32 %v18138_v55, %v5687_v4  ;;  %v5436_v44 = vmul.f32 %v11235_v40, %v14588_v48  ;;  %v5437_v39 = vmul.f32 %v11237_v46, %v14594_v13  ;;  %11246 = vrcp.f32 %v14636_v57  ;;  %v15447_v30 = vpop.permute.xlu2 %10694  ;;  %v18139_v48 = vld [vmem:[#allocation195_spill] sm:$0xff]  ;;  %v18146_v4 = vld [vmem:[#allocation212_spill] sm:$0xff] }
 0x677   : > { %v15433_v10 = vpop.permute.xlu0 %10689  ;;  %v10681_v38 = vunpack.i.l.bf16 %v15410_v15  ;;  %v5438_v45 = vmul.f32 %v11239_v24, %v14592_v63  ;;  %11248 = vrcp.f32 %v14642_v23  ;;  %v5691_v13 = vmul.f32 %v11231_v36, %v5563_v8 }
 0x678   : > { %10392 = vmatmul.msk.f32.vlgmr.msrb.gmra.mxu1 %vm785_vm1, %v5808_v0  ;;  %10393 = vmatmul.msk.f32.vlgmr.msrb.gmra.mxu2 %vm785_vm1, %v5809_v16  ;;  %v11241_v0 = vpop.eup %11240  ;;  %v10692_v41 = vunpack.i.h.bf16 %v15433_v10  ;;  %v5816_v16 = vmul.f32 %v18139_v48, %v5688_v34  ;;  %v5690_v9 = vmul.f32 %v11233_v19, %v5562_v26  ;;  %v5817_v29 = vmul.f32 %v18140_v17, %v5689_v37  ;;  %v18148_v26 = vld [vmem:[#allocation218_spill] sm:$0xff] }
 0x679   : > { %6965 = vmatpush.msrb.mxu1 %v10667_v32  ;;  %6991 = vmatpush.msrb.mxu2 %v10676_v51  ;;  %v11243_v27 = vpop.eup %11242  ;;  %v5564_v32 = vsub.f32 2.0, %v5436_v44  ;;  %v5565_v51 = vsub.f32 2.0, %v5437_v39  ;;  %v5439_v63 = vmul.f32 %v11241_v0, %v14612_v18  ;;  %11250 = vrcp.f32 %v14640_v35  ;;  %v18150_v44 = vld [vmem:[#allocation151_spill] sm:$0xff] }
 0x67a   : > { %v10696_v15 = vunpack.i.l.bf16 %v15447_v30  ;;  %v10687_v61 = vunpack.i.h.bf16 %v15421_v12  ;;  %v5819_v19 = vmul.f32 %v18141_v54, %v5691_v13  ;;  %v5441_v18 = vmul.f32 %v11243_v27, %v14616_v49 }
 0x67b   : > { %v11245_v56 = vpop.eup %11244  ;;  %11252 = vrcp.f32 %v14660_v25  ;;  %v5692_v53 = vmul.f32 %v11235_v40, %v5564_v32  ;;  %v5693_v50 = vmul.f32 %v11237_v46, %v5565_v51  ;;  %v10691_v5 = vunpack.i.l.bf16 %v15433_v10  ;;  %v18154_v32 = vld [vmem:[#allocation154_spill] sm:$0xff] }
 0x67c   : > { %10394 = vmatmul.msk.f32.vlgmr.msrb.gmra.mxu3 %vm785_vm1, %v5810_v47  ;;  %10395 = vmatmul.msk.f32.vlgmr.msra.gmra.mxu0 %vm785_vm1, %v5811_v3  ;;  %v5566_v47 = vsub.f32 2.0, %v5438_v45  ;;  %v15457_v58 = vpop.permute.xlu1 %10699  ;;  %v11247_v36 = vpop.eup %11246  ;;  %v5818_v3 = vmul.f32 %v18142_v43, %v5690_v9  ;;  %11254 = vrcp.f32 %v18143_v60  ;;  %v5569_v14 = vsub.f32 2.0, %v5441_v18  ;;  %v18153_v9 = vld [vmem:[#allocation211_spill] sm:$0xff] }
 0x67d   : > { %7017 = vmatpush.msrb.mxu3 %v10682_v22  ;;  %7043 = vmatpush.msra.mxu0 %v10671_v59  ;;  %v11249_v7 = vpop.eup %11248  ;;  %v5567_v22 = vsub.f32 2.0, %v5439_v63  ;;  %v5440_v59 = vmul.f32 %v11245_v56, %v14618_v42  ;;  %v10702_v12 = vunpack.i.h.bf16 %v15457_v58  ;;  %v5442_v40 = vmul.f32 %v11247_v36, %v14636_v57  ;;  %v18144_v42 = vld [vmem:[#allocation207_spill] sm:$0xff]  ;;  %v18147_v57 = vld [vmem:[#allocation213_spill] sm:$0xff] }
 0x67e   : > { %v5694_v33 = vmul.f32 %v11239_v24, %v5566_v47  ;;  %11256 = vrcp.f32 %v18144_v42  ;;  %v5821_v62 = vmul.f32 %v18146_v4, %v5693_v50  ;;  %v10697_v34 = vunpack.i.h.bf16 %v15447_v30 }
 0x67f   : > { %v15469_v20 = vpop.permute.xlu0 %10704  ;;  %v11251_v49 = vpop.eup %11250  ;;  %v5695_v46 = vmul.f32 %v11241_v0, %v5567_v22  ;;  %11258 = vrcp.f32 %v18147_v57  ;;  %v5697_v6 = vmul.f32 %v11243_v27, %v5569_v14  ;;  %v10701_v30 = vunpack.i.l.bf16 %v15457_v58  ;;  %v18158_v22 = vld [vmem:[#allocation231_spill] sm:$0xff] }
 0x680   : > { %10396 = vmatmul.msk.f32.vlgmr.msra.gmra.mxu1 %vm785_vm1, %v5812_v52  ;;  %10397 = vmatmul.msk.f32.vlgmr.msra.gmra.mxu2 %vm785_vm1, %v5813_v28  ;;  %v5443_v28 = vmul.f32 %v11249_v7, %v14642_v23  ;;  %v5820_v52 = vmul.f32 %v18145_v1, %v5692_v53  ;;  %v10706_v10 = vunpack.i.l.bf16 %v15469_v20  ;;  %v5444_v24 = vmul.f32 %v11251_v49, %v14640_v35  ;;  %v15482_v23 = vpop.permute.xlu2 %10709 }
 0x681   : > { %7069 = vmatpush.msra.mxu1 %v10677_v11  ;;  %7095 = vmatpush.msra.mxu2 %v10686_v2  ;;  %v5568_v11 = vsub.f32 2.0, %v5440_v59  ;;  %v11253_v2 = vpop.eup %11252  ;;  %11260 = vrcp.f32 %v18148_v26  ;;  %v5823_v35 = vmul.f32 %v18150_v44, %v5695_v46  ;;  %v10712_v45 = vunpack.i.h.bf16 %v15482_v23  ;;  %v18164_v44 = vld [vmem:[#allocation248_spill] sm:$0xff] }
 0x682   : > { %v5571_v8 = vsub.f32 2.0, %v5443_v28  ;;  %v11255_v55 = vpop.eup %11254  ;;  %v5445_v0 = vmul.f32 %v11253_v2, %v14660_v25  ;;  %v5572_v48 = vsub.f32 2.0, %v5444_v24  ;;  %v5825_v27 = vmul.f32 %v18153_v9, %v5697_v6 }
 0x683   : > { %v5696_v39 = vmul.f32 %v11245_v56, %v5568_v11  ;;  %v5447_v56 = vmul.f32 %v11255_v55, %v18143_v60  ;;  %v10707_v47 = vunpack.i.h.bf16 %v15469_v20  ;;  %v10711_v20 = vunpack.i.l.bf16 %v15482_v23  ;;  %v18162_v11 = vld [vmem:[#allocation226_spill] sm:$0xff]  ;;  %v18163_v23 = vld [vmem:[#allocation239_spill] sm:$0xff] }
 0x684   : > { %10398 = vmatmul.msk.f32.vlgmr.msra.gmra.mxu3 %vm785_vm1, %v5814_v21  ;;  %10399 = vmatmul.msk.f32.vlgmr.msrb.gmra.mxu0 %vm785_vm1, %v5815_v31  ;;  %v5570_v21 = vsub.f32 2.0, %v5442_v40  ;;  %v18149_v31 = vld [vmem:[#allocation150_spill] sm:$0xff]  ;;  %v15494_v13 = vpop.permute.xlu1 %10714  ;;  %v5699_v25 = vmul.f32 %v11249_v7, %v5571_v8  ;;  %v5573_v63 = vsub.f32 2.0, %v5445_v0  ;;  %v5700_v54 = vmul.f32 %v11251_v49, %v5572_v48  ;;  %v18157_v7 = vld [vmem:[#allocation157_spill] sm:$0xff] }
 0x685   : > { %7121 = vmatpush.msra.mxu3 %v10692_v41  ;;  %7147 = vmatpush.msrb.mxu0 %v10681_v38  ;;  %v5822_v37 = vmul.f32 %v18149_v31, %v5694_v33  ;;  %v11257_v38 = vpop.eup %11256  ;;  %v18151_v41 = vld [vmem:[#allocation215_spill] sm:$0xff]  ;;  %v5824_v51 = vmul.f32 %v18154_v32, %v5696_v39  ;;  %v10716_v58 = vunpack.i.l.bf16 %v15494_v13  ;;  %v18159_v40 = vld [vmem:[#allocation237_spill] sm:$0xff]  ;;  %v18165_v39 = vld [vmem:[#allocation222_spill] sm:$0xff] }
 0x686   : > { %11262 = vrcp.f32 %v18151_v41  ;;  %v5698_v17 = vmul.f32 %v11247_v36, %v5570_v21  ;;  %v5827_v53 = vmul.f32 %v18157_v7, %v5699_v25  ;;  %v10717_v21 = vunpack.i.h.bf16 %v15494_v13  ;;  %v18171_v7 = vld [vmem:[#allocation261_spill] sm:$0xff] }
 0x687   : > { %v15505_v36 = vpop.permute.xlu0 %10719 }
 0x688   : > { %10400 = vmatmul.msk.f32.vlgmr.msrb.gmra.mxu1 %vm785_vm1, %v5816_v16  ;;  %10401 = vmatmul.msk.f32.vlgmr.msrb.gmra.mxu2 %vm785_vm1, %v5817_v29  ;;  %v18152_v16 = vld [vmem:[#allocation224_spill] sm:$0xff]  ;;  %v11259_v29 = vpop.eup %11258  ;;  %v10722_v49 = vunpack.i.h.bf16 %v15505_v36  ;;  %v15518_v28 = vpop.permute.xlu2 %10724  ;;  %v10721_v13 = vunpack.i.l.bf16 %v15505_v36 }
 0x689   : > { %7173 = vmatpush.msrb.mxu1 %v10687_v61  ;;  %7199 = vmatpush.msrb.mxu2 %v10696_v15  ;;  %11264 = vrcp.f32 %v18152_v16  ;;  %v5446_v15 = vmul.f32 %v11257_v38, %v18144_v42  ;;  %v11261_v61 = vpop.eup %11260  ;;  %v5448_v50 = vmul.f32 %v11259_v29, %v18147_v57  ;;  %v18160_v42 = vld [vmem:[#allocation216_spill] sm:$0xff]  ;;  %v10726_v6 = vunpack.i.l.bf16 %v15518_v28 }
 0x68a   : > { %v5449_v60 = vmul.f32 %v11261_v61, %v18148_v26  ;;  %v5828_v1 = vmul.f32 %v18160_v42, %v5700_v54  ;;  %v10727_v36 = vunpack.i.h.bf16 %v15518_v28  ;;  %v18175_v28 = vld [vmem:[#allocation263_spill] sm:$0xff] }
 0x68b   : > { %v5574_v33 = vsub.f32 2.0, %v5446_v15  ;;  %v18170_v15 = vld [vmem:[#allocation163_spill] sm:$0xff] }
 0x68c   : > { %10402 = vmatmul.msk.f32.vlgmr.msrb.gmra.mxu3 %vm785_vm1, %v5818_v3  ;;  %10403 = vmatmul.msk.f32.vlgmr.msra.gmra.mxu0 %vm785_vm1, %v5819_v19  ;;  %v18155_v19 = vld [vmem:[#allocation227_spill] sm:$0xff]  ;;  %v11263_v43 = vpop.eup %11262  ;;  %v18156_v3 = vld [vmem:[#allocation220_spill] sm:$0xff]  ;;  %v5577_v24 = vsub.f32 2.0, %v5449_v60  ;;  %v15529_v26 = vpop.permute.xlu1 %10729 }
 0x68d   : > { %7225 = vmatpush.msrb.mxu3 %v10702_v12  ;;  %7251 = vmatpush.msra.mxu0 %v10691_v5  ;;  %11266 = vrcp.f32 %v18155_v19  ;;  %v5826_v18 = vmul.f32 %v18156_v3, %v5698_v17  ;;  %v5701_v5 = vmul.f32 %v11253_v2, %v5573_v63  ;;  %v5575_v12 = vsub.f32 2.0, %v5447_v56 }
 0x68e   : > { %11268 = vrcp.f32 %v18158_v22  ;;  %v5450_v14 = vmul.f32 %v11263_v43, %v18151_v41  ;;  %v10732_v9 = vunpack.i.h.bf16 %v15529_v26 }
 0x68f   : > { %v11265_v59 = vpop.eup %11264  ;;  %11270 = vrcp.f32 %v18159_v40  ;;  %v5829_v2 = vmul.f32 %v18162_v11, %v5701_v5  ;;  %v15542_v17 = vpop.permute.xlu0 %10734 }
 0x690   : > { %10404 = vmatmul.msk.f32.vlgmr.msra.gmra.mxu1 %vm785_vm1, %v5820_v52  ;;  %10405 = vmatmul.msk.f32.vlgmr.msra.gmra.mxu2 %vm785_vm1, %v5821_v62  ;;  %v5576_v52 = vsub.f32 2.0, %v5448_v50  ;;  %v5451_v4 = vmul.f32 %v11265_v59, %v18152_v16  ;;  %v18161_v62 = vld [vmem:[#allocation242_spill] sm:$0xff]  ;;  %v5578_v8 = vsub.f32 2.0, %v5450_v14  ;;  %v18167_v16 = vld [vmem:[#allocation251_spill] sm:$0xff]  ;;  %v10736_v3 = vunpack.i.l.bf16 %v15542_v17  ;;  %v18172_v50 = vld [vmem:[#allocation228_spill] sm:$0xff] }
 0x691   : > { %7277 = vmatpush.msra.mxu1 %v10697_v34  ;;  %7303 = vmatpush.msra.mxu2 %v10706_v10  ;;  %11272 = vrcp.f32 %v18161_v62  ;;  %v5703_v34 = vmul.f32 %v11255_v55, %v5575_v12  ;;  %v5702_v10 = vmul.f32 %v11257_v38, %v5574_v33  ;;  %v18166_v38 = vld [vmem:[#allocation160_spill] sm:$0xff]  ;;  %v18174_v33 = vld [vmem:[#allocation266_spill] sm:$0xff] }
 0x692   : > { %11274 = vrcp.f32 %v18163_v23  ;;  %v5704_v31 = vmul.f32 %v11259_v29, %v5576_v52  ;;  %v18169_v29 = vld [vmem:[#allocation232_spill] sm:$0xff] }
 0x693   : > { %v11267_v46 = vpop.eup %11266  ;;  %11276 = vrcp.f32 %v18164_v44  ;;  %v5831_v0 = vmul.f32 %v18165_v39, %v5703_v34  ;;  %v5830_v41 = vmul.f32 %v18166_v38, %v5702_v10  ;;  %v18177_v34 = vld [vmem:[#allocation272_spill] sm:$0xff] }
 0x694   : > { %10406 = vmatmul.msk.f32.vlgmr.msra.gmra.mxu3 %vm785_vm1, %v5822_v37  ;;  %10407 = vmatmul.msk.f32.vlgmr.msrb.gmra.mxu0 %vm785_vm1, %v5823_v35  ;;  %v11269_v57 = vpop.eup %11268  ;;  %v5579_v37 = vsub.f32 2.0, %v5451_v4  ;;  %v5453_v55 = vmul.f32 %v11267_v46, %v18155_v19  ;;  %11278 = vrcp.f32 %v18167_v16  ;;  %v5832_v32 = vmul.f32 %v18169_v29, %v5704_v31  ;;  %v15565_v4 = vpop.permute.xlu1 %10744 }
 0x695   : > { %7329 = vmatpush.msra.mxu3 %v10712_v45  ;;  %7355 = vmatpush.msrb.mxu0 %v10701_v30  ;;  %v11271_v35 = vpop.eup %11270  ;;  %v5705_v45 = vmul.f32 %v11261_v61, %v5577_v24  ;;  %v5452_v30 = vmul.f32 %v11269_v57, %v18158_v22  ;;  %v18178_v24 = vld [vmem:[#allocation166_spill] sm:$0xff]  ;;  %v10746_v31 = vunpack.i.l.bf16 %v15565_v4 }
 0x696   : > { %v5707_v63 = vmul.f32 %v11265_v59, %v5579_v37  ;;  %v5581_v56 = vsub.f32 2.0, %v5453_v55  ;;  %v18173_v59 = vld [vmem:[#allocation238_spill] sm:$0xff] }
 0x697   : > { %v11273_v48 = vpop.eup %11272  ;;  %v5833_v61 = vmul.f32 %v18170_v15, %v5705_v45  ;;  %v18179_v55 = vld [vmem:[#allocation274_spill] sm:$0xff]  ;;  %v18181_v45 = vld [vmem:[#allocation244_spill] sm:$0xff] }
 0x698   : > { %10408 = vmatmul.msk.f32.vlgmr.msrb.gmra.mxu1 %vm785_vm1, %v5824_v51  ;;  %10409 = vmatmul.msk.f32.vlgmr.msrb.gmra.mxu2 %vm785_vm1, %v5825_v27  ;;  %v18168_v27 = vld [vmem:[#allocation255_spill] sm:$0xff]  ;;  %v11275_v25 = vpop.eup %11274  ;;  %v5706_v51 = vmul.f32 %v11263_v43, %v5578_v8  ;;  %v5455_v54 = vmul.f32 %v11273_v48, %v18161_v62  ;;  %v15554_v43 = vpop.permute.xlu2 %10739  ;;  %v5835_v5 = vmul.f32 %v18173_v59, %v5707_v63  ;;  %v18176_v62 = vld [vmem:[#allocation234_spill] sm:$0xff]  ;;  %v18188_v59 = vld [vmem:[#allocation277_spill] sm:$0xff] }
 0x699   : > { %7381 = vmatpush.msrb.mxu1 %v10707_v47  ;;  %7407 = vmatpush.msrb.mxu2 %v10716_v58  ;;  %11280 = vrcp.f32 %v18168_v27  ;;  %v5580_v47 = vsub.f32 2.0, %v5452_v30  ;;  %v5454_v58 = vmul.f32 %v11271_v35, %v18159_v40  ;;  %v11277_v19 = vpop.eup %11276  ;;  %v5709_v12 = vmul.f32 %v11267_v46, %v5581_v56 }
 0x69a   : > { %11282 = vrcp.f32 %v18171_v7  ;;  %v5834_v22 = vmul.f32 %v18172_v50, %v5706_v51  ;;  %v5583_v14 = vsub.f32 2.0, %v5455_v54  ;;  %v5457_v40 = vmul.f32 %v11277_v19, %v18164_v44  ;;  %v15577_v44 = vpop.permute.xlu0 %10749  ;;  %v18184_v51 = vld [vmem:[#allocation305_spill] sm:$0xff]  ;;  %v18186_v54 = vld [vmem:[#allocation240_spill] sm:$0xff] }
 0x69b   : > { %11284 = vrcp.f32 %v18174_v33  ;;  %v10742_v42 = vunpack.i.h.bf16 %v15554_v43  ;;  %v5837_v46 = vmul.f32 %v18176_v62, %v5709_v12  ;;  %v10752_v29 = vunpack.i.h.bf16 %v15577_v44 }
 0x69c   : > { %10410 = vmatmul.msk.f32.vlgmr.msrb.gmra.mxu3 %vm785_vm1, %v5826_v18  ;;  %10411 = vmatmul.msk.f32.vlgmr.msra.gmra.mxu0 %vm785_vm1, %v5827_v53  ;;  %v5456_v18 = vmul.f32 %v11275_v25, %v18163_v23  ;;  %v11279_v53 = vpop.eup %11278  ;;  %11286 = vrcp.f32 %v18175_v28 }
 0x69d   : > { %7433 = vmatpush.msrb.mxu3 %v10722_v49  ;;  %7459 = vmatpush.msra.mxu0 %v10711_v20  ;;  %v5708_v20 = vmul.f32 %v11269_v57, %v5580_v47  ;;  %v5582_v49 = vsub.f32 2.0, %v5454_v58  ;;  %v5459_v11 = vmul.f32 %v11279_v53, %v18167_v16  ;;  %11288 = vrcp.f32 %v18177_v34 }
 0x69e   : > { %v5584_v52 = vsub.f32 2.0, %v5456_v18  ;;  %11290 = vrcp.f32 %v18179_v55 }
 0x69f   : > { %v11281_v60 = vpop.eup %11280  ;;  %v5836_v57 = vmul.f32 %v18178_v24, %v5708_v20  ;;  %v5710_v23 = vmul.f32 %v11271_v35, %v5582_v49  ;;  %v18190_v20 = vld [vmem:[#allocation253_spill] sm:$0xff] }
 0x6a0   : > { %10412 = vmatmul.msk.f32.vlgmr.msra.gmra.mxu1 %vm785_vm1, %v5828_v1  ;;  %10413 = vmatmul.msk.f32.vlgmr.msra.gmra.mxu2 %vm785_vm1, %v5829_v2  ;;  %v10731_v1 = vunpack.i.l.bf16 %v15529_v26  ;;  %v5458_v2 = vmul.f32 %v11281_v60, %v18168_v27  ;;  %v11283_v10 = vpop.eup %11282  ;;  %v10737_v26 = vunpack.i.h.bf16 %v15542_v17  ;;  %v5712_v37 = vmul.f32 %v11275_v25, %v5584_v52  ;;  %v18183_v17 = vld [vmem:[#allocation283_spill] sm:$0xff]  ;;  %v15591_v63 = vpop.permute.xlu2 %10754 }
 0x6a1   : > { %7485 = vmatpush.msra.mxu1 %v10717_v21  ;;  %7511 = vmatpush.msra.mxu2 %v10726_v6  ;;  %v5711_v6 = vmul.f32 %v11273_v48, %v5583_v14  ;;  %v5585_v21 = vsub.f32 2.0, %v5457_v40  ;;  %v11285_v8 = vpop.eup %11284  ;;  %v5460_v35 = vmul.f32 %v11283_v10, %v18171_v7  ;;  %v5838_v30 = vmul.f32 %v18181_v45, %v5710_v23  ;;  %v18182_v48 = vld [vmem:[#allocation247_spill] sm:$0xff]  ;;  %v18191_v40 = vld [vmem:[#allocation284_spill] sm:$0xff] }
 0x6a2   : > { %v11287_v39 = vpop.eup %11286  ;;  %v5586_v38 = vsub.f32 2.0, %v5458_v2  ;;  %v10741_v25 = vunpack.i.l.bf16 %v15554_v43  ;;  %v10756_v50 = vunpack.i.l.bf16 %v15591_v63  ;;  %v15624_v24 = vpop.permute.xlu0 %10764 }
 0x6a3   : > { %v5839_v16 = vmul.f32 %v18182_v48, %v5711_v6  ;;  %v11289_v27 = vpop.eup %11288 }
 0x6a4   : > { %10414 = vmatmul.msk.f32.vlgmr.msra.gmra.mxu3 %vm785_vm1, %v5830_v41  ;;  %10415 = vmatmul.msk.f32.vlgmr.msrb.gmra.mxu0 %vm785_vm1, %v5831_v0  ;;  %v5587_v0 = vsub.f32 2.0, %v5459_v11  ;;  %v18180_v41 = vld [vmem:[#allocation278_spill] sm:$0xff]  ;;  %v5714_v15 = vmul.f32 %v11281_v60, %v5586_v38  ;;  %v15597_v58 = vpop.eup %11290  ;;  %v5463_v7 = vmul.f32 %v11289_v27, %v18177_v34 }
 0x6a5   : > { %7537 = vmatpush.msra.mxu3 %v10732_v9  ;;  %7563 = vmatpush.msrb.mxu0 %v10721_v13  ;;  %11292 = vrcp.f32 %v18180_v41  ;;  %v5713_v13 = vmul.f32 %v11277_v19, %v5585_v21  ;;  %v5461_v9 = vmul.f32 %v11285_v8, %v18174_v33  ;;  %v5840_v19 = vmul.f32 %v18186_v54, %v5712_v37  ;;  %v18189_v33 = vld [vmem:[#allocation170_spill] sm:$0xff]  ;;  %v18198_v37 = vld [vmem:[#allocation171_spill] sm:$0xff] }
 0x6a6   : > { %11294 = vrcp.f32 %v18183_v17  ;;  %v5715_v56 = vmul.f32 %v11279_v53, %v5587_v0  ;;  %v10747_v53 = vunpack.i.h.bf16 %v15565_v4  ;;  %v5842_v49 = vmul.f32 %v18190_v20, %v5714_v15  ;;  %v18208_v20 = vld [vmem:[#allocation258_spill] sm:$0xff] }
 0x6a7   : > { %11296 = vrcp.f32 %v18184_v51  ;;  %v5589_v18 = vsub.f32 2.0, %v5461_v9  ;;  %v5591_v52 = vsub.f32 2.0, %v5463_v7  ;;  %v5465_v4 = vmul.f32 %v15597_v58, %v18179_v55  ;;  %v18205_v7 = vld [vmem:[#allocation313_spill] sm:$0xff] }
 0x6a8   : > { %10416 = vmatmul.msk.f32.vlgmr.msrb.gmra.mxu1 %vm785_vm1, %v5832_v32  ;;  %10417 = vmatmul.msk.f32.vlgmr.msrb.gmra.mxu2 %vm785_vm1, %v5833_v61  ;;  %v5462_v32 = vmul.f32 %v11287_v39, %v18175_v28  ;;  %v5588_v61 = vsub.f32 2.0, %v5460_v35  ;;  %11298 = vrcp.f32 %v18188_v59  ;;  %v5843_v60 = vmul.f32 %v18189_v33, %v5715_v56  ;;  %v18207_v33 = vld [vmem:[#allocation262_spill] sm:$0xff] }
 0x6a9   : > { %7589 = vmatpush.msrb.mxu1 %v10727_v36  ;;  %7615 = vmatpush.msrb.mxu2 %v10736_v3  ;;  %v18187_v36 = vld [vmem:[#allocation169_spill] sm:$0xff]  ;;  %11300 = vrcp.f32 %v18191_v40  ;;  %v10757_v35 = vunpack.i.h.bf16 %v15591_v63 }
 0x6aa   : > { %v5841_v3 = vmul.f32 %v18187_v36, %v5713_v13  ;;  %v5716_v14 = vmul.f32 %v11283_v10, %v5588_v61  ;;  %v18194_v10 = vld [vmem:[#allocation134_spill] sm:$0xff]  ;;  %v15642_v13 = vpop.permute.xlu2 %10769 }
 0x6ab   : > { %v11293_v43 = vpop.eup %11292  ;;  %11302 = vrcp.f32 %v18194_v10  ;;  %v10772_v36 = vunpack.i.h.bf16 %v15642_v13 }
 0x6ac   : > { %10418 = vmatmul.msk.f32.vlgmr.msrb.gmra.mxu3 %vm785_vm1, %v5834_v22  ;;  %10419 = vmatmul.msk.f32.vlgmr.msra.gmra.mxu0 %vm785_vm1, %v5835_v5  ;;  %v15595_v47 = vpop.f32.mrf.mxu1  ;;  %v5590_v22 = vsub.f32 2.0, %v5462_v32  ;;  %v15605_v5 = vpop.permute.xlu1 %10759  ;;  %v5464_v62 = vmul.f32 %v11293_v43, %v18180_v41  ;;  %v10766_v41 = vunpack.i.l.bf16 %v15624_v24 }
 0x6ad   : > { %7641 = vmatpush.msrb.mxu3 %v10742_v42  ;;  %7667 = vmatpush.msra.mxu0 %v10731_v1  ;;  %18185 = vst [vmem:[#allocation26_spill] sm:$0xff] %v15595_v47  ;;  %v15609_v12 = vpop.eup %11294  ;;  %v5717_v1 = vmul.f32 %v11285_v8, %v5589_v18  ;;  %v10762_v11 = vunpack.i.h.bf16 %v15605_v5  ;;  %v18196_v8 = vld [vmem:[#allocation200_spill] sm:$0xff] }
 0x6ae   : > { %v11297_v42 = vpop.eup %11296  ;;  %v5718_v34 = vmul.f32 %v11287_v39, %v5590_v22  ;;  %v5466_v6 = vmul.f32 %v15609_v12, %v18183_v17  ;;  %11304 = vrcp.f32 %v18196_v8  ;;  %v5593_v39 = vsub.f32 2.0, %v5465_v4 }
 0x6af   : > { %v5467_v21 = vmul.f32 %v11297_v42, %v18184_v51  ;;  %v5845_v55 = vmul.f32 %v18198_v37, %v5717_v1  ;;  %v5592_v0 = vsub.f32 2.0, %v5464_v62  ;;  %v18203_v51 = vld [vmem:[#allocation259_spill] sm:$0xff] }
 0x6b0   : > { %10420 = vmatmul.msk.f32.vlgmr.msra.gmra.mxu1 %vm785_vm1, %v5836_v57  ;;  %10421 = vmatmul.msk.f32.vlgmr.msra.gmra.mxu2 %vm785_vm1, %v5837_v46  ;;  %v10751_v46 = vunpack.i.l.bf16 %v15577_v44  ;;  %v18195_v57 = vld [vmem:[#allocation172_spill] sm:$0xff]  ;;  %v5719_v44 = vmul.f32 %v11289_v27, %v5591_v52  ;;  %v5594_v9 = vsub.f32 2.0, %v5466_v6  ;;  %v5721_v56 = vmul.f32 %v15597_v58, %v5593_v39  ;;  %v18209_v52 = vld [vmem:[#allocation314_spill] sm:$0xff]  ;;  %v18210_v62 = vld [vmem:[#allocation315_spill] sm:$0xff] }
 0x6b1   : > { %7693 = vmatpush.msra.mxu1 %v10737_v26  ;;  %7719 = vmatpush.msra.mxu2 %v10746_v31  ;;  %v5844_v23 = vmul.f32 %v18195_v57, %v5716_v14  ;;  %v11299_v31 = vpop.eup %11298  ;;  %v5595_v17 = vsub.f32 2.0, %v5467_v21  ;;  %v5720_v15 = vmul.f32 %v11293_v43, %v5592_v0  ;;  %v10771_v0 = vunpack.i.l.bf16 %v15642_v13 }
 0x6b2   : > { %v15621_v2 = vpop.f32.mrf.mxu2  ;;  %v11301_v38 = vpop.eup %11300  ;;  %v5468_v27 = vmul.f32 %v11299_v31, %v18188_v59  ;;  %v5847_v63 = vmul.f32 %v18203_v51, %v5719_v44  ;;  %v5722_v58 = vmul.f32 %v15609_v12, %v5594_v9  ;;  %v10767_v12 = vunpack.i.h.bf16 %v15624_v24 }
 0x6b3   : > { %18193 = vst [vmem:[#allocation49_spill] sm:$0xff] %v15621_v2  ;;  %v11303_v32 = vpop.eup %11302  ;;  %v5469_v61 = vmul.f32 %v11301_v38, %v18191_v40 }
 0x6b4   : > { %10422 = vmatmul.msk.f32.vlgmr.msra.gmra.mxu3 %vm785_vm1, %v5838_v30  ;;  %10423 = vmatmul.msk.f32.vlgmr.msrb.gmra.mxu0 %vm785_vm1, %v5839_v16  ;;  %v18200_v30 = vld [vmem:[#allocation173_spill] sm:$0xff]  ;;  %v18201_v16 = vld [vmem:[#allocation308_spill] sm:$0xff]  ;;  %v11305_v54 = vpop.eup %11304  ;;  %v5596_v43 = vsub.f32 2.0, %v5468_v27  ;;  %v5471_v22 = vmul.f32 %v11303_v32, %v18194_v10 }
 0x6b5   : > { %7745 = vmatpush.msra.mxu3 %v10752_v29  ;;  %7771 = vmatpush.msrb.mxu0 %v10741_v25  ;;  %v5846_v48 = vmul.f32 %v18200_v30, %v5718_v34  ;;  %11306 = vrcp.f32 %v18201_v16  ;;  %v18202_v25 = vld [vmem:[#allocation311_spill] sm:$0xff]  ;;  %v5597_v14 = vsub.f32 2.0, %v5469_v61  ;;  %v5470_v40 = vmul.f32 %v11305_v54, %v18196_v8  ;;  %v18211_v34 = vld [vmem:[#allocation174_spill] sm:$0xff]  ;;  %v18215_v30 = vld [vmem:[#allocation316_spill] sm:$0xff] }
 0x6b6   : > { %11308 = vrcp.f32 %v18202_v25  ;;  %v5850_v10 = vmul.f32 %v18211_v34, %v5722_v58  ;;  %v5724_v57 = vmul.f32 %v11299_v31, %v5596_v43  ;;  %v5599_v21 = vsub.f32 2.0, %v5471_v22 }
 0x6b7   : > { %v5725_v37 = vmul.f32 %v11301_v38, %v5597_v14  ;;  %v18224_v14 = vld [vmem:[#allocation264_spill] sm:$0xff] }
 0x6b8   : > { %10424 = vmatmul.msk.f32.vlgmr.msrb.gmra.mxu1 %vm785_vm1, %v5840_v19  ;;  %10425 = vmatmul.msk.f32.vlgmr.msrb.gmra.mxu2 %vm785_vm1, %v5841_v3  ;;  %v18204_v19 = vld [vmem:[#allocation310_spill] sm:$0xff]  ;;  %v10761_v3 = vunpack.i.l.bf16 %v15605_v5  ;;  %v5727_v27 = vmul.f32 %v11303_v32, %v5599_v21 }
 0x6b9   : > { %v15614_v28 = vpop.f32.mrf.mxu0  ;;  %7797 = vmatpush.msrb.mxu1 %v10747_v53  ;;  %7823 = vmatpush.msrb.mxu2 %v10756_v50  ;;  %11310 = vrcp.f32 %v18204_v19  ;;  %v15659_v50 = vpop.permute.xlu1 %10774  ;;  %v5723_v53 = vmul.f32 %v11297_v42, %v5595_v17  ;;  %v18217_v17 = vld [vmem:[#allocation318_spill] sm:$0xff] }
 0x6ba   : > { %18192 = vst [vmem:[#allocation38_spill] sm:$0xff] %v15614_v28  ;;  %11312 = vrcp.f32 %v18205_v7  ;;  %v10776_v42 = vunpack.i.l.bf16 %v15659_v50 }
 0x6bb   : > { %v15667_v5 = vpop.eup %11306  ;;  %11314 = vrcp.f32 %v18209_v52 }
 0x6bc   : > { %10426 = vmatmul.msk.f32.vlgmr.msrb.gmra.mxu3 %vm785_vm1, %v5842_v49  ;;  %10427 = vmatmul.msk.f32.vlgmr.msra.gmra.mxu0 %vm785_vm1, %v5843_v60  ;;  %v5849_v60 = vmul.f32 %v18207_v33, %v5721_v56  ;;  %v5848_v49 = vmul.f32 %v18208_v20, %v5720_v15  ;;  %v11309_v1 = vpop.eup %11308  ;;  %11316 = vrcp.f32 %v18210_v62  ;;  %v5472_v44 = vmul.f32 %v15667_v5, %v18201_v16  ;;  %v18216_v16 = vld [vmem:[#allocation265_spill] sm:$0xff]  ;;  %v18222_v33 = vld [vmem:[#allocation319_spill] sm:$0xff] }
 0x6bd   : > { %7849 = vmatpush.msrb.mxu3 %v10762_v11  ;;  %7875 = vmatpush.msra.mxu0 %v10751_v46  ;;  %v15633_v26 = vpop.f32.mrf.mxu1  ;;  %v15678_v46 = vpop.permute.xlu0 %10779  ;;  %v5473_v39 = vmul.f32 %v11309_v1, %v18202_v25  ;;  %11318 = vrcp.f32 %v18215_v30  ;;  %v5852_v9 = vmul.f32 %v18216_v16, %v5724_v57  ;;  %v18223_v20 = vld [vmem:[#allocation181_spill] sm:$0xff] }
 0x6be   : > { %18197 = vst [vmem:[#allocation41_spill] sm:$0xff] %v15633_v26  ;;  %v15638_v45 = vpop.f32.mrf.mxu3  ;;  %11320 = vrcp.f32 %v18217_v17  ;;  %v5600_v61 = vsub.f32 2.0, %v5472_v44  ;;  %v18228_v44 = vld [vmem:[#allocation177_spill] sm:$0xff]  ;;  %v18270_v26 = vld [vmem:[#allocation42_spill] sm:$0xff] }
 0x6bf   : > { %18199 = vst [vmem:[#allocation53_spill] sm:$0xff] %v15638_v45  ;;  %v11311_v11 = vpop.eup %11310 }
 0x6c0   : > { %10428 = vmatmul.msk.f32.vlgmr.msra.gmra.mxu1 %vm785_vm1, %v5844_v23  ;;  %10429 = vmatmul.msk.f32.vlgmr.msra.gmra.mxu2 %vm785_vm1, %v5845_v55  ;;  %v18212_v23 = vld [vmem:[#allocation178_spill] sm:$0xff]  ;;  %v11313_v8 = vpop.eup %11312  ;;  %v5598_v55 = vsub.f32 2.0, %v5470_v40 }
 0x6c1   : > { %v15648_v29 = vpop.f32.mrf.mxu0  ;;  %7901 = vmatpush.msra.mxu1 %v10757_v35  ;;  %7927 = vmatpush.msra.mxu2 %v10766_v41  ;;  %v5851_v6 = vmul.f32 %v18212_v23, %v5723_v53  ;;  %v10782_v35 = vunpack.i.h.bf16 %v15678_v46  ;;  %v5474_v41 = vmul.f32 %v11311_v11, %v18204_v19  ;;  %v15699_v38 = vpop.eup %11314  ;;  %v5475_v13 = vmul.f32 %v11313_v8, %v18205_v7  ;;  %v18221_v7 = vld [vmem:[#allocation317_spill] sm:$0xff] }
 0x6c2   : > { %v11317_v51 = vpop.eup %11316  ;;  %v5726_v15 = vmul.f32 %v11305_v54, %v5598_v55  ;;  %v5601_v19 = vsub.f32 2.0, %v5473_v39  ;;  %11322 = vrcp.f32 %v18221_v7  ;;  %v15712_v43 = vpop.permute.xlu1 %10789  ;;  %v5477_v54 = vmul.f32 %v15699_v38, %v18209_v52 }
 0x6c3   : > { %v15656_v18 = vpop.f32.mrf.mxu2  ;;  %v5602_v32 = vsub.f32 2.0, %v5474_v41  ;;  %v5603_v53 = vsub.f32 2.0, %v5475_v13  ;;  %v5476_v22 = vmul.f32 %v11317_v51, %v18210_v62  ;;  %11324 = vrcp.f32 %v18222_v33 }
 0x6c4   : > { %10430 = vmatmul.msk.f32.vlgmr.msra.gmra.mxu3 %vm785_vm1, %v5846_v48  ;;  %10431 = vmatmul.msk.f32.vlgmr.msrb.gmra.mxu0 %vm785_vm1, %v5847_v63  ;;  %v15695_v48 = vpop.permute.xlu2 %10784  ;;  %v18219_v63 = vld [vmem:[#allocation268_spill] sm:$0xff]  ;;  %v5854_v40 = vmul.f32 %v18224_v14, %v5726_v15  ;;  %v10781_v52 = vunpack.i.l.bf16 %v15678_v46  ;;  %v10792_v62 = vunpack.i.h.bf16 %v15712_v43  ;;  %v18232_v15 = vld [vmem:[#allocation6_spill] sm:$0xff] }
 0x6c5   : > { %7953 = vmatpush.msra.mxu3 %v10772_v36  ;;  %7979 = vmatpush.msrb.mxu0 %v10761_v3  ;;  %v15665_v59 = vpop.f32.mrf.mxu1  ;;  %v5853_v56 = vmul.f32 %v18219_v63, %v5725_v37  ;;  %v10786_v36 = vunpack.i.l.bf16 %v15695_v48  ;;  %v10777_v3 = vunpack.i.h.bf16 %v15659_v50  ;;  %v5730_v23 = vmul.f32 %v11311_v11, %v5602_v32  ;;  %v15733_v21 = vpop.permute.xlu0 %10794  ;;  %v18229_v11 = vld [vmem:[#allocation183_spill] sm:$0xff] }
 0x6c6   : > { %18206 = vst [vmem:[#allocation64_spill] sm:$0xff] %v15665_v59  ;;  %v5604_v37 = vsub.f32 2.0, %v5476_v22  ;;  %v18231_v63 = vld [vmem:[#allocation271_spill] sm:$0xff] }
 0x6c7   : > { %v15675_v4 = vpop.f32.mrf.mxu3 }
 0x6c8   : > { %10432 = vmatmul.msk.f32.vlgmr.msrb.gmra.mxu1 %vm785_vm1, %v5848_v49  ;;  %10433 = vmatmul.msk.f32.vlgmr.msrb.gmra.mxu2 %vm785_vm1, %v5849_v60  ;;  %v15722_v60 = vpop.eup %11318  ;;  %v5855_v49 = vmul.f32 %v18223_v20, %v5727_v27  ;;  %v10796_v27 = vunpack.i.l.bf16 %v15733_v21 }
 0x6c9   : > { %v15684_v24 = vpop.f32.mrf.mxu0  ;;  %8005 = vmatpush.msrb.mxu1 %v10767_v12  ;;  %8031 = vmatpush.msrb.mxu2 %v10776_v42  ;;  %v5728_v12 = vmul.f32 %v15667_v5, %v5600_v61  ;;  %v5729_v42 = vmul.f32 %v11309_v1, %v5601_v19  ;;  %v11321_v34 = vpop.eup %11320  ;;  %v5731_v5 = vmul.f32 %v11313_v8, %v5603_v53  ;;  %v5605_v1 = vsub.f32 2.0, %v5477_v54 }
 0x6ca   : > { %18213 = vst [vmem:[#allocation75_spill] sm:$0xff] %v15684_v24  ;;  %v15739_v46 = vpop.eup %11322  ;;  %v5479_v41 = vmul.f32 %v11321_v34, %v18217_v17  ;;  %v10787_v8 = vunpack.i.h.bf16 %v15695_v48  ;;  %v18233_v17 = vld [vmem:[#allocation186_spill] sm:$0xff]  ;;  %v5732_v48 = vmul.f32 %v11317_v51, %v5604_v37 }
 0x6cb   : > { %v15691_v31 = vpop.f32.mrf.mxu2  ;;  %v5856_v39 = vmul.f32 %v18228_v44, %v5728_v12  ;;  %v11325_v16 = vpop.eup %11324  ;;  %v5859_v19 = vmul.f32 %v18233_v17, %v5731_v5  ;;  %v5480_v54 = vmul.f32 %v15739_v46, %v18221_v7  ;;  %v18239_v5 = vld [vmem:[#allocation7_spill] sm:$0xff]  ;;  %v18244_v17 = vld [vmem:[#allocation276_spill] sm:$0xff]  ;;  %v18302_v24 = vld [vmem:[#allocation102_spill] sm:$0xff] }
 0x6cc   : > { %18214 = vst [vmem:[#allocation54_spill] sm:$0xff] %v15691_v31  ;;  %10434 = vmatmul.msk.f32.vlgmr.msrb.gmra.mxu3 %vm785_vm1, %v5850_v10  ;;  %10435 = vmatmul.msk.f32.vlgmr.msra.gmra.mxu0 %vm785_vm1, %v5851_v6  ;;  %v18225_v10 = vld [vmem:[#allocation4_spill] sm:$0xff]  ;;  %v18227_v6 = vld [vmem:[#allocation5_spill] sm:$0xff]  ;;  %v15753_v61 = vpop.permute.xlu2 %10799  ;;  %v5607_v22 = vsub.f32 2.0, %v5479_v41  ;;  %v5481_v20 = vmul.f32 %v11325_v16, %v18222_v33  ;;  %v15770_v12 = vpop.permute.xlu1 %10804 }
 0x6cd   : > { %8057 = vmatpush.msrb.mxu3 %v10782_v35  ;;  %8083 = vmatpush.msra.mxu0 %v10771_v0  ;;  %v15704_v25 = vpop.f32.mrf.mxu1  ;;  %11326 = vrcp.f32 %v18225_v10  ;;  %v5857_v0 = vmul.f32 %v18229_v11, %v5729_v42  ;;  %v5478_v35 = vmul.f32 %v15722_v60, %v18215_v30  ;;  %v10802_v14 = vunpack.i.h.bf16 %v15753_v61  ;;  %v18237_v42 = vld [vmem:[#allocation270_spill] sm:$0xff] }
 0x6ce   : > { %18218 = vst [vmem:[#allocation66_spill] sm:$0xff] %v15704_v25  ;;  %11328 = vrcp.f32 %v18227_v6  ;;  %v5608_v37 = vsub.f32 2.0, %v5480_v54  ;;  %v5735_v44 = vmul.f32 %v11321_v34, %v5607_v22  ;;  %v10797_v11 = vunpack.i.h.bf16 %v15733_v21 }
 0x6cf   : > { %v15709_v58 = vpop.f32.mrf.mxu3  ;;  %v5606_v53 = vsub.f32 2.0, %v5478_v35 }
 0x6d0   : > { %18220 = vst [vmem:[#allocation77_spill] sm:$0xff] %v15709_v58  ;;  %10436 = vmatmul.msk.f32.vlgmr.msra.gmra.mxu1 %vm785_vm1, %v5852_v9  ;;  %10437 = vmatmul.msk.f32.vlgmr.msra.gmra.mxu2 %vm785_vm1, %v5853_v56  ;;  %v18230_v9 = vld [vmem:[#allocation2_spill] sm:$0xff]  ;;  %v5858_v56 = vmul.f32 %v18231_v63, %v5730_v23  ;;  %v18243_v63 = vld [vmem:[#allocation9_spill] sm:$0xff] }
 0x6d1   : > { %v15720_v50 = vpop.f32.mrf.mxu0  ;;  %8109 = vmatpush.msra.mxu1 %v10777_v3  ;;  %8135 = vmatpush.msra.mxu2 %v10786_v36  ;;  %11330 = vrcp.f32 %v18230_v9  ;;  %v5733_v36 = vmul.f32 %v15699_v38, %v5605_v1  ;;  %v5734_v1 = vmul.f32 %v15722_v60, %v5606_v53 }
 0x6d2   : > { %11332 = vrcp.f32 %v18232_v15 }
 0x6d3   : > { %v15730_v57 = vpop.f32.mrf.mxu2  ;;  %v11327_v30 = vpop.eup %11326  ;;  %v5861_v33 = vmul.f32 %v18237_v42, %v5733_v36  ;;  %v5736_v36 = vmul.f32 %v15739_v46, %v5608_v37  ;;  %v18248_v42 = vld [vmem:[#allocation14_spill] sm:$0xff] }
 0x6d4   : > { %18226 = vst [vmem:[#allocation89_spill] sm:$0xff] %v15730_v57  ;;  %10438 = vmatmul.msk.f32.vlgmr.msra.gmra.mxu3 %vm785_vm1, %v5854_v40  ;;  %10439 = vmatmul.msk.f32.vlgmr.msrb.gmra.mxu0 %vm785_vm1, %v5855_v49  ;;  %v11329_v32 = vpop.eup %11328  ;;  %v18235_v49 = vld [vmem:[#allocation3_spill] sm:$0xff]  ;;  %v10791_v40 = vunpack.i.l.bf16 %v15712_v43  ;;  %v5483_v51 = vmul.f32 %v11327_v30, %v18225_v10 }
 0x6d5   : > { %8161 = vmatpush.msra.mxu3 %v10792_v62  ;;  %8187 = vmatpush.msrb.mxu0 %v10781_v52  ;;  %v15737_v55 = vpop.f32.mrf.mxu1  ;;  %11334 = vrcp.f32 %v18235_v49  ;;  %v18238_v52 = vld [vmem:[#allocation182_spill] sm:$0xff]  ;;  %v5482_v23 = vmul.f32 %v11329_v32, %v18227_v6  ;;  %v18242_v6 = vld [vmem:[#allocation8_spill] sm:$0xff] }
 0x6d6   : > { %v5860_v62 = vmul.f32 %v18238_v52, %v5732_v48  ;;  %11336 = vrcp.f32 %v18239_v5  ;;  %v5611_v41 = vsub.f32 2.0, %v5483_v51  ;;  %v18245_v48 = vld [vmem:[#allocation279_spill] sm:$0xff] }
 0x6d7   : > { %v15749_v13 = vpop.f32.mrf.mxu3  ;;  %v15774_v7 = vpop.eup %11330  ;;  %11338 = vrcp.f32 %v18242_v6  ;;  %v5610_v60 = vsub.f32 2.0, %v5482_v23  ;;  %v5863_v53 = vmul.f32 %v18245_v48, %v5735_v44 }
 0x6d8   : > { %10440 = vmatmul.msk.f32.vlgmr.msrb.gmra.mxu1 %vm785_vm1, %v5856_v39  ;;  %10441 = vmatmul.msk.f32.vlgmr.msrb.gmra.mxu2 %vm785_vm1, %v5857_v0  ;;  %v11333_v10 = vpop.eup %11332  ;;  %v5609_v39 = vsub.f32 2.0, %v5481_v20  ;;  %v10806_v0 = vunpack.i.l.bf16 %v15770_v12  ;;  %v5484_v34 = vmul.f32 %v15774_v7, %v18230_v9  ;;  %11340 = vrcp.f32 %v18243_v63  ;;  %v18246_v20 = vld [vmem:[#allocation10_spill] sm:$0xff] }
 0x6d9   : > { %v15759_v3 = vpop.f32.mrf.mxu0  ;;  %8213 = vmatpush.msrb.mxu1 %v10787_v8  ;;  %8239 = vmatpush.msrb.mxu2 %v10796_v27  ;;  %v15788_v8 = vpop.permute.xlu0 %10809  ;;  %v5485_v21 = vmul.f32 %v11333_v10, %v18232_v15  ;;  %11342 = vrcp.f32 %v18246_v20  ;;  %v10801_v9 = vunpack.i.l.bf16 %v15753_v61  ;;  %v5738_v46 = vmul.f32 %v11329_v32, %v5610_v60 }
 0x6da   : > { %18234 = vst [vmem:[#allocation60_spill] sm:$0xff] %v15759_v3  ;;  %v5737_v54 = vmul.f32 %v11325_v16, %v5609_v39  ;;  %v10812_v15 = vunpack.i.h.bf16 %v15788_v8  ;;  %11344 = vrcp.f32 %v18248_v42  ;;  %v5612_v16 = vsub.f32 2.0, %v5484_v34  ;;  %v18251_v39 = vld [vmem:[#allocation12_spill] sm:$0xff] }
 0x6db   : > { %v15767_v38 = vpop.f32.mrf.mxu2  ;;  %v11335_v27 = vpop.eup %11334  ;;  %v5613_v52 = vsub.f32 2.0, %v5485_v21  ;;  %11346 = vrcp.f32 %v18251_v39  ;;  %v10807_v32 = vunpack.i.h.bf16 %v15770_v12 }
 0x6dc   : > { %18236 = vst [vmem:[#allocation74_spill] sm:$0xff] %v15767_v38  ;;  %10442 = vmatmul.msk.f32.vlgmr.msrb.gmra.mxu3 %vm785_vm1, %v5858_v56  ;;  %10443 = vmatmul.msk.f32.vlgmr.msra.gmra.mxu0 %vm785_vm1, %v5859_v19  ;;  %v5862_v19 = vmul.f32 %v18244_v17, %v5734_v1  ;;  %v11337_v22 = vpop.eup %11336  ;;  %v5486_v51 = vmul.f32 %v11335_v27, %v18235_v49  ;;  %v18250_v49 = vld [vmem:[#allocation191_spill] sm:$0xff]  ;;  %v15825_v21 = vpop.permute.xlu1 %10819 }
 0x6dd   : > { %8265 = vmatpush.msrb.mxu3 %v10802_v14  ;;  %8291 = vmatpush.msra.mxu0 %v10791_v40  ;;  %v15780_v43 = vpop.f32.mrf.mxu1  ;;  %v5739_v40 = vmul.f32 %v11327_v30, %v5611_v41  ;;  %v18249_v30 = vld [vmem:[#allocation188_spill] sm:$0xff]  ;;  %v5865_v1 = vmul.f32 %v18250_v49, %v5737_v54  ;;  %v5487_v37 = vmul.f32 %v11337_v22, %v18239_v5  ;;  %v18253_v41 = vld [vmem:[#allocation275_spill] sm:$0xff]  ;;  %v10821_v57 = vunpack.i.l.bf16 %v15825_v21 }
 0x6de   : > { %18240 = vst [vmem:[#allocation86_spill] sm:$0xff] %v15780_v43  ;;  %v5864_v23 = vmul.f32 %v18249_v30, %v5736_v36  ;;  %v5614_v34 = vsub.f32 2.0, %v5486_v51  ;;  %v18254_v5 = vld [vmem:[#allocation187_spill] sm:$0xff]  ;;  %v5740_v36 = vmul.f32 %v15774_v7, %v5612_v16  ;;  %v5741_v48 = vmul.f32 %v11333_v10, %v5613_v52  ;;  %v18257_v10 = vld [vmem:[#allocation20_spill] sm:$0xff]  ;;  %v18258_v52 = vld [vmem:[#allocation282_spill] sm:$0xff] }
 0x6df   : > { %v15785_v35 = vpop.f32.mrf.mxu3  ;;  %v5867_v60 = vmul.f32 %v18253_v41, %v5739_v40  ;;  %v5615_v54 = vsub.f32 2.0, %v5487_v37  ;;  %v18256_v40 = vld [vmem:[#allocation15_spill] sm:$0xff]  ;;  %v10811_v51 = vunpack.i.l.bf16 %v15788_v8  ;;  %v18259_v49 = vld [vmem:[#allocation24_spill] sm:$0xff] }
 0x6e0   : > { %18241 = vst [vmem:[#allocation98_spill] sm:$0xff] %v15785_v35  ;;  %10444 = vmatmul.msk.f32.vlgmr.msra.gmra.mxu1 %vm785_vm1, %v5860_v62  ;;  %10445 = vmatmul.msk.f32.vlgmr.msra.gmra.mxu2 %vm785_vm1, %v5861_v33  ;;  %v15808_v33 = vpop.permute.xlu2 %10814  ;;  %v15814_v62 = vpop.eup %11338  ;;  %11348 = vrcp.f32 %v18256_v40  ;;  %v5742_v7 = vmul.f32 %v11335_v27, %v5614_v34 }
 0x6e1   : > { %v15796_v56 = vpop.f32.mrf.mxu0  ;;  %8317 = vmatpush.msra.mxu1 %v10797_v11  ;;  %8343 = vmatpush.msra.mxu2 %v10806_v0  ;;  %v11341_v44 = vpop.eup %11340  ;;  %v10816_v11 = vunpack.i.l.bf16 %v15808_v33  ;;  %11350 = vrcp.f32 %v18257_v10 }
 0x6e2   : > { %v15829_v17 = vpop.eup %11342  ;;  %v15844_v16 = vpop.permute.xlu0 %10824  ;;  %11352 = vrcp.f32 %v18259_v49 }
 0x6e3   : > { %v15804_v14 = vpop.f32.mrf.mxu2  ;;  %v11345_v12 = vpop.eup %11344  ;;  %v10826_v34 = vunpack.i.l.bf16 %v15844_v16 }
 0x6e4   : > { %18247 = vst [vmem:[#allocation87_spill] sm:$0xff] %v15804_v14  ;;  %10446 = vmatmul.msk.f32.vlgmr.msra.gmra.mxu3 %vm785_vm1, %v5862_v19  ;;  %10447 = vmatmul.msk.f32.vlgmr.msrb.gmra.mxu0 %vm785_vm1, %v5863_v53  ;;  %v5866_v19 = vmul.f32 %v18254_v5, %v5738_v46  ;;  %v10822_v46 = vunpack.i.h.bf16 %v15825_v21  ;;  %v5491_v8 = vmul.f32 %v11345_v12, %v18248_v42 }
 0x6e5   : > { %8369 = vmatpush.msra.mxu3 %v10812_v15  ;;  %8395 = vmatpush.msrb.mxu0 %v10801_v9  ;;  %v15812_v61 = vpop.f32.mrf.mxu1  ;;  %v5489_v9 = vmul.f32 %v15814_v62, %v18242_v6  ;;  %v5488_v15 = vmul.f32 %v11341_v44, %v18243_v63  ;;  %v11347_v6 = vpop.eup %11346  ;;  %v5868_v63 = vmul.f32 %v18258_v52, %v5740_v36 }
 0x6e6   : > { %v5492_v42 = vmul.f32 %v11347_v6, %v18251_v39 }
 0x6e7   : > { %v15822_v0 = vpop.f32.mrf.mxu3  ;;  %v5616_v41 = vsub.f32 2.0, %v5488_v15  ;;  %v18266_v15 = vld [vmem:[#allocation194_spill] sm:$0xff] }
 0x6e8   : > { %18252 = vst [vmem:[#allocation99_spill] sm:$0xff] %v15822_v0  ;;  %10448 = vmatmul.msk.f32.vlgmr.msrb.gmra.mxu1 %vm785_vm1, %v5864_v23  ;;  %10449 = vmatmul.msk.f32.vlgmr.msrb.gmra.mxu2 %vm785_vm1, %v5865_v1  ;;  %v5490_v23 = vmul.f32 %v15829_v17, %v18246_v20  ;;  %v18261_v1 = vld [vmem:[#allocation197_spill] sm:$0xff]  ;;  %v11349_v20 = vpop.eup %11348  ;;  %v15862_v36 = vpop.permute.xlu2 %10829  ;;  %v5870_v39 = vmul.f32 %v18266_v15, %v5742_v7 }
 0x6e9   : > { %v15833_v53 = vpop.f32.mrf.mxu0  ;;  %8421 = vmatpush.msrb.mxu1 %v10807_v32  ;;  %8447 = vmatpush.msrb.mxu2 %v10816_v11  ;;  %v5869_v37 = vmul.f32 %v18261_v1, %v5741_v48  ;;  %v5743_v11 = vmul.f32 %v11337_v22, %v5615_v54  ;;  %v5617_v32 = vsub.f32 2.0, %v5489_v9  ;;  %v5619_v48 = vsub.f32 2.0, %v5491_v8  ;;  %v18264_v54 = vld [vmem:[#allocation33_spill] sm:$0xff]  ;;  %v15869_v9 = vpop.eup %11350 }
 0x6ea   : > { %18255 = vst [vmem:[#allocation110_spill] sm:$0xff] %v15833_v53  ;;  %v5618_v22 = vsub.f32 2.0, %v5490_v23  ;;  %v5744_v1 = vmul.f32 %v11341_v44, %v5616_v41  ;;  %v18268_v23 = vld [vmem:[#allocation36_spill] sm:$0xff]  ;;  %v10832_v8 = vunpack.i.h.bf16 %v15862_v36  ;;  %v15881_v7 = vpop.permute.xlu1 %10834 }
 0x6eb   : > { %v15841_v30 = vpop.f32.mrf.mxu2  ;;  %v5745_v52 = vmul.f32 %v15814_v62, %v5617_v32  ;;  %v5747_v44 = vmul.f32 %v11345_v12, %v5619_v48  ;;  %v18271_v32 = vld [vmem:[#allocation192_spill] sm:$0xff]  ;;  %v10827_v12 = vunpack.i.h.bf16 %v15844_v16  ;;  %v15900_v48 = vpop.permute.xlu0 %10839 }
 0x6ec   : > { %10450 = vmatmul.msk.f32.vlgmr.msrb.gmra.mxu3 %vm785_vm1, %v5866_v19  ;;  %10451 = vmatmul.msk.f32.vlgmr.msra.gmra.mxu0 %vm785_vm1, %v5867_v60  ;;  %v10817_v60 = vunpack.i.h.bf16 %v15808_v33  ;;  %v18263_v19 = vld [vmem:[#allocation28_spill] sm:$0xff]  ;;  %v5746_v62 = vmul.f32 %v15829_v17, %v5618_v22 }
 0x6ed   : > { %8473 = vmatpush.msrb.mxu3 %v10822_v46  ;;  %8499 = vmatpush.msra.mxu0 %v10811_v51  ;;  %v15853_v27 = vpop.f32.mrf.mxu1  ;;  %11354 = vrcp.f32 %v18263_v19  ;;  %v18267_v51 = vld [vmem:[#allocation281_spill] sm:$0xff]  ;;  %v5873_v41 = vmul.f32 %v18271_v32, %v5745_v52 }
 0x6ee   : > { %18260 = vst [vmem:[#allocation119_spill] sm:$0xff] %v15853_v27  ;;  %11356 = vrcp.f32 %v18264_v54  ;;  %v5871_v46 = vmul.f32 %v18267_v51, %v5743_v11 }
 0x6ef   : > { %v15858_v5 = vpop.f32.mrf.mxu3  ;;  %11358 = vrcp.f32 %v18268_v23 }
 0x6f0   : > { %18262 = vst [vmem:[#allocation101_spill] sm:$0xff] %v15858_v5  ;;  %10452 = vmatmul.msk.f32.vlgmr.msra.gmra.mxu1 %vm785_vm1, %v5868_v63  ;;  %10453 = vmatmul.msk.f32.vlgmr.msra.gmra.mxu2 %vm785_vm1, %v5869_v37  ;;  %v11353_v63 = vpop.eup %11352  ;;  %v5493_v37 = vmul.f32 %v11349_v20, %v18256_v40  ;;  %11360 = vrcp.f32 %v18270_v26  ;;  %v5495_v40 = vmul.f32 %v15869_v9, %v18257_v10  ;;  %v10836_v10 = vunpack.i.l.bf16 %v15881_v7 }
 0x6f1   : > { %v15867_v33 = vpop.f32.mrf.mxu0  ;;  %8525 = vmatpush.msra.mxu1 %v10817_v60  ;;  %8551 = vmatpush.msra.mxu2 %v10826_v34  ;;  %v5620_v34 = vsub.f32 2.0, %v5492_v42  ;;  %v18272_v42 = vld [vmem:[#allocation199_spill] sm:$0xff]  ;;  %v5494_v51 = vmul.f32 %v11353_v63, %v18259_v49 }
 0x6f2   : > { %18265 = vst [vmem:[#allocation111_spill] sm:$0xff] %v15867_v33  ;;  %v5872_v15 = vmul.f32 %v18272_v42, %v5744_v1  ;;  %v5621_v17 = vsub.f32 2.0, %v5493_v37  ;;  %v18275_v1 = vld [vmem:[#allocation202_spill] sm:$0xff]  ;;  %v5623_v37 = vsub.f32 2.0, %v5495_v40  ;;  %v18277_v42 = vld [vmem:[#allocation47_spill] sm:$0xff] }
 0x6f3   : > { %v15878_v60 = vpop.f32.mrf.mxu2  ;;  %v15888_v11 = vpop.eup %11354  ;;  %v5748_v22 = vmul.f32 %v11347_v6, %v5620_v34  ;;  %v5622_v6 = vsub.f32 2.0, %v5494_v51  ;;  %v18279_v51 = vld [vmem:[#allocation198_spill] sm:$0xff] }
 0x6f4   : > { %18269 = vst [vmem:[#allocation120_spill] sm:$0xff] %v15878_v60  ;;  %10454 = vmatmul.msk.f32.vlgmr.msra.gmra.mxu3 %vm785_vm1, %v5870_v39  ;;  %10455 = vmatmul.msk.f32.vlgmr.msrb.gmra.mxu0 %vm785_vm1, %v5871_v46  ;;  %v15894_v39 = vpop.eup %11356  ;;  %v18274_v46 = vld [vmem:[#allocation201_spill] sm:$0xff]  ;;  %v5496_v34 = vmul.f32 %v15888_v11, %v18263_v19 }
 0x6f5   : > { %8577 = vmatpush.msra.mxu3 %v10832_v8  ;;  %8603 = vmatpush.msrb.mxu0 %v10821_v57  ;;  %v6759_v21 = vpop.f32.mrf.mxu1  ;;  %v15904_v49 = vpop.eup %11358  ;;  %v5874_v52 = vmul.f32 %v18274_v46, %v5746_v62  ;;  %v5875_v8 = vmul.f32 %v18275_v1, %v5747_v44  ;;  %v10831_v62 = vunpack.i.l.bf16 %v15862_v36  ;;  %v10842_v44 = vunpack.i.h.bf16 %v15900_v48  ;;  %v18278_v46 = vld [vmem:[#allocation56_spill] sm:$0xff] }
 0x6f6   : > { %9264 = vrot.lane.b32.xlu2 %v6759_v21, %s11432_s28  ;;  %v18276_v21 = vld [vmem:[#allocation51_spill] sm:$0xff]  ;;  %v11361_v32 = vpop.eup %11360  ;;  %v5498_v19 = vmul.f32 %v15904_v49, %v18268_v23  ;;  %v5750_v1 = vmul.f32 %v11353_v63, %v5622_v6  ;;  %v18281_v23 = vld [vmem:[#allocation210_spill] sm:$0xff]  ;;  %v15937_v63 = vpop.permute.xlu1 %10849  ;;  %v18283_v6 = vld [vmem:[#allocation69_spill] sm:$0xff] }
 0x6f7   : > { %v15898_v57 = vpop.f32.mrf.mxu3  ;;  %11362 = vrcp.f32 %v18276_v21 }
 0x6f8   : > { %18273 = vst [vmem:[#allocation128_spill] sm:$0xff] %v15898_v57  ;;  %10456 = vmatmul.msk.f32.vlgmr.msrb.gmra.mxu1 %vm785_vm1, %v5872_v15  ;;  %10457 = vmatmul.msk.f32.vlgmr.msrb.gmra.mxu2 %vm785_vm1, %v5873_v41  ;;  %v5497_v41 = vmul.f32 %v15894_v39, %v18264_v54  ;;  %11364 = vrcp.f32 %v18277_v42  ;;  %v5749_v15 = vmul.f32 %v11349_v20, %v5621_v17  ;;  %v15924_v20 = vpop.permute.xlu2 %10844 }
 0x6f9   : > { %v6837_v16 = vpop.f32.mrf.mxu0  ;;  %8629 = vmatpush.msrb.mxu1 %v10827_v12  ;;  %8655 = vmatpush.msrb.mxu2 %v10836_v10  ;;  %11366 = vrcp.f32 %v18278_v46  ;;  %v5876_v12 = vmul.f32 %v18279_v51, %v5748_v22  ;;  %v5499_v54 = vmul.f32 %v11361_v32, %v18270_v26  ;;  %v18280_v10 = vld [vmem:[#allocation62_spill] sm:$0xff]  ;;  %v5751_v17 = vmul.f32 %v15869_v9, %v5623_v37 }
 0x6fa   : > { %11368 = vrcp.f32 %v18280_v10  ;;  %v5625_v33 = vsub.f32 2.0, %v5497_v41  ;;  %v5877_v26 = vmul.f32 %v18281_v23, %v5749_v15  ;;  %v10846_v9 = vunpack.i.l.bf16 %v15924_v20  ;;  %v18284_v41 = vld [vmem:[#allocation208_spill] sm:$0xff] }
 0x6fb   : > { %v6785_v40 = vpop.f32.mrf.mxu2  ;;  %v5626_v37 = vsub.f32 2.0, %v5498_v19  ;;  %v5879_v15 = vmul.f32 %v18284_v41, %v5751_v17  ;;  %v18286_v17 = vld [vmem:[#allocation78_spill] sm:$0xff]  ;;  %v18288_v41 = vld [vmem:[#allocation221_spill] sm:$0xff] }
 0x6fc   : > { %10458 = vmatmul.msk.f32.vlgmr.msrb.gmra.mxu3 %vm785_vm1, %v5874_v52  ;;  %10459 = vmatmul.msk.f32.vlgmr.msra.gmra.mxu0 %vm785_vm1, %v5875_v8  ;;  %v5624_v52 = vsub.f32 2.0, %v5496_v34  ;;  %v10837_v8 = vunpack.i.h.bf16 %v15881_v7 }
 0x6fd   : > { %8681 = vmatpush.msrb.mxu3 %v10842_v44  ;;  %8707 = vmatpush.msra.mxu0 %v10831_v62  ;;  %v6863_v36 = vpop.f32.mrf.mxu1  ;;  %v15929_v22 = vpop.eup %11362  ;;  %v18282_v62 = vld [vmem:[#allocation65_spill] sm:$0xff]  ;;  %v18285_v44 = vld [vmem:[#allocation214_spill] sm:$0xff] }
 0x6fe   : > { %9266 = vrot.lane.b32.xlu1 %v6785_v40, %s11432_s28  ;;  %9270 = vrot.lane.b32.xlu2 %v6837_v16, %s11432_s28  ;;  %v15933_v28 = vpop.eup %11364  ;;  %11370 = vrcp.f32 %v18282_v62  ;;  %v5627_v16 = vsub.f32 2.0, %v5499_v54  ;;  %v5878_v40 = vmul.f32 %v18285_v44, %v5750_v1  ;;  %v5752_v23 = vmul.f32 %v15888_v11, %v5624_v52 }
 0x6ff   : > { %v6811_v51 = vpop.f32.mrf.mxu3  ;;  %11372 = vrcp.f32 %v18283_v6  ;;  %v15945_v7 = vpop.eup %11366  ;;  %v5501_v19 = vmul.f32 %v15929_v22, %v18276_v21  ;;  %v5500_v54 = vmul.f32 %v15933_v28, %v18277_v42 }
 0x700   : > { %9268 = vrot.lane.b32.xlu0 %v6811_v51, %s11432_s28  ;;  %10460 = vmatmul.msk.f32.vlgmr.msra.gmra.mxu1 %vm785_vm1, %v5876_v12  ;;  %v5753_v51 = vmul.f32 %v15894_v39, %v5625_v33  ;;  %v11369_v12 = vpop.eup %11368  ;;  %11374 = vrcp.f32 %v18286_v17  ;;  %v5754_v33 = vmul.f32 %v15904_v49, %v5626_v37  ;;  %v5755_v11 = vmul.f32 %v11361_v32, %v5627_v16  ;;  %v18287_v39 = vld [vmem:[#allocation76_spill] sm:$0xff]  ;;  %v15962_v21 = vpop.permute.xlu0 %10854  ;;  %v18289_v32 = vld [vmem:[#allocation225_spill] sm:$0xff] }
 0x701   : > { %v15942_v34 = vpop.f32.mrf.mxu0  ;;  %10461 = vmatmul.msk.f32.vlgmr.msra.gmra.mxu2 %vm785_vm1, %v5877_v26  ;;  %8733 = vmatpush.msra.mxu1 %v10837_v8  ;;  %v10841_v26 = vunpack.i.l.bf16 %v15900_v48  ;;  %v10852_v8 = vunpack.i.h.bf16 %v15937_v63  ;;  %11376 = vrcp.f32 %v18287_v39  ;;  %v5502_v1 = vmul.f32 %v15945_v7, %v18278_v46  ;;  %v18290_v46 = vld [vmem:[#allocation219_spill] sm:$0xff] }
 0x702   : > { %8759 = vmatpush.msra.mxu2 %v10846_v9  ;;  %v5503_v52 = vmul.f32 %v11369_v12, %v18280_v10  ;;  %v5880_v49 = vmul.f32 %v18288_v41, %v5752_v23  ;;  %v5881_v37 = vmul.f32 %v18289_v32, %v5753_v51  ;;  %v5629_v16 = vsub.f32 2.0, %v5501_v19  ;;  %v18292_v51 = vld [vmem:[#allocation81_spill] sm:$0xff]  ;;  %v18293_v32 = vld [vmem:[#allocation88_spill] sm:$0xff] }
 0x703   : > { %v6889_v0 = vpop.f32.mrf.mxu2  ;;  %v5882_v10 = vmul.f32 %v18290_v46, %v5754_v33  ;;  %11378 = vrcp.f32 %v18292_v51  ;;  %v18294_v46 = vld [vmem:[#allocation93_spill] sm:$0xff] }
 0x704   : > { %10462 = vmatmul.msk.f32.vlgmr.msra.gmra.mxu3 %vm785_vm1, %v5878_v40  ;;  %10463 = vmatmul.msk.f32.vlgmr.msrb.gmra.mxu0 %vm785_vm1, %v5879_v15  ;;  %v11371_v48 = vpop.eup %11370  ;;  %v5628_v15 = vsub.f32 2.0, %v5500_v54  ;;  %v10847_v40 = vunpack.i.h.bf16 %v15924_v20  ;;  %v5630_v54 = vsub.f32 2.0, %v5502_v1  ;;  %v5631_v41 = vsub.f32 2.0, %v5503_v52  ;;  %v18295_v52 = vld [vmem:[#allocation90_spill] sm:$0xff] }
 0x705   : > { %8785 = vmatpush.msra.mxu3 %v10852_v8  ;;  %8811 = vmatpush.msrb.mxu0 %v10841_v26  ;;  %v6967_v42 = vpop.f32.mrf.mxu1  ;;  %v15968_v9 = vpop.eup %11372  ;;  %v10856_v8 = vunpack.i.l.bf16 %v15962_v21  ;;  %v5504_v23 = vmul.f32 %v11371_v48, %v18282_v62  ;;  %11380 = vrcp.f32 %v18293_v32  ;;  %v5757_v62 = vmul.f32 %v15929_v22, %v5629_v16 }
 0x706   : > { %9272 = vrot.lane.b32.xlu1 %v6863_v36, %s11432_s28  ;;  %v15973_v26 = vpop.permute.xlu2 %10859  ;;  %v18291_v36 = vld [vmem:[#allocation233_spill] sm:$0xff]  ;;  %v11375_v20 = vpop.eup %11374  ;;  %11382 = vrcp.f32 %v18294_v46  ;;  %v5758_v22 = vmul.f32 %v15945_v7, %v5630_v54  ;;  %v10857_v7 = vunpack.i.h.bf16 %v15962_v21 }
 0x707   : > { %v6915_v44 = vpop.f32.mrf.mxu3  ;;  %v5883_v25 = vmul.f32 %v18291_v36, %v5755_v11  ;;  %v11377_v33 = vpop.eup %11376  ;;  %v5756_v11 = vmul.f32 %v15933_v28, %v5628_v15  ;;  %v5507_v1 = vmul.f32 %v11375_v20, %v18286_v17  ;;  %11384 = vrcp.f32 %v18295_v52 }
 0x708   : > { %9274 = vrot.lane.b32.xlu0 %v6889_v0, %s11432_s28  ;;  %9276 = vrot.lane.b32.xlu2 %v6915_v44, %s11432_s28  ;;  %v5505_v0 = vmul.f32 %v15968_v9, %v18283_v6  ;;  %v10862_v44 = vunpack.i.h.bf16 %v15973_v26  ;;  %v5632_v6 = vsub.f32 2.0, %v5504_v23  ;;  %v5506_v15 = vmul.f32 %v11377_v33, %v18287_v39  ;;  %v10870_v54 = vpop.permute.xlu0 %10869 }
 0x709   : > { %v15982_v19 = vpop.f32.mrf.mxu0  ;;  %10464 = vmatmul.msk.f32.vlgmr.msrb.gmra.mxu1 %vm785_vm1, %v5880_v49  ;;  %10465 = vmatmul.msk.f32.vlgmr.msrb.gmra.mxu2 %vm785_vm1, %v5881_v37  ;;  %v10851_v49 = vunpack.i.l.bf16 %v15937_v63  ;;  %v5759_v63 = vmul.f32 %v11369_v12, %v5631_v41  ;;  %v5635_v39 = vsub.f32 2.0, %v5507_v1  ;;  %v18299_v41 = vld [vmem:[#allocation100_spill] sm:$0xff]  ;;  %v10861_v1 = vunpack.i.l.bf16 %v15973_v26 }
 0x70a   : > { %8837 = vmatpush.msrb.mxu1 %v10847_v40  ;;  %8863 = vmatpush.msrb.mxu2 %v10856_v8  ;;  %v15998_v40 = vpop.permute.xlu1 %10864  ;;  %v5633_v16 = vsub.f32 2.0, %v5505_v0  ;;  %v18296_v8 = vld [vmem:[#allocation230_spill] sm:$0xff] }
 0x70b   : > { %v6993_v37 = vpop.f32.mrf.mxu2  ;;  %v5885_v17 = vmul.f32 %v18296_v8, %v5757_v62  ;;  %v10866_v12 = vunpack.i.l.bf16 %v15998_v40 }
 0x70c   : > { %10466 = vmatmul.msk.f32.vlgmr.msrb.gmra.mxu3 %vm785_vm1, %v5882_v10  ;;  %10467 = vmatmul.msk.f32.vlgmr.msra.gmra.mxu0 %vm785_vm1, %v5883_v25  ;;  %v16004_v25 = vpop.eup %11378  ;;  %v18297_v10 = vld [vmem:[#allocation236_spill] sm:$0xff] }
 0x70d   : > { %8889 = vmatpush.msrb.mxu3 %v10862_v44  ;;  %8915 = vmatpush.msra.mxu0 %v10851_v49  ;;  %v7071_v28 = vpop.f32.mrf.mxu1  ;;  %v5884_v36 = vmul.f32 %v18297_v10, %v5756_v11  ;;  %v16008_v14 = vpop.eup %11380  ;;  %v18298_v44 = vld [vmem:[#allocation18_spill] sm:$0xff]  ;;  %v18300_v11 = vld [vmem:[#allocation245_spill] sm:$0xff]  ;;  %v5761_v10 = vmul.f32 %v15968_v9, %v5633_v16  ;;  %v5763_v9 = vmul.f32 %v11375_v20, %v5635_v39 }
 0x70e   : > { %9278 = vrot.lane.b32.xlu1 %v15942_v34, %s11432_s28  ;;  %11386 = vrcp.f32 %v18298_v44  ;;  %v5760_v34 = vmul.f32 %v11371_v48, %v5632_v6  ;;  %v11383_v62 = vpop.eup %11382  ;;  %v5886_v21 = vmul.f32 %v18300_v11, %v5758_v22  ;;  %v18301_v49 = vld [vmem:[#allocation249_spill] sm:$0xff]  ;;  %v5509_v6 = vmul.f32 %v16008_v14, %v18293_v32 }
 0x70f   : > { %v7019_v23 = vpop.f32.mrf.mxu3  ;;  %11388 = vrcp.f32 %v18299_v41  ;;  %v5887_v8 = vmul.f32 %v18301_v49, %v5759_v63  ;;  %v11385_v48 = vpop.eup %11384  ;;  %v5510_v22 = vmul.f32 %v11383_v62, %v18294_v46  ;;  %v18303_v63 = vld [vmem:[#allocation29_spill] sm:$0xff] }
 0x710   : > { %9280 = vrot.lane.b32.xlu0 %v6967_v42, %s11432_s28  ;;  %9282 = vrot.lane.b32.xlu2 %v6993_v37, %s11432_s28  ;;  %v5634_v42 = vsub.f32 2.0, %v5506_v15  ;;  %v5508_v37 = vmul.f32 %v16004_v25, %v18292_v51  ;;  %11390 = vrcp.f32 %v18302_v24  ;;  %v5511_v26 = vmul.f32 %v11385_v48, %v18295_v52  ;;  %v18305_v11 = vld [vmem:[#allocation257_spill] sm:$0xff]  ;;  %v10875_v49 = vpop.permute.xlu2 %10874 }
 0x711   : > { %v16016_v0 = vpop.f32.mrf.mxu0  ;;  %10468 = vmatmul.msk.f32.vlgmr.msra.gmra.mxu1 %vm785_vm1, %v5884_v36  ;;  %10469 = vmatmul.msk.f32.vlgmr.msra.gmra.mxu2 %vm785_vm1, %v5885_v17  ;;  %v10871_v17 = vunpack.i.l.bf16 %v10870_v54  ;;  %11392 = vrcp.f32 %v18303_v63  ;;  %v5889_v20 = vmul.f32 %v18305_v11, %v5761_v10  ;;  %v5637_v46 = vsub.f32 2.0, %v5509_v6  ;;  %v18310_v11 = vld [vmem:[#allocation43_spill] sm:$0xff] }
 0x712   : > { %8941 = vmatpush.msra.mxu1 %v10857_v7  ;;  %8967 = vmatpush.msra.mxu2 %v10866_v12  ;;  %v5762_v16 = vmul.f32 %v11377_v33, %v5634_v42  ;;  %v18304_v7 = vld [vmem:[#allocation243_spill] sm:$0xff]  ;;  %v5636_v39 = vsub.f32 2.0, %v5508_v37  ;;  %v18306_v33 = vld [vmem:[#allocation254_spill] sm:$0xff]  ;;  %v5639_v6 = vsub.f32 2.0, %v5511_v26 }
 0x713   : > { %v7097_v36 = vpop.f32.mrf.mxu2  ;;  %v5888_v12 = vmul.f32 %v18304_v7, %v5760_v34  ;;  %v5891_v52 = vmul.f32 %v18306_v33, %v5763_v9  ;;  %v18307_v34 = vld [vmem:[#allocation21_spill] sm:$0xff]  ;;  %v5765_v9 = vmul.f32 %v16008_v14, %v5637_v46  ;;  %v10876_v7 = vunpack.i.l.bf16 %v10875_v49  ;;  %v18311_v26 = vld [vmem:[#allocation19_spill] sm:$0xff] }
 0x714   : > { %10470 = vmatmul.msk.f32.vlgmr.msra.gmra.mxu3 %vm785_vm1, %v5886_v21  ;;  %10471 = vmatmul.msk.f32.vlgmr.msrb.gmra.mxu0 %vm785_vm1, %v5887_v8  ;;  %v11387_v32 = vpop.eup %11386  ;;  %v10867_v8 = vunpack.i.h.bf16 %v15998_v40  ;;  %11394 = vrcp.f32 %v18307_v34  ;;  %v5767_v14 = vmul.f32 %v11385_v48, %v5639_v6 }
 0x715   : > { %8993 = vmatpush.msra.mxu3 %v10871_v17  ;;  %9019 = vmatpush.msrb.mxu0 %v10861_v1  ;;  %v16033_v51 = vpop.f32.mrf.mxu1  ;;  %v16037_v15 = vpop.eup %11388  ;;  %v10872_v1 = vunpack.i.h.bf16 %v10870_v54  ;;  %v5513_v42 = vmul.f32 %v11387_v32, %v18298_v44  ;;  %v18308_v54 = vld [vmem:[#allocation260_spill] sm:$0xff]  ;;  %v5764_v17 = vmul.f32 %v16004_v25, %v5636_v39 }
 0x716   : > { %9284 = vrot.lane.b32.xlu1 %v7019_v23, %s11432_s28  ;;  %v5638_v23 = vsub.f32 2.0, %v5510_v22  ;;  %v11391_v40 = vpop.eup %11390  ;;  %v5890_v37 = vmul.f32 %v18308_v54, %v5762_v16  ;;  %v10877_v22 = vunpack.i.h.bf16 %v10875_v49 }
 0x717   : > { %v7123_v21 = vpop.f32.mrf.mxu3  ;;  %v11393_v44 = vpop.eup %11392  ;;  %v5641_v16 = vsub.f32 2.0, %v5513_v42  ;;  %v5514_v46 = vmul.f32 %v11391_v40, %v18302_v24  ;;  %v18314_v24 = vld [vmem:[#allocation267_spill] sm:$0xff] }
 0x718   : > { %9286 = vrot.lane.b32.xlu0 %v15982_v19, %s11432_s28  ;;  %9288 = vrot.lane.b32.xlu2 %v7071_v28, %s11432_s28  ;;  %v5512_v19 = vmul.f32 %v16037_v15, %v18299_v41  ;;  %v18309_v28 = vld [vmem:[#allocation23_spill] sm:$0xff]  ;;  %v5766_v41 = vmul.f32 %v11383_v62, %v5638_v23  ;;  %v5515_v49 = vmul.f32 %v11393_v44, %v18303_v63  ;;  %v18313_v62 = vld [vmem:[#allocation273_spill] sm:$0xff] }
 0x719   : > { %v16048_v10 = vpop.f32.mrf.mxu0  ;;  %10472 = vmatmul.msk.f32.vlgmr.msrb.gmra.mxu1 %vm785_vm1, %v5888_v12  ;;  %10473 = vmatmul.msk.f32.vlgmr.msrb.gmra.mxu2 %vm785_vm1, %v5889_v20  ;;  %11396 = vrcp.f32 %v18309_v28  ;;  %v10880_v20 = vpop.permute.xlu1 %10879  ;;  %v5769_v63 = vmul.f32 %v11387_v32, %v5641_v16 }
 0x71a   : > { %9045 = vmatpush.msrb.mxu1 %v10867_v8  ;;  %9071 = vmatpush.msrb.mxu2 %v10872_v1  ;;  %11398 = vrcp.f32 %v18310_v11  ;;  %v5640_v39 = vsub.f32 2.0, %v5512_v19  ;;  %v11395_v8 = vpop.eup %11394  ;;  %v18312_v1 = vld [vmem:[#allocation269_spill] sm:$0xff]  ;;  %v10882_v54 = vunpack.i.h.bf16 %v10880_v20  ;;  %v5894_v48 = vmul.f32 %v18314_v24, %v5766_v41  ;;  %v18315_v19 = vld [vmem:[#allocation280_spill] sm:$0xff] }
 0x71b   : > { %v16058_v12 = vpop.f32.mrf.mxu2  ;;  %11400 = vrcp.f32 %v18311_v26  ;;  %v5892_v33 = vmul.f32 %v18312_v1, %v5764_v17  ;;  %v5895_v17 = vmul.f32 %v18315_v19, %v5767_v14 }
 0x71c   : > { %10474 = vmatmul.msk.f32.vlgmr.msrb.gmra.mxu3 %vm785_vm1, %v5890_v37  ;;  %10475 = vmatmul.msk.f32.vlgmr.msra.gmra.mxu0 %vm785_vm1, %v5891_v52  ;;  %v5893_v52 = vmul.f32 %v18313_v62, %v5765_v9  ;;  %v10881_v37 = vunpack.i.l.bf16 %v10880_v20  ;;  %v5768_v9 = vmul.f32 %v16037_v15, %v5640_v39  ;;  %v5643_v20 = vsub.f32 2.0, %v5515_v49 }
 0x71d   : > { %9097 = vmatpush.msrb.mxu3 %v10876_v7  ;;  %9123 = vmatpush.msra.mxu0 %v10877_v22  ;;  %v16064_v25 = vpop.f32.mrf.mxu1  ;;  %v10885_v22 = vpop.permute.xlu0 %10884  ;;  %v5642_v7 = vsub.f32 2.0, %v5514_v46 }
 0x71e   : > { %9290 = vrot.lane.b32.xlu1 %v7097_v36, %s11432_s28  ;;  %v10887_v32 = vunpack.i.h.bf16 %v10885_v22  ;;  %v10886_v16 = vunpack.i.l.bf16 %v10885_v22  ;;  %v5771_v39 = vmul.f32 %v11393_v44, %v5643_v20  ;;  %v18320_v20 = vld [vmem:[#allocation209_spill] sm:$0xff] }
 0x71f   : > { %v16071_v23 = vpop.f32.mrf.mxu3  ;;  %v11397_v42 = vpop.eup %11396  ;;  %v5770_v14 = vmul.f32 %v11391_v40, %v5642_v7  ;;  %v18318_v40 = vld [vmem:[#allocation143_spill] sm:$0xff] }
 0x720   : > { %9294 = vrot.lane.b32.xlu2 %v16016_v0, %s11432_s28  ;;  %9292 = vrot.lane.b32.xlu0 %v7123_v21, %s11432_s28  ;;  %v11399_v6 = vpop.eup %11398  ;;  %v5516_v21 = vmul.f32 %v11395_v8, %v18307_v34  ;;  %v5517_v41 = vmul.f32 %v11397_v42, %v18309_v28  ;;  %v18316_v28 = vld [vmem:[#allocation133_spill] sm:$0xff] }
 0x721   : > { %v7357_v36 = vpop.f32.mrf.mxu0  ;;  %10476 = vmatmul.msk.f32.vlgmr.msra.gmra.mxu1 %vm785_vm1, %v5892_v33  ;;  %10477 = vmatmul.msk.f32.vlgmr.msra.gmra.mxu2 %vm785_vm1, %v5893_v52  ;;  %v11401_v0 = vpop.eup %11400  ;;  %v5519_v46 = vmul.f32 %v11399_v6, %v18310_v11  ;;  %v5897_v49 = vmul.f32 %v18316_v28, %v5769_v63  ;;  %v18317_v33 = vld [vmem:[#allocation306_spill] sm:$0xff]  ;;  %v5898_v44 = vmul.f32 %v18318_v40, %v5770_v14  ;;  %v18319_v11 = vld [vmem:[#allocation132_spill] sm:$0xff] }
 0x722   : > { %9149 = vmatpush.msra.mxu1 %v10881_v37  ;;  %9175 = vmatpush.msra.mxu2 %v10882_v54  ;;  %v5518_v34 = vmul.f32 %v11401_v0, %v18311_v26  ;;  %v5896_v62 = vmul.f32 %v18317_v33, %v5768_v9  ;;  %v5644_v52 = vsub.f32 2.0, %v5516_v21  ;;  %v5645_v54 = vsub.f32 2.0, %v5517_v41  ;;  %v18321_v41 = vld [vmem:[#allocation307_spill] sm:$0xff] }
 0x723   : > { %v16083_v1 = vpop.f32.mrf.mxu2  ;;  %v5899_v26 = vmul.f32 %v18319_v11, %v5771_v39  ;;  %v5647_v24 = vsub.f32 2.0, %v5519_v46  ;;  %v18324_v39 = vld [vmem:[#allocation312_spill] sm:$0xff] }
 0x724   : > { %10478 = vmatmul.msk.f32.vlgmr.msra.gmra.mxu3 %vm785_vm1, %v5894_v48  ;;  %10479 = vmatmul.msk.f32.vlgmr.msrb.gmra.mxu0 %vm785_vm1, %v5895_v17  ;;  %v5646_v48 = vsub.f32 2.0, %v5518_v34  ;;  %v5773_v63 = vmul.f32 %v11397_v42, %v5645_v54 }
 0x725   : > { %9201 = vmatpush.msra.mxu3 %v10886_v16  ;;  %9227 = vmatpush.msrb.mxu0 %v10887_v32  ;;  %v16087_v15 = vpop.f32.mrf.mxu1  ;;  %v5775_v9 = vmul.f32 %v11399_v6, %v5647_v24 }
 0x726   : > { %9310 = vrot.lane.b32.xlu1 %v7357_v36, %s11432_s28  ;;  %v5772_v36 = vmul.f32 %v11395_v8, %v5644_v52  ;;  %v5774_v7 = vmul.f32 %v11401_v0, %v5646_v48  ;;  %v5901_v32 = vmul.f32 %v18321_v41, %v5773_v63  ;;  %v18323_v8 = vld [vmem:[#allocation309_spill] sm:$0xff] }
 0x727   : > { %v16094_v37 = vpop.f32.mrf.mxu3  ;;  %v5903_v42 = vmul.f32 %v18323_v8, %v5775_v9 }
 0x728   : > { %v5900_v21 = vmul.f32 %v18320_v20, %v5772_v36  ;;  %v5902_v46 = vmul.f32 %v18324_v39, %v5774_v7 }
 0x729   : > { %v16096_v22 = vpop.f32.mrf.mxu0  ;;  %10480 = vmatmul.msk.f32.vlgmr.msrb.gmra.mxu1 %vm785_vm1, %v5896_v62  ;;  %10481 = vmatmul.msk.f32.vlgmr.msrb.gmra.mxu2 %vm785_vm1, %v5897_v49 }
 0x72b   : > { %v16102_v19 = vpop.f32.mrf.mxu2 }
 0x72c   : > { %10482 = vmatmul.msk.f32.vlgmr.msrb.gmra.mxu3 %vm785_vm1, %v5898_v44  ;;  %10483 = vmatmul.msk.f32.vlgmr.msra.gmra.mxu0 %vm785_vm1, %v5899_v26 }
 0x72d   : > { %v16106_v17 = vpop.f32.mrf.mxu1 }
 0x72f   : > { %v16110_v16 = vpop.f32.mrf.mxu3 }
 0x731   : > { %v16112_v14 = vpop.f32.mrf.mxu0  ;;  %10484 = vmatmul.msk.f32.vlgmr.msra.gmra.mxu1 %vm785_vm1, %v5900_v21  ;;  %10485 = vmatmul.msk.f32.vlgmr.msra.gmra.mxu2 %vm785_vm1, %v5901_v32 }
 0x732   : > { %18322 = vst [vmem:[#allocation109_spill] sm:$0xff] %v16112_v14 }
 0x733   : > { %v16118_v34 = vpop.f32.mrf.mxu2 }
 0x734   : > { %10486 = vmatmul.msk.f32.vlgmr.msra.gmra.mxu3 %vm785_vm1, %v5902_v46  ;;  %10487 = vmatmul.msk.f32.vlgmr.msrb.gmra.mxu0 %vm785_vm1, %v5903_v42 }
 0x735   : > { %v16122_v6 = vpop.f32.mrf.mxu1 }
 0x737   : > { %v16124_v0 = vpop.f32.mrf.mxu3 }
 0x739   : > { %v16126_v28 = vpop.f32.mrf.mxu0 }
 0x73b   : > { %v16128_v49 = vpop.f32.mrf.mxu2 }
 0x73d   : > { %v16130_v33 = vpop.f32.mrf.mxu1 }
 0x73e   : > { %18325 = vst [vmem:[#allocation118_spill] sm:$0xff] %v16130_v33 }
 0x73f   : > { %v16132_v62 = vpop.f32.mrf.mxu3 }
 0x741   : > { %v16134_v52 = vpop.f32.mrf.mxu0 }
 0x743   : > { %v7721_v40 = vpop.f32.mrf.mxu2 }
 0x745   : > { %v16136_v54 = vpop.f32.mrf.mxu1 }
 0x747   : > { %v7747_v44 = vpop.f32.mrf.mxu3 }
 0x749   : > { %v16138_v11 = vpop.f32.mrf.mxu0 }
 0x74b   : > { %v16144_v48 = vpop.f32.mrf.mxu2 }
 0x74d   : > { %v16140_v26 = vpop.f32.mrf.mxu1 }
 0x74e   : > { %18326 = vst [vmem:[#allocation11_spill] sm:$0xff] %v16140_v26 }
 0x74f   : > { %v16142_v24 = vpop.f32.mrf.mxu3 }
 0x751   : > { %v7981_v36 = vpop.f32.mrf.mxu0 }
 0x753   : > { %v16151_v20 = vpop.f32.mrf.mxu2 }
 0x754   : > { %18327 = vst [vmem:[#allocation17_spill] sm:$0xff] %v16151_v20 }
 0x755   : > { %v16146_v63 = vpop.f32.mrf.mxu1 }
 0x757   : > { %v7955_v9 = vpop.f32.mrf.mxu3 }
 0x758   : > { %9420 = vrot.lane.b32.xlu0 %v7955_v9, %s11433_s29 }
 0x759   : > { %v16149_v7 = vpop.f32.mrf.mxu0 }
 0x75b   : > { %v16158_v8 = vpop.f32.mrf.mxu2 }
 0x75d   : > { %v16153_v21 = vpop.f32.mrf.mxu1 }
 0x75f   : > { %v16155_v41 = vpop.f32.mrf.mxu3 }
 0x761   : > { %v8189_v32 = vpop.f32.mrf.mxu0 }
 0x762   : > { %9438 = vrot.lane.b32.xlu2 %v8189_v32, %s11433_s29 }
 0x763   : > { %v16167_v57 = vpop.f32.mrf.mxu2 }
 0x765   : > { %v8215_v42 = vpop.f32.mrf.mxu1 }
 0x767   : > { %v16160_v39 = vpop.f32.mrf.mxu3 }
 0x768   : > { %18328 = vst [vmem:[#allocation127_spill] sm:$0xff] %v16160_v39 }
 0x769   : > { %v16162_v46 = vpop.f32.mrf.mxu0 }
 0x76a   : > { %9402 = vrot.lane.b32.xlu2 %v7721_v40, %s11433_s29 }
 0x76b   : > { %v8241_v58 = vpop.f32.mrf.mxu2 }
 0x76d   : > { %v16165_v9 = vpop.f32.mrf.mxu1 }
 0x76f   : > { %v16169_v45 = vpop.f32.mrf.mxu3 }
 0x771   : > { %v16171_v60 = vpop.f32.mrf.mxu0 }
 0x772   : > { %18329 = vst [vmem:[#allocation205_spill] sm:$0xff] %v16171_v60  ;;  %9422 = vrot.lane.b32.xlu2 %v7981_v36, %s11433_s29 }
 0x773   : > { %v16184_v3 = vpop.f32.mrf.mxu2 }
 0x775   : > { %v16174_v32 = vpop.f32.mrf.mxu1 }
 0x777   : > { %v16176_v43 = vpop.f32.mrf.mxu3 }
 0x779   : > { %v16178_v2 = vpop.f32.mrf.mxu0 }
 0x77a   : > { %18330 = vst [vmem:[#allocation146_spill] sm:$0xff] %v16178_v2 }
 0x77b   : > { %v16190_v36 = vpop.f32.mrf.mxu2 }
 0x77d   : > { %v16180_v27 = vpop.f32.mrf.mxu1 }
 0x77e   : > { %18331 = vst [vmem:[#allocation27_spill] sm:$0xff] %v16180_v27 }
 0x77f   : > { %v16182_v40 = vpop.f32.mrf.mxu3 }
 0x781   : > { %v8605_v47 = vpop.f32.mrf.mxu0 }
 0x784   : > { %v8553_v2 = vpop.f32.mrf.mxu2 }
 0x786   : > { %v16186_v31 = vpop.f32.mrf.mxu1 }
 0x787   : > { %v8579_v35 = vpop.f32.mrf.mxu3 }
 0x789   : > { %v16188_v33 = vpop.f32.mrf.mxu0 }
 0x78c   : > { %v16203_v26 = vpop.f32.mrf.mxu2 }
 0x78e   : > { %v16192_v59 = vpop.f32.mrf.mxu1 }
 0x78f   : > { %18332 = vst [vmem:[#allocation35_spill] sm:$0xff] %v16192_v59  ;;  %v16194_v60 = vpop.f32.mrf.mxu3 }
 0x791   : > { %v8813_v53 = vpop.f32.mrf.mxu0 }
 0x794   : > { %v16211_v38 = vpop.f32.mrf.mxu2 }
 0x796   : > { %v8839_v20 = vpop.f32.mrf.mxu1 }
 0x797   : > { %v8787_v27 = vpop.f32.mrf.mxu3 }
 0x798   : > { %9548 = vrot.lane.b32.xlu1 %v8787_v27, %s11434_s30  ;;  %v16209_v27 = vpop.permute.xlu2 %9264 }
 0x799   : > { %v16197_v39 = vpop.f32.mrf.mxu0 }
 0x79e   : > { %v16199_v5 = vpop.f32.mrf.mxu1 }
 0x7a0   : > { %9312 = vrot.lane.b32.xlu1 %v16087_v15, %s11432_s28  ;;  %v16217_v15 = vpop.permute.xlu2 %9270 }
 0x7a1   : > { %v9021_v14 = vpop.f32.mrf.mxu0 }
 0x7a2   : > { %9566 = vrot.lane.b32.xlu0 %v9021_v14, %s11434_s30  ;;  %v8865_v14 = vpop.f32.mrf.mxu2 }
 0x7a6   : > { %v9047_v59 = vpop.f32.mrf.mxu1 }
 0x7a7   : > { %9568 = vrot.lane.b32.xlu2 %v9047_v59, %s11434_s30 }
 0x7a8   : > { %9440 = vrot.lane.b32.xlu1 %v8215_v42, %s11433_s29  ;;  %v9714_v42 = vld [vmem:[%s16685_s4] sm:$0xff] }
 0x7aa   : > { %9530 = vrot.lane.b32.xlu0 %v8553_v2, %s11434_s30  ;;  %v16223_v2 = vpop.permute.xlu2 %9276  ;;  %v16225_v59 = vpop.f32.mrf.mxu2 }
 0x7af   : > { %9314 = vrot.lane.b32.xlu2 %v16102_v19, %s11432_s28  ;;  %v16241_v19 = vpop.permute.xlu1 %9266 }
 0x7b0   : > { %9404 = vrot.lane.b32.xlu1 %v7747_v44, %s11433_s29 }
 0x7b2   : > { %9550 = vrot.lane.b32.xlu0 %v8813_v53, %s11434_s30  ;;  %v8891_v53 = vpop.f32.mrf.mxu3 }
 0x7b7   : > { %9442 = vrot.lane.b32.xlu2 %v8241_v58, %s11433_s29  ;;  %v16235_v58 = vpop.permute.xlu2 %9282  ;;  %v16254_v44 = vpop.permute.xlu1 %9272 }
 0x7b8   : > { %9532 = vrot.lane.b32.xlu1 %v8579_v35, %s11434_s30  ;;  %v9073_v35 = vpop.f32.mrf.mxu2 }
 0x7ba   : > { %9296 = vrot.lane.b32.xlu0 %v16033_v51, %s11432_s28  ;;  %v16238_v51 = vpop.f32.mrf.mxu3 }
 0x7bf   : > { %9406 = vrot.lane.b32.xlu2 %v16134_v52, %s11433_s29 }
 0x7c0   : > { %9552 = vrot.lane.b32.xlu1 %v8839_v20, %s11434_s30  ;;  %v16274_v20 = vpop.permute.xlu1 %9278 }
 0x7c2   : > { %9424 = vrot.lane.b32.xlu0 %v16146_v63, %s11433_s29  ;;  %v9099_v52 = vpop.f32.mrf.mxu3 }
 0x7c7   : > { %9534 = vrot.lane.b32.xlu2 %v8605_v47, %s11434_s30  ;;  %v16247_v47 = vpop.permute.xlu2 %9288 }
 0x7c8   : > { %9298 = vrot.lane.b32.xlu1 %v16058_v12, %s11432_s28  ;;  %v16249_v12 = vpop.permute.xlu0 %9268 }
 0x7ca   : > { %9570 = vrot.lane.b32.xlu0 %v9073_v35, %s11434_s30 }
 0x7cf   : > { %9554 = vrot.lane.b32.xlu2 %v8865_v14, %s11434_s30  ;;  %v16258_v63 = vpop.permute.xlu2 %9294 }
 0x7d0   : > { %9426 = vrot.lane.b32.xlu1 %v16158_v8, %s11433_s29 }
 0x7d2   : > { %9316 = vrot.lane.b32.xlu0 %v16110_v16, %s11432_s28  ;;  %v16264_v16 = vpop.permute.xlu0 %9274 }
 0x7d7   : > { %9300 = vrot.lane.b32.xlu2 %v16071_v23, %s11432_s28  ;;  %v9717_v23 = vld [vmem:[%s16685_s4 + $0x18] sm:$0xff] }
 0x7d8   : > { %9572 = vrot.lane.b32.xlu1 %v9099_v52, %s11434_s30  ;;  %10525 = vmatpush.msrb.mxu2 %v9717_v23 }
 0x7d9   : > { %10526 = vmatpush.msrb.mxu3 %v9717_v23  ;;  %10524 = vmatpush.msrb.mxu1 %v9717_v23 }
 0x7da   : > { %9444 = vrot.lane.b32.xlu0 %v16169_v45, %s11433_s29  ;;  %v9716_v45 = vld [vmem:[%s16685_s4 + $0x10] sm:$0xff]  ;;  %9830 = vmatpush.msra.mxu0 %v9717_v23  ;;  %v16284_v8 = vpop.permute.xlu0 %9280 }
 0x7db   : > { %10528 = vmatpush.msrb.mxu2 %v9716_v45  ;;  %10529 = vmatpush.msrb.mxu3 %v9716_v45 }
 0x7dc   : > { %10527 = vmatpush.msrb.mxu1 %v9716_v45  ;;  %9831 = vmatpush.msra.mxu0 %v9716_v45 }
 0x7df   : > { %9428 = vrot.lane.b32.xlu2 %v16155_v41, %s11433_s29  ;;  %v9125_v41 = vpop.f32.mrf.mxu0 }
 0x7e0   : > { %9318 = vrot.lane.b32.xlu1 %v16096_v22, %s11432_s28  ;;  %v9439_v22 = vpop.permute.xlu2 %9438 }
 0x7e2   : > { %9408 = vrot.lane.b32.xlu0 %v16136_v54, %s11433_s29  ;;  %v9715_v54 = vld [vmem:[%s16685_s4 + $0x8] sm:$0xff] }
 0x7e3   : > { %10531 = vmatpush.msrb.mxu2 %v9715_v54  ;;  %10532 = vmatpush.msrb.mxu3 %v9715_v54 }
 0x7e4   : > { %10530 = vmatpush.msrb.mxu1 %v9715_v54  ;;  %9832 = vmatpush.msra.mxu0 %v9715_v54 }
 0x7e5   : > { %10534 = vmatpush.msrb.mxu2 %v9714_v42  ;;  %10535 = vmatpush.msrb.mxu3 %v9714_v42 }
 0x7e6   : > { %10533 = vmatpush.msrb.mxu1 %v9714_v42  ;;  %9833 = vmatpush.msra.mxu0 %v9714_v42 }
 0x7e7   : > { %9574 = vrot.lane.b32.xlu2 %v9125_v41, %s11434_s30 }
 0x7e8   : > { %9446 = vrot.lane.b32.xlu1 %v16162_v46, %s11433_s29  ;;  %v16289_v46 = vpop.permute.xlu1 %9284  ;;  %v9403_v14 = vpop.permute.xlu2 %9402 }
 0x7ea   : > { %9536 = vrot.lane.b32.xlu0 %v16186_v31, %s11434_s30  ;;  %v16296_v31 = vpop.permute.xlu0 %9286 }
 0x7ef   : > { %9302 = vrot.lane.b32.xlu2 %v16048_v10, %s11432_s28 }
 0x7f0   : > { %9392 = vrot.lane.b32.xlu1 %v16122_v6, %s11433_s29  ;;  %v16300_v35 = vpop.permute.xlu1 %9290  ;;  %v9423_v52 = vpop.permute.xlu2 %9422 }
 0x7f2   : > { %9556 = vrot.lane.b32.xlu0 %v8891_v53, %s11434_s30  ;;  %v9293_v10 = vpop.permute.xlu0 %9292 }
 0x7f7   : > { %9538 = vrot.lane.b32.xlu2 %v16203_v26, %s11434_s30  ;;  %v9151_v26 = vpop.f32.mrf.mxu1 }
 0x7f8   : > { %9320 = vrot.lane.b32.xlu1 %v16106_v17, %s11432_s28  ;;  %v9311_v53 = vpop.permute.xlu1 %9310  ;;  %v9630_v17 = vsel %vm785_vm1, %v15749_v13, %v9293_v10 }
 0x7f9   : > { %v9639_v45 = vsel %vm785_vm1, %v15796_v56, %v9311_v53  ;;  %v9621_v56 = vsel %vm785_vm1, %v15656_v18, %v16264_v16 }
 0x7fa   : > { %9410 = vrot.lane.b32.xlu0 %v16144_v48, %s11433_s29  ;;  %v9421_v23 = vpop.permute.xlu0 %9420  ;;  %v9654_v42 = vsel %vm9648_vm3, %v9621_v56, %v9403_v14 }
 0x7ff   : > { %9558 = vrot.lane.b32.xlu2 %v16197_v39, %s11434_s30 }
 0x800   : > { %9430 = vrot.lane.b32.xlu1 %v16149_v7, %s11433_s29  ;;  %v9663_v7 = vsel %vm9648_vm3, %v9630_v17, %v9421_v23  ;;  %v9203_v17 = vpop.f32.mrf.mxu3 }
 0x801   : > { %v9569_v6 = vpop.permute.xlu2 %9568 }
 0x802   : > { %9520 = vrot.lane.b32.xlu0 %v16174_v32, %s11434_s30 }
 0x807   : > { %9412 = vrot.lane.b32.xlu2 %v16142_v24, %s11433_s29 }
 0x808   : > { %9576 = vrot.lane.b32.xlu1 %v9151_v26, %s11434_s30 }
 0x809   : > { %v16317_v48 = vpop.permute.xlu2 %9314 }
 0x80a   : > { %v9549_v39 = vpop.permute.xlu1 %9548  ;;  %9448 = vrot.lane.b32.xlu0 %v16165_v9, %s11433_s29  ;;  %v9672_v9 = vsel %vm9648_vm3, %v9639_v45, %v9439_v22 }
 0x80b   : > { %v9696_v32 = vsel %vm9681_vm2, %v9663_v7, %v9549_v39 }
 0x80c   : > { %10502 = vmatmul.msk.f32.vlgmr.msrb.gmra.mxu2 %vm348_vm0, %v9696_v32 }
 0x80f   : > { %9522 = vrot.lane.b32.xlu2 %v16190_v36, %s11434_s30 }
 0x810   : > { %9304 = vrot.lane.b32.xlu1 %v16064_v25, %s11432_s28 }
 0x811   : > { %v16328_v13 = vpop.permute.xlu2 %9442 }
 0x812   : > { %v9313_v24 = vpop.permute.xlu1 %9312  ;;  %9394 = vrot.lane.b32.xlu0 %v16128_v49, %s11433_s29 }
 0x813   : > { %v9640_v49 = vsel %vm785_vm1, %v15812_v61, %v9313_v24 }
 0x814   : > { %v9567_v41 = vpop.permute.xlu0 %9566 }
 0x815   : > { %v9705_v54 = vsel %vm9681_vm2, %v9672_v9, %v9567_v41  ;;  %v18336_v9 = vld [vmem:[#allocation11_spill] sm:$0xff] }
 0x816   : > { %10511 = vmatmul.msk.f32.vlgmr.msrb.gmra.mxu3 %vm348_vm0, %v9705_v54 }
 0x817   : > { %9450 = vrot.lane.b32.xlu2 %v16184_v3, %s11433_s29 }
 0x818   : > { %9540 = vrot.lane.b32.xlu1 %v16194_v60, %s11434_s30 }
 0x819   : > { %v9407_v25 = vpop.permute.xlu2 %9406 }
 0x81a   : > { %v9441_v36 = vpop.permute.xlu1 %9440  ;;  %9322 = vrot.lane.b32.xlu0 %v16118_v34, %s11432_s28  ;;  %v9631_v34 = vsel %vm785_vm1, %v15720_v50, %v16258_v63 }
 0x81b   : > { %v9673_v22 = vsel %vm9648_vm3, %v9640_v49, %v9441_v36  ;;  %v9664_v16 = vsel %vm9648_vm3, %v9631_v34, %v9423_v52  ;;  %v18341_v34 = vld [vmem:[#allocation110_spill] sm:$0xff] }
 0x81c   : > { %v9531_v3 = vpop.permute.xlu0 %9530  ;;  %v9706_v10 = vsel %vm9681_vm2, %v9673_v22, %v9569_v6  ;;  %v18338_v22 = vld [vmem:[#allocation127_spill] sm:$0xff] }
 0x81d   : > { %v9687_v60 = vsel %vm9681_vm2, %v9654_v42, %v9531_v3  ;;  %v18339_v42 = vld [vmem:[#allocation146_spill] sm:$0xff] }
 0x81e   : > { %10493 = vmatmul.msk.f32.vlgmr.msrb.gmra.mxu1 %vm348_vm0, %v9687_v60  ;;  %10512 = vmatmul.msk.f32.gmra.mxu3 %vm348_vm0, %v9706_v10 }
 0x81f   : > { %9396 = vrot.lane.b32.xlu2 %v16132_v62, %s11433_s29  ;;  %v9177_v62 = vpop.f32.mrf.mxu2 }
 0x820   : > { %9560 = vrot.lane.b32.xlu1 %v16199_v5, %s11434_s30  ;;  %v9622_v5 = vsel %vm785_vm1, %v15675_v4, %v16223_v2  ;;  %v9623_v4 = vsel %vm785_vm1, %v15648_v29, %v16274_v20 }
 0x821   : > { %v9535_v18 = vpop.permute.xlu2 %9534 }
 0x822   : > { %v9405_v61 = vpop.permute.xlu1 %9404  ;;  %9432 = vrot.lane.b32.xlu0 %v16153_v21, %s11433_s29 }
 0x823   : > { %v9655_v50 = vsel %vm9648_vm3, %v9622_v5, %v9405_v61  ;;  %v18340_v61 = vld [vmem:[#allocation17_spill] sm:$0xff] }
 0x824   : > { %v9551_v14 = vpop.permute.xlu0 %9550 }
 0x825   : > { %v9697_v6 = vsel %vm9681_vm2, %v9664_v16, %v9551_v14 }
 0x826   : > { %10503 = vmatmul.msk.f32.gmra.mxu2 %vm348_vm0, %v9697_v6  ;;  %v18343_v6 = vld [vmem:[#allocation64_spill] sm:$0xff] }
 0x827   : > { %9324 = vrot.lane.b32.xlu2 %v16124_v0, %s11432_s28  ;;  %v9624_v5 = vsel %vm785_vm1, %v18343_v6, %v16284_v8 }
 0x828   : > { %9414 = vrot.lane.b32.xlu1 %v16138_v11, %s11433_s29  ;;  %v9656_v11 = vsel %vm9648_vm3, %v9623_v4, %v9407_v25  ;;  %v18337_v25 = vld [vmem:[#allocation101_spill] sm:$0xff]  ;;  %v18344_v4 = vld [vmem:[#allocation27_spill] sm:$0xff] }
 0x829   : > { %v9555_v21 = vpop.permute.xlu2 %9554  ;;  %v9689_v26 = vsel %vm9681_vm2, %v9656_v11, %v9535_v18  ;;  %v9229_v18 = vpop.f32.mrf.mxu0  ;;  %v18345_v11 = vld [vmem:[#allocation118_spill] sm:$0xff] }
 0x82a   : > { %v9533_v63 = vpop.permute.xlu1 %9532  ;;  %9578 = vrot.lane.b32.xlu0 %v9177_v62, %s11434_s30 }
 0x82b   : > { %v9688_v52 = vsel %vm9681_vm2, %v9655_v50, %v9533_v63 }
 0x82c   : > { %v9297_v53 = vpop.permute.xlu0 %9296  ;;  %10494 = vmatmul.msk.f32.gmra.mxu1 %vm348_vm0, %v9688_v52 }
 0x82f   : > { %9434 = vrot.lane.b32.xlu2 %v16167_v57, %s11433_s29  ;;  %v9632_v57 = vsel %vm785_vm1, %v15737_v55, %v9297_v53  ;;  %v9641_v55 = vsel %vm785_vm1, %v15841_v30, %v16317_v48 }
 0x830   : > { %9524 = vrot.lane.b32.xlu1 %v16182_v40, %s11434_s30  ;;  %v9674_v7 = vsel %vm9648_vm3, %v9641_v55, %v16328_v13 }
 0x831   : > { %v16384_v0 = vpop.permute.xlu2 %9300 }
 0x832   : > { %v9553_v2 = vpop.permute.xlu1 %9552  ;;  %9306 = vrot.lane.b32.xlu0 %v16083_v1, %s11432_s28 }
 0x834   : > { %v9425_v23 = vpop.permute.xlu0 %9424  ;;  %10495 = vmatmul.msk.f32.gmra.mxu1 %vm348_vm0, %v9689_v26 }
 0x835   : > { %v9665_v40 = vsel %vm9648_vm3, %v9632_v57, %v9425_v23 }
 0x836   : > { %v9698_v29 = vsel %vm9681_vm2, %v9665_v40, %v9553_v2  ;;  %v18346_v2 = vld [vmem:[#allocation98_spill] sm:$0xff] }
 0x837   : > { %10504 = vmatmul.msk.f32.gmra.mxu2 %vm348_vm0, %v9698_v29  ;;  %9580 = vrot.lane.b32.xlu2 %v9203_v17, %s11434_s30  ;;  %v9634_v26 = vsel %vm785_vm1, %v18346_v2, %v16384_v0 }
 0x838   : > { %9452 = vrot.lane.b32.xlu1 %v16176_v43, %s11433_s29 }
 0x839   : > { %v9429_v1 = vpop.permute.xlu2 %9428 }
 0x83a   : > { %v9299_v20 = vpop.permute.xlu1 %9298  ;;  %9542 = vrot.lane.b32.xlu0 %v16188_v33, %s11434_s30  ;;  %v18333_v33 = vld [vmem:[#allocation74_spill] sm:$0xff]  ;;  %v9667_v57 = vsel %vm9648_vm3, %v9634_v26, %v9429_v1  ;;  %v18348_v1 = vld [vmem:[#allocation60_spill] sm:$0xff] }
 0x83b   : > { %v9633_v24 = vsel %vm785_vm1, %v18333_v33, %v9299_v20  ;;  %v18347_v20 = vld [vmem:[#allocation54_spill] sm:$0xff] }
 0x83c   : > { %v9571_v39 = vpop.permute.xlu0 %9570  ;;  %v9625_v55 = vsel %vm785_vm1, %v18347_v20, %v16235_v58  ;;  %v18349_v33 = vld [vmem:[#allocation26_spill] sm:$0xff] }
 0x83d   : > { %v9707_v32 = vsel %vm9681_vm2, %v9674_v7, %v9571_v39 }
 0x83e   : > { %10513 = vmatmul.msk.f32.gmra.mxu3 %vm348_vm0, %v9707_v32 }
 0x83f   : > { %9308 = vrot.lane.b32.xlu2 %v16094_v37, %s11432_s28  ;;  %v18334_v37 = vld [vmem:[#allocation35_spill] sm:$0xff] }
 0x840   : > { %9398 = vrot.lane.b32.xlu1 %v16126_v28, %s11433_s29  ;;  %v18335_v28 = vld [vmem:[#allocation109_spill] sm:$0xff] }
 0x841   : > { %v9575_v43 = vpop.permute.xlu2 %9574 }
 0x842   : > { %v9427_v45 = vpop.permute.xlu1 %9426  ;;  %9562 = vrot.lane.b32.xlu0 %v16225_v59, %s11434_s30 }
 0x843   : > { %v9666_v30 = vsel %vm9648_vm3, %v9633_v24, %v9427_v45 }
 0x844   : > { %v9317_v48 = vpop.permute.xlu0 %9316  ;;  %v9699_v13 = vsel %vm9681_vm2, %v9666_v30, %v9555_v21 }
 0x845   : > { %10505 = vmatmul.msk.f32.gmra.mxu2 %vm348_vm0, %v9699_v13  ;;  %v9642_v59 = vsel %vm785_vm1, %v18337_v25, %v9317_v48 }
 0x847   : > { %9544 = vrot.lane.b32.xlu2 %v18334_v37, %s11434_s30 }
 0x848   : > { %9326 = vrot.lane.b32.xlu1 %v18335_v28, %s11432_s28  ;;  %v18350_v28 = vld [vmem:[#allocation119_spill] sm:$0xff] }
 0x849   : > { %v9303_v54 = vpop.permute.xlu2 %9302 }
 0x84a   : > { %9416 = vrot.lane.b32.xlu0 %v18336_v9, %s11433_s29  ;;  %v9573_v41 = vpop.permute.xlu1 %9572  ;;  %v9635_v32 = vsel %vm785_vm1, %v18348_v1, %v9303_v54 }
 0x84c   : > { %v9445_v49 = vpop.permute.xlu0 %9444 }
 0x84d   : > { %v9675_v36 = vsel %vm9648_vm3, %v9642_v59, %v9445_v49  ;;  %v18351_v49 = vld [vmem:[#allocation49_spill] sm:$0xff] }
 0x84e   : > { %v9708_v56 = vsel %vm9681_vm2, %v9675_v36, %v9573_v41  ;;  %v9617_v36 = vsel %vm785_vm1, %v18351_v49, %v16241_v19  ;;  %v16501_v19 = vld [vmem:[%s16686_s5] ss:$0 sm:$0xff] }
 0x84f   : > { %10514 = vmatmul.msk.f32.gmra.mxu3 %vm348_vm0, %v9708_v56  ;;  %9564 = vrot.lane.b32.xlu2 %v16238_v51, %s11434_s30  ;;  %v18342_v51 = vld [vmem:[#allocation205_spill] sm:$0xff] }
 0x850   : > { %9436 = vrot.lane.b32.xlu1 %v18338_v22, %s11433_s29 }
 0x851   : > { %v9539_v60 = vpop.permute.xlu2 %9538 }
 0x852   : > { %9526 = vrot.lane.b32.xlu0 %v18339_v42, %s11434_s30  ;;  %v9319_v3 = vpop.permute.xlu1 %9318 }
 0x853   : > { %v9643_v16 = vsel %vm785_vm1, %v18341_v34, %v9319_v3 }
 0x854   : > { %v9409_v10 = vpop.permute.xlu0 %9408 }
 0x855   : > { %v9657_v21 = vsel %vm9648_vm3, %v9624_v5, %v9409_v10  ;;  %v18352_v10 = vld [vmem:[#allocation77_spill] sm:$0xff]  ;;  %v18353_v5 = vld [vmem:[#allocation86_spill] sm:$0xff] }
 0x857   : > { %9418 = vrot.lane.b32.xlu2 %v18340_v61, %s11433_s29 }
 0x858   : > { %9582 = vrot.lane.b32.xlu1 %v9229_v18, %s11434_s30 }
 0x859   : > { %v9559_v53 = vpop.permute.xlu2 %9558 }
 0x85a   : > { %9454 = vrot.lane.b32.xlu0 %v18342_v51, %s11433_s29  ;;  %v9447_v14 = vpop.permute.xlu1 %9446 }
 0x85b   : > { %v9676_v62 = vsel %vm9648_vm3, %v9643_v16, %v9447_v14 }
 0x85c   : > { %v9537_v50 = vpop.permute.xlu0 %9536  ;;  %v9709_v63 = vsel %vm9681_vm2, %v9676_v62, %v9575_v43 }
 0x85d   : > { %v9690_v52 = vsel %vm9681_vm2, %v9657_v21, %v9537_v50  ;;  %10515 = vmatmul.msk.f32.gmra.mxu3 %vm348_vm0, %v9709_v63 }
 0x85e   : > { %10496 = vmatmul.msk.f32.gmra.mxu1 %vm348_vm0, %v9690_v52  ;;  %v18354_v52 = vld [vmem:[#allocation120_spill] sm:$0xff] }
 0x860   : > { %9528 = vrot.lane.b32.xlu1 %v18344_v4, %s11434_s30 }
 0x861   : > { %v9413_v17 = vpop.permute.xlu2 %9412 }
 0x862   : > { %9400 = vrot.lane.b32.xlu0 %v18345_v11, %s11433_s29  ;;  %v9393_v8 = vpop.permute.xlu1 %9392 }
 0x864   : > { %v9557_v23 = vpop.permute.xlu0 %9556 }
 0x865   : > { %v9700_v40 = vsel %vm9681_vm2, %v9667_v57, %v9557_v23 }
 0x866   : > { %10506 = vmatmul.msk.f32.gmra.mxu2 %vm348_vm0, %v9700_v40 }
 0x869   : > { %v9523_v24 = vpop.permute.xlu2 %9522 }
 0x86a   : > { %9546 = vrot.lane.b32.xlu0 %v16211_v38, %s11434_s30  ;;  %v9321_v29 = vpop.permute.xlu1 %9320  ;;  %v9616_v38 = vsel %vm785_vm1, %v18349_v33, %v16209_v27 }
 0x86b   : > { %v9649_v58 = vsel %vm9648_vm3, %v9616_v38, %v9393_v8  ;;  %v9644_v9 = vsel %vm785_vm1, %v18350_v28, %v9321_v29  ;;  %v18355_v29 = vld [vmem:[#allocation53_spill] sm:$0xff] }
 0x86c   : > { %v9411_v7 = vpop.permute.xlu0 %9410  ;;  %v9618_v20 = vsel %vm785_vm1, %v18355_v29, %v16249_v12 }
 0x86d   : > { %v9658_v39 = vsel %vm9648_vm3, %v9625_v55, %v9411_v7 }
 0x86e   : > { %v9691_v0 = vsel %vm9681_vm2, %v9658_v39, %v9539_v60  ;;  %v9626_v60 = vsel %vm785_vm1, %v18352_v10, %v16289_v46 }
 0x86f   : > { %10497 = vmatmul.msk.f32.gmra.mxu1 %vm348_vm0, %v9691_v0  ;;  %v9659_v18 = vsel %vm9648_vm3, %v9626_v60, %v9413_v17 }
 0x871   : > { %v9451_v27 = vpop.permute.xlu2 %9450 }
 0x872   : > { %v9431_v43 = vpop.permute.xlu1 %9430 }
 0x873   : > { %v9668_v45 = vsel %vm9648_vm3, %v9635_v32, %v9431_v43 }
 0x874   : > { %v9521_v30 = vpop.permute.xlu0 %9520  ;;  %v9701_v48 = vsel %vm9681_vm2, %v9668_v45, %v9559_v53 }
 0x875   : > { %v9682_v13 = vsel %vm9681_vm2, %v9649_v58, %v9521_v30  ;;  %10507 = vmatmul.msk.f32.gmra.mxu2 %vm348_vm0, %v9701_v48  ;;  %v18357_v48 = vld [vmem:[#allocation75_spill] sm:$0xff] }
 0x876   : > { %10488 = vmatmul.msk.f32.vlgmr.msra.gmra.mxu0 %vm348_vm0, %v9682_v13  ;;  %v9627_v13 = vsel %vm785_vm1, %v18357_v48, %v16296_v31 }
 0x879   : > { %v9397_v3 = vpop.permute.xlu2 %9396 }
 0x87a   : > { %v9577_v37 = vpop.permute.xlu1 %9576  ;;  %v9651_v7 = vsel %vm9648_vm3, %v9618_v20, %v9397_v3 }
 0x87c   : > { %v9449_v41 = vpop.permute.xlu0 %9448 }
 0x87d   : > { %v9677_v54 = vsel %vm9648_vm3, %v9644_v9, %v9449_v41 }
 0x87e   : > { %v9710_v25 = vsel %vm9681_vm2, %v9677_v54, %v9577_v37 }
 0x87f   : > { %10516 = vmatmul.msk.f32.gmra.mxu3 %vm348_vm0, %v9710_v25  ;;  %v18358_v25 = vld [vmem:[#allocation87_spill] sm:$0xff] }
 0x881   : > { %v9325_v14 = vpop.permute.xlu2 %9324 }
 0x882   : > { %v9305_v59 = vpop.permute.xlu1 %9304 }
 0x883   : > { %v9636_v62 = vsel %vm785_vm1, %v18353_v5, %v9305_v59 }
 0x884   : > { %v9395_v56 = vpop.permute.xlu0 %9394 }
 0x885   : > { %v9650_v22 = vsel %vm9648_vm3, %v9617_v36, %v9395_v56 }
 0x886   : > { %v9683_v42 = vsel %vm9681_vm2, %v9650_v22, %v9523_v24  ;;  %v18356_v24 = vld [vmem:[#allocation128_spill] sm:$0xff] }
 0x887   : > { %10489 = vmatmul.msk.f32.gmra.mxu0 %vm348_vm0, %v9683_v42  ;;  %v9646_v12 = vsel %vm785_vm1, %v18356_v24, %v9325_v14 }
 0x889   : > { %v9435_v2 = vpop.permute.xlu2 %9434 }
 0x88a   : > { %v9541_v61 = vpop.permute.xlu1 %9540 }
 0x88b   : > { %v9692_v34 = vsel %vm9681_vm2, %v9659_v18, %v9541_v61  ;;  %v18359_v61 = vld [vmem:[#allocation66_spill] sm:$0xff] }
 0x88c   : > { %v9323_v16 = vpop.permute.xlu0 %9322  ;;  %10498 = vmatmul.msk.f32.gmra.mxu1 %vm348_vm0, %v9692_v34  ;;  %v9628_v34 = vsel %vm785_vm1, %v18359_v61, %v16247_v47 }
 0x88d   : > { %v9645_v53 = vsel %vm785_vm1, %v18354_v52, %v9323_v16 }
 0x88e   : > { %v9678_v23 = vsel %vm9648_vm3, %v9645_v53, %v9451_v27 }
 0x88f   : > { %v9877_v46 = vpop.f32.mrf.mxu2 }
 0x890   : > { %v9878_v51 = vadd.f32 %v16501_v19, %v9877_v46 }
 0x891   : > { %v9581_v43 = vpop.permute.xlu2 %9580 }
 0x892   : > { %9945 = vst.msk [vmem:[%s16508_s20 + $0x70] sm:$0xff] %vm348_vm0, %v9878_v51  ;;  %v9561_v6 = vpop.permute.xlu1 %9560 }
 0x894   : > { %v9433_v21 = vpop.permute.xlu0 %9432 }
 0x895   : > { %v9669_v50 = vsel %vm9648_vm3, %v9636_v62, %v9433_v21 }
 0x896   : > { %v9702_v63 = vsel %vm9681_vm2, %v9669_v50, %v9561_v6  ;;  %v18360_v6 = vld [vmem:[#allocation99_spill] sm:$0xff]  ;;  %v18361_v50 = vld [vmem:[#allocation38_spill] sm:$0xff] }
 0x897   : > { %10508 = vmatmul.msk.f32.gmra.mxu2 %vm348_vm0, %v9702_v63  ;;  %v9619_v47 = vsel %vm785_vm1, %v18361_v50, %v16217_v15 }
 0x899   : > { %v9904_v4 = vpop.f32.mrf.mxu3  ;;  %v9309_v54 = vpop.permute.xlu2 %9308 }
 0x89a   : > { %v9905_v11 = vadd.f32 %v16501_v19, %v9904_v4  ;;  %v9415_v8 = vpop.permute.xlu1 %9414  ;;  %v9638_v5 = vsel %vm785_vm1, %v18360_v6, %v9309_v54 }
 0x89b   : > { %v9850_v26 = vpop.f32.mrf.mxu1  ;;  %v9660_v28 = vsel %vm9648_vm3, %v9627_v13, %v9415_v8 }
 0x89c   : > { %9954 = vst.msk [vmem:[%s16508_s20 + $0xb8] sm:$0xff] %vm348_vm0, %v9905_v11  ;;  %v9851_v57 = vadd.f32 %v16501_v19, %v9850_v26  ;;  %v9579_v40 = vpop.permute.xlu0 %9578 }
 0x89d   : > { %v9711_v17 = vsel %vm9681_vm2, %v9678_v23, %v9579_v40 }
 0x89e   : > { %9936 = vst.msk [vmem:[%s16508_s20 + $0x28] sm:$0xff] %vm348_vm0, %v9851_v57  ;;  %10517 = vmatmul.msk.f32.gmra.mxu3 %vm348_vm0, %v9711_v17  ;;  %v18362_v57 = vld [vmem:[#allocation111_spill] sm:$0xff] }
 0x8a1   : > { %v9907_v55 = vpop.f32.mrf.mxu3  ;;  %v9545_v3 = vpop.permute.xlu2 %9544 }
 0x8a2   : > { %v9908_v39 = vadd.f32 %v16501_v19, %v9907_v55  ;;  %v9525_v0 = vpop.permute.xlu1 %9524 }
 0x8a3   : > { %v9684_v1 = vsel %vm9681_vm2, %v9651_v7, %v9525_v0  ;;  %v18363_v7 = vld [vmem:[#allocation41_spill] sm:$0xff] }
 0x8a4   : > { %9955 = vst.msk [vmem:[%s16508_s20 + $0xc0] sm:$0xff] %vm348_vm0, %v9908_v39  ;;  %v9307_v32 = vpop.permute.xlu0 %9306  ;;  %10490 = vmatmul.msk.f32.gmra.mxu0 %vm348_vm0, %v9684_v1  ;;  %v9620_v39 = vsel %vm785_vm1, %v18363_v7, %v16254_v44 }
 0x8a5   : > { %v9637_v31 = vsel %vm785_vm1, %v18358_v25, %v9307_v32 }
 0x8a6   : > { %v9670_v56 = vsel %vm9648_vm3, %v9637_v31, %v9435_v2 }
 0x8a9   : > { %v9853_v33 = vpop.f32.mrf.mxu1  ;;  %v9880_v38 = vpop.f32.mrf.mxu2 }
 0x8aa   : > { %v9854_v45 = vadd.f32 %v16501_v19, %v9853_v33  ;;  %v9881_v58 = vadd.f32 %v16501_v19, %v9880_v38  ;;  %v9453_v30 = vpop.permute.xlu1 %9452  ;;  %v9565_v63 = vpop.permute.xlu2 %9564  ;;  %v18364_v38 = vld [vmem:[#allocation89_spill] sm:$0xff] }
 0x8ab   : > { %v9679_v37 = vsel %vm9648_vm3, %v9646_v12, %v9453_v30  ;;  %v9629_v24 = vsel %vm785_vm1, %v18364_v38, %v16300_v35 }
 0x8ac   : > { %9937 = vst.msk [vmem:[%s16508_s20 + $0x30] sm:$0xff] %vm348_vm0, %v9854_v45  ;;  %v9543_v9 = vpop.permute.xlu0 %9542  ;;  %v9712_v41 = vsel %vm9681_vm2, %v9679_v37, %v9581_v43 }
 0x8ad   : > { %9946 = vst.msk [vmem:[%s16508_s20 + $0x78] sm:$0xff] %vm348_vm0, %v9881_v58  ;;  %v9693_v27 = vsel %vm9681_vm2, %v9660_v28, %v9543_v9  ;;  %10518 = vmatmul.msk.f32.gmra.mxu3 %vm348_vm0, %v9712_v41 }
 0x8ae   : > { %10499 = vmatmul.msk.f32.gmra.mxu1 %vm348_vm0, %v9693_v27 }
 0x8b1   : > { %v9856_v59 = vpop.f32.mrf.mxu1 }
 0x8b2   : > { %v9857_v49 = vadd.f32 %v16501_v19, %v9856_v59  ;;  %v9399_v36 = vpop.permute.xlu1 %9398  ;;  %v9419_v33 = vpop.permute.xlu2 %9418 }
 0x8b3   : > { %v9652_v53 = vsel %vm9648_vm3, %v9619_v47, %v9399_v36  ;;  %v9662_v44 = vsel %vm9648_vm3, %v9629_v24, %v9419_v33 }
 0x8b4   : > { %9938 = vst.msk [vmem:[%s16508_s20 + $0x38] sm:$0xff] %vm348_vm0, %v9857_v49  ;;  %v9563_v22 = vpop.permute.xlu0 %9562 }
 0x8b5   : > { %v9703_v42 = vsel %vm9681_vm2, %v9670_v56, %v9563_v22 }
 0x8b6   : > { %10509 = vmatmul.msk.f32.gmra.mxu2 %vm348_vm0, %v9703_v42 }
 0x8ba   : > { %v9883_v10 = vpop.f32.mrf.mxu2  ;;  %v9327_v60 = vpop.permute.xlu1 %9326 }
 0x8bb   : > { %v9884_v18 = vadd.f32 %v16501_v19, %v9883_v10  ;;  %v9647_v23 = vsel %vm785_vm1, %v18362_v57, %v9327_v60 }
 0x8bc   : > { %v9417_v16 = vpop.permute.xlu0 %9416 }
 0x8bd   : > { %9947 = vst.msk [vmem:[%s16508_s20 + $0x80] sm:$0xff] %vm348_vm0, %v9884_v18  ;;  %v9661_v46 = vsel %vm9648_vm3, %v9628_v34, %v9417_v16 }
 0x8be   : > { %v9694_v51 = vsel %vm9681_vm2, %v9661_v46, %v9545_v3 }
 0x8bf   : > { %10500 = vmatmul.msk.f32.gmra.mxu1 %vm348_vm0, %v9694_v51 }
 0x8c1   : > { %v9910_v14 = vpop.f32.mrf.mxu3 }
 0x8c2   : > { %v9911_v62 = vadd.f32 %v16501_v19, %v9910_v14  ;;  %v9437_v21 = vpop.permute.xlu1 %9436 }
 0x8c3   : > { %v9671_v52 = vsel %vm9648_vm3, %v9638_v5, %v9437_v21 }
 0x8c4   : > { %9956 = vst.msk [vmem:[%s16508_s20 + $0xc8] sm:$0xff] %vm348_vm0, %v9911_v62  ;;  %v9527_v4 = vpop.permute.xlu0 %9526  ;;  %v9704_v11 = vsel %vm9681_vm2, %v9671_v52, %v9565_v63 }
 0x8c5   : > { %v9685_v8 = vsel %vm9681_vm2, %v9652_v53, %v9527_v4  ;;  %10510 = vmatmul.msk.f32.gmra.mxu2 %vm348_vm0, %v9704_v11 }
 0x8c6   : > { %10491 = vmatmul.msk.f32.gmra.mxu0 %vm348_vm0, %v9685_v8 }
 0x8c8   : > { %v9886_v2 = vpop.f32.mrf.mxu2 }
 0x8c9   : > { %v9887_v15 = vadd.f32 %v16501_v19, %v9886_v2 }
 0x8ca   : > { %v9583_v26 = vpop.permute.xlu1 %9582 }
 0x8cb   : > { %9948 = vst.msk [vmem:[%s16508_s20 + $0x88] sm:$0xff] %vm348_vm0, %v9887_v15 }
 0x8cc   : > { %v9455_v40 = vpop.permute.xlu0 %9454 }
 0x8cd   : > { %v9680_v17 = vsel %vm9648_vm3, %v9647_v23, %v9455_v40 }
 0x8ce   : > { %v9713_v29 = vsel %vm9681_vm2, %v9680_v17, %v9583_v26 }
 0x8cf   : > { %10519 = vmatmul.msk.f32.gmra.mxu3 %vm348_vm0, %v9713_v29 }
 0x8d2   : > { %v9913_v20 = vpop.f32.mrf.mxu3  ;;  %v9529_v1 = vpop.permute.xlu1 %9528 }
 0x8d3   : > { %v9914_v55 = vadd.f32 %v16501_v19, %v9913_v20 }
 0x8d4   : > { %v9401_v0 = vpop.permute.xlu0 %9400 }
 0x8d5   : > { %9957 = vst.msk [vmem:[%s16508_s20 + $0xd0] sm:$0xff] %vm348_vm0, %v9914_v55  ;;  %v9653_v32 = vsel %vm9648_vm3, %v9620_v39, %v9401_v0 }
 0x8d6   : > { %v9686_v43 = vsel %vm9681_vm2, %v9653_v32, %v9529_v1 }
 0x8d7   : > { %10492 = vmatmul.msk.f32.gmra.mxu0 %vm348_vm0, %v9686_v43 }
 0x8db   : > { %v9859_v12 = vpop.f32.mrf.mxu1 }
 0x8dc   : > { %v9860_v45 = vadd.f32 %v16501_v19, %v9859_v12  ;;  %v9547_v58 = vpop.permute.xlu0 %9546 }
 0x8dd   : > { %v9695_v30 = vsel %vm9681_vm2, %v9662_v44, %v9547_v58 }
 0x8de   : > { %9939 = vst.msk [vmem:[%s16508_s20 + $0x40] sm:$0xff] %vm348_vm0, %v9860_v45  ;;  %10501 = vmatmul.msk.f32.gmra.mxu1 %vm348_vm0, %v9695_v30 }
 0x8e0   : > { %v9916_v48 = vpop.f32.mrf.mxu3 }
 0x8e1   : > { %v9917_v13 = vadd.f32 %v16501_v19, %v9916_v48 }
 0x8e3   : > { %9958 = vst.msk [vmem:[%s16508_s20 + $0xd8] sm:$0xff] %vm348_vm0, %v9917_v13 }
 0x8e9   : > { %v9889_v35 = vpop.f32.mrf.mxu2 }
 0x8ea   : > { %v9890_v37 = vadd.f32 %v16501_v19, %v9889_v35 }
 0x8ec   : > { %9949 = vst.msk [vmem:[%s16508_s20 + $0x90] sm:$0xff] %vm348_vm0, %v9890_v37  ;;  %v9862_v28 = vpop.f32.mrf.mxu1 }
 0x8ed   : > { %v9863_v9 = vadd.f32 %v16501_v19, %v9862_v28 }
 0x8ef   : > { %9940 = vst.msk [vmem:[%s16508_s20 + $0x48] sm:$0xff] %vm348_vm0, %v9863_v9 }
 0x8f3   : > { %v9835_v41 = vpop.f32.mrf.mxu0 }
 0x8f4   : > { %v9836_v27 = vadd.f32 %v16501_v19, %v9835_v41 }
 0x8f6   : > { %9931 = vst.msk [vmem:[%s16508_s20] sm:$0xff] %vm348_vm0, %v9836_v27 }
 0x8f8   : > { %v9892_v54 = vpop.f32.mrf.mxu2 }
 0x8f9   : > { %v9893_v25 = vadd.f32 %v16501_v19, %v9892_v54 }
 0x8fb   : > { %9950 = vst.msk [vmem:[%s16508_s20 + $0x98] sm:$0xff] %vm348_vm0, %v9893_v25 }
 0x902   : > { %v9919_v31 = vpop.f32.mrf.mxu3 }
 0x903   : > { %v9920_v59 = vadd.f32 %v16501_v19, %v9919_v31 }
 0x904   : > { %v9838_v49 = vpop.f32.mrf.mxu0 }
 0x905   : > { %9959 = vst.msk [vmem:[%s16508_s20 + $0xe0] sm:$0xff] %vm348_vm0, %v9920_v59  ;;  %v9839_v36 = vadd.f32 %v16501_v19, %v9838_v49 }
 0x907   : > { %9932 = vst.msk [vmem:[%s16508_s20 + $0x8] sm:$0xff] %vm348_vm0, %v9839_v36 }
 0x909   : > { %v9865_v56 = vpop.f32.mrf.mxu1 }
 0x90a   : > { %v9866_v22 = vadd.f32 %v16501_v19, %v9865_v56 }
 0x90c   : > { %9941 = vst.msk [vmem:[%s16508_s20 + $0x50] sm:$0xff] %vm348_vm0, %v9866_v22 }
 0x91a   : > { %v9895_v42 = vpop.f32.mrf.mxu2 }
 0x91b   : > { %v9896_v3 = vadd.f32 %v16501_v19, %v9895_v42 }
 0x91d   : > { %9951 = vst.msk [vmem:[%s16508_s20 + $0xa0] sm:$0xff] %vm348_vm0, %v9896_v3 }
 0x921   : > { %v9841_v10 = vpop.f32.mrf.mxu0  ;;  %v9922_v60 = vpop.f32.mrf.mxu3 }
 0x922   : > { %v9842_v18 = vadd.f32 %v16501_v19, %v9841_v10  ;;  %v9923_v61 = vadd.f32 %v16501_v19, %v9922_v60 }
 0x924   : > { %9933 = vst.msk [vmem:[%s16508_s20 + $0x10] sm:$0xff] %vm348_vm0, %v9842_v18 }
 0x925   : > { %9960 = vst.msk [vmem:[%s16508_s20 + $0xe8] sm:$0xff] %vm348_vm0, %v9923_v61 }
 0x92b   : > { %v9868_v34 = vpop.f32.mrf.mxu1 }
 0x92c   : > { %v9869_v16 = vadd.f32 %v16501_v19, %v9868_v34 }
 0x92e   : > { %9942 = vst.msk [vmem:[%s16508_s20 + $0x58] sm:$0xff] %vm348_vm0, %v9869_v16 }
 0x930   : > { %v9925_v46 = vpop.f32.mrf.mxu3 }
 0x931   : > { %v9926_v51 = vadd.f32 %v16501_v19, %v9925_v46 }
 0x933   : > { %9961 = vst.msk [vmem:[%s16508_s20 + $0xf0] sm:$0xff] %vm348_vm0, %v9926_v51 }
 0x939   : > { %v9898_v14 = vpop.f32.mrf.mxu2 }
 0x93a   : > { %v9899_v6 = vadd.f32 %v16501_v19, %v9898_v14 }
 0x93c   : > { %9952 = vst.msk [vmem:[%s16508_s20 + $0xa8] sm:$0xff] %vm348_vm0, %v9899_v6  ;;  %v9871_v5 = vpop.f32.mrf.mxu1 }
 0x93d   : > { %v9872_v62 = vadd.f32 %v16501_v19, %v9871_v5 }
 0x93f   : > { %9943 = vst.msk [vmem:[%s16508_s20 + $0x60] sm:$0xff] %vm348_vm0, %v9872_v62 }
 0x943   : > { %v9844_v21 = vpop.f32.mrf.mxu0 }
 0x944   : > { %v9845_v50 = vadd.f32 %v16501_v19, %v9844_v21 }
 0x946   : > { %9934 = vst.msk [vmem:[%s16508_s20 + $0x18] sm:$0xff] %vm348_vm0, %v9845_v50 }
 0x948   : > { %v9901_v47 = vpop.f32.mrf.mxu2 }
 0x949   : > { %v9902_v63 = vadd.f32 %v16501_v19, %v9901_v47 }
 0x94b   : > { %9953 = vst.msk [vmem:[%s16508_s20 + $0xb0] sm:$0xff] %vm348_vm0, %v9902_v63 }
 0x952   : > { %v9928_v52 = vpop.f32.mrf.mxu3 }
 0x953   : > { %v9929_v53 = vadd.f32 %v16501_v19, %v9928_v52 }
 0x954   : > { %v9847_v4 = vpop.f32.mrf.mxu0 }
 0x955   : > { %9962 = vst.msk [vmem:[%s16508_s20 + $0xf8] sm:$0xff] %vm348_vm0, %v9929_v53  ;;  %v9848_v11 = vadd.f32 %v16501_v19, %v9847_v4 }
 0x957   : > { %9935 = vst.msk [vmem:[%s16508_s20 + $0x20] sm:$0xff] %vm348_vm0, %v9848_v11 }
 0x95b   : > { %v9874_v8 = vpop.f32.mrf.mxu1 }
 0x95c   : > { %v9875_v2 = vadd.f32 %v16501_v19, %v9874_v8 }
 0x95e   : > { %9944 = vst.msk [vmem:[%s16508_s20 + $0x68] sm:$0xff] %vm348_vm0, %v9875_v2 }
 0x95f PF: > { %s16_s23 = sadd.s32 1, %s11425_s23   ;;  %s18365_s21 = smov %s11421_s22 }
 0x960   : > { %p13_p5 = scmp.ge.s32.totalorder %s16_s23, 4   ;;  %s18366_s22 = smov %s18368_s24 }
 0x962   :  { %15 = sbr.rel (!%p13_p5) target bundleno = 2 (0x2), region = 77 }

</bundles_post_ra>
